<compile_context>
chip_gen: v7x
topology: tpu7x:2x2x1
jax: 0.10.0
libtpu: 0.0.40
codegen_flags: <defaults>
</compile_context>

<pallas_src>
import functools

import jax
import jax.numpy as jnp
from jax.experimental import pallas as pl
from jax.experimental.pallas import tpu as pltpu

# ---- model hyper-parameters (from the PyTorch source) ----
BLOCK_SIZE = 48
N_EMBD = 72
N_HEAD = 8
N_LAYER = 4
HEAD_SIZE = N_EMBD // N_HEAD          # 9
VOCAB_SIZE = 65                       # len(chars)
LN_EPS = 1e-5
FF_HIDDEN = 4 * N_EMBD                # 288

# ---- TPU-friendly padded sizes (zero padding is mathematically inert) ----
HEAD_PAD = 16                         # per-head width padded 9 -> 16
HP = N_HEAD * HEAD_PAD                # 128 lanes for the concatenated heads
C_PAD = 128                           # residual channel dim padded 72 -> 128 (lane-dense)
VOCAB_PAD = 128                       # lane-dense LM-head / output width
NEG_BIG = -1e30                       # additive causal bias (avoids -inf arithmetic)


def transformer_kernel(
    x_ref,                      # (Bb*T, CP)       f32
    ln1g_ref, ln1b_ref,         # (L, 1, CP)       f32 (padded lanes are 0)
    wqkv_ref,                   # (L, CP, 3*HP)    bf16  [q | k | v], q pre-scaled by C**-0.5
    wproj_ref, bproj_ref,       # (L, HP, CP) bf16, (L, 1, CP) f32
    ln2g_ref, ln2b_ref,         # (L, 1, CP)       f32
    w1_ref, b1_ref,             # (L, CP, 4C) bf16, (L, 1, 4C) f32
    w2_ref, b2_ref,             # (L, 4C, CP) bf16, (L, 1, CP) f32
    lnfg_ref, lnfb_ref,         # (1, CP)          f32
    whead_ref, bhead_ref,       # (CP, VP) bf16, (1, VP) f32
    out_ref,                    # (Bb*T, VP)       f32
    *, bb, seq,
):
    n_rows = bb * seq
    x = x_ref[...]                                            # (N, CP) f32, padded lanes == 0

    # lane mask for the padded channel dim: LayerNorm statistics use the true width (72)
    lane = jax.lax.broadcasted_iota(jnp.int32, (1, C_PAD), 1)
    cmask = (lane < N_EMBD).astype(jnp.float32)               # (1, CP)
    inv_c = jnp.float32(1.0 / N_EMBD)

    # additive causal bias, built ONCE and reused by every layer / head
    row = jax.lax.broadcasted_iota(jnp.int32, (seq, seq), 0)
    col = jax.lax.broadcasted_iota(jnp.int32, (seq, seq), 1)
    bias = jnp.where(row >= col, jnp.float32(0.0), jnp.float32(NEG_BIG))[None, :, :]  # (1,T,T)

    def layernorm(h, g, b):
        # padded lanes of h are exactly zero, so a full-width sum / 72 is the exact mean
        mu = jnp.sum(h, axis=-1, keepdims=True) * inv_c
        d = (h - mu) * cmask
        var = jnp.sum(d * d, axis=-1, keepdims=True) * inv_c
        return d * jax.lax.rsqrt(var + LN_EPS) * g + b        # padded lanes stay exactly 0

    def split_heads(qkv, base):
        # (N, 3*HP) -> (H*Bb, T, D): 16-lane-aligned head slices stacked on a leading batch axis
        parts = [
            qkv[:, base + hh * HEAD_PAD: base + (hh + 1) * HEAD_PAD].reshape(bb, seq, HEAD_PAD)
            for hh in range(N_HEAD)
        ]
        return jnp.concatenate(parts, axis=0).astype(jnp.bfloat16)

    # unrolled layer loop: static layer indices -> static weight slices, cross-layer overlap
    for l in range(N_LAYER):
        # ---- self-attention sub-block:  x = x + Proj(MHA(LN1(x))) ----
        h = layernorm(x, ln1g_ref[l], ln1b_ref[l])
        qkv = jnp.dot(h.astype(jnp.bfloat16), wqkv_ref[l],
                      preferred_element_type=jnp.float32)     # (N, 3*HP)

        q4 = split_heads(qkv, 0)                              # (H*Bb, T, D) bf16
        k4 = split_heads(qkv, HP)
        v4 = split_heads(qkv, 2 * HP)

        # one batched score einsum + ONE softmax over all heads (scale folded into q weights)
        wei = jnp.einsum('btd,bsd->bts', q4, k4,
                         preferred_element_type=jnp.float32)  # (H*Bb, T, T) f32
        wei = wei + bias
        wei = wei - jnp.max(wei, axis=-1, keepdims=True)
        p = jnp.exp(wei)
        p = p * pl.reciprocal(jnp.sum(p, axis=-1, keepdims=True), approx=True)
        att = jnp.einsum('bts,bsd->btd', p.astype(jnp.bfloat16), v4,
                         preferred_element_type=jnp.float32)  # (H*Bb, T, D) f32
        att = att.astype(jnp.bfloat16)

        # head-merge folded into the output projection: no lane-axis concat
        wproj_l = wproj_ref[l]                                # (HP, CP) bf16
        sa = bproj_ref[l]                                     # (1, CP) f32
        for hh in range(N_HEAD):
            ah = att[hh * bb:(hh + 1) * bb].reshape(n_rows, HEAD_PAD)
            sa = sa + jnp.dot(ah, wproj_l[hh * HEAD_PAD:(hh + 1) * HEAD_PAD, :],
                              preferred_element_type=jnp.float32)
        x = x + sa

        # ---- feed-forward sub-block:  x = x + FFN(LN2(x)) ----
        h = layernorm(x, ln2g_ref[l], ln2b_ref[l])
        h1 = jnp.dot(h.astype(jnp.bfloat16), w1_ref[l],
                     preferred_element_type=jnp.float32) + b1_ref[l]
        h1 = jnp.maximum(h1, 0.0)                             # ReLU
        ff = jnp.dot(h1.astype(jnp.bfloat16), w2_ref[l],
                     preferred_element_type=jnp.float32) + b2_ref[l]
        x = x + ff

    # ---- final LayerNorm + LM head (lane-dense 128-wide output) ----
    h = layernorm(x, lnfg_ref[...], lnfb_ref[...])
    out_ref[...] = jnp.dot(h.astype(jnp.bfloat16), whead_ref[...],
                           preferred_element_type=jnp.float32) + bhead_ref[...]


def _rep_spec(arr):
    # whole-array block, same block every grid step -> DMA'd once, VMEM-resident
    n = arr.ndim
    return pl.BlockSpec(arr.shape, lambda b, n=n: (0,) * n)


def transformer_forward(x_emb, params, *, block_batch=None):
    """x_emb: (B, T, C_PAD) f32 padded embeddings. Returns logits (B, T, VOCAB_SIZE)."""
    B, T, C = x_emb.shape
    assert C == C_PAD and T <= BLOCK_SIZE

    if block_batch is None:
        bb = max(1, min(B, 1024 // T))          # ~1k rows/step amortizes per-step overhead
        if B >= 2:
            bb = min(bb, (B + 1) // 2)          # >= 2 grid steps -> both v7x TensorCores busy
        for cand in range(bb, 0, -1):           # prefer 128-row multiples (full MXU M passes)
            if (cand * T) % 128 == 0:
                bb = cand
                break
    else:
        bb = block_batch

    Bpad = ((B + bb - 1) // bb) * bb
    if Bpad // bb > 1 and (bb * T) % 8 != 0:
        bb, Bpad = B, B                          # single full block: exempt from the (8,128) rule
    if Bpad != B:
        x_emb = jnp.pad(x_emb, ((0, Bpad - B), (0, 0), (0, 0)))

    n_blk = bb * T
    x2d = x_emb.reshape(Bpad * T, C_PAD)

    weights = (
        params["ln1_g"], params["ln1_b"],
        params["wqkv"],
        params["wproj"], params["bproj"],
        params["ln2_g"], params["ln2_b"],
        params["w1"], params["b1"],
        params["w2"], params["b2"],
        params["lnf_g"], params["lnf_b"],
        params["whead"], params["bhead"],
    )

    out = pl.pallas_call(
        functools.partial(transformer_kernel, bb=bb, seq=T),
        out_shape=jax.ShapeDtypeStruct((Bpad * T, VOCAB_PAD), jnp.float32),
        grid_spec=pltpu.PrefetchScalarGridSpec(
            num_scalar_prefetch=0,
            grid=(Bpad // bb,),
            in_specs=[pl.BlockSpec((n_blk, C_PAD), lambda b: (b, 0))]
                     + [_rep_spec(w) for w in weights],
            out_specs=pl.BlockSpec((n_blk, VOCAB_PAD), lambda b: (b, 0)),
        ),
        compiler_params=pltpu.CompilerParams(
            # independent batch blocks -> megacore-shardable on v7x, neutral on v5e/v6e
            dimension_semantics=("parallel",),
            # explicit headroom: generous on v5e/v6e, still under v7x's 64 MiB physical VMEM
            vmem_limit_bytes=48 * 1024 * 1024,
        ),
    )(x2d, *weights)

    logits = out.reshape(Bpad, T, VOCAB_PAD)[:B, :, :VOCAB_SIZE]
    return logits


def init_params(key):
    """Deterministic synthetic parameter init (logical shapes follow the PyTorch module)."""
    keys = jax.random.split(key, 16)
    s = 0.02
    L, C, H, V = N_LAYER, N_EMBD, FF_HIDDEN, VOCAB_SIZE
    norm = lambda k, shape: (s * jax.random.normal(k, shape)).astype(jnp.float32)
    return {
        "tok_table": norm(keys[0], (V, C)),
        "pos_table": norm(keys[1], (BLOCK_SIZE, C)),
        # per-layer attention: q/k/v are the 8 per-head (C, head_size) weights concatenated
        "wq": norm(keys[2], (L, C, C)),
        "wk": norm(keys[3], (L, C, C)),
        "wv": norm(keys[4], (L, C, C)),
        "wproj": norm(keys[5], (L, C, C)),
        "bproj": jnp.zeros((L, C), jnp.float32),
        "ln1_g": jnp.ones((L, C), jnp.float32), "ln1_b": jnp.zeros((L, C), jnp.float32),
        "ln2_g": jnp.ones((L, C), jnp.float32), "ln2_b": jnp.zeros((L, C), jnp.float32),
        "w1": norm(keys[6], (L, C, H)), "b1": jnp.zeros((L, H), jnp.float32),
        "w2": norm(keys[7], (L, H, C)), "b2": jnp.zeros((L, C), jnp.float32),
        "lnf_g": jnp.ones((1, C), jnp.float32), "lnf_b": jnp.zeros((1, C), jnp.float32),
        "whead": norm(keys[8], (C, V)), "bhead": jnp.zeros((1, V), jnp.float32),
    }


def prepare_params(p):
    """One-time host-side layout transform: pad C 72->128, heads 9->16, vocab 65->128,
    fuse q|k|v, fold the C**-0.5 attention scale into wq, cast matmul weights to bf16.
    All padding is with zeros, so the padded lanes of the residual stream stay exactly 0."""
    C, CP = N_EMBD, C_PAD
    DC = CP - C
    DH = HEAD_PAD - HEAD_SIZE
    DV = VOCAB_PAD - VOCAB_SIZE
    scale = C ** -0.5  # NOTE: PyTorch Head scales by n_embd**-0.5 (x.shape[-1]) — kept as-is

    def pad_heads_out(w):   # (L, C, H*9) -> (L, CP, 128): zero pad input rows and per-head cols
        w = w.reshape(N_LAYER, C, N_HEAD, HEAD_SIZE)
        w = jnp.pad(w, ((0, 0), (0, DC), (0, 0), (0, DH)))
        return w.reshape(N_LAYER, CP, HP)

    def pad_heads_in(w):    # (L, H*9, C) -> (L, 128, CP): zero pad per-head rows and output cols
        w = w.reshape(N_LAYER, N_HEAD, HEAD_SIZE, C)
        w = jnp.pad(w, ((0, 0), (0, 0), (0, DH), (0, DC)))
        return w.reshape(N_LAYER, HP, CP)

    pad_c = lambda a: jnp.pad(a, ((0, 0), (0, DC)))   # (X, C) -> (X, CP)
    lift = lambda a: a[:, None, :]                    # (L, D) -> (L, 1, D)

    wqkv = jnp.concatenate(
        [pad_heads_out(p["wq"]) * scale, pad_heads_out(p["wk"]), pad_heads_out(p["wv"])],
        axis=-1).astype(jnp.bfloat16)                                   # (L, CP, 3*HP)
    wproj = pad_heads_in(p["wproj"]).astype(jnp.bfloat16)               # (L, HP, CP)
    w1 = jnp.pad(p["w1"], ((0, 0), (0, DC), (0, 0))).astype(jnp.bfloat16)   # (L, CP, 4C)
    w2 = jnp.pad(p["w2"], ((0, 0), (0, 0), (0, DC))).astype(jnp.bfloat16)   # (L, 4C, CP)
    whead = jnp.pad(p["whead"], ((0, DC), (0, DV))).astype(jnp.bfloat16)    # (CP, VP)
    bhead = jnp.pad(p["bhead"], ((0, 0), (0, DV)))                          # (1, VP)

    return {
        "tok_table": pad_c(p["tok_table"]),          # (V, CP)
        "pos_table": pad_c(p["pos_table"]),          # (block_size, CP)
        "wqkv": wqkv, "wproj": wproj, "bproj": lift(pad_c(p["bproj"])),
        "ln1_g": lift(pad_c(p["ln1_g"])), "ln1_b": lift(pad_c(p["ln1_b"])),
        "ln2_g": lift(pad_c(p["ln2_g"])), "ln2_b": lift(pad_c(p["ln2_b"])),
        "w1": w1, "b1": lift(p["b1"]),
        "w2": w2, "b2": lift(pad_c(p["b2"])),
        "lnf_g": pad_c(p["lnf_g"]), "lnf_b": pad_c(p["lnf_b"]),
        "whead": whead, "bhead": bhead,
    }


@functools.partial(jax.jit, static_argnames=("block_batch",))
def model_apply(idx, params, block_batch=None):
    """Full TransformerModel.forward with targets=None (loss is None)."""
    B, T = idx.shape
    # TODO(synk): data-dependent token/position embedding gather stays in plain JAX glue.
    tok_emb = jnp.take(params["tok_table"], idx, axis=0)        # (B, T, CP)
    pos_emb = params["pos_table"][:T][None, :, :]               # (1, T, CP)
    x = (tok_emb + pos_emb).astype(jnp.float32)
    return transformer_forward(x, params, block_batch=block_batch)


if __name__ == "__main__":
    key = jax.random.PRNGKey(0)
    pkey, dkey = jax.random.split(key)
    params = prepare_params(init_params(pkey))

    B, T = 4, 16                                                # T <= block_size (48)
    idx = jax.random.randint(dkey, (B, T), 0, VOCAB_SIZE, dtype=jnp.int32)

    logits = model_apply(idx, params)                           # heuristic -> 2 batch blocks
    jax.block_until_ready(logits)
    assert logits.shape == (B, T, VOCAB_SIZE)
    assert bool(jnp.all(jnp.isfinite(logits)))
    # TODO(synk): cross-entropy loss / autoregressive generate() are host-side glue, not kernelized.
    print("KERNEL_OK")
</pallas_src>

<mosaic_0001>
module attributes {stable_mosaic.version = 11 : i64} {
  func.func @transformer_kernel(%arg0: i32, %arg1: memref<32x128xf32, #tpu.memory_space<vmem>>, %arg2: memref<4x1x128xf32, #tpu.memory_space<vmem>>, %arg3: memref<4x1x128xf32, #tpu.memory_space<vmem>>, %arg4: memref<4x128x384xbf16, #tpu.memory_space<vmem>>, %arg5: memref<4x128x128xbf16, #tpu.memory_space<vmem>>, %arg6: memref<4x1x128xf32, #tpu.memory_space<vmem>>, %arg7: memref<4x1x128xf32, #tpu.memory_space<vmem>>, %arg8: memref<4x1x128xf32, #tpu.memory_space<vmem>>, %arg9: memref<4x128x288xbf16, #tpu.memory_space<vmem>>, %arg10: memref<4x1x288xf32, #tpu.memory_space<vmem>>, %arg11: memref<4x288x128xbf16, #tpu.memory_space<vmem>>, %arg12: memref<4x1x128xf32, #tpu.memory_space<vmem>>, %arg13: memref<1x128xf32, #tpu.memory_space<vmem>>, %arg14: memref<1x128xf32, #tpu.memory_space<vmem>>, %arg15: memref<128x128xbf16, #tpu.memory_space<vmem>>, %arg16: memref<1x128xf32, #tpu.memory_space<vmem>>, %arg17: memref<32x128xf32, #tpu.memory_space<vmem>>) attributes {dimension_semantics = [#tpu.dimension_semantics<parallel>], iteration_bounds = array<i64: 2>, scalar_prefetch = 0 : i64, scratch_operands = 0 : i64, tpu.core_type = #tpu.core_type<tc>, window_params = [{transform_indices = @transform_0, window_bounds = array<i64: 32, 128>}, {pipeline_mode = #tpu.pipeline_mode<synchronous>, transform_indices = @transform_1, window_bounds = array<i64: 4, 1, 128>}, {pipeline_mode = #tpu.pipeline_mode<synchronous>, transform_indices = @transform_2, window_bounds = array<i64: 4, 1, 128>}, {pipeline_mode = #tpu.pipeline_mode<synchronous>, transform_indices = @transform_3, window_bounds = array<i64: 4, 128, 384>}, {pipeline_mode = #tpu.pipeline_mode<synchronous>, transform_indices = @transform_4, window_bounds = array<i64: 4, 128, 128>}, {pipeline_mode = #tpu.pipeline_mode<synchronous>, transform_indices = @transform_5, window_bounds = array<i64: 4, 1, 128>}, {pipeline_mode = #tpu.pipeline_mode<synchronous>, transform_indices = @transform_6, window_bounds = array<i64: 4, 1, 128>}, {pipeline_mode = #tpu.pipeline_mode<synchronous>, transform_indices = @transform_7, window_bounds = array<i64: 4, 1, 128>}, {pipeline_mode = #tpu.pipeline_mode<synchronous>, transform_indices = @transform_8, window_bounds = array<i64: 4, 128, 288>}, {pipeline_mode = #tpu.pipeline_mode<synchronous>, transform_indices = @transform_9, window_bounds = array<i64: 4, 1, 288>}, {pipeline_mode = #tpu.pipeline_mode<synchronous>, transform_indices = @transform_10, window_bounds = array<i64: 4, 288, 128>}, {pipeline_mode = #tpu.pipeline_mode<synchronous>, transform_indices = @transform_11, window_bounds = array<i64: 4, 1, 128>}, {pipeline_mode = #tpu.pipeline_mode<synchronous>, transform_indices = @transform_12, window_bounds = array<i64: 1, 128>}, {pipeline_mode = #tpu.pipeline_mode<synchronous>, transform_indices = @transform_13, window_bounds = array<i64: 1, 128>}, {pipeline_mode = #tpu.pipeline_mode<synchronous>, transform_indices = @transform_14, window_bounds = array<i64: 128, 128>}, {pipeline_mode = #tpu.pipeline_mode<synchronous>, transform_indices = @transform_15, window_bounds = array<i64: 1, 128>}, {transform_indices = @transform_16, window_bounds = array<i64: 32, 128>}]} {
    %c0 = arith.constant 0 : index
    %c0_0 = arith.constant 0 : index
    %0 = vector.load %arg1[%c0, %c0_0] : memref<32x128xf32, #tpu.memory_space<vmem>>, vector<32x128xf32>
    %1 = tpu.iota {dimensions = array<i32: 1>} : vector<1x128xi32>
    %c72_i32 = arith.constant 72 : i32
    %2 = vector.broadcast %c72_i32 : i32 to vector<1x128xi32>
    %3 = arith.cmpi slt, %1, %2 : vector<1x128xi32>
    %4 = arith.extui %3 : vector<1x128xi1> to vector<1x128xi32>
    %5 = arith.sitofp %4 : vector<1x128xi32> to vector<1x128xf32>
    %6 = tpu.iota {dimensions = array<i32: 0>} : vector<16x16xi32>
    %7 = tpu.iota {dimensions = array<i32: 1>} : vector<16x16xi32>
    %8 = arith.cmpi sge, %6, %7 : vector<16x16xi32>
    %cst = arith.constant 0.000000e+00 : f32
    %cst_1 = arith.constant -1.000000e+30 : f32
    %9 = vector.broadcast %cst : f32 to vector<16x16xf32>
    %10 = vector.broadcast %cst_1 : f32 to vector<16x16xf32>
    %11 = arith.select %8, %9, %10 : vector<16x16xi1>, vector<16x16xf32>
    %12 = vector.shape_cast %11 : vector<16x16xf32> to vector<1x16x16xf32>
    %c0_2 = arith.constant 0 : index
    %c0_3 = arith.constant 0 : index
    %c0_4 = arith.constant 0 : index
    %13 = vector.load %arg2[%c0_2, %c0_3, %c0_4] : memref<4x1x128xf32, #tpu.memory_space<vmem>>, vector<1x1x128xf32>
    %14 = vector.shape_cast %13 : vector<1x1x128xf32> to vector<1x128xf32>
    %c0_5 = arith.constant 0 : index
    %c0_6 = arith.constant 0 : index
    %c0_7 = arith.constant 0 : index
    %15 = vector.load %arg3[%c0_5, %c0_6, %c0_7] : memref<4x1x128xf32, #tpu.memory_space<vmem>>, vector<1x1x128xf32>
    %16 = vector.shape_cast %15 : vector<1x1x128xf32> to vector<1x128xf32>
    %cst_8 = arith.constant dense<0.000000e+00> : vector<32xf32>
    %17 = vector.multi_reduction <add>, %0, %cst_8 [1] : vector<32x128xf32> to vector<32xf32>
    %18 = vector.shape_cast %17 : vector<32xf32> to vector<32x1xf32>
    %cst_9 = arith.constant 0.013888889 : f32
    %19 = vector.broadcast %cst_9 : f32 to vector<32x1xf32>
    %20 = arith.mulf %18, %19 : vector<32x1xf32>
    %21 = vector.broadcast %20 : vector<32x1xf32> to vector<32x128xf32>
    %22 = arith.subf %0, %21 : vector<32x128xf32>
    %23 = vector.broadcast %5 : vector<1x128xf32> to vector<32x128xf32>
    %24 = arith.mulf %22, %23 : vector<32x128xf32>
    %25 = arith.mulf %24, %24 : vector<32x128xf32>
    %cst_10 = arith.constant dense<0.000000e+00> : vector<32xf32>
    %26 = vector.multi_reduction <add>, %25, %cst_10 [1] : vector<32x128xf32> to vector<32xf32>
    %27 = vector.shape_cast %26 : vector<32xf32> to vector<32x1xf32>
    %cst_11 = arith.constant 0.013888889 : f32
    %28 = vector.broadcast %cst_11 : f32 to vector<32x1xf32>
    %29 = arith.mulf %27, %28 : vector<32x1xf32>
    %cst_12 = arith.constant 9.99999974E-6 : f32
    %30 = vector.broadcast %cst_12 : f32 to vector<32x1xf32>
    %31 = arith.addf %29, %30 : vector<32x1xf32>
    %32 = math.rsqrt %31 : vector<32x1xf32>
    %33 = vector.broadcast %32 : vector<32x1xf32> to vector<32x128xf32>
    %34 = arith.mulf %24, %33 : vector<32x128xf32>
    %35 = vector.broadcast %14 : vector<1x128xf32> to vector<32x128xf32>
    %36 = arith.mulf %34, %35 : vector<32x128xf32>
    %37 = vector.broadcast %16 : vector<1x128xf32> to vector<32x128xf32>
    %38 = arith.addf %36, %37 : vector<32x128xf32>
    %39 = arith.truncf %38 : vector<32x128xf32> to vector<32x128xbf16>
    %c0_13 = arith.constant 0 : index
    %c0_14 = arith.constant 0 : index
    %c0_15 = arith.constant 0 : index
    %40 = vector.load %arg4[%c0_13, %c0_14, %c0_15] : memref<4x128x384xbf16, #tpu.memory_space<vmem>>, vector<1x128x384xbf16>
    %41 = vector.shape_cast %40 : vector<1x128x384xbf16> to vector<128x384xbf16>
    %cst_16 = arith.constant dense<0.000000e+00> : vector<32x384xf32>
    %42 = tpu.matmul %39, %41, %cst_16 {dimension_numbers = #tpu.dot_dimension_numbers<[1], [0], [0], [1], [0, 0, 1, 1], [], []>} : vector<32x128xbf16>, vector<128x384xbf16>, vector<32x384xf32> -> vector<32x384xf32>
    %43 = vector.extract_strided_slice %42 {offsets = [0, 0], sizes = [32, 16], strides = [1, 1]} : vector<32x384xf32> to vector<32x16xf32>
    %44 = vector.shape_cast %43 : vector<32x16xf32> to vector<2x16x16xf32>
    %45 = vector.extract_strided_slice %42 {offsets = [0, 16], sizes = [32, 16], strides = [1, 1]} : vector<32x384xf32> to vector<32x16xf32>
    %46 = vector.shape_cast %45 : vector<32x16xf32> to vector<2x16x16xf32>
    %47 = vector.extract_strided_slice %42 {offsets = [0, 32], sizes = [32, 16], strides = [1, 1]} : vector<32x384xf32> to vector<32x16xf32>
    %48 = vector.shape_cast %47 : vector<32x16xf32> to vector<2x16x16xf32>
    %49 = vector.extract_strided_slice %42 {offsets = [0, 48], sizes = [32, 16], strides = [1, 1]} : vector<32x384xf32> to vector<32x16xf32>
    %50 = vector.shape_cast %49 : vector<32x16xf32> to vector<2x16x16xf32>
    %51 = vector.extract_strided_slice %42 {offsets = [0, 64], sizes = [32, 16], strides = [1, 1]} : vector<32x384xf32> to vector<32x16xf32>
    %52 = vector.shape_cast %51 : vector<32x16xf32> to vector<2x16x16xf32>
    %53 = vector.extract_strided_slice %42 {offsets = [0, 80], sizes = [32, 16], strides = [1, 1]} : vector<32x384xf32> to vector<32x16xf32>
    %54 = vector.shape_cast %53 : vector<32x16xf32> to vector<2x16x16xf32>
    %55 = vector.extract_strided_slice %42 {offsets = [0, 96], sizes = [32, 16], strides = [1, 1]} : vector<32x384xf32> to vector<32x16xf32>
    %56 = vector.shape_cast %55 : vector<32x16xf32> to vector<2x16x16xf32>
    %57 = vector.extract_strided_slice %42 {offsets = [0, 112], sizes = [32, 16], strides = [1, 1]} : vector<32x384xf32> to vector<32x16xf32>
    %58 = vector.shape_cast %57 : vector<32x16xf32> to vector<2x16x16xf32>
    %59 = tpu.concatenate %44, %46, %48, %50, %52, %54, %56, %58 in 0 : vector<2x16x16xf32>, vector<2x16x16xf32>, vector<2x16x16xf32>, vector<2x16x16xf32>, vector<2x16x16xf32>, vector<2x16x16xf32>, vector<2x16x16xf32>, vector<2x16x16xf32> -> vector<16x16x16xf32>
    %60 = arith.truncf %59 : vector<16x16x16xf32> to vector<16x16x16xbf16>
    %61 = vector.extract_strided_slice %42 {offsets = [0, 128], sizes = [32, 16], strides = [1, 1]} : vector<32x384xf32> to vector<32x16xf32>
    %62 = vector.shape_cast %61 : vector<32x16xf32> to vector<2x16x16xf32>
    %63 = vector.extract_strided_slice %42 {offsets = [0, 144], sizes = [32, 16], strides = [1, 1]} : vector<32x384xf32> to vector<32x16xf32>
    %64 = vector.shape_cast %63 : vector<32x16xf32> to vector<2x16x16xf32>
    %65 = vector.extract_strided_slice %42 {offsets = [0, 160], sizes = [32, 16], strides = [1, 1]} : vector<32x384xf32> to vector<32x16xf32>
    %66 = vector.shape_cast %65 : vector<32x16xf32> to vector<2x16x16xf32>
    %67 = vector.extract_strided_slice %42 {offsets = [0, 176], sizes = [32, 16], strides = [1, 1]} : vector<32x384xf32> to vector<32x16xf32>
    %68 = vector.shape_cast %67 : vector<32x16xf32> to vector<2x16x16xf32>
    %69 = vector.extract_strided_slice %42 {offsets = [0, 192], sizes = [32, 16], strides = [1, 1]} : vector<32x384xf32> to vector<32x16xf32>
    %70 = vector.shape_cast %69 : vector<32x16xf32> to vector<2x16x16xf32>
    %71 = vector.extract_strided_slice %42 {offsets = [0, 208], sizes = [32, 16], strides = [1, 1]} : vector<32x384xf32> to vector<32x16xf32>
    %72 = vector.shape_cast %71 : vector<32x16xf32> to vector<2x16x16xf32>
    %73 = vector.extract_strided_slice %42 {offsets = [0, 224], sizes = [32, 16], strides = [1, 1]} : vector<32x384xf32> to vector<32x16xf32>
    %74 = vector.shape_cast %73 : vector<32x16xf32> to vector<2x16x16xf32>
    %75 = vector.extract_strided_slice %42 {offsets = [0, 240], sizes = [32, 16], strides = [1, 1]} : vector<32x384xf32> to vector<32x16xf32>
    %76 = vector.shape_cast %75 : vector<32x16xf32> to vector<2x16x16xf32>
    %77 = tpu.concatenate %62, %64, %66, %68, %70, %72, %74, %76 in 0 : vector<2x16x16xf32>, vector<2x16x16xf32>, vector<2x16x16xf32>, vector<2x16x16xf32>, vector<2x16x16xf32>, vector<2x16x16xf32>, vector<2x16x16xf32>, vector<2x16x16xf32> -> vector<16x16x16xf32>
    %78 = arith.truncf %77 : vector<16x16x16xf32> to vector<16x16x16xbf16>
    %79 = vector.extract_strided_slice %42 {offsets = [0, 256], sizes = [32, 16], strides = [1, 1]} : vector<32x384xf32> to vector<32x16xf32>
    %80 = vector.shape_cast %79 : vector<32x16xf32> to vector<2x16x16xf32>
    %81 = vector.extract_strided_slice %42 {offsets = [0, 272], sizes = [32, 16], strides = [1, 1]} : vector<32x384xf32> to vector<32x16xf32>
    %82 = vector.shape_cast %81 : vector<32x16xf32> to vector<2x16x16xf32>
    %83 = vector.extract_strided_slice %42 {offsets = [0, 288], sizes = [32, 16], strides = [1, 1]} : vector<32x384xf32> to vector<32x16xf32>
    %84 = vector.shape_cast %83 : vector<32x16xf32> to vector<2x16x16xf32>
    %85 = vector.extract_strided_slice %42 {offsets = [0, 304], sizes = [32, 16], strides = [1, 1]} : vector<32x384xf32> to vector<32x16xf32>
    %86 = vector.shape_cast %85 : vector<32x16xf32> to vector<2x16x16xf32>
    %87 = vector.extract_strided_slice %42 {offsets = [0, 320], sizes = [32, 16], strides = [1, 1]} : vector<32x384xf32> to vector<32x16xf32>
    %88 = vector.shape_cast %87 : vector<32x16xf32> to vector<2x16x16xf32>
    %89 = vector.extract_strided_slice %42 {offsets = [0, 336], sizes = [32, 16], strides = [1, 1]} : vector<32x384xf32> to vector<32x16xf32>
    %90 = vector.shape_cast %89 : vector<32x16xf32> to vector<2x16x16xf32>
    %91 = vector.extract_strided_slice %42 {offsets = [0, 352], sizes = [32, 16], strides = [1, 1]} : vector<32x384xf32> to vector<32x16xf32>
    %92 = vector.shape_cast %91 : vector<32x16xf32> to vector<2x16x16xf32>
    %93 = vector.extract_strided_slice %42 {offsets = [0, 368], sizes = [32, 16], strides = [1, 1]} : vector<32x384xf32> to vector<32x16xf32>
    %94 = vector.shape_cast %93 : vector<32x16xf32> to vector<2x16x16xf32>
    %95 = tpu.concatenate %80, %82, %84, %86, %88, %90, %92, %94 in 0 : vector<2x16x16xf32>, vector<2x16x16xf32>, vector<2x16x16xf32>, vector<2x16x16xf32>, vector<2x16x16xf32>, vector<2x16x16xf32>, vector<2x16x16xf32>, vector<2x16x16xf32> -> vector<16x16x16xf32>
    %96 = arith.truncf %95 : vector<16x16x16xf32> to vector<16x16x16xbf16>
    "tpu.trace_start"() <{level = 10 : i32, message = "btd,bsd->bts"}> : () -> ()
    %cst_17 = arith.constant dense<0.000000e+00> : vector<16x16x16xf32>
    %97 = tpu.matmul %60, %78, %cst_17 {dimension_numbers = #tpu.dot_dimension_numbers<[2], [2], [1], [1], [0, 0, 0, 1, 1, 1], [0], [0]>} : vector<16x16x16xbf16>, vector<16x16x16xbf16>, vector<16x16x16xf32> -> vector<16x16x16xf32>
    "tpu.trace_stop"() : () -> ()
    %98 = vector.broadcast %12 : vector<1x16x16xf32> to vector<16x16x16xf32>
    %99 = arith.addf %97, %98 : vector<16x16x16xf32>
    %cst_18 = arith.constant dense<0xFF800000> : vector<16x16xf32>
    %100 = vector.multi_reduction <maximumf>, %99, %cst_18 [2] : vector<16x16x16xf32> to vector<16x16xf32>
    %101 = vector.shape_cast %100 : vector<16x16xf32> to vector<16x16x1xf32>
    %102 = vector.broadcast %101 : vector<16x16x1xf32> to vector<16x16x16xf32>
    %103 = arith.subf %99, %102 : vector<16x16x16xf32>
    %104 = math.exp %103 : vector<16x16x16xf32>
    %cst_19 = arith.constant dense<0.000000e+00> : vector<16x16xf32>
    %105 = vector.multi_reduction <add>, %104, %cst_19 [2] : vector<16x16x16xf32> to vector<16x16xf32>
    %106 = vector.shape_cast %105 : vector<16x16xf32> to vector<16x16x1xf32>
    %107 = tpu.reciprocal %106 {approx = true} : vector<16x16x1xf32> -> vector<16x16x1xf32>
    %108 = vector.broadcast %107 : vector<16x16x1xf32> to vector<16x16x16xf32>
    %109 = arith.mulf %104, %108 : vector<16x16x16xf32>
    %110 = arith.truncf %109 : vector<16x16x16xf32> to vector<16x16x16xbf16>
    "tpu.trace_start"() <{level = 10 : i32, message = "bts,bsd->btd"}> : () -> ()
    %cst_20 = arith.constant dense<0.000000e+00> : vector<16x16x16xf32>
    %111 = tpu.matmul %110, %96, %cst_20 {dimension_numbers = #tpu.dot_dimension_numbers<[2], [1], [1], [2], [0, 0, 0, 1, 1, 2], [0], [0]>} : vector<16x16x16xbf16>, vector<16x16x16xbf16>, vector<16x16x16xf32> -> vector<16x16x16xf32>
    "tpu.trace_stop"() : () -> ()
    %112 = arith.truncf %111 : vector<16x16x16xf32> to vector<16x16x16xbf16>
    %c0_21 = arith.constant 0 : index
    %c0_22 = arith.constant 0 : index
    %c0_23 = arith.constant 0 : index
    %113 = vector.load %arg5[%c0_21, %c0_22, %c0_23] : memref<4x128x128xbf16, #tpu.memory_space<vmem>>, vector<1x128x128xbf16>
    %114 = vector.shape_cast %113 : vector<1x128x128xbf16> to vector<128x128xbf16>
    %c0_24 = arith.constant 0 : index
    %c0_25 = arith.constant 0 : index
    %c0_26 = arith.constant 0 : index
    %115 = vector.load %arg6[%c0_24, %c0_25, %c0_26] : memref<4x1x128xf32, #tpu.memory_space<vmem>>, vector<1x1x128xf32>
    %116 = vector.shape_cast %115 : vector<1x1x128xf32> to vector<1x128xf32>
    %117 = vector.extract_strided_slice %112 {offsets = [0, 0, 0], sizes = [2, 16, 16], strides = [1, 1, 1]} : vector<16x16x16xbf16> to vector<2x16x16xbf16>
    %118 = vector.shape_cast %117 : vector<2x16x16xbf16> to vector<32x16xbf16>
    %119 = vector.extract_strided_slice %114 {offsets = [0, 0], sizes = [16, 128], strides = [1, 1]} : vector<128x128xbf16> to vector<16x128xbf16>
    %cst_27 = arith.constant dense<0.000000e+00> : vector<32x128xf32>
    %120 = tpu.matmul %118, %119, %cst_27 {dimension_numbers = #tpu.dot_dimension_numbers<[1], [0], [0], [1], [0, 0, 1, 1], [], []>} : vector<32x16xbf16>, vector<16x128xbf16>, vector<32x128xf32> -> vector<32x128xf32>
    %121 = vector.broadcast %116 : vector<1x128xf32> to vector<32x128xf32>
    %122 = arith.addf %121, %120 : vector<32x128xf32>
    %123 = vector.extract_strided_slice %112 {offsets = [2, 0, 0], sizes = [2, 16, 16], strides = [1, 1, 1]} : vector<16x16x16xbf16> to vector<2x16x16xbf16>
    %124 = vector.shape_cast %123 : vector<2x16x16xbf16> to vector<32x16xbf16>
    %125 = vector.extract_strided_slice %114 {offsets = [16, 0], sizes = [16, 128], strides = [1, 1]} : vector<128x128xbf16> to vector<16x128xbf16>
    %cst_28 = arith.constant dense<0.000000e+00> : vector<32x128xf32>
    %126 = tpu.matmul %124, %125, %cst_28 {dimension_numbers = #tpu.dot_dimension_numbers<[1], [0], [0], [1], [0, 0, 1, 1], [], []>} : vector<32x16xbf16>, vector<16x128xbf16>, vector<32x128xf32> -> vector<32x128xf32>
    %127 = arith.addf %122, %126 : vector<32x128xf32>
    %128 = vector.extract_strided_slice %112 {offsets = [4, 0, 0], sizes = [2, 16, 16], strides = [1, 1, 1]} : vector<16x16x16xbf16> to vector<2x16x16xbf16>
    %129 = vector.shape_cast %128 : vector<2x16x16xbf16> to vector<32x16xbf16>
    %130 = vector.extract_strided_slice %114 {offsets = [32, 0], sizes = [16, 128], strides = [1, 1]} : vector<128x128xbf16> to vector<16x128xbf16>
    %cst_29 = arith.constant dense<0.000000e+00> : vector<32x128xf32>
    %131 = tpu.matmul %129, %130, %cst_29 {dimension_numbers = #tpu.dot_dimension_numbers<[1], [0], [0], [1], [0, 0, 1, 1], [], []>} : vector<32x16xbf16>, vector<16x128xbf16>, vector<32x128xf32> -> vector<32x128xf32>
    %132 = arith.addf %127, %131 : vector<32x128xf32>
    %133 = vector.extract_strided_slice %112 {offsets = [6, 0, 0], sizes = [2, 16, 16], strides = [1, 1, 1]} : vector<16x16x16xbf16> to vector<2x16x16xbf16>
    %134 = vector.shape_cast %133 : vector<2x16x16xbf16> to vector<32x16xbf16>
    %135 = vector.extract_strided_slice %114 {offsets = [48, 0], sizes = [16, 128], strides = [1, 1]} : vector<128x128xbf16> to vector<16x128xbf16>
    %cst_30 = arith.constant dense<0.000000e+00> : vector<32x128xf32>
    %136 = tpu.matmul %134, %135, %cst_30 {dimension_numbers = #tpu.dot_dimension_numbers<[1], [0], [0], [1], [0, 0, 1, 1], [], []>} : vector<32x16xbf16>, vector<16x128xbf16>, vector<32x128xf32> -> vector<32x128xf32>
    %137 = arith.addf %132, %136 : vector<32x128xf32>
    %138 = vector.extract_strided_slice %112 {offsets = [8, 0, 0], sizes = [2, 16, 16], strides = [1, 1, 1]} : vector<16x16x16xbf16> to vector<2x16x16xbf16>
    %139 = vector.shape_cast %138 : vector<2x16x16xbf16> to vector<32x16xbf16>
    %140 = vector.extract_strided_slice %114 {offsets = [64, 0], sizes = [16, 128], strides = [1, 1]} : vector<128x128xbf16> to vector<16x128xbf16>
    %cst_31 = arith.constant dense<0.000000e+00> : vector<32x128xf32>
    %141 = tpu.matmul %139, %140, %cst_31 {dimension_numbers = #tpu.dot_dimension_numbers<[1], [0], [0], [1], [0, 0, 1, 1], [], []>} : vector<32x16xbf16>, vector<16x128xbf16>, vector<32x128xf32> -> vector<32x128xf32>
    %142 = arith.addf %137, %141 : vector<32x128xf32>
    %143 = vector.extract_strided_slice %112 {offsets = [10, 0, 0], sizes = [2, 16, 16], strides = [1, 1, 1]} : vector<16x16x16xbf16> to vector<2x16x16xbf16>
    %144 = vector.shape_cast %143 : vector<2x16x16xbf16> to vector<32x16xbf16>
    %145 = vector.extract_strided_slice %114 {offsets = [80, 0], sizes = [16, 128], strides = [1, 1]} : vector<128x128xbf16> to vector<16x128xbf16>
    %cst_32 = arith.constant dense<0.000000e+00> : vector<32x128xf32>
    %146 = tpu.matmul %144, %145, %cst_32 {dimension_numbers = #tpu.dot_dimension_numbers<[1], [0], [0], [1], [0, 0, 1, 1], [], []>} : vector<32x16xbf16>, vector<16x128xbf16>, vector<32x128xf32> -> vector<32x128xf32>
    %147 = arith.addf %142, %146 : vector<32x128xf32>
    %148 = vector.extract_strided_slice %112 {offsets = [12, 0, 0], sizes = [2, 16, 16], strides = [1, 1, 1]} : vector<16x16x16xbf16> to vector<2x16x16xbf16>
    %149 = vector.shape_cast %148 : vector<2x16x16xbf16> to vector<32x16xbf16>
    %150 = vector.extract_strided_slice %114 {offsets = [96, 0], sizes = [16, 128], strides = [1, 1]} : vector<128x128xbf16> to vector<16x128xbf16>
    %cst_33 = arith.constant dense<0.000000e+00> : vector<32x128xf32>
    %151 = tpu.matmul %149, %150, %cst_33 {dimension_numbers = #tpu.dot_dimension_numbers<[1], [0], [0], [1], [0, 0, 1, 1], [], []>} : vector<32x16xbf16>, vector<16x128xbf16>, vector<32x128xf32> -> vector<32x128xf32>
    %152 = arith.addf %147, %151 : vector<32x128xf32>
    %153 = vector.extract_strided_slice %112 {offsets = [14, 0, 0], sizes = [2, 16, 16], strides = [1, 1, 1]} : vector<16x16x16xbf16> to vector<2x16x16xbf16>
    %154 = vector.shape_cast %153 : vector<2x16x16xbf16> to vector<32x16xbf16>
    %155 = vector.extract_strided_slice %114 {offsets = [112, 0], sizes = [16, 128], strides = [1, 1]} : vector<128x128xbf16> to vector<16x128xbf16>
    %cst_34 = arith.constant dense<0.000000e+00> : vector<32x128xf32>
    %156 = tpu.matmul %154, %155, %cst_34 {dimension_numbers = #tpu.dot_dimension_numbers<[1], [0], [0], [1], [0, 0, 1, 1], [], []>} : vector<32x16xbf16>, vector<16x128xbf16>, vector<32x128xf32> -> vector<32x128xf32>
    %157 = arith.addf %152, %156 : vector<32x128xf32>
    %158 = arith.addf %0, %157 : vector<32x128xf32>
    %c0_35 = arith.constant 0 : index
    %c0_36 = arith.constant 0 : index
    %c0_37 = arith.constant 0 : index
    %159 = vector.load %arg7[%c0_35, %c0_36, %c0_37] : memref<4x1x128xf32, #tpu.memory_space<vmem>>, vector<1x1x128xf32>
    %160 = vector.shape_cast %159 : vector<1x1x128xf32> to vector<1x128xf32>
    %c0_38 = arith.constant 0 : index
    %c0_39 = arith.constant 0 : index
    %c0_40 = arith.constant 0 : index
    %161 = vector.load %arg8[%c0_38, %c0_39, %c0_40] : memref<4x1x128xf32, #tpu.memory_space<vmem>>, vector<1x1x128xf32>
    %162 = vector.shape_cast %161 : vector<1x1x128xf32> to vector<1x128xf32>
    %cst_41 = arith.constant dense<0.000000e+00> : vector<32xf32>
    %163 = vector.multi_reduction <add>, %158, %cst_41 [1] : vector<32x128xf32> to vector<32xf32>
    %164 = vector.shape_cast %163 : vector<32xf32> to vector<32x1xf32>
    %cst_42 = arith.constant 0.013888889 : f32
    %165 = vector.broadcast %cst_42 : f32 to vector<32x1xf32>
    %166 = arith.mulf %164, %165 : vector<32x1xf32>
    %167 = vector.broadcast %166 : vector<32x1xf32> to vector<32x128xf32>
    %168 = arith.subf %158, %167 : vector<32x128xf32>
    %169 = vector.broadcast %5 : vector<1x128xf32> to vector<32x128xf32>
    %170 = arith.mulf %168, %169 : vector<32x128xf32>
    %171 = arith.mulf %170, %170 : vector<32x128xf32>
    %cst_43 = arith.constant dense<0.000000e+00> : vector<32xf32>
    %172 = vector.multi_reduction <add>, %171, %cst_43 [1] : vector<32x128xf32> to vector<32xf32>
    %173 = vector.shape_cast %172 : vector<32xf32> to vector<32x1xf32>
    %cst_44 = arith.constant 0.013888889 : f32
    %174 = vector.broadcast %cst_44 : f32 to vector<32x1xf32>
    %175 = arith.mulf %173, %174 : vector<32x1xf32>
    %cst_45 = arith.constant 9.99999974E-6 : f32
    %176 = vector.broadcast %cst_45 : f32 to vector<32x1xf32>
    %177 = arith.addf %175, %176 : vector<32x1xf32>
    %178 = math.rsqrt %177 : vector<32x1xf32>
    %179 = vector.broadcast %178 : vector<32x1xf32> to vector<32x128xf32>
    %180 = arith.mulf %170, %179 : vector<32x128xf32>
    %181 = vector.broadcast %160 : vector<1x128xf32> to vector<32x128xf32>
    %182 = arith.mulf %180, %181 : vector<32x128xf32>
    %183 = vector.broadcast %162 : vector<1x128xf32> to vector<32x128xf32>
    %184 = arith.addf %182, %183 : vector<32x128xf32>
    %185 = arith.truncf %184 : vector<32x128xf32> to vector<32x128xbf16>
    %c0_46 = arith.constant 0 : index
    %c0_47 = arith.constant 0 : index
    %c0_48 = arith.constant 0 : index
    %186 = vector.load %arg9[%c0_46, %c0_47, %c0_48] : memref<4x128x288xbf16, #tpu.memory_space<vmem>>, vector<1x128x288xbf16>
    %187 = vector.shape_cast %186 : vector<1x128x288xbf16> to vector<128x288xbf16>
    %cst_49 = arith.constant dense<0.000000e+00> : vector<32x288xf32>
    %188 = tpu.matmul %185, %187, %cst_49 {dimension_numbers = #tpu.dot_dimension_numbers<[1], [0], [0], [1], [0, 0, 1, 1], [], []>} : vector<32x128xbf16>, vector<128x288xbf16>, vector<32x288xf32> -> vector<32x288xf32>
    %c0_50 = arith.constant 0 : index
    %c0_51 = arith.constant 0 : index
    %c0_52 = arith.constant 0 : index
    %189 = vector.load %arg10[%c0_50, %c0_51, %c0_52] : memref<4x1x288xf32, #tpu.memory_space<vmem>>, vector<1x1x288xf32>
    %190 = vector.shape_cast %189 : vector<1x1x288xf32> to vector<1x288xf32>
    %191 = vector.broadcast %190 : vector<1x288xf32> to vector<32x288xf32>
    %192 = arith.addf %188, %191 : vector<32x288xf32>
    %cst_53 = arith.constant 0.000000e+00 : f32
    %193 = vector.broadcast %cst_53 : f32 to vector<32x288xf32>
    %194 = arith.maximumf %192, %193 : vector<32x288xf32>
    %195 = arith.truncf %194 : vector<32x288xf32> to vector<32x288xbf16>
    %c0_54 = arith.constant 0 : index
    %c0_55 = arith.constant 0 : index
    %c0_56 = arith.constant 0 : index
    %196 = vector.load %arg11[%c0_54, %c0_55, %c0_56] : memref<4x288x128xbf16, #tpu.memory_space<vmem>>, vector<1x288x128xbf16>
    %197 = vector.shape_cast %196 : vector<1x288x128xbf16> to vector<288x128xbf16>
    %cst_57 = arith.constant dense<0.000000e+00> : vector<32x128xf32>
    %198 = tpu.matmul %195, %197, %cst_57 {dimension_numbers = #tpu.dot_dimension_numbers<[1], [0], [0], [1], [0, 0, 1, 1], [], []>} : vector<32x288xbf16>, vector<288x128xbf16>, vector<32x128xf32> -> vector<32x128xf32>
    %c0_58 = arith.constant 0 : index
    %c0_59 = arith.constant 0 : index
    %c0_60 = arith.constant 0 : index
    %199 = vector.load %arg12[%c0_58, %c0_59, %c0_60] : memref<4x1x128xf32, #tpu.memory_space<vmem>>, vector<1x1x128xf32>
    %200 = vector.shape_cast %199 : vector<1x1x128xf32> to vector<1x128xf32>
    %201 = vector.broadcast %200 : vector<1x128xf32> to vector<32x128xf32>
    %202 = arith.addf %198, %201 : vector<32x128xf32>
    %203 = arith.addf %158, %202 : vector<32x128xf32>
    %c1 = arith.constant 1 : index
    %c0_61 = arith.constant 0 : index
    %c0_62 = arith.constant 0 : index
    %204 = vector.load %arg2[%c1, %c0_61, %c0_62] : memref<4x1x128xf32, #tpu.memory_space<vmem>>, vector<1x1x128xf32>
    %205 = vector.shape_cast %204 : vector<1x1x128xf32> to vector<1x128xf32>
    %c1_63 = arith.constant 1 : index
    %c0_64 = arith.constant 0 : index
    %c0_65 = arith.constant 0 : index
    %206 = vector.load %arg3[%c1_63, %c0_64, %c0_65] : memref<4x1x128xf32, #tpu.memory_space<vmem>>, vector<1x1x128xf32>
    %207 = vector.shape_cast %206 : vector<1x1x128xf32> to vector<1x128xf32>
    %cst_66 = arith.constant dense<0.000000e+00> : vector<32xf32>
    %208 = vector.multi_reduction <add>, %203, %cst_66 [1] : vector<32x128xf32> to vector<32xf32>
    %209 = vector.shape_cast %208 : vector<32xf32> to vector<32x1xf32>
    %cst_67 = arith.constant 0.013888889 : f32
    %210 = vector.broadcast %cst_67 : f32 to vector<32x1xf32>
    %211 = arith.mulf %209, %210 : vector<32x1xf32>
    %212 = vector.broadcast %211 : vector<32x1xf32> to vector<32x128xf32>
    %213 = arith.subf %203, %212 : vector<32x128xf32>
    %214 = vector.broadcast %5 : vector<1x128xf32> to vector<32x128xf32>
    %215 = arith.mulf %213, %214 : vector<32x128xf32>
    %216 = arith.mulf %215, %215 : vector<32x128xf32>
    %cst_68 = arith.constant dense<0.000000e+00> : vector<32xf32>
    %217 = vector.multi_reduction <add>, %216, %cst_68 [1] : vector<32x128xf32> to vector<32xf32>
    %218 = vector.shape_cast %217 : vector<32xf32> to vector<32x1xf32>
    %cst_69 = arith.constant 0.013888889 : f32
    %219 = vector.broadcast %cst_69 : f32 to vector<32x1xf32>
    %220 = arith.mulf %218, %219 : vector<32x1xf32>
    %cst_70 = arith.constant 9.99999974E-6 : f32
    %221 = vector.broadcast %cst_70 : f32 to vector<32x1xf32>
    %222 = arith.addf %220, %221 : vector<32x1xf32>
    %223 = math.rsqrt %222 : vector<32x1xf32>
    %224 = vector.broadcast %223 : vector<32x1xf32> to vector<32x128xf32>
    %225 = arith.mulf %215, %224 : vector<32x128xf32>
    %226 = vector.broadcast %205 : vector<1x128xf32> to vector<32x128xf32>
    %227 = arith.mulf %225, %226 : vector<32x128xf32>
    %228 = vector.broadcast %207 : vector<1x128xf32> to vector<32x128xf32>
    %229 = arith.addf %227, %228 : vector<32x128xf32>
    %230 = arith.truncf %229 : vector<32x128xf32> to vector<32x128xbf16>
    %c1_71 = arith.constant 1 : index
    %c0_72 = arith.constant 0 : index
    %c0_73 = arith.constant 0 : index
    %231 = vector.load %arg4[%c1_71, %c0_72, %c0_73] : memref<4x128x384xbf16, #tpu.memory_space<vmem>>, vector<1x128x384xbf16>
    %232 = vector.shape_cast %231 : vector<1x128x384xbf16> to vector<128x384xbf16>
    %cst_74 = arith.constant dense<0.000000e+00> : vector<32x384xf32>
    %233 = tpu.matmul %230, %232, %cst_74 {dimension_numbers = #tpu.dot_dimension_numbers<[1], [0], [0], [1], [0, 0, 1, 1], [], []>} : vector<32x128xbf16>, vector<128x384xbf16>, vector<32x384xf32> -> vector<32x384xf32>
    %234 = vector.extract_strided_slice %233 {offsets = [0, 0], sizes = [32, 16], strides = [1, 1]} : vector<32x384xf32> to vector<32x16xf32>
    %235 = vector.shape_cast %234 : vector<32x16xf32> to vector<2x16x16xf32>
    %236 = vector.extract_strided_slice %233 {offsets = [0, 16], sizes = [32, 16], strides = [1, 1]} : vector<32x384xf32> to vector<32x16xf32>
    %237 = vector.shape_cast %236 : vector<32x16xf32> to vector<2x16x16xf32>
    %238 = vector.extract_strided_slice %233 {offsets = [0, 32], sizes = [32, 16], strides = [1, 1]} : vector<32x384xf32> to vector<32x16xf32>
    %239 = vector.shape_cast %238 : vector<32x16xf32> to vector<2x16x16xf32>
    %240 = vector.extract_strided_slice %233 {offsets = [0, 48], sizes = [32, 16], strides = [1, 1]} : vector<32x384xf32> to vector<32x16xf32>
    %241 = vector.shape_cast %240 : vector<32x16xf32> to vector<2x16x16xf32>
    %242 = vector.extract_strided_slice %233 {offsets = [0, 64], sizes = [32, 16], strides = [1, 1]} : vector<32x384xf32> to vector<32x16xf32>
    %243 = vector.shape_cast %242 : vector<32x16xf32> to vector<2x16x16xf32>
    %244 = vector.extract_strided_slice %233 {offsets = [0, 80], sizes = [32, 16], strides = [1, 1]} : vector<32x384xf32> to vector<32x16xf32>
    %245 = vector.shape_cast %244 : vector<32x16xf32> to vector<2x16x16xf32>
    %246 = vector.extract_strided_slice %233 {offsets = [0, 96], sizes = [32, 16], strides = [1, 1]} : vector<32x384xf32> to vector<32x16xf32>
    %247 = vector.shape_cast %246 : vector<32x16xf32> to vector<2x16x16xf32>
    %248 = vector.extract_strided_slice %233 {offsets = [0, 112], sizes = [32, 16], strides = [1, 1]} : vector<32x384xf32> to vector<32x16xf32>
    %249 = vector.shape_cast %248 : vector<32x16xf32> to vector<2x16x16xf32>
    %250 = tpu.concatenate %235, %237, %239, %241, %243, %245, %247, %249 in 0 : vector<2x16x16xf32>, vector<2x16x16xf32>, vector<2x16x16xf32>, vector<2x16x16xf32>, vector<2x16x16xf32>, vector<2x16x16xf32>, vector<2x16x16xf32>, vector<2x16x16xf32> -> vector<16x16x16xf32>
    %251 = arith.truncf %250 : vector<16x16x16xf32> to vector<16x16x16xbf16>
    %252 = vector.extract_strided_slice %233 {offsets = [0, 128], sizes = [32, 16], strides = [1, 1]} : vector<32x384xf32> to vector<32x16xf32>
    %253 = vector.shape_cast %252 : vector<32x16xf32> to vector<2x16x16xf32>
    %254 = vector.extract_strided_slice %233 {offsets = [0, 144], sizes = [32, 16], strides = [1, 1]} : vector<32x384xf32> to vector<32x16xf32>
    %255 = vector.shape_cast %254 : vector<32x16xf32> to vector<2x16x16xf32>
    %256 = vector.extract_strided_slice %233 {offsets = [0, 160], sizes = [32, 16], strides = [1, 1]} : vector<32x384xf32> to vector<32x16xf32>
    %257 = vector.shape_cast %256 : vector<32x16xf32> to vector<2x16x16xf32>
    %258 = vector.extract_strided_slice %233 {offsets = [0, 176], sizes = [32, 16], strides = [1, 1]} : vector<32x384xf32> to vector<32x16xf32>
    %259 = vector.shape_cast %258 : vector<32x16xf32> to vector<2x16x16xf32>
    %260 = vector.extract_strided_slice %233 {offsets = [0, 192], sizes = [32, 16], strides = [1, 1]} : vector<32x384xf32> to vector<32x16xf32>
    %261 = vector.shape_cast %260 : vector<32x16xf32> to vector<2x16x16xf32>
    %262 = vector.extract_strided_slice %233 {offsets = [0, 208], sizes = [32, 16], strides = [1, 1]} : vector<32x384xf32> to vector<32x16xf32>
    %263 = vector.shape_cast %262 : vector<32x16xf32> to vector<2x16x16xf32>
    %264 = vector.extract_strided_slice %233 {offsets = [0, 224], sizes = [32, 16], strides = [1, 1]} : vector<32x384xf32> to vector<32x16xf32>
    %265 = vector.shape_cast %264 : vector<32x16xf32> to vector<2x16x16xf32>
    %266 = vector.extract_strided_slice %233 {offsets = [0, 240], sizes = [32, 16], strides = [1, 1]} : vector<32x384xf32> to vector<32x16xf32>
    %267 = vector.shape_cast %266 : vector<32x16xf32> to vector<2x16x16xf32>
    %268 = tpu.concatenate %253, %255, %257, %259, %261, %263, %265, %267 in 0 : vector<2x16x16xf32>, vector<2x16x16xf32>, vector<2x16x16xf32>, vector<2x16x16xf32>, vector<2x16x16xf32>, vector<2x16x16xf32>, vector<2x16x16xf32>, vector<2x16x16xf32> -> vector<16x16x16xf32>
    %269 = arith.truncf %268 : vector<16x16x16xf32> to vector<16x16x16xbf16>
    %270 = vector.extract_strided_slice %233 {offsets = [0, 256], sizes = [32, 16], strides = [1, 1]} : vector<32x384xf32> to vector<32x16xf32>
    %271 = vector.shape_cast %270 : vector<32x16xf32> to vector<2x16x16xf32>
    %272 = vector.extract_strided_slice %233 {offsets = [0, 272], sizes = [32, 16], strides = [1, 1]} : vector<32x384xf32> to vector<32x16xf32>
    %273 = vector.shape_cast %272 : vector<32x16xf32> to vector<2x16x16xf32>
    %274 = vector.extract_strided_slice %233 {offsets = [0, 288], sizes = [32, 16], strides = [1, 1]} : vector<32x384xf32> to vector<32x16xf32>
    %275 = vector.shape_cast %274 : vector<32x16xf32> to vector<2x16x16xf32>
    %276 = vector.extract_strided_slice %233 {offsets = [0, 304], sizes = [32, 16], strides = [1, 1]} : vector<32x384xf32> to vector<32x16xf32>
    %277 = vector.shape_cast %276 : vector<32x16xf32> to vector<2x16x16xf32>
    %278 = vector.extract_strided_slice %233 {offsets = [0, 320], sizes = [32, 16], strides = [1, 1]} : vector<32x384xf32> to vector<32x16xf32>
    %279 = vector.shape_cast %278 : vector<32x16xf32> to vector<2x16x16xf32>
    %280 = vector.extract_strided_slice %233 {offsets = [0, 336], sizes = [32, 16], strides = [1, 1]} : vector<32x384xf32> to vector<32x16xf32>
    %281 = vector.shape_cast %280 : vector<32x16xf32> to vector<2x16x16xf32>
    %282 = vector.extract_strided_slice %233 {offsets = [0, 352], sizes = [32, 16], strides = [1, 1]} : vector<32x384xf32> to vector<32x16xf32>
    %283 = vector.shape_cast %282 : vector<32x16xf32> to vector<2x16x16xf32>
    %284 = vector.extract_strided_slice %233 {offsets = [0, 368], sizes = [32, 16], strides = [1, 1]} : vector<32x384xf32> to vector<32x16xf32>
    %285 = vector.shape_cast %284 : vector<32x16xf32> to vector<2x16x16xf32>
    %286 = tpu.concatenate %271, %273, %275, %277, %279, %281, %283, %285 in 0 : vector<2x16x16xf32>, vector<2x16x16xf32>, vector<2x16x16xf32>, vector<2x16x16xf32>, vector<2x16x16xf32>, vector<2x16x16xf32>, vector<2x16x16xf32>, vector<2x16x16xf32> -> vector<16x16x16xf32>
    %287 = arith.truncf %286 : vector<16x16x16xf32> to vector<16x16x16xbf16>
    "tpu.trace_start"() <{level = 10 : i32, message = "btd,bsd->bts"}> : () -> ()
    %cst_75 = arith.constant dense<0.000000e+00> : vector<16x16x16xf32>
    %288 = tpu.matmul %251, %269, %cst_75 {dimension_numbers = #tpu.dot_dimension_numbers<[2], [2], [1], [1], [0, 0, 0, 1, 1, 1], [0], [0]>} : vector<16x16x16xbf16>, vector<16x16x16xbf16>, vector<16x16x16xf32> -> vector<16x16x16xf32>
    "tpu.trace_stop"() : () -> ()
    %289 = vector.broadcast %12 : vector<1x16x16xf32> to vector<16x16x16xf32>
    %290 = arith.addf %288, %289 : vector<16x16x16xf32>
    %cst_76 = arith.constant dense<0xFF800000> : vector<16x16xf32>
    %291 = vector.multi_reduction <maximumf>, %290, %cst_76 [2] : vector<16x16x16xf32> to vector<16x16xf32>
    %292 = vector.shape_cast %291 : vector<16x16xf32> to vector<16x16x1xf32>
    %293 = vector.broadcast %292 : vector<16x16x1xf32> to vector<16x16x16xf32>
    %294 = arith.subf %290, %293 : vector<16x16x16xf32>
    %295 = math.exp %294 : vector<16x16x16xf32>
    %cst_77 = arith.constant dense<0.000000e+00> : vector<16x16xf32>
    %296 = vector.multi_reduction <add>, %295, %cst_77 [2] : vector<16x16x16xf32> to vector<16x16xf32>
    %297 = vector.shape_cast %296 : vector<16x16xf32> to vector<16x16x1xf32>
    %298 = tpu.reciprocal %297 {approx = true} : vector<16x16x1xf32> -> vector<16x16x1xf32>
    %299 = vector.broadcast %298 : vector<16x16x1xf32> to vector<16x16x16xf32>
    %300 = arith.mulf %295, %299 : vector<16x16x16xf32>
    %301 = arith.truncf %300 : vector<16x16x16xf32> to vector<16x16x16xbf16>
    "tpu.trace_start"() <{level = 10 : i32, message = "bts,bsd->btd"}> : () -> ()
    %cst_78 = arith.constant dense<0.000000e+00> : vector<16x16x16xf32>
    %302 = tpu.matmul %301, %287, %cst_78 {dimension_numbers = #tpu.dot_dimension_numbers<[2], [1], [1], [2], [0, 0, 0, 1, 1, 2], [0], [0]>} : vector<16x16x16xbf16>, vector<16x16x16xbf16>, vector<16x16x16xf32> -> vector<16x16x16xf32>
    "tpu.trace_stop"() : () -> ()
    %303 = arith.truncf %302 : vector<16x16x16xf32> to vector<16x16x16xbf16>
    %c1_79 = arith.constant 1 : index
    %c0_80 = arith.constant 0 : index
    %c0_81 = arith.constant 0 : index
    %304 = vector.load %arg5[%c1_79, %c0_80, %c0_81] : memref<4x128x128xbf16, #tpu.memory_space<vmem>>, vector<1x128x128xbf16>
    %305 = vector.shape_cast %304 : vector<1x128x128xbf16> to vector<128x128xbf16>
    %c1_82 = arith.constant 1 : index
    %c0_83 = arith.constant 0 : index
    %c0_84 = arith.constant 0 : index
    %306 = vector.load %arg6[%c1_82, %c0_83, %c0_84] : memref<4x1x128xf32, #tpu.memory_space<vmem>>, vector<1x1x128xf32>
    %307 = vector.shape_cast %306 : vector<1x1x128xf32> to vector<1x128xf32>
    %308 = vector.extract_strided_slice %303 {offsets = [0, 0, 0], sizes = [2, 16, 16], strides = [1, 1, 1]} : vector<16x16x16xbf16> to vector<2x16x16xbf16>
    %309 = vector.shape_cast %308 : vector<2x16x16xbf16> to vector<32x16xbf16>
    %310 = vector.extract_strided_slice %305 {offsets = [0, 0], sizes = [16, 128], strides = [1, 1]} : vector<128x128xbf16> to vector<16x128xbf16>
    %cst_85 = arith.constant dense<0.000000e+00> : vector<32x128xf32>
    %311 = tpu.matmul %309, %310, %cst_85 {dimension_numbers = #tpu.dot_dimension_numbers<[1], [0], [0], [1], [0, 0, 1, 1], [], []>} : vector<32x16xbf16>, vector<16x128xbf16>, vector<32x128xf32> -> vector<32x128xf32>
    %312 = vector.broadcast %307 : vector<1x128xf32> to vector<32x128xf32>
    %313 = arith.addf %312, %311 : vector<32x128xf32>
    %314 = vector.extract_strided_slice %303 {offsets = [2, 0, 0], sizes = [2, 16, 16], strides = [1, 1, 1]} : vector<16x16x16xbf16> to vector<2x16x16xbf16>
    %315 = vector.shape_cast %314 : vector<2x16x16xbf16> to vector<32x16xbf16>
    %316 = vector.extract_strided_slice %305 {offsets = [16, 0], sizes = [16, 128], strides = [1, 1]} : vector<128x128xbf16> to vector<16x128xbf16>
    %cst_86 = arith.constant dense<0.000000e+00> : vector<32x128xf32>
    %317 = tpu.matmul %315, %316, %cst_86 {dimension_numbers = #tpu.dot_dimension_numbers<[1], [0], [0], [1], [0, 0, 1, 1], [], []>} : vector<32x16xbf16>, vector<16x128xbf16>, vector<32x128xf32> -> vector<32x128xf32>
    %318 = arith.addf %313, %317 : vector<32x128xf32>
    %319 = vector.extract_strided_slice %303 {offsets = [4, 0, 0], sizes = [2, 16, 16], strides = [1, 1, 1]} : vector<16x16x16xbf16> to vector<2x16x16xbf16>
    %320 = vector.shape_cast %319 : vector<2x16x16xbf16> to vector<32x16xbf16>
    %321 = vector.extract_strided_slice %305 {offsets = [32, 0], sizes = [16, 128], strides = [1, 1]} : vector<128x128xbf16> to vector<16x128xbf16>
    %cst_87 = arith.constant dense<0.000000e+00> : vector<32x128xf32>
    %322 = tpu.matmul %320, %321, %cst_87 {dimension_numbers = #tpu.dot_dimension_numbers<[1], [0], [0], [1], [0, 0, 1, 1], [], []>} : vector<32x16xbf16>, vector<16x128xbf16>, vector<32x128xf32> -> vector<32x128xf32>
    %323 = arith.addf %318, %322 : vector<32x128xf32>
    %324 = vector.extract_strided_slice %303 {offsets = [6, 0, 0], sizes = [2, 16, 16], strides = [1, 1, 1]} : vector<16x16x16xbf16> to vector<2x16x16xbf16>
    %325 = vector.shape_cast %324 : vector<2x16x16xbf16> to vector<32x16xbf16>
    %326 = vector.extract_strided_slice %305 {offsets = [48, 0], sizes = [16, 128], strides = [1, 1]} : vector<128x128xbf16> to vector<16x128xbf16>
    %cst_88 = arith.constant dense<0.000000e+00> : vector<32x128xf32>
    %327 = tpu.matmul %325, %326, %cst_88 {dimension_numbers = #tpu.dot_dimension_numbers<[1], [0], [0], [1], [0, 0, 1, 1], [], []>} : vector<32x16xbf16>, vector<16x128xbf16>, vector<32x128xf32> -> vector<32x128xf32>
    %328 = arith.addf %323, %327 : vector<32x128xf32>
    %329 = vector.extract_strided_slice %303 {offsets = [8, 0, 0], sizes = [2, 16, 16], strides = [1, 1, 1]} : vector<16x16x16xbf16> to vector<2x16x16xbf16>
    %330 = vector.shape_cast %329 : vector<2x16x16xbf16> to vector<32x16xbf16>
    %331 = vector.extract_strided_slice %305 {offsets = [64, 0], sizes = [16, 128], strides = [1, 1]} : vector<128x128xbf16> to vector<16x128xbf16>
    %cst_89 = arith.constant dense<0.000000e+00> : vector<32x128xf32>
    %332 = tpu.matmul %330, %331, %cst_89 {dimension_numbers = #tpu.dot_dimension_numbers<[1], [0], [0], [1], [0, 0, 1, 1], [], []>} : vector<32x16xbf16>, vector<16x128xbf16>, vector<32x128xf32> -> vector<32x128xf32>
    %333 = arith.addf %328, %332 : vector<32x128xf32>
    %334 = vector.extract_strided_slice %303 {offsets = [10, 0, 0], sizes = [2, 16, 16], strides = [1, 1, 1]} : vector<16x16x16xbf16> to vector<2x16x16xbf16>
    %335 = vector.shape_cast %334 : vector<2x16x16xbf16> to vector<32x16xbf16>
    %336 = vector.extract_strided_slice %305 {offsets = [80, 0], sizes = [16, 128], strides = [1, 1]} : vector<128x128xbf16> to vector<16x128xbf16>
    %cst_90 = arith.constant dense<0.000000e+00> : vector<32x128xf32>
    %337 = tpu.matmul %335, %336, %cst_90 {dimension_numbers = #tpu.dot_dimension_numbers<[1], [0], [0], [1], [0, 0, 1, 1], [], []>} : vector<32x16xbf16>, vector<16x128xbf16>, vector<32x128xf32> -> vector<32x128xf32>
    %338 = arith.addf %333, %337 : vector<32x128xf32>
    %339 = vector.extract_strided_slice %303 {offsets = [12, 0, 0], sizes = [2, 16, 16], strides = [1, 1, 1]} : vector<16x16x16xbf16> to vector<2x16x16xbf16>
    %340 = vector.shape_cast %339 : vector<2x16x16xbf16> to vector<32x16xbf16>
    %341 = vector.extract_strided_slice %305 {offsets = [96, 0], sizes = [16, 128], strides = [1, 1]} : vector<128x128xbf16> to vector<16x128xbf16>
    %cst_91 = arith.constant dense<0.000000e+00> : vector<32x128xf32>
    %342 = tpu.matmul %340, %341, %cst_91 {dimension_numbers = #tpu.dot_dimension_numbers<[1], [0], [0], [1], [0, 0, 1, 1], [], []>} : vector<32x16xbf16>, vector<16x128xbf16>, vector<32x128xf32> -> vector<32x128xf32>
    %343 = arith.addf %338, %342 : vector<32x128xf32>
    %344 = vector.extract_strided_slice %303 {offsets = [14, 0, 0], sizes = [2, 16, 16], strides = [1, 1, 1]} : vector<16x16x16xbf16> to vector<2x16x16xbf16>
    %345 = vector.shape_cast %344 : vector<2x16x16xbf16> to vector<32x16xbf16>
    %346 = vector.extract_strided_slice %305 {offsets = [112, 0], sizes = [16, 128], strides = [1, 1]} : vector<128x128xbf16> to vector<16x128xbf16>
    %cst_92 = arith.constant dense<0.000000e+00> : vector<32x128xf32>
    %347 = tpu.matmul %345, %346, %cst_92 {dimension_numbers = #tpu.dot_dimension_numbers<[1], [0], [0], [1], [0, 0, 1, 1], [], []>} : vector<32x16xbf16>, vector<16x128xbf16>, vector<32x128xf32> -> vector<32x128xf32>
    %348 = arith.addf %343, %347 : vector<32x128xf32>
    %349 = arith.addf %203, %348 : vector<32x128xf32>
    %c1_93 = arith.constant 1 : index
    %c0_94 = arith.constant 0 : index
    %c0_95 = arith.constant 0 : index
    %350 = vector.load %arg7[%c1_93, %c0_94, %c0_95] : memref<4x1x128xf32, #tpu.memory_space<vmem>>, vector<1x1x128xf32>
    %351 = vector.shape_cast %350 : vector<1x1x128xf32> to vector<1x128xf32>
    %c1_96 = arith.constant 1 : index
    %c0_97 = arith.constant 0 : index
    %c0_98 = arith.constant 0 : index
    %352 = vector.load %arg8[%c1_96, %c0_97, %c0_98] : memref<4x1x128xf32, #tpu.memory_space<vmem>>, vector<1x1x128xf32>
    %353 = vector.shape_cast %352 : vector<1x1x128xf32> to vector<1x128xf32>
    %cst_99 = arith.constant dense<0.000000e+00> : vector<32xf32>
    %354 = vector.multi_reduction <add>, %349, %cst_99 [1] : vector<32x128xf32> to vector<32xf32>
    %355 = vector.shape_cast %354 : vector<32xf32> to vector<32x1xf32>
    %cst_100 = arith.constant 0.013888889 : f32
    %356 = vector.broadcast %cst_100 : f32 to vector<32x1xf32>
    %357 = arith.mulf %355, %356 : vector<32x1xf32>
    %358 = vector.broadcast %357 : vector<32x1xf32> to vector<32x128xf32>
    %359 = arith.subf %349, %358 : vector<32x128xf32>
    %360 = vector.broadcast %5 : vector<1x128xf32> to vector<32x128xf32>
    %361 = arith.mulf %359, %360 : vector<32x128xf32>
    %362 = arith.mulf %361, %361 : vector<32x128xf32>
    %cst_101 = arith.constant dense<0.000000e+00> : vector<32xf32>
    %363 = vector.multi_reduction <add>, %362, %cst_101 [1] : vector<32x128xf32> to vector<32xf32>
    %364 = vector.shape_cast %363 : vector<32xf32> to vector<32x1xf32>
    %cst_102 = arith.constant 0.013888889 : f32
    %365 = vector.broadcast %cst_102 : f32 to vector<32x1xf32>
    %366 = arith.mulf %364, %365 : vector<32x1xf32>
    %cst_103 = arith.constant 9.99999974E-6 : f32
    %367 = vector.broadcast %cst_103 : f32 to vector<32x1xf32>
    %368 = arith.addf %366, %367 : vector<32x1xf32>
    %369 = math.rsqrt %368 : vector<32x1xf32>
    %370 = vector.broadcast %369 : vector<32x1xf32> to vector<32x128xf32>
    %371 = arith.mulf %361, %370 : vector<32x128xf32>
    %372 = vector.broadcast %351 : vector<1x128xf32> to vector<32x128xf32>
    %373 = arith.mulf %371, %372 : vector<32x128xf32>
    %374 = vector.broadcast %353 : vector<1x128xf32> to vector<32x128xf32>
    %375 = arith.addf %373, %374 : vector<32x128xf32>
    %376 = arith.truncf %375 : vector<32x128xf32> to vector<32x128xbf16>
    %c1_104 = arith.constant 1 : index
    %c0_105 = arith.constant 0 : index
    %c0_106 = arith.constant 0 : index
    %377 = vector.load %arg9[%c1_104, %c0_105, %c0_106] : memref<4x128x288xbf16, #tpu.memory_space<vmem>>, vector<1x128x288xbf16>
    %378 = vector.shape_cast %377 : vector<1x128x288xbf16> to vector<128x288xbf16>
    %cst_107 = arith.constant dense<0.000000e+00> : vector<32x288xf32>
    %379 = tpu.matmul %376, %378, %cst_107 {dimension_numbers = #tpu.dot_dimension_numbers<[1], [0], [0], [1], [0, 0, 1, 1], [], []>} : vector<32x128xbf16>, vector<128x288xbf16>, vector<32x288xf32> -> vector<32x288xf32>
    %c1_108 = arith.constant 1 : index
    %c0_109 = arith.constant 0 : index
    %c0_110 = arith.constant 0 : index
    %380 = vector.load %arg10[%c1_108, %c0_109, %c0_110] : memref<4x1x288xf32, #tpu.memory_space<vmem>>, vector<1x1x288xf32>
    %381 = vector.shape_cast %380 : vector<1x1x288xf32> to vector<1x288xf32>
    %382 = vector.broadcast %381 : vector<1x288xf32> to vector<32x288xf32>
    %383 = arith.addf %379, %382 : vector<32x288xf32>
    %cst_111 = arith.constant 0.000000e+00 : f32
    %384 = vector.broadcast %cst_111 : f32 to vector<32x288xf32>
    %385 = arith.maximumf %383, %384 : vector<32x288xf32>
    %386 = arith.truncf %385 : vector<32x288xf32> to vector<32x288xbf16>
    %c1_112 = arith.constant 1 : index
    %c0_113 = arith.constant 0 : index
    %c0_114 = arith.constant 0 : index
    %387 = vector.load %arg11[%c1_112, %c0_113, %c0_114] : memref<4x288x128xbf16, #tpu.memory_space<vmem>>, vector<1x288x128xbf16>
    %388 = vector.shape_cast %387 : vector<1x288x128xbf16> to vector<288x128xbf16>
    %cst_115 = arith.constant dense<0.000000e+00> : vector<32x128xf32>
    %389 = tpu.matmul %386, %388, %cst_115 {dimension_numbers = #tpu.dot_dimension_numbers<[1], [0], [0], [1], [0, 0, 1, 1], [], []>} : vector<32x288xbf16>, vector<288x128xbf16>, vector<32x128xf32> -> vector<32x128xf32>
    %c1_116 = arith.constant 1 : index
    %c0_117 = arith.constant 0 : index
    %c0_118 = arith.constant 0 : index
    %390 = vector.load %arg12[%c1_116, %c0_117, %c0_118] : memref<4x1x128xf32, #tpu.memory_space<vmem>>, vector<1x1x128xf32>
    %391 = vector.shape_cast %390 : vector<1x1x128xf32> to vector<1x128xf32>
    %392 = vector.broadcast %391 : vector<1x128xf32> to vector<32x128xf32>
    %393 = arith.addf %389, %392 : vector<32x128xf32>
    %394 = arith.addf %349, %393 : vector<32x128xf32>
    %c2 = arith.constant 2 : index
    %c0_119 = arith.constant 0 : index
    %c0_120 = arith.constant 0 : index
    %395 = vector.load %arg2[%c2, %c0_119, %c0_120] : memref<4x1x128xf32, #tpu.memory_space<vmem>>, vector<1x1x128xf32>
    %396 = vector.shape_cast %395 : vector<1x1x128xf32> to vector<1x128xf32>
    %c2_121 = arith.constant 2 : index
    %c0_122 = arith.constant 0 : index
    %c0_123 = arith.constant 0 : index
    %397 = vector.load %arg3[%c2_121, %c0_122, %c0_123] : memref<4x1x128xf32, #tpu.memory_space<vmem>>, vector<1x1x128xf32>
    %398 = vector.shape_cast %397 : vector<1x1x128xf32> to vector<1x128xf32>
    %cst_124 = arith.constant dense<0.000000e+00> : vector<32xf32>
    %399 = vector.multi_reduction <add>, %394, %cst_124 [1] : vector<32x128xf32> to vector<32xf32>
    %400 = vector.shape_cast %399 : vector<32xf32> to vector<32x1xf32>
    %cst_125 = arith.constant 0.013888889 : f32
    %401 = vector.broadcast %cst_125 : f32 to vector<32x1xf32>
    %402 = arith.mulf %400, %401 : vector<32x1xf32>
    %403 = vector.broadcast %402 : vector<32x1xf32> to vector<32x128xf32>
    %404 = arith.subf %394, %403 : vector<32x128xf32>
    %405 = vector.broadcast %5 : vector<1x128xf32> to vector<32x128xf32>
    %406 = arith.mulf %404, %405 : vector<32x128xf32>
    %407 = arith.mulf %406, %406 : vector<32x128xf32>
    %cst_126 = arith.constant dense<0.000000e+00> : vector<32xf32>
    %408 = vector.multi_reduction <add>, %407, %cst_126 [1] : vector<32x128xf32> to vector<32xf32>
    %409 = vector.shape_cast %408 : vector<32xf32> to vector<32x1xf32>
    %cst_127 = arith.constant 0.013888889 : f32
    %410 = vector.broadcast %cst_127 : f32 to vector<32x1xf32>
    %411 = arith.mulf %409, %410 : vector<32x1xf32>
    %cst_128 = arith.constant 9.99999974E-6 : f32
    %412 = vector.broadcast %cst_128 : f32 to vector<32x1xf32>
    %413 = arith.addf %411, %412 : vector<32x1xf32>
    %414 = math.rsqrt %413 : vector<32x1xf32>
    %415 = vector.broadcast %414 : vector<32x1xf32> to vector<32x128xf32>
    %416 = arith.mulf %406, %415 : vector<32x128xf32>
    %417 = vector.broadcast %396 : vector<1x128xf32> to vector<32x128xf32>
    %418 = arith.mulf %416, %417 : vector<32x128xf32>
    %419 = vector.broadcast %398 : vector<1x128xf32> to vector<32x128xf32>
    %420 = arith.addf %418, %419 : vector<32x128xf32>
    %421 = arith.truncf %420 : vector<32x128xf32> to vector<32x128xbf16>
    %c2_129 = arith.constant 2 : index
    %c0_130 = arith.constant 0 : index
    %c0_131 = arith.constant 0 : index
    %422 = vector.load %arg4[%c2_129, %c0_130, %c0_131] : memref<4x128x384xbf16, #tpu.memory_space<vmem>>, vector<1x128x384xbf16>
    %423 = vector.shape_cast %422 : vector<1x128x384xbf16> to vector<128x384xbf16>
    %cst_132 = arith.constant dense<0.000000e+00> : vector<32x384xf32>
    %424 = tpu.matmul %421, %423, %cst_132 {dimension_numbers = #tpu.dot_dimension_numbers<[1], [0], [0], [1], [0, 0, 1, 1], [], []>} : vector<32x128xbf16>, vector<128x384xbf16>, vector<32x384xf32> -> vector<32x384xf32>
    %425 = vector.extract_strided_slice %424 {offsets = [0, 0], sizes = [32, 16], strides = [1, 1]} : vector<32x384xf32> to vector<32x16xf32>
    %426 = vector.shape_cast %425 : vector<32x16xf32> to vector<2x16x16xf32>
    %427 = vector.extract_strided_slice %424 {offsets = [0, 16], sizes = [32, 16], strides = [1, 1]} : vector<32x384xf32> to vector<32x16xf32>
    %428 = vector.shape_cast %427 : vector<32x16xf32> to vector<2x16x16xf32>
    %429 = vector.extract_strided_slice %424 {offsets = [0, 32], sizes = [32, 16], strides = [1, 1]} : vector<32x384xf32> to vector<32x16xf32>
    %430 = vector.shape_cast %429 : vector<32x16xf32> to vector<2x16x16xf32>
    %431 = vector.extract_strided_slice %424 {offsets = [0, 48], sizes = [32, 16], strides = [1, 1]} : vector<32x384xf32> to vector<32x16xf32>
    %432 = vector.shape_cast %431 : vector<32x16xf32> to vector<2x16x16xf32>
    %433 = vector.extract_strided_slice %424 {offsets = [0, 64], sizes = [32, 16], strides = [1, 1]} : vector<32x384xf32> to vector<32x16xf32>
    %434 = vector.shape_cast %433 : vector<32x16xf32> to vector<2x16x16xf32>
    %435 = vector.extract_strided_slice %424 {offsets = [0, 80], sizes = [32, 16], strides = [1, 1]} : vector<32x384xf32> to vector<32x16xf32>
    %436 = vector.shape_cast %435 : vector<32x16xf32> to vector<2x16x16xf32>
    %437 = vector.extract_strided_slice %424 {offsets = [0, 96], sizes = [32, 16], strides = [1, 1]} : vector<32x384xf32> to vector<32x16xf32>
    %438 = vector.shape_cast %437 : vector<32x16xf32> to vector<2x16x16xf32>
    %439 = vector.extract_strided_slice %424 {offsets = [0, 112], sizes = [32, 16], strides = [1, 1]} : vector<32x384xf32> to vector<32x16xf32>
    %440 = vector.shape_cast %439 : vector<32x16xf32> to vector<2x16x16xf32>
    %441 = tpu.concatenate %426, %428, %430, %432, %434, %436, %438, %440 in 0 : vector<2x16x16xf32>, vector<2x16x16xf32>, vector<2x16x16xf32>, vector<2x16x16xf32>, vector<2x16x16xf32>, vector<2x16x16xf32>, vector<2x16x16xf32>, vector<2x16x16xf32> -> vector<16x16x16xf32>
    %442 = arith.truncf %441 : vector<16x16x16xf32> to vector<16x16x16xbf16>
    %443 = vector.extract_strided_slice %424 {offsets = [0, 128], sizes = [32, 16], strides = [1, 1]} : vector<32x384xf32> to vector<32x16xf32>
    %444 = vector.shape_cast %443 : vector<32x16xf32> to vector<2x16x16xf32>
    %445 = vector.extract_strided_slice %424 {offsets = [0, 144], sizes = [32, 16], strides = [1, 1]} : vector<32x384xf32> to vector<32x16xf32>
    %446 = vector.shape_cast %445 : vector<32x16xf32> to vector<2x16x16xf32>
    %447 = vector.extract_strided_slice %424 {offsets = [0, 160], sizes = [32, 16], strides = [1, 1]} : vector<32x384xf32> to vector<32x16xf32>
    %448 = vector.shape_cast %447 : vector<32x16xf32> to vector<2x16x16xf32>
    %449 = vector.extract_strided_slice %424 {offsets = [0, 176], sizes = [32, 16], strides = [1, 1]} : vector<32x384xf32> to vector<32x16xf32>
    %450 = vector.shape_cast %449 : vector<32x16xf32> to vector<2x16x16xf32>
    %451 = vector.extract_strided_slice %424 {offsets = [0, 192], sizes = [32, 16], strides = [1, 1]} : vector<32x384xf32> to vector<32x16xf32>
    %452 = vector.shape_cast %451 : vector<32x16xf32> to vector<2x16x16xf32>
    %453 = vector.extract_strided_slice %424 {offsets = [0, 208], sizes = [32, 16], strides = [1, 1]} : vector<32x384xf32> to vector<32x16xf32>
    %454 = vector.shape_cast %453 : vector<32x16xf32> to vector<2x16x16xf32>
    %455 = vector.extract_strided_slice %424 {offsets = [0, 224], sizes = [32, 16], strides = [1, 1]} : vector<32x384xf32> to vector<32x16xf32>
    %456 = vector.shape_cast %455 : vector<32x16xf32> to vector<2x16x16xf32>
    %457 = vector.extract_strided_slice %424 {offsets = [0, 240], sizes = [32, 16], strides = [1, 1]} : vector<32x384xf32> to vector<32x16xf32>
    %458 = vector.shape_cast %457 : vector<32x16xf32> to vector<2x16x16xf32>
    %459 = tpu.concatenate %444, %446, %448, %450, %452, %454, %456, %458 in 0 : vector<2x16x16xf32>, vector<2x16x16xf32>, vector<2x16x16xf32>, vector<2x16x16xf32>, vector<2x16x16xf32>, vector<2x16x16xf32>, vector<2x16x16xf32>, vector<2x16x16xf32> -> vector<16x16x16xf32>
    %460 = arith.truncf %459 : vector<16x16x16xf32> to vector<16x16x16xbf16>
    %461 = vector.extract_strided_slice %424 {offsets = [0, 256], sizes = [32, 16], strides = [1, 1]} : vector<32x384xf32> to vector<32x16xf32>
    %462 = vector.shape_cast %461 : vector<32x16xf32> to vector<2x16x16xf32>
    %463 = vector.extract_strided_slice %424 {offsets = [0, 272], sizes = [32, 16], strides = [1, 1]} : vector<32x384xf32> to vector<32x16xf32>
    %464 = vector.shape_cast %463 : vector<32x16xf32> to vector<2x16x16xf32>
    %465 = vector.extract_strided_slice %424 {offsets = [0, 288], sizes = [32, 16], strides = [1, 1]} : vector<32x384xf32> to vector<32x16xf32>
    %466 = vector.shape_cast %465 : vector<32x16xf32> to vector<2x16x16xf32>
    %467 = vector.extract_strided_slice %424 {offsets = [0, 304], sizes = [32, 16], strides = [1, 1]} : vector<32x384xf32> to vector<32x16xf32>
    %468 = vector.shape_cast %467 : vector<32x16xf32> to vector<2x16x16xf32>
    %469 = vector.extract_strided_slice %424 {offsets = [0, 320], sizes = [32, 16], strides = [1, 1]} : vector<32x384xf32> to vector<32x16xf32>
    %470 = vector.shape_cast %469 : vector<32x16xf32> to vector<2x16x16xf32>
    %471 = vector.extract_strided_slice %424 {offsets = [0, 336], sizes = [32, 16], strides = [1, 1]} : vector<32x384xf32> to vector<32x16xf32>
    %472 = vector.shape_cast %471 : vector<32x16xf32> to vector<2x16x16xf32>
    %473 = vector.extract_strided_slice %424 {offsets = [0, 352], sizes = [32, 16], strides = [1, 1]} : vector<32x384xf32> to vector<32x16xf32>
    %474 = vector.shape_cast %473 : vector<32x16xf32> to vector<2x16x16xf32>
    %475 = vector.extract_strided_slice %424 {offsets = [0, 368], sizes = [32, 16], strides = [1, 1]} : vector<32x384xf32> to vector<32x16xf32>
    %476 = vector.shape_cast %475 : vector<32x16xf32> to vector<2x16x16xf32>
    %477 = tpu.concatenate %462, %464, %466, %468, %470, %472, %474, %476 in 0 : vector<2x16x16xf32>, vector<2x16x16xf32>, vector<2x16x16xf32>, vector<2x16x16xf32>, vector<2x16x16xf32>, vector<2x16x16xf32>, vector<2x16x16xf32>, vector<2x16x16xf32> -> vector<16x16x16xf32>
    %478 = arith.truncf %477 : vector<16x16x16xf32> to vector<16x16x16xbf16>
    "tpu.trace_start"() <{level = 10 : i32, message = "btd,bsd->bts"}> : () -> ()
    %cst_133 = arith.constant dense<0.000000e+00> : vector<16x16x16xf32>
    %479 = tpu.matmul %442, %460, %cst_133 {dimension_numbers = #tpu.dot_dimension_numbers<[2], [2], [1], [1], [0, 0, 0, 1, 1, 1], [0], [0]>} : vector<16x16x16xbf16>, vector<16x16x16xbf16>, vector<16x16x16xf32> -> vector<16x16x16xf32>
    "tpu.trace_stop"() : () -> ()
    %480 = vector.broadcast %12 : vector<1x16x16xf32> to vector<16x16x16xf32>
    %481 = arith.addf %479, %480 : vector<16x16x16xf32>
    %cst_134 = arith.constant dense<0xFF800000> : vector<16x16xf32>
    %482 = vector.multi_reduction <maximumf>, %481, %cst_134 [2] : vector<16x16x16xf32> to vector<16x16xf32>
    %483 = vector.shape_cast %482 : vector<16x16xf32> to vector<16x16x1xf32>
    %484 = vector.broadcast %483 : vector<16x16x1xf32> to vector<16x16x16xf32>
    %485 = arith.subf %481, %484 : vector<16x16x16xf32>
    %486 = math.exp %485 : vector<16x16x16xf32>
    %cst_135 = arith.constant dense<0.000000e+00> : vector<16x16xf32>
    %487 = vector.multi_reduction <add>, %486, %cst_135 [2] : vector<16x16x16xf32> to vector<16x16xf32>
    %488 = vector.shape_cast %487 : vector<16x16xf32> to vector<16x16x1xf32>
    %489 = tpu.reciprocal %488 {approx = true} : vector<16x16x1xf32> -> vector<16x16x1xf32>
    %490 = vector.broadcast %489 : vector<16x16x1xf32> to vector<16x16x16xf32>
    %491 = arith.mulf %486, %490 : vector<16x16x16xf32>
    %492 = arith.truncf %491 : vector<16x16x16xf32> to vector<16x16x16xbf16>
    "tpu.trace_start"() <{level = 10 : i32, message = "bts,bsd->btd"}> : () -> ()
    %cst_136 = arith.constant dense<0.000000e+00> : vector<16x16x16xf32>
    %493 = tpu.matmul %492, %478, %cst_136 {dimension_numbers = #tpu.dot_dimension_numbers<[2], [1], [1], [2], [0, 0, 0, 1, 1, 2], [0], [0]>} : vector<16x16x16xbf16>, vector<16x16x16xbf16>, vector<16x16x16xf32> -> vector<16x16x16xf32>
    "tpu.trace_stop"() : () -> ()
    %494 = arith.truncf %493 : vector<16x16x16xf32> to vector<16x16x16xbf16>
    %c2_137 = arith.constant 2 : index
    %c0_138 = arith.constant 0 : index
    %c0_139 = arith.constant 0 : index
    %495 = vector.load %arg5[%c2_137, %c0_138, %c0_139] : memref<4x128x128xbf16, #tpu.memory_space<vmem>>, vector<1x128x128xbf16>
    %496 = vector.shape_cast %495 : vector<1x128x128xbf16> to vector<128x128xbf16>
    %c2_140 = arith.constant 2 : index
    %c0_141 = arith.constant 0 : index
    %c0_142 = arith.constant 0 : index
    %497 = vector.load %arg6[%c2_140, %c0_141, %c0_142] : memref<4x1x128xf32, #tpu.memory_space<vmem>>, vector<1x1x128xf32>
    %498 = vector.shape_cast %497 : vector<1x1x128xf32> to vector<1x128xf32>
    %499 = vector.extract_strided_slice %494 {offsets = [0, 0, 0], sizes = [2, 16, 16], strides = [1, 1, 1]} : vector<16x16x16xbf16> to vector<2x16x16xbf16>
    %500 = vector.shape_cast %499 : vector<2x16x16xbf16> to vector<32x16xbf16>
    %501 = vector.extract_strided_slice %496 {offsets = [0, 0], sizes = [16, 128], strides = [1, 1]} : vector<128x128xbf16> to vector<16x128xbf16>
    %cst_143 = arith.constant dense<0.000000e+00> : vector<32x128xf32>
    %502 = tpu.matmul %500, %501, %cst_143 {dimension_numbers = #tpu.dot_dimension_numbers<[1], [0], [0], [1], [0, 0, 1, 1], [], []>} : vector<32x16xbf16>, vector<16x128xbf16>, vector<32x128xf32> -> vector<32x128xf32>
    %503 = vector.broadcast %498 : vector<1x128xf32> to vector<32x128xf32>
    %504 = arith.addf %503, %502 : vector<32x128xf32>
    %505 = vector.extract_strided_slice %494 {offsets = [2, 0, 0], sizes = [2, 16, 16], strides = [1, 1, 1]} : vector<16x16x16xbf16> to vector<2x16x16xbf16>
    %506 = vector.shape_cast %505 : vector<2x16x16xbf16> to vector<32x16xbf16>
    %507 = vector.extract_strided_slice %496 {offsets = [16, 0], sizes = [16, 128], strides = [1, 1]} : vector<128x128xbf16> to vector<16x128xbf16>
    %cst_144 = arith.constant dense<0.000000e+00> : vector<32x128xf32>
    %508 = tpu.matmul %506, %507, %cst_144 {dimension_numbers = #tpu.dot_dimension_numbers<[1], [0], [0], [1], [0, 0, 1, 1], [], []>} : vector<32x16xbf16>, vector<16x128xbf16>, vector<32x128xf32> -> vector<32x128xf32>
    %509 = arith.addf %504, %508 : vector<32x128xf32>
    %510 = vector.extract_strided_slice %494 {offsets = [4, 0, 0], sizes = [2, 16, 16], strides = [1, 1, 1]} : vector<16x16x16xbf16> to vector<2x16x16xbf16>
    %511 = vector.shape_cast %510 : vector<2x16x16xbf16> to vector<32x16xbf16>
    %512 = vector.extract_strided_slice %496 {offsets = [32, 0], sizes = [16, 128], strides = [1, 1]} : vector<128x128xbf16> to vector<16x128xbf16>
    %cst_145 = arith.constant dense<0.000000e+00> : vector<32x128xf32>
    %513 = tpu.matmul %511, %512, %cst_145 {dimension_numbers = #tpu.dot_dimension_numbers<[1], [0], [0], [1], [0, 0, 1, 1], [], []>} : vector<32x16xbf16>, vector<16x128xbf16>, vector<32x128xf32> -> vector<32x128xf32>
    %514 = arith.addf %509, %513 : vector<32x128xf32>
    %515 = vector.extract_strided_slice %494 {offsets = [6, 0, 0], sizes = [2, 16, 16], strides = [1, 1, 1]} : vector<16x16x16xbf16> to vector<2x16x16xbf16>
    %516 = vector.shape_cast %515 : vector<2x16x16xbf16> to vector<32x16xbf16>
    %517 = vector.extract_strided_slice %496 {offsets = [48, 0], sizes = [16, 128], strides = [1, 1]} : vector<128x128xbf16> to vector<16x128xbf16>
    %cst_146 = arith.constant dense<0.000000e+00> : vector<32x128xf32>
    %518 = tpu.matmul %516, %517, %cst_146 {dimension_numbers = #tpu.dot_dimension_numbers<[1], [0], [0], [1], [0, 0, 1, 1], [], []>} : vector<32x16xbf16>, vector<16x128xbf16>, vector<32x128xf32> -> vector<32x128xf32>
    %519 = arith.addf %514, %518 : vector<32x128xf32>
    %520 = vector.extract_strided_slice %494 {offsets = [8, 0, 0], sizes = [2, 16, 16], strides = [1, 1, 1]} : vector<16x16x16xbf16> to vector<2x16x16xbf16>
    %521 = vector.shape_cast %520 : vector<2x16x16xbf16> to vector<32x16xbf16>
    %522 = vector.extract_strided_slice %496 {offsets = [64, 0], sizes = [16, 128], strides = [1, 1]} : vector<128x128xbf16> to vector<16x128xbf16>
    %cst_147 = arith.constant dense<0.000000e+00> : vector<32x128xf32>
    %523 = tpu.matmul %521, %522, %cst_147 {dimension_numbers = #tpu.dot_dimension_numbers<[1], [0], [0], [1], [0, 0, 1, 1], [], []>} : vector<32x16xbf16>, vector<16x128xbf16>, vector<32x128xf32> -> vector<32x128xf32>
    %524 = arith.addf %519, %523 : vector<32x128xf32>
    %525 = vector.extract_strided_slice %494 {offsets = [10, 0, 0], sizes = [2, 16, 16], strides = [1, 1, 1]} : vector<16x16x16xbf16> to vector<2x16x16xbf16>
    %526 = vector.shape_cast %525 : vector<2x16x16xbf16> to vector<32x16xbf16>
    %527 = vector.extract_strided_slice %496 {offsets = [80, 0], sizes = [16, 128], strides = [1, 1]} : vector<128x128xbf16> to vector<16x128xbf16>
    %cst_148 = arith.constant dense<0.000000e+00> : vector<32x128xf32>
    %528 = tpu.matmul %526, %527, %cst_148 {dimension_numbers = #tpu.dot_dimension_numbers<[1], [0], [0], [1], [0, 0, 1, 1], [], []>} : vector<32x16xbf16>, vector<16x128xbf16>, vector<32x128xf32> -> vector<32x128xf32>
    %529 = arith.addf %524, %528 : vector<32x128xf32>
    %530 = vector.extract_strided_slice %494 {offsets = [12, 0, 0], sizes = [2, 16, 16], strides = [1, 1, 1]} : vector<16x16x16xbf16> to vector<2x16x16xbf16>
    %531 = vector.shape_cast %530 : vector<2x16x16xbf16> to vector<32x16xbf16>
    %532 = vector.extract_strided_slice %496 {offsets = [96, 0], sizes = [16, 128], strides = [1, 1]} : vector<128x128xbf16> to vector<16x128xbf16>
    %cst_149 = arith.constant dense<0.000000e+00> : vector<32x128xf32>
    %533 = tpu.matmul %531, %532, %cst_149 {dimension_numbers = #tpu.dot_dimension_numbers<[1], [0], [0], [1], [0, 0, 1, 1], [], []>} : vector<32x16xbf16>, vector<16x128xbf16>, vector<32x128xf32> -> vector<32x128xf32>
    %534 = arith.addf %529, %533 : vector<32x128xf32>
    %535 = vector.extract_strided_slice %494 {offsets = [14, 0, 0], sizes = [2, 16, 16], strides = [1, 1, 1]} : vector<16x16x16xbf16> to vector<2x16x16xbf16>
    %536 = vector.shape_cast %535 : vector<2x16x16xbf16> to vector<32x16xbf16>
    %537 = vector.extract_strided_slice %496 {offsets = [112, 0], sizes = [16, 128], strides = [1, 1]} : vector<128x128xbf16> to vector<16x128xbf16>
    %cst_150 = arith.constant dense<0.000000e+00> : vector<32x128xf32>
    %538 = tpu.matmul %536, %537, %cst_150 {dimension_numbers = #tpu.dot_dimension_numbers<[1], [0], [0], [1], [0, 0, 1, 1], [], []>} : vector<32x16xbf16>, vector<16x128xbf16>, vector<32x128xf32> -> vector<32x128xf32>
    %539 = arith.addf %534, %538 : vector<32x128xf32>
    %540 = arith.addf %394, %539 : vector<32x128xf32>
    %c2_151 = arith.constant 2 : index
    %c0_152 = arith.constant 0 : index
    %c0_153 = arith.constant 0 : index
    %541 = vector.load %arg7[%c2_151, %c0_152, %c0_153] : memref<4x1x128xf32, #tpu.memory_space<vmem>>, vector<1x1x128xf32>
    %542 = vector.shape_cast %541 : vector<1x1x128xf32> to vector<1x128xf32>
    %c2_154 = arith.constant 2 : index
    %c0_155 = arith.constant 0 : index
    %c0_156 = arith.constant 0 : index
    %543 = vector.load %arg8[%c2_154, %c0_155, %c0_156] : memref<4x1x128xf32, #tpu.memory_space<vmem>>, vector<1x1x128xf32>
    %544 = vector.shape_cast %543 : vector<1x1x128xf32> to vector<1x128xf32>
    %cst_157 = arith.constant dense<0.000000e+00> : vector<32xf32>
    %545 = vector.multi_reduction <add>, %540, %cst_157 [1] : vector<32x128xf32> to vector<32xf32>
    %546 = vector.shape_cast %545 : vector<32xf32> to vector<32x1xf32>
    %cst_158 = arith.constant 0.013888889 : f32
    %547 = vector.broadcast %cst_158 : f32 to vector<32x1xf32>
    %548 = arith.mulf %546, %547 : vector<32x1xf32>
    %549 = vector.broadcast %548 : vector<32x1xf32> to vector<32x128xf32>
    %550 = arith.subf %540, %549 : vector<32x128xf32>
    %551 = vector.broadcast %5 : vector<1x128xf32> to vector<32x128xf32>
    %552 = arith.mulf %550, %551 : vector<32x128xf32>
    %553 = arith.mulf %552, %552 : vector<32x128xf32>
    %cst_159 = arith.constant dense<0.000000e+00> : vector<32xf32>
    %554 = vector.multi_reduction <add>, %553, %cst_159 [1] : vector<32x128xf32> to vector<32xf32>
    %555 = vector.shape_cast %554 : vector<32xf32> to vector<32x1xf32>
    %cst_160 = arith.constant 0.013888889 : f32
    %556 = vector.broadcast %cst_160 : f32 to vector<32x1xf32>
    %557 = arith.mulf %555, %556 : vector<32x1xf32>
    %cst_161 = arith.constant 9.99999974E-6 : f32
    %558 = vector.broadcast %cst_161 : f32 to vector<32x1xf32>
    %559 = arith.addf %557, %558 : vector<32x1xf32>
    %560 = math.rsqrt %559 : vector<32x1xf32>
    %561 = vector.broadcast %560 : vector<32x1xf32> to vector<32x128xf32>
    %562 = arith.mulf %552, %561 : vector<32x128xf32>
    %563 = vector.broadcast %542 : vector<1x128xf32> to vector<32x128xf32>
    %564 = arith.mulf %562, %563 : vector<32x128xf32>
    %565 = vector.broadcast %544 : vector<1x128xf32> to vector<32x128xf32>
    %566 = arith.addf %564, %565 : vector<32x128xf32>
    %567 = arith.truncf %566 : vector<32x128xf32> to vector<32x128xbf16>
    %c2_162 = arith.constant 2 : index
    %c0_163 = arith.constant 0 : index
    %c0_164 = arith.constant 0 : index
    %568 = vector.load %arg9[%c2_162, %c0_163, %c0_164] : memref<4x128x288xbf16, #tpu.memory_space<vmem>>, vector<1x128x288xbf16>
    %569 = vector.shape_cast %568 : vector<1x128x288xbf16> to vector<128x288xbf16>
    %cst_165 = arith.constant dense<0.000000e+00> : vector<32x288xf32>
    %570 = tpu.matmul %567, %569, %cst_165 {dimension_numbers = #tpu.dot_dimension_numbers<[1], [0], [0], [1], [0, 0, 1, 1], [], []>} : vector<32x128xbf16>, vector<128x288xbf16>, vector<32x288xf32> -> vector<32x288xf32>
    %c2_166 = arith.constant 2 : index
    %c0_167 = arith.constant 0 : index
    %c0_168 = arith.constant 0 : index
    %571 = vector.load %arg10[%c2_166, %c0_167, %c0_168] : memref<4x1x288xf32, #tpu.memory_space<vmem>>, vector<1x1x288xf32>
    %572 = vector.shape_cast %571 : vector<1x1x288xf32> to vector<1x288xf32>
    %573 = vector.broadcast %572 : vector<1x288xf32> to vector<32x288xf32>
    %574 = arith.addf %570, %573 : vector<32x288xf32>
    %cst_169 = arith.constant 0.000000e+00 : f32
    %575 = vector.broadcast %cst_169 : f32 to vector<32x288xf32>
    %576 = arith.maximumf %574, %575 : vector<32x288xf32>
    %577 = arith.truncf %576 : vector<32x288xf32> to vector<32x288xbf16>
    %c2_170 = arith.constant 2 : index
    %c0_171 = arith.constant 0 : index
    %c0_172 = arith.constant 0 : index
    %578 = vector.load %arg11[%c2_170, %c0_171, %c0_172] : memref<4x288x128xbf16, #tpu.memory_space<vmem>>, vector<1x288x128xbf16>
    %579 = vector.shape_cast %578 : vector<1x288x128xbf16> to vector<288x128xbf16>
    %cst_173 = arith.constant dense<0.000000e+00> : vector<32x128xf32>
    %580 = tpu.matmul %577, %579, %cst_173 {dimension_numbers = #tpu.dot_dimension_numbers<[1], [0], [0], [1], [0, 0, 1, 1], [], []>} : vector<32x288xbf16>, vector<288x128xbf16>, vector<32x128xf32> -> vector<32x128xf32>
    %c2_174 = arith.constant 2 : index
    %c0_175 = arith.constant 0 : index
    %c0_176 = arith.constant 0 : index
    %581 = vector.load %arg12[%c2_174, %c0_175, %c0_176] : memref<4x1x128xf32, #tpu.memory_space<vmem>>, vector<1x1x128xf32>
    %582 = vector.shape_cast %581 : vector<1x1x128xf32> to vector<1x128xf32>
    %583 = vector.broadcast %582 : vector<1x128xf32> to vector<32x128xf32>
    %584 = arith.addf %580, %583 : vector<32x128xf32>
    %585 = arith.addf %540, %584 : vector<32x128xf32>
    %c3 = arith.constant 3 : index
    %c0_177 = arith.constant 0 : index
    %c0_178 = arith.constant 0 : index
    %586 = vector.load %arg2[%c3, %c0_177, %c0_178] : memref<4x1x128xf32, #tpu.memory_space<vmem>>, vector<1x1x128xf32>
    %587 = vector.shape_cast %586 : vector<1x1x128xf32> to vector<1x128xf32>
    %c3_179 = arith.constant 3 : index
    %c0_180 = arith.constant 0 : index
    %c0_181 = arith.constant 0 : index
    %588 = vector.load %arg3[%c3_179, %c0_180, %c0_181] : memref<4x1x128xf32, #tpu.memory_space<vmem>>, vector<1x1x128xf32>
    %589 = vector.shape_cast %588 : vector<1x1x128xf32> to vector<1x128xf32>
    %cst_182 = arith.constant dense<0.000000e+00> : vector<32xf32>
    %590 = vector.multi_reduction <add>, %585, %cst_182 [1] : vector<32x128xf32> to vector<32xf32>
    %591 = vector.shape_cast %590 : vector<32xf32> to vector<32x1xf32>
    %cst_183 = arith.constant 0.013888889 : f32
    %592 = vector.broadcast %cst_183 : f32 to vector<32x1xf32>
    %593 = arith.mulf %591, %592 : vector<32x1xf32>
    %594 = vector.broadcast %593 : vector<32x1xf32> to vector<32x128xf32>
    %595 = arith.subf %585, %594 : vector<32x128xf32>
    %596 = vector.broadcast %5 : vector<1x128xf32> to vector<32x128xf32>
    %597 = arith.mulf %595, %596 : vector<32x128xf32>
    %598 = arith.mulf %597, %597 : vector<32x128xf32>
    %cst_184 = arith.constant dense<0.000000e+00> : vector<32xf32>
    %599 = vector.multi_reduction <add>, %598, %cst_184 [1] : vector<32x128xf32> to vector<32xf32>
    %600 = vector.shape_cast %599 : vector<32xf32> to vector<32x1xf32>
    %cst_185 = arith.constant 0.013888889 : f32
    %601 = vector.broadcast %cst_185 : f32 to vector<32x1xf32>
    %602 = arith.mulf %600, %601 : vector<32x1xf32>
    %cst_186 = arith.constant 9.99999974E-6 : f32
    %603 = vector.broadcast %cst_186 : f32 to vector<32x1xf32>
    %604 = arith.addf %602, %603 : vector<32x1xf32>
    %605 = math.rsqrt %604 : vector<32x1xf32>
    %606 = vector.broadcast %605 : vector<32x1xf32> to vector<32x128xf32>
    %607 = arith.mulf %597, %606 : vector<32x128xf32>
    %608 = vector.broadcast %587 : vector<1x128xf32> to vector<32x128xf32>
    %609 = arith.mulf %607, %608 : vector<32x128xf32>
    %610 = vector.broadcast %589 : vector<1x128xf32> to vector<32x128xf32>
    %611 = arith.addf %609, %610 : vector<32x128xf32>
    %612 = arith.truncf %611 : vector<32x128xf32> to vector<32x128xbf16>
    %c3_187 = arith.constant 3 : index
    %c0_188 = arith.constant 0 : index
    %c0_189 = arith.constant 0 : index
    %613 = vector.load %arg4[%c3_187, %c0_188, %c0_189] : memref<4x128x384xbf16, #tpu.memory_space<vmem>>, vector<1x128x384xbf16>
    %614 = vector.shape_cast %613 : vector<1x128x384xbf16> to vector<128x384xbf16>
    %cst_190 = arith.constant dense<0.000000e+00> : vector<32x384xf32>
    %615 = tpu.matmul %612, %614, %cst_190 {dimension_numbers = #tpu.dot_dimension_numbers<[1], [0], [0], [1], [0, 0, 1, 1], [], []>} : vector<32x128xbf16>, vector<128x384xbf16>, vector<32x384xf32> -> vector<32x384xf32>
    %616 = vector.extract_strided_slice %615 {offsets = [0, 0], sizes = [32, 16], strides = [1, 1]} : vector<32x384xf32> to vector<32x16xf32>
    %617 = vector.shape_cast %616 : vector<32x16xf32> to vector<2x16x16xf32>
    %618 = vector.extract_strided_slice %615 {offsets = [0, 16], sizes = [32, 16], strides = [1, 1]} : vector<32x384xf32> to vector<32x16xf32>
    %619 = vector.shape_cast %618 : vector<32x16xf32> to vector<2x16x16xf32>
    %620 = vector.extract_strided_slice %615 {offsets = [0, 32], sizes = [32, 16], strides = [1, 1]} : vector<32x384xf32> to vector<32x16xf32>
    %621 = vector.shape_cast %620 : vector<32x16xf32> to vector<2x16x16xf32>
    %622 = vector.extract_strided_slice %615 {offsets = [0, 48], sizes = [32, 16], strides = [1, 1]} : vector<32x384xf32> to vector<32x16xf32>
    %623 = vector.shape_cast %622 : vector<32x16xf32> to vector<2x16x16xf32>
    %624 = vector.extract_strided_slice %615 {offsets = [0, 64], sizes = [32, 16], strides = [1, 1]} : vector<32x384xf32> to vector<32x16xf32>
    %625 = vector.shape_cast %624 : vector<32x16xf32> to vector<2x16x16xf32>
    %626 = vector.extract_strided_slice %615 {offsets = [0, 80], sizes = [32, 16], strides = [1, 1]} : vector<32x384xf32> to vector<32x16xf32>
    %627 = vector.shape_cast %626 : vector<32x16xf32> to vector<2x16x16xf32>
    %628 = vector.extract_strided_slice %615 {offsets = [0, 96], sizes = [32, 16], strides = [1, 1]} : vector<32x384xf32> to vector<32x16xf32>
    %629 = vector.shape_cast %628 : vector<32x16xf32> to vector<2x16x16xf32>
    %630 = vector.extract_strided_slice %615 {offsets = [0, 112], sizes = [32, 16], strides = [1, 1]} : vector<32x384xf32> to vector<32x16xf32>
    %631 = vector.shape_cast %630 : vector<32x16xf32> to vector<2x16x16xf32>
    %632 = tpu.concatenate %617, %619, %621, %623, %625, %627, %629, %631 in 0 : vector<2x16x16xf32>, vector<2x16x16xf32>, vector<2x16x16xf32>, vector<2x16x16xf32>, vector<2x16x16xf32>, vector<2x16x16xf32>, vector<2x16x16xf32>, vector<2x16x16xf32> -> vector<16x16x16xf32>
    %633 = arith.truncf %632 : vector<16x16x16xf32> to vector<16x16x16xbf16>
    %634 = vector.extract_strided_slice %615 {offsets = [0, 128], sizes = [32, 16], strides = [1, 1]} : vector<32x384xf32> to vector<32x16xf32>
    %635 = vector.shape_cast %634 : vector<32x16xf32> to vector<2x16x16xf32>
    %636 = vector.extract_strided_slice %615 {offsets = [0, 144], sizes = [32, 16], strides = [1, 1]} : vector<32x384xf32> to vector<32x16xf32>
    %637 = vector.shape_cast %636 : vector<32x16xf32> to vector<2x16x16xf32>
    %638 = vector.extract_strided_slice %615 {offsets = [0, 160], sizes = [32, 16], strides = [1, 1]} : vector<32x384xf32> to vector<32x16xf32>
    %639 = vector.shape_cast %638 : vector<32x16xf32> to vector<2x16x16xf32>
    %640 = vector.extract_strided_slice %615 {offsets = [0, 176], sizes = [32, 16], strides = [1, 1]} : vector<32x384xf32> to vector<32x16xf32>
    %641 = vector.shape_cast %640 : vector<32x16xf32> to vector<2x16x16xf32>
    %642 = vector.extract_strided_slice %615 {offsets = [0, 192], sizes = [32, 16], strides = [1, 1]} : vector<32x384xf32> to vector<32x16xf32>
    %643 = vector.shape_cast %642 : vector<32x16xf32> to vector<2x16x16xf32>
    %644 = vector.extract_strided_slice %615 {offsets = [0, 208], sizes = [32, 16], strides = [1, 1]} : vector<32x384xf32> to vector<32x16xf32>
    %645 = vector.shape_cast %644 : vector<32x16xf32> to vector<2x16x16xf32>
    %646 = vector.extract_strided_slice %615 {offsets = [0, 224], sizes = [32, 16], strides = [1, 1]} : vector<32x384xf32> to vector<32x16xf32>
    %647 = vector.shape_cast %646 : vector<32x16xf32> to vector<2x16x16xf32>
    %648 = vector.extract_strided_slice %615 {offsets = [0, 240], sizes = [32, 16], strides = [1, 1]} : vector<32x384xf32> to vector<32x16xf32>
    %649 = vector.shape_cast %648 : vector<32x16xf32> to vector<2x16x16xf32>
    %650 = tpu.concatenate %635, %637, %639, %641, %643, %645, %647, %649 in 0 : vector<2x16x16xf32>, vector<2x16x16xf32>, vector<2x16x16xf32>, vector<2x16x16xf32>, vector<2x16x16xf32>, vector<2x16x16xf32>, vector<2x16x16xf32>, vector<2x16x16xf32> -> vector<16x16x16xf32>
    %651 = arith.truncf %650 : vector<16x16x16xf32> to vector<16x16x16xbf16>
    %652 = vector.extract_strided_slice %615 {offsets = [0, 256], sizes = [32, 16], strides = [1, 1]} : vector<32x384xf32> to vector<32x16xf32>
    %653 = vector.shape_cast %652 : vector<32x16xf32> to vector<2x16x16xf32>
    %654 = vector.extract_strided_slice %615 {offsets = [0, 272], sizes = [32, 16], strides = [1, 1]} : vector<32x384xf32> to vector<32x16xf32>
    %655 = vector.shape_cast %654 : vector<32x16xf32> to vector<2x16x16xf32>
    %656 = vector.extract_strided_slice %615 {offsets = [0, 288], sizes = [32, 16], strides = [1, 1]} : vector<32x384xf32> to vector<32x16xf32>
    %657 = vector.shape_cast %656 : vector<32x16xf32> to vector<2x16x16xf32>
    %658 = vector.extract_strided_slice %615 {offsets = [0, 304], sizes = [32, 16], strides = [1, 1]} : vector<32x384xf32> to vector<32x16xf32>
    %659 = vector.shape_cast %658 : vector<32x16xf32> to vector<2x16x16xf32>
    %660 = vector.extract_strided_slice %615 {offsets = [0, 320], sizes = [32, 16], strides = [1, 1]} : vector<32x384xf32> to vector<32x16xf32>
    %661 = vector.shape_cast %660 : vector<32x16xf32> to vector<2x16x16xf32>
    %662 = vector.extract_strided_slice %615 {offsets = [0, 336], sizes = [32, 16], strides = [1, 1]} : vector<32x384xf32> to vector<32x16xf32>
    %663 = vector.shape_cast %662 : vector<32x16xf32> to vector<2x16x16xf32>
    %664 = vector.extract_strided_slice %615 {offsets = [0, 352], sizes = [32, 16], strides = [1, 1]} : vector<32x384xf32> to vector<32x16xf32>
    %665 = vector.shape_cast %664 : vector<32x16xf32> to vector<2x16x16xf32>
    %666 = vector.extract_strided_slice %615 {offsets = [0, 368], sizes = [32, 16], strides = [1, 1]} : vector<32x384xf32> to vector<32x16xf32>
    %667 = vector.shape_cast %666 : vector<32x16xf32> to vector<2x16x16xf32>
    %668 = tpu.concatenate %653, %655, %657, %659, %661, %663, %665, %667 in 0 : vector<2x16x16xf32>, vector<2x16x16xf32>, vector<2x16x16xf32>, vector<2x16x16xf32>, vector<2x16x16xf32>, vector<2x16x16xf32>, vector<2x16x16xf32>, vector<2x16x16xf32> -> vector<16x16x16xf32>
    %669 = arith.truncf %668 : vector<16x16x16xf32> to vector<16x16x16xbf16>
    "tpu.trace_start"() <{level = 10 : i32, message = "btd,bsd->bts"}> : () -> ()
    %cst_191 = arith.constant dense<0.000000e+00> : vector<16x16x16xf32>
    %670 = tpu.matmul %633, %651, %cst_191 {dimension_numbers = #tpu.dot_dimension_numbers<[2], [2], [1], [1], [0, 0, 0, 1, 1, 1], [0], [0]>} : vector<16x16x16xbf16>, vector<16x16x16xbf16>, vector<16x16x16xf32> -> vector<16x16x16xf32>
    "tpu.trace_stop"() : () -> ()
    %671 = vector.broadcast %12 : vector<1x16x16xf32> to vector<16x16x16xf32>
    %672 = arith.addf %670, %671 : vector<16x16x16xf32>
    %cst_192 = arith.constant dense<0xFF800000> : vector<16x16xf32>
    %673 = vector.multi_reduction <maximumf>, %672, %cst_192 [2] : vector<16x16x16xf32> to vector<16x16xf32>
    %674 = vector.shape_cast %673 : vector<16x16xf32> to vector<16x16x1xf32>
    %675 = vector.broadcast %674 : vector<16x16x1xf32> to vector<16x16x16xf32>
    %676 = arith.subf %672, %675 : vector<16x16x16xf32>
    %677 = math.exp %676 : vector<16x16x16xf32>
    %cst_193 = arith.constant dense<0.000000e+00> : vector<16x16xf32>
    %678 = vector.multi_reduction <add>, %677, %cst_193 [2] : vector<16x16x16xf32> to vector<16x16xf32>
    %679 = vector.shape_cast %678 : vector<16x16xf32> to vector<16x16x1xf32>
    %680 = tpu.reciprocal %679 {approx = true} : vector<16x16x1xf32> -> vector<16x16x1xf32>
    %681 = vector.broadcast %680 : vector<16x16x1xf32> to vector<16x16x16xf32>
    %682 = arith.mulf %677, %681 : vector<16x16x16xf32>
    %683 = arith.truncf %682 : vector<16x16x16xf32> to vector<16x16x16xbf16>
    "tpu.trace_start"() <{level = 10 : i32, message = "bts,bsd->btd"}> : () -> ()
    %cst_194 = arith.constant dense<0.000000e+00> : vector<16x16x16xf32>
    %684 = tpu.matmul %683, %669, %cst_194 {dimension_numbers = #tpu.dot_dimension_numbers<[2], [1], [1], [2], [0, 0, 0, 1, 1, 2], [0], [0]>} : vector<16x16x16xbf16>, vector<16x16x16xbf16>, vector<16x16x16xf32> -> vector<16x16x16xf32>
    "tpu.trace_stop"() : () -> ()
    %685 = arith.truncf %684 : vector<16x16x16xf32> to vector<16x16x16xbf16>
    %c3_195 = arith.constant 3 : index
    %c0_196 = arith.constant 0 : index
    %c0_197 = arith.constant 0 : index
    %686 = vector.load %arg5[%c3_195, %c0_196, %c0_197] : memref<4x128x128xbf16, #tpu.memory_space<vmem>>, vector<1x128x128xbf16>
    %687 = vector.shape_cast %686 : vector<1x128x128xbf16> to vector<128x128xbf16>
    %c3_198 = arith.constant 3 : index
    %c0_199 = arith.constant 0 : index
    %c0_200 = arith.constant 0 : index
    %688 = vector.load %arg6[%c3_198, %c0_199, %c0_200] : memref<4x1x128xf32, #tpu.memory_space<vmem>>, vector<1x1x128xf32>
    %689 = vector.shape_cast %688 : vector<1x1x128xf32> to vector<1x128xf32>
    %690 = vector.extract_strided_slice %685 {offsets = [0, 0, 0], sizes = [2, 16, 16], strides = [1, 1, 1]} : vector<16x16x16xbf16> to vector<2x16x16xbf16>
    %691 = vector.shape_cast %690 : vector<2x16x16xbf16> to vector<32x16xbf16>
    %692 = vector.extract_strided_slice %687 {offsets = [0, 0], sizes = [16, 128], strides = [1, 1]} : vector<128x128xbf16> to vector<16x128xbf16>
    %cst_201 = arith.constant dense<0.000000e+00> : vector<32x128xf32>
    %693 = tpu.matmul %691, %692, %cst_201 {dimension_numbers = #tpu.dot_dimension_numbers<[1], [0], [0], [1], [0, 0, 1, 1], [], []>} : vector<32x16xbf16>, vector<16x128xbf16>, vector<32x128xf32> -> vector<32x128xf32>
    %694 = vector.broadcast %689 : vector<1x128xf32> to vector<32x128xf32>
    %695 = arith.addf %694, %693 : vector<32x128xf32>
    %696 = vector.extract_strided_slice %685 {offsets = [2, 0, 0], sizes = [2, 16, 16], strides = [1, 1, 1]} : vector<16x16x16xbf16> to vector<2x16x16xbf16>
    %697 = vector.shape_cast %696 : vector<2x16x16xbf16> to vector<32x16xbf16>
    %698 = vector.extract_strided_slice %687 {offsets = [16, 0], sizes = [16, 128], strides = [1, 1]} : vector<128x128xbf16> to vector<16x128xbf16>
    %cst_202 = arith.constant dense<0.000000e+00> : vector<32x128xf32>
    %699 = tpu.matmul %697, %698, %cst_202 {dimension_numbers = #tpu.dot_dimension_numbers<[1], [0], [0], [1], [0, 0, 1, 1], [], []>} : vector<32x16xbf16>, vector<16x128xbf16>, vector<32x128xf32> -> vector<32x128xf32>
    %700 = arith.addf %695, %699 : vector<32x128xf32>
    %701 = vector.extract_strided_slice %685 {offsets = [4, 0, 0], sizes = [2, 16, 16], strides = [1, 1, 1]} : vector<16x16x16xbf16> to vector<2x16x16xbf16>
    %702 = vector.shape_cast %701 : vector<2x16x16xbf16> to vector<32x16xbf16>
    %703 = vector.extract_strided_slice %687 {offsets = [32, 0], sizes = [16, 128], strides = [1, 1]} : vector<128x128xbf16> to vector<16x128xbf16>
    %cst_203 = arith.constant dense<0.000000e+00> : vector<32x128xf32>
    %704 = tpu.matmul %702, %703, %cst_203 {dimension_numbers = #tpu.dot_dimension_numbers<[1], [0], [0], [1], [0, 0, 1, 1], [], []>} : vector<32x16xbf16>, vector<16x128xbf16>, vector<32x128xf32> -> vector<32x128xf32>
    %705 = arith.addf %700, %704 : vector<32x128xf32>
    %706 = vector.extract_strided_slice %685 {offsets = [6, 0, 0], sizes = [2, 16, 16], strides = [1, 1, 1]} : vector<16x16x16xbf16> to vector<2x16x16xbf16>
    %707 = vector.shape_cast %706 : vector<2x16x16xbf16> to vector<32x16xbf16>
    %708 = vector.extract_strided_slice %687 {offsets = [48, 0], sizes = [16, 128], strides = [1, 1]} : vector<128x128xbf16> to vector<16x128xbf16>
    %cst_204 = arith.constant dense<0.000000e+00> : vector<32x128xf32>
    %709 = tpu.matmul %707, %708, %cst_204 {dimension_numbers = #tpu.dot_dimension_numbers<[1], [0], [0], [1], [0, 0, 1, 1], [], []>} : vector<32x16xbf16>, vector<16x128xbf16>, vector<32x128xf32> -> vector<32x128xf32>
    %710 = arith.addf %705, %709 : vector<32x128xf32>
    %711 = vector.extract_strided_slice %685 {offsets = [8, 0, 0], sizes = [2, 16, 16], strides = [1, 1, 1]} : vector<16x16x16xbf16> to vector<2x16x16xbf16>
    %712 = vector.shape_cast %711 : vector<2x16x16xbf16> to vector<32x16xbf16>
    %713 = vector.extract_strided_slice %687 {offsets = [64, 0], sizes = [16, 128], strides = [1, 1]} : vector<128x128xbf16> to vector<16x128xbf16>
    %cst_205 = arith.constant dense<0.000000e+00> : vector<32x128xf32>
    %714 = tpu.matmul %712, %713, %cst_205 {dimension_numbers = #tpu.dot_dimension_numbers<[1], [0], [0], [1], [0, 0, 1, 1], [], []>} : vector<32x16xbf16>, vector<16x128xbf16>, vector<32x128xf32> -> vector<32x128xf32>
    %715 = arith.addf %710, %714 : vector<32x128xf32>
    %716 = vector.extract_strided_slice %685 {offsets = [10, 0, 0], sizes = [2, 16, 16], strides = [1, 1, 1]} : vector<16x16x16xbf16> to vector<2x16x16xbf16>
    %717 = vector.shape_cast %716 : vector<2x16x16xbf16> to vector<32x16xbf16>
    %718 = vector.extract_strided_slice %687 {offsets = [80, 0], sizes = [16, 128], strides = [1, 1]} : vector<128x128xbf16> to vector<16x128xbf16>
    %cst_206 = arith.constant dense<0.000000e+00> : vector<32x128xf32>
    %719 = tpu.matmul %717, %718, %cst_206 {dimension_numbers = #tpu.dot_dimension_numbers<[1], [0], [0], [1], [0, 0, 1, 1], [], []>} : vector<32x16xbf16>, vector<16x128xbf16>, vector<32x128xf32> -> vector<32x128xf32>
    %720 = arith.addf %715, %719 : vector<32x128xf32>
    %721 = vector.extract_strided_slice %685 {offsets = [12, 0, 0], sizes = [2, 16, 16], strides = [1, 1, 1]} : vector<16x16x16xbf16> to vector<2x16x16xbf16>
    %722 = vector.shape_cast %721 : vector<2x16x16xbf16> to vector<32x16xbf16>
    %723 = vector.extract_strided_slice %687 {offsets = [96, 0], sizes = [16, 128], strides = [1, 1]} : vector<128x128xbf16> to vector<16x128xbf16>
    %cst_207 = arith.constant dense<0.000000e+00> : vector<32x128xf32>
    %724 = tpu.matmul %722, %723, %cst_207 {dimension_numbers = #tpu.dot_dimension_numbers<[1], [0], [0], [1], [0, 0, 1, 1], [], []>} : vector<32x16xbf16>, vector<16x128xbf16>, vector<32x128xf32> -> vector<32x128xf32>
    %725 = arith.addf %720, %724 : vector<32x128xf32>
    %726 = vector.extract_strided_slice %685 {offsets = [14, 0, 0], sizes = [2, 16, 16], strides = [1, 1, 1]} : vector<16x16x16xbf16> to vector<2x16x16xbf16>
    %727 = vector.shape_cast %726 : vector<2x16x16xbf16> to vector<32x16xbf16>
    %728 = vector.extract_strided_slice %687 {offsets = [112, 0], sizes = [16, 128], strides = [1, 1]} : vector<128x128xbf16> to vector<16x128xbf16>
    %cst_208 = arith.constant dense<0.000000e+00> : vector<32x128xf32>
    %729 = tpu.matmul %727, %728, %cst_208 {dimension_numbers = #tpu.dot_dimension_numbers<[1], [0], [0], [1], [0, 0, 1, 1], [], []>} : vector<32x16xbf16>, vector<16x128xbf16>, vector<32x128xf32> -> vector<32x128xf32>
    %730 = arith.addf %725, %729 : vector<32x128xf32>
    %731 = arith.addf %585, %730 : vector<32x128xf32>
    %c3_209 = arith.constant 3 : index
    %c0_210 = arith.constant 0 : index
    %c0_211 = arith.constant 0 : index
    %732 = vector.load %arg7[%c3_209, %c0_210, %c0_211] : memref<4x1x128xf32, #tpu.memory_space<vmem>>, vector<1x1x128xf32>
    %733 = vector.shape_cast %732 : vector<1x1x128xf32> to vector<1x128xf32>
    %c3_212 = arith.constant 3 : index
    %c0_213 = arith.constant 0 : index
    %c0_214 = arith.constant 0 : index
    %734 = vector.load %arg8[%c3_212, %c0_213, %c0_214] : memref<4x1x128xf32, #tpu.memory_space<vmem>>, vector<1x1x128xf32>
    %735 = vector.shape_cast %734 : vector<1x1x128xf32> to vector<1x128xf32>
    %cst_215 = arith.constant dense<0.000000e+00> : vector<32xf32>
    %736 = vector.multi_reduction <add>, %731, %cst_215 [1] : vector<32x128xf32> to vector<32xf32>
    %737 = vector.shape_cast %736 : vector<32xf32> to vector<32x1xf32>
    %cst_216 = arith.constant 0.013888889 : f32
    %738 = vector.broadcast %cst_216 : f32 to vector<32x1xf32>
    %739 = arith.mulf %737, %738 : vector<32x1xf32>
    %740 = vector.broadcast %739 : vector<32x1xf32> to vector<32x128xf32>
    %741 = arith.subf %731, %740 : vector<32x128xf32>
    %742 = vector.broadcast %5 : vector<1x128xf32> to vector<32x128xf32>
    %743 = arith.mulf %741, %742 : vector<32x128xf32>
    %744 = arith.mulf %743, %743 : vector<32x128xf32>
    %cst_217 = arith.constant dense<0.000000e+00> : vector<32xf32>
    %745 = vector.multi_reduction <add>, %744, %cst_217 [1] : vector<32x128xf32> to vector<32xf32>
    %746 = vector.shape_cast %745 : vector<32xf32> to vector<32x1xf32>
    %cst_218 = arith.constant 0.013888889 : f32
    %747 = vector.broadcast %cst_218 : f32 to vector<32x1xf32>
    %748 = arith.mulf %746, %747 : vector<32x1xf32>
    %cst_219 = arith.constant 9.99999974E-6 : f32
    %749 = vector.broadcast %cst_219 : f32 to vector<32x1xf32>
    %750 = arith.addf %748, %749 : vector<32x1xf32>
    %751 = math.rsqrt %750 : vector<32x1xf32>
    %752 = vector.broadcast %751 : vector<32x1xf32> to vector<32x128xf32>
    %753 = arith.mulf %743, %752 : vector<32x128xf32>
    %754 = vector.broadcast %733 : vector<1x128xf32> to vector<32x128xf32>
    %755 = arith.mulf %753, %754 : vector<32x128xf32>
    %756 = vector.broadcast %735 : vector<1x128xf32> to vector<32x128xf32>
    %757 = arith.addf %755, %756 : vector<32x128xf32>
    %758 = arith.truncf %757 : vector<32x128xf32> to vector<32x128xbf16>
    %c3_220 = arith.constant 3 : index
    %c0_221 = arith.constant 0 : index
    %c0_222 = arith.constant 0 : index
    %759 = vector.load %arg9[%c3_220, %c0_221, %c0_222] : memref<4x128x288xbf16, #tpu.memory_space<vmem>>, vector<1x128x288xbf16>
    %760 = vector.shape_cast %759 : vector<1x128x288xbf16> to vector<128x288xbf16>
    %cst_223 = arith.constant dense<0.000000e+00> : vector<32x288xf32>
    %761 = tpu.matmul %758, %760, %cst_223 {dimension_numbers = #tpu.dot_dimension_numbers<[1], [0], [0], [1], [0, 0, 1, 1], [], []>} : vector<32x128xbf16>, vector<128x288xbf16>, vector<32x288xf32> -> vector<32x288xf32>
    %c3_224 = arith.constant 3 : index
    %c0_225 = arith.constant 0 : index
    %c0_226 = arith.constant 0 : index
    %762 = vector.load %arg10[%c3_224, %c0_225, %c0_226] : memref<4x1x288xf32, #tpu.memory_space<vmem>>, vector<1x1x288xf32>
    %763 = vector.shape_cast %762 : vector<1x1x288xf32> to vector<1x288xf32>
    %764 = vector.broadcast %763 : vector<1x288xf32> to vector<32x288xf32>
    %765 = arith.addf %761, %764 : vector<32x288xf32>
    %cst_227 = arith.constant 0.000000e+00 : f32
    %766 = vector.broadcast %cst_227 : f32 to vector<32x288xf32>
    %767 = arith.maximumf %765, %766 : vector<32x288xf32>
    %768 = arith.truncf %767 : vector<32x288xf32> to vector<32x288xbf16>
    %c3_228 = arith.constant 3 : index
    %c0_229 = arith.constant 0 : index
    %c0_230 = arith.constant 0 : index
    %769 = vector.load %arg11[%c3_228, %c0_229, %c0_230] : memref<4x288x128xbf16, #tpu.memory_space<vmem>>, vector<1x288x128xbf16>
    %770 = vector.shape_cast %769 : vector<1x288x128xbf16> to vector<288x128xbf16>
    %cst_231 = arith.constant dense<0.000000e+00> : vector<32x128xf32>
    %771 = tpu.matmul %768, %770, %cst_231 {dimension_numbers = #tpu.dot_dimension_numbers<[1], [0], [0], [1], [0, 0, 1, 1], [], []>} : vector<32x288xbf16>, vector<288x128xbf16>, vector<32x128xf32> -> vector<32x128xf32>
    %c3_232 = arith.constant 3 : index
    %c0_233 = arith.constant 0 : index
    %c0_234 = arith.constant 0 : index
    %772 = vector.load %arg12[%c3_232, %c0_233, %c0_234] : memref<4x1x128xf32, #tpu.memory_space<vmem>>, vector<1x1x128xf32>
    %773 = vector.shape_cast %772 : vector<1x1x128xf32> to vector<1x128xf32>
    %774 = vector.broadcast %773 : vector<1x128xf32> to vector<32x128xf32>
    %775 = arith.addf %771, %774 : vector<32x128xf32>
    %776 = arith.addf %731, %775 : vector<32x128xf32>
    %c0_235 = arith.constant 0 : index
    %c0_236 = arith.constant 0 : index
    %777 = vector.load %arg13[%c0_235, %c0_236] : memref<1x128xf32, #tpu.memory_space<vmem>>, vector<1x128xf32>
    %c0_237 = arith.constant 0 : index
    %c0_238 = arith.constant 0 : index
    %778 = vector.load %arg14[%c0_237, %c0_238] : memref<1x128xf32, #tpu.memory_space<vmem>>, vector<1x128xf32>
    %cst_239 = arith.constant dense<0.000000e+00> : vector<32xf32>
    %779 = vector.multi_reduction <add>, %776, %cst_239 [1] : vector<32x128xf32> to vector<32xf32>
    %780 = vector.shape_cast %779 : vector<32xf32> to vector<32x1xf32>
    %cst_240 = arith.constant 0.013888889 : f32
    %781 = vector.broadcast %cst_240 : f32 to vector<32x1xf32>
    %782 = arith.mulf %780, %781 : vector<32x1xf32>
    %783 = vector.broadcast %782 : vector<32x1xf32> to vector<32x128xf32>
    %784 = arith.subf %776, %783 : vector<32x128xf32>
    %785 = vector.broadcast %5 : vector<1x128xf32> to vector<32x128xf32>
    %786 = arith.mulf %784, %785 : vector<32x128xf32>
    %787 = arith.mulf %786, %786 : vector<32x128xf32>
    %cst_241 = arith.constant dense<0.000000e+00> : vector<32xf32>
    %788 = vector.multi_reduction <add>, %787, %cst_241 [1] : vector<32x128xf32> to vector<32xf32>
    %789 = vector.shape_cast %788 : vector<32xf32> to vector<32x1xf32>
    %cst_242 = arith.constant 0.013888889 : f32
    %790 = vector.broadcast %cst_242 : f32 to vector<32x1xf32>
    %791 = arith.mulf %789, %790 : vector<32x1xf32>
    %cst_243 = arith.constant 9.99999974E-6 : f32
    %792 = vector.broadcast %cst_243 : f32 to vector<32x1xf32>
    %793 = arith.addf %791, %792 : vector<32x1xf32>
    %794 = math.rsqrt %793 : vector<32x1xf32>
    %795 = vector.broadcast %794 : vector<32x1xf32> to vector<32x128xf32>
    %796 = arith.mulf %786, %795 : vector<32x128xf32>
    %797 = vector.broadcast %777 : vector<1x128xf32> to vector<32x128xf32>
    %798 = arith.mulf %796, %797 : vector<32x128xf32>
    %799 = vector.broadcast %778 : vector<1x128xf32> to vector<32x128xf32>
    %800 = arith.addf %798, %799 : vector<32x128xf32>
    %801 = arith.truncf %800 : vector<32x128xf32> to vector<32x128xbf16>
    %c0_244 = arith.constant 0 : index
    %c0_245 = arith.constant 0 : index
    %802 = vector.load %arg15[%c0_244, %c0_245] : memref<128x128xbf16, #tpu.memory_space<vmem>>, vector<128x128xbf16>
    %cst_246 = arith.constant dense<0.000000e+00> : vector<32x128xf32>
    %803 = tpu.matmul %801, %802, %cst_246 {dimension_numbers = #tpu.dot_dimension_numbers<[1], [0], [0], [1], [0, 0, 1, 1], [], []>} : vector<32x128xbf16>, vector<128x128xbf16>, vector<32x128xf32> -> vector<32x128xf32>
    %c0_247 = arith.constant 0 : index
    %c0_248 = arith.constant 0 : index
    %804 = vector.load %arg16[%c0_247, %c0_248] : memref<1x128xf32, #tpu.memory_space<vmem>>, vector<1x128xf32>
    %805 = vector.broadcast %804 : vector<1x128xf32> to vector<32x128xf32>
    %806 = arith.addf %803, %805 : vector<32x128xf32>
    %c0_249 = arith.constant 0 : index
    %c0_250 = arith.constant 0 : index
    %807 = vector.load %arg17[%c0_249, %c0_250] : memref<32x128xf32, #tpu.memory_space<vmem>>, vector<32x128xf32>
    tpu.vector_store %arg17[%c0_249, %c0_250], %806 {strides = array<i32>} : memref<32x128xf32, #tpu.memory_space<vmem>>, vector<32x128xf32>,
    return
  }
  func.func @transform_0(%arg0: i32) -> (i32, i32) {
    %c0_i32 = arith.constant 0 : i32
    %c0_i32_0 = arith.constant 0 : i32
    return %arg0, %c0_i32 : i32, i32
  }
  func.func @transform_1(%arg0: i32) -> (i32, i32, i32) {
    %c0_i32 = arith.constant 0 : i32
    %c0_i32_0 = arith.constant 0 : i32
    %c0_i32_1 = arith.constant 0 : i32
    %c0_i32_2 = arith.constant 0 : i32
    return %c0_i32, %c0_i32_0, %c0_i32_1 : i32, i32, i32
  }
  func.func @transform_2(%arg0: i32) -> (i32, i32, i32) {
    %c0_i32 = arith.constant 0 : i32
    %c0_i32_0 = arith.constant 0 : i32
    %c0_i32_1 = arith.constant 0 : i32
    %c0_i32_2 = arith.constant 0 : i32
    return %c0_i32, %c0_i32_0, %c0_i32_1 : i32, i32, i32
  }
  func.func @transform_3(%arg0: i32) -> (i32, i32, i32) {
    %c0_i32 = arith.constant 0 : i32
    %c0_i32_0 = arith.constant 0 : i32
    %c0_i32_1 = arith.constant 0 : i32
    %c0_i32_2 = arith.constant 0 : i32
    return %c0_i32, %c0_i32_0, %c0_i32_1 : i32, i32, i32
  }
  func.func @transform_4(%arg0: i32) -> (i32, i32, i32) {
    %c0_i32 = arith.constant 0 : i32
    %c0_i32_0 = arith.constant 0 : i32
    %c0_i32_1 = arith.constant 0 : i32
    %c0_i32_2 = arith.constant 0 : i32
    return %c0_i32, %c0_i32_0, %c0_i32_1 : i32, i32, i32
  }
  func.func @transform_5(%arg0: i32) -> (i32, i32, i32) {
    %c0_i32 = arith.constant 0 : i32
    %c0_i32_0 = arith.constant 0 : i32
    %c0_i32_1 = arith.constant 0 : i32
    %c0_i32_2 = arith.constant 0 : i32
    return %c0_i32, %c0_i32_0, %c0_i32_1 : i32, i32, i32
  }
  func.func @transform_6(%arg0: i32) -> (i32, i32, i32) {
    %c0_i32 = arith.constant 0 : i32
    %c0_i32_0 = arith.constant 0 : i32
    %c0_i32_1 = arith.constant 0 : i32
    %c0_i32_2 = arith.constant 0 : i32
    return %c0_i32, %c0_i32_0, %c0_i32_1 : i32, i32, i32
  }
  func.func @transform_7(%arg0: i32) -> (i32, i32, i32) {
    %c0_i32 = arith.constant 0 : i32
    %c0_i32_0 = arith.constant 0 : i32
    %c0_i32_1 = arith.constant 0 : i32
    %c0_i32_2 = arith.constant 0 : i32
    return %c0_i32, %c0_i32_0, %c0_i32_1 : i32, i32, i32
  }
  func.func @transform_8(%arg0: i32) -> (i32, i32, i32) {
    %c0_i32 = arith.constant 0 : i32
    %c0_i32_0 = arith.constant 0 : i32
    %c0_i32_1 = arith.constant 0 : i32
    %c0_i32_2 = arith.constant 0 : i32
    return %c0_i32, %c0_i32_0, %c0_i32_1 : i32, i32, i32
  }
  func.func @transform_9(%arg0: i32) -> (i32, i32, i32) {
    %c0_i32 = arith.constant 0 : i32
    %c0_i32_0 = arith.constant 0 : i32
    %c0_i32_1 = arith.constant 0 : i32
    %c0_i32_2 = arith.constant 0 : i32
    return %c0_i32, %c0_i32_0, %c0_i32_1 : i32, i32, i32
  }
  func.func @transform_10(%arg0: i32) -> (i32, i32, i32) {
    %c0_i32 = arith.constant 0 : i32
    %c0_i32_0 = arith.constant 0 : i32
    %c0_i32_1 = arith.constant 0 : i32
    %c0_i32_2 = arith.constant 0 : i32
    return %c0_i32, %c0_i32_0, %c0_i32_1 : i32, i32, i32
  }
  func.func @transform_11(%arg0: i32) -> (i32, i32, i32) {
    %c0_i32 = arith.constant 0 : i32
    %c0_i32_0 = arith.constant 0 : i32
    %c0_i32_1 = arith.constant 0 : i32
    %c0_i32_2 = arith.constant 0 : i32
    return %c0_i32, %c0_i32_0, %c0_i32_1 : i32, i32, i32
  }
  func.func @transform_12(%arg0: i32) -> (i32, i32) {
    %c0_i32 = arith.constant 0 : i32
    %c0_i32_0 = arith.constant 0 : i32
    %c0_i32_1 = arith.constant 0 : i32
    return %c0_i32, %c0_i32_0 : i32, i32
  }
  func.func @transform_13(%arg0: i32) -> (i32, i32) {
    %c0_i32 = arith.constant 0 : i32
    %c0_i32_0 = arith.constant 0 : i32
    %c0_i32_1 = arith.constant 0 : i32
    return %c0_i32, %c0_i32_0 : i32, i32
  }
  func.func @transform_14(%arg0: i32) -> (i32, i32) {
    %c0_i32 = arith.constant 0 : i32
    %c0_i32_0 = arith.constant 0 : i32
    %c0_i32_1 = arith.constant 0 : i32
    return %c0_i32, %c0_i32_0 : i32, i32
  }
  func.func @transform_15(%arg0: i32) -> (i32, i32) {
    %c0_i32 = arith.constant 0 : i32
    %c0_i32_0 = arith.constant 0 : i32
    %c0_i32_1 = arith.constant 0 : i32
    return %c0_i32, %c0_i32_0 : i32, i32
  }
  func.func @transform_16(%arg0: i32) -> (i32, i32) {
    %c0_i32 = arith.constant 0 : i32
    %c0_i32_0 = arith.constant 0 : i32
    return %arg0, %c0_i32 : i32, i32
  }
}

</mosaic_0001>

<bundles_post_ra>
// kernel: model_apply.1
= control target key start
LH: loop header
LB: loop body
LE: loop exit
PB: predicated region body
PF: predicated region fallthrough
CT: control target
= control target key end

     0   :  { %s24412_s0 = inlined_call_operand.vmem [shape: f32[64,128], index: 0, kind: input, shape index: {}]   ;;  %s24413_s1 = inlined_call_operand.vmem [shape: f32[4,1,128], index: 1, kind: input, shape index: {}]   ;;  %s24414_s2 = inlined_call_operand.vmem [shape: f32[4,1,128], index: 2, kind: input, shape index: {}]   ;;  %s24415_s3 = inlined_call_operand.vmem [shape: bf16[4,128,384], index: 3, kind: input, shape index: {}]   ;;  %s24416_s4 = inlined_call_operand.vmem [shape: bf16[4,128,128], index: 4, kind: input, shape index: {}]   ;;  %s24417_s5 = inlined_call_operand.vmem [shape: f32[4,1,128], index: 5, kind: input, shape index: {}]   ;;  %s24418_s6 = inlined_call_operand.vmem [shape: f32[4,1,128], index: 6, kind: input, shape index: {}]   ;;  %s24419_s7 = inlined_call_operand.vmem [shape: f32[4,1,128], index: 7, kind: input, shape index: {}]   ;;  %s24420_s8 = inlined_call_operand.vmem [shape: bf16[4,128,288], index: 8, kind: input, shape index: {}]   ;;  %s24421_s9 = inlined_call_operand.vmem [shape: f32[4,1,288], index: 9, kind: input, shape index: {}]   ;;  %s24422_s10 = inlined_call_operand.vmem [shape: bf16[4,288,128], index: 10, kind: input, shape index: {}]   ;;  %s24423_s11 = inlined_call_operand.vmem [shape: f32[4,1,128], index: 11, kind: input, shape index: {}]   ;;  %s24424_s12 = inlined_call_operand.vmem [shape: f32[1,128], index: 12, kind: input, shape index: {}]   ;;  %s24425_s13 = inlined_call_operand.vmem [shape: f32[1,128], index: 13, kind: input, shape index: {}]   ;;  %s24426_s14 = inlined_call_operand.vmem [shape: bf16[128,128], index: 14, kind: input, shape index: {}]   ;;  %s24427_s15 = inlined_call_operand.vmem [shape: f32[1,128], index: 15, kind: input, shape index: {}]   ;;  %s24428_s16 = inlined_call_operand.hbm [shape: f32[64,128], index: 16, kind: output, shape index: {}]  }
   0x1   :  { %24470 = sst [smem:[#allocation19_spill]] %s24412_s0 }
   0x2   :  { %24471 = sst [smem:[#allocation20_spill]] %s24427_s15 }
   0x3   :  { %24472 = sst [smem:[#allocation21_spill]] %s24428_s16 }
   0x4   :  { %21 = vsyncpa [#allocation3], 0 }
   0x5   :  { %23 = vsyncpa [#allocation3 + $0x1], 0  ;;  %s20286_s21 = smov 0   ;;  %s20288_s22 = smov 0  }
   0x6   :  { %s20290_s23 = smov 0   ;;  %s20292_s24 = smov 0  }
   0x7 LB: > { %24473 = sst [smem:[#allocation5_spill]] %s20173_s21  ;;  %s20307_s25 = sadd.s32 4294967295, %s20185_s24   ;;  %s20185_s24 = sphi %s20292_s24, %s24518_s24   ;;  %s20181_s23 = sphi %s20290_s23, %s24521_s23   ;;  %s20177_s22 = sphi %s20288_s22, %s24520_s22   ;;  %s20173_s21 = sphi %s20286_s21, %s24519_s21  }
   0x8   : > { %24474 = sst [smem:[#allocation6_spill]] %s20177_s22  ;;  %s15491_s26 = sadd.s32 4294967294, %s20185_s24  }
   0x9   : > { %24475 = sst [smem:[#allocation7_spill]] %s20181_s23  ;;  %s20311_s27 = sadd.s32 1, %s20185_s24  }
   0xa   : > { %24476 = sst [smem:[#allocation8_spill]] %s20185_s24  ;;  %s377_s28 = sadd.s32 1, %s20181_s23 }
   0xb   : > { %24477 = sst [smem:[#allocation9_spill]] %s20307_s25  ;;  %s374_s29 = ssub.s32 %s20185_s24, %s20311_s27 }
   0xc   : > { %24478 = sst [smem:[#allocation10_spill]] %s20311_s27  ;;  %p387_p0 = scmp.ne.s32.totalorder %s20181_s23, %s20177_s22 }
   0xd   : > { %p375_p1 = scmp.eq.s32.totalorder %s374_s29, 0  ;;  %p388_p2 = scmp.eq.s32.totalorder %s20307_s25, 1 }
   0xe   : > { %p393_p3 = scmp.ne.s32.totalorder %s20177_s22, %s20173_s21  ;;  %p394_p4 = scmp.eq.s32.totalorder %s15491_s26, 1 }
   0xf   : > { %s20322_s30 = scalar_select %p375_p1, %s20181_s23, %s377_s28  }
  0x10   : > { %p20324_p5 = por %p388_p2, %p387_p0  ;;  %p20328_p6 = por %p394_p4, %p393_p3 }
  0x11   : > { %24479 = sst [smem:[#allocation11_spill]] %s20322_s30  ;;  %p15494_p7 = scmp.ge.s32.totalorder %s20185_s24, 1 }
  0x12   : > { %s24480_s0 = scalar_select %p20324_p5, 1, 0 }
  0x13   : > { %s24482_s17 = scalar_select %p20328_p6, 1, 0 }
  0x14   : > { %24481 = sst [smem:[#allocation12_spill]] %s24480_s0  ;;  %p466_p8 = scmp.lt.s32.totalorder %s20185_s24, 3 }
  0x15   : > { %24483 = sst [smem:[#allocation13_spill]] %s24482_s17 }
  0x16   : > { %p467_p9 = pnand %p15494_p7, %p466_p8 }
  0x18   : > { %470 = sbr.rel (%p467_p9) target bundleno = 10919 (0x2aa7), region = 84 }
  0x1f   : > { %s15496_s18 = sshll.u32 %s20307_s25, 2  ;;  %s24484_s28 = sld [smem:[#allocation19_spill]]  ;;  %v19167_v4 = vld [vmem:[%s24415_s3 + $0x4] ss:$12 sps:$4 sm:$0xff]   ;;  %v19169_v5 = vld [vmem:[%s24415_s3] ss:$12 sps:$4 sm:$0xff]   ;;  %v528_v8 = vlaneseq }
  0x20   : > { %p517_p10 = scmp.lt.s32.totalorder %s15496_s18, 7  ;;  %v19170_v6 = vld [vmem:[%s24415_s3 + $0x1c] ss:$12 sps:$4 sm:$0xff]   ;;  %772 = vmatprep.subr.bf16.mxu0 %v19167_v4  ;;  %v24448_v10 = vmov 0.0   ;;  %v19173_v32 = vld [vmem:[%s24415_s3 + $0x18] ss:$12 sps:$4 sm:$0xff]  }
  0x21   : > { %v19172_v7 = vld [vmem:[%s24415_s3 + $0x8] ss:$12 sps:$4 sm:$0xff]   ;;  %773 = vmatpush1.bf16.msra.mxu0 %v19169_v5  ;;  %v20357_v9 = vand.u32 127, %v528_v8  ;;  %v19176_v34 = vld [vmem:[%s24415_s3 + $0x20] ss:$12 sps:$4 sm:$0xff]   ;;  %v24446_v47 = vmov 0  }
  0x22   : > { %s24523_s18 = smov (!%p517_p10, %s15496_s18), 7  ;;  %16975 = vmatprep.subr.bf16.mxu1 %v19172_v7  ;;  %774 = vmatprep.subr.bf16.mxu0 %v19170_v6  ;;  %v19174_v33 = vld [vmem:[%s24415_s3 + $0x34] ss:$12 sps:$4 sm:$0xff]   ;;  %v19177_v35 = vld [vmem:[%s24415_s3 + $0x30] ss:$12 sps:$4 sm:$0xff]   ;;  %vm20189_vm1 = vmmov 0  }
  0x23   : > { %s15497_s19 = sshll.u32 %s24523_s18, 3  ;;  %16976 = vmatpush3.bf16.msra.mxu1 %v19172_v7  ;;  %vm530_vm0 = vcmp.lt.s32.totalorder %v20357_v9, 72  ;;  %v19178_v36 = vld [vmem:[%s24415_s3 + $0x4c] ss:$12 sps:$4 sm:$0xff]   ;;  %v19181_v38 = vld [vmem:[%s24415_s3 + $0x48] ss:$12 sps:$4 sm:$0xff]   ;;  %804 = vmatprep.mubr.bf16.mxu0 %v24446_v47 }
  0x24   : > { %v20361_v11 = vsel %vm530_vm0, 1.0, %v24448_v10  ;;  %16977 = vmatprep.subr.bf16.mxu1 %v19176_v34  ;;  %v19180_v37 = vld [vmem:[%s24415_s3 + $0x38] ss:$12 sps:$4 sm:$0xff]   ;;  %v19184_v40 = vld [vmem:[%s24415_s3 + $0x50] ss:$12 sps:$4 sm:$0xff]   ;;  %vm1186_vm2 = vcmask 130048  }
  0x25   : > { %s20338_s29 = scalar_lea.vmem %s24484_s28, %s15497_s19  ;;  %775 = vmatpush1.bf16.msra.mxu0 %v19173_v32  ;;  %v19182_v39 = vld [vmem:[%s24415_s3 + $0x64] ss:$12 sps:$4 sm:$0xff]   ;;  %v19185_v41 = vld [vmem:[%s24415_s3 + $0x60] ss:$12 sps:$4 sm:$0xff]   ;;  %v19186_v42 = vld [vmem:[%s24415_s3 + $0x7c] ss:$12 sps:$4 sm:$0xff]  }
  0x26   : > { %v524_v0 = vld [vmem:[%s20338_s29] sm:$0xff]  ;;  %v526_v1 = vld [vmem:[%s20338_s29 + $0x10] sm:$0xff]  ;;  %v525_v2 = vld [vmem:[%s20338_s29 + $0x8] sm:$0xff]  ;;  %776 = vmatprep.subr.bf16.mxu0 %v19174_v33  ;;  %s24456_s20 = smov 112   ;;  %s24444_s19 = smov 96   ;;  %vm4094_vm5 = vcmask 261120  }
  0x27   : > { %542 = vadd.xlane.f32.xlu0 %v524_v0  ;;  %546 = vadd.xlane.f32.xlu1 %v526_v1  ;;  %v527_v3 = vld [vmem:[%s20338_s29 + $0x18] sm:$0xff]  ;;  %v19188_v43 = vld [vmem:[%s24415_s3 + $0x68] ss:$12 sps:$4 sm:$0xff]   ;;  %v19192_v46 = vld [vmem:[%s24415_s3 + $0x80] ss:$12 sps:$4 sm:$0xff]   ;;  %s24442_s26 = smov 80  }
  0x28   : > { %16978 = vmatpush3.bf16.msra.mxu1 %v19176_v34  ;;  %v19189_v44 = vld [vmem:[%s24415_s3 + $0x78] ss:$12 sps:$4 sm:$0xff]   ;;  %v19190_v45 = vld [vmem:[%s24415_s3 + $0x94] ss:$12 sps:$4 sm:$0xff]   ;;  %v19193_v48 = vld [vmem:[%s24415_s3 + $0x90] ss:$12 sps:$4 sm:$0xff]  }
  0x29   : > { %777 = vmatpush1.bf16.msra.mxu0 %v19177_v35  ;;  %16979 = vmatprep.subr.bf16.mxu1 %v19180_v37  ;;  %v19194_v49 = vld [vmem:[%s24415_s3 + $0xac] ss:$12 sps:$4 sm:$0xff]   ;;  %v19197_v51 = vld [vmem:[%s24415_s3 + $0xa8] ss:$12 sps:$4 sm:$0xff]   ;;  %v19198_v52 = vld [vmem:[%s24415_s3 + $0xb0] ss:$12 sps:$4 sm:$0xff]  }
  0x2a   : > { %778 = vmatprep.subr.bf16.mxu0 %v19178_v36  ;;  %v19196_v50 = vld [vmem:[%s24415_s3 + $0x98] ss:$12 sps:$4 sm:$0xff]   ;;  %s24440_s28 = smov 64   ;;  %s24438_s17 = smov 48  }
  0x2b   : > { %544 = vadd.xlane.f32.xlu0 %v525_v2  ;;  %548 = vadd.xlane.f32.xlu1 %v527_v3  ;;  %s24436_s23 = smov 32   ;;  %s24434_s21 = smov 16  }
  0x2c   : > { %16980 = vmatpush3.bf16.msra.mxu1 %v19180_v37  ;;  %s24510_s30 = sld [smem:[#allocation6_spill]]  ;;  %s24511_s18 = sld [smem:[#allocation9_spill]] }
  0x2d   : > { %779 = vmatpush1.bf16.msra.mxu0 %v19181_v38  ;;  %16981 = vmatprep.subr.bf16.mxu1 %v19184_v40  ;;  %s24514_s0 = sld [smem:[#allocation21_spill]] }
  0x2e   : > { %780 = vmatprep.subr.bf16.mxu0 %v19182_v39 }
  0x30   : > { %16982 = vmatpush3.bf16.msra.mxu1 %v19184_v40 }
  0x31   : > { %781 = vmatpush1.bf16.msra.mxu0 %v19185_v41  ;;  %16983 = vmatprep.subr.bf16.mxu1 %v19188_v43 }
  0x32   : > { %782 = vmatprep.subr.bf16.mxu0 %v19186_v42  ;;  %s513_s15 = sand.u32 1, %s24510_s30   ;;  %s20198_s30 = smov [#allocation2]  }
  0x33   : > { %s15495_s25 = sshll.u32 %s513_s15, 5  ;;  %s24371_s22 = scalar_lea.sflag [#allocation3], %s513_s15 }
  0x34   : > { %16984 = vmatpush3.bf16.msra.mxu1 %v19188_v43 }
  0x35   : > { %783 = vmatpush1.bf16.msra.mxu0 %v19189_v44  ;;  %16985 = vmatprep.subr.bf16.mxu1 %v19192_v46 }
  0x36   : > { %784 = vmatprep.subr.bf16.mxu0 %v19190_v45 }
  0x38   : > { %16986 = vmatpush3.bf16.msra.mxu1 %v19192_v46 }
  0x39   : > { %785 = vmatpush1.bf16.msra.mxu0 %v19193_v48  ;;  %16987 = vmatprep.subr.bf16.mxu1 %v19196_v50 }
  0x3a   : > { %786 = vmatprep.subr.bf16.mxu0 %v19194_v49 }
  0x3c   : > { %16988 = vmatpush3.bf16.msra.mxu1 %v19196_v50 }
  0x3d   : > { %787 = vmatpush1.bf16.msra.mxu0 %v19197_v51  ;;  %16989 = vmatprep.subr.bf16.mxu1 %v19198_v52 }
  0x3e   : > { %17001 = vmatprep.subr.bf16.mxu0 %v24448_v10 }
  0x40   : > { %16990 = vmatpush3.bf16.msra.mxu1 %v19198_v52 }
  0x41   : > { %16995 = vmatprep.subr.bf16.mxu1 %v24448_v10 }
  0xb4   : > { %v543_v12 = vpop.xlane.xlu0 %542  ;;  %v547_v13 = vpop.xlane.xlu1 %546 }
  0xb5   : > { %v550_v14 = vmul.f32 0.013888889, %v543_v12  ;;  %v552_v15 = vmul.f32 0.013888889, %v547_v13  ;;  %v15500_v12 = vld [vmem:[%s24414_s2] ss:$0 sm:$0xff] }
  0xb7   : > { %v554_v16 = vsub.f32 %v524_v0, %v550_v14  ;;  %v556_v17 = vsub.f32 %v526_v1, %v552_v15 }
  0xb8   : > { %v545_v18 = vpop.xlane.xlu0 %544  ;;  %v549_v19 = vpop.xlane.xlu1 %548 }
  0xb9   : > { %v551_v20 = vmul.f32 0.013888889, %v545_v18  ;;  %v553_v21 = vmul.f32 0.013888889, %v549_v19  ;;  %v20364_v22 = vmul.f32 %v20361_v11, %v554_v16  ;;  %v20367_v23 = vmul.f32 %v20361_v11, %v556_v17 }
  0xbb   : > { %v555_v24 = vsub.f32 %v525_v2, %v551_v20  ;;  %v557_v25 = vsub.f32 %v527_v3, %v553_v21  ;;  %v562_v26 = vmul.f32 %v20364_v22, %v20364_v22  ;;  %v564_v27 = vmul.f32 %v20367_v23, %v20367_v23  ;;  %v15499_v3 = vld [vmem:[%s24413_s1] ss:$0 sm:$0xff] }
  0xbd   : > { %566 = vadd.xlane.f32.xlu0 %v562_v26  ;;  %v20374_v28 = vmul.f32 %v20361_v11, %v555_v24  ;;  %v20377_v29 = vmul.f32 %v20361_v11, %v557_v25 }
  0xbf   : > { %v563_v30 = vmul.f32 %v20374_v28, %v20374_v28  ;;  %v565_v31 = vmul.f32 %v20377_v29, %v20377_v29 }
  0xc1   : > { %570 = vadd.xlane.f32.xlu0 %v564_v27  ;;  %568 = vadd.xlane.f32.xlu1 %v563_v30 }
  0xc5   : > { %572 = vadd.xlane.f32.xlu1 %v565_v31 }
 0x14a   : > { %v567_v53 = vpop.xlane.xlu0 %566 }
 0x14b   : > { %v574_v54 = vmul.f32 0.013888889, %v567_v53 }
 0x14d   : > { %v578_v55 = vadd.f32 1e-05, %v574_v54 }
 0x14e   : > { %v569_v56 = vpop.xlane.xlu1 %568  ;;  %v571_v57 = vpop.xlane.xlu0 %570 }
 0x14f   : > { %19535 = vrsqrt.f32 %v578_v55  ;;  %v575_v58 = vmul.f32 0.013888889, %v569_v56  ;;  %v576_v59 = vmul.f32 0.013888889, %v571_v57 }
 0x151   : > { %v579_v60 = vadd.f32 1e-05, %v575_v58  ;;  %v580_v61 = vadd.f32 1e-05, %v576_v59 }
 0x152   : > { %v573_v62 = vpop.xlane.xlu1 %572 }
 0x153   : > { %19537 = vrsqrt.f32 %v579_v60  ;;  %v577_v63 = vmul.f32 0.013888889, %v573_v62 }
 0x154   : > { %19539 = vrsqrt.f32 %v580_v61 }
 0x155   : > { %v581_v0 = vadd.f32 1e-05, %v577_v63 }
 0x157   : > { %19541 = vrsqrt.f32 %v581_v0 }
 0x159   : > { %v19536_v1 = vpop.eup %19535 }
 0x15a   : > { %v586_v2 = vmul.f32 %v19536_v1, %v20364_v22 }
 0x15c   : > { %v596_v7 = vmul.f32 %v15499_v3, %v586_v2 }
 0x15d   : > { %v19538_v4 = vpop.eup %19537 }
 0x15e   : > { %v19540_v5 = vpop.eup %19539  ;;  %v587_v6 = vmul.f32 %v19538_v4, %v20374_v28  ;;  %v606_v16 = vadd.f32 %v15500_v12, %v596_v7 }
 0x15f   : > { %v588_v13 = vmul.f32 %v19540_v5, %v20367_v23 }
 0x160   : > { %v597_v14 = vmul.f32 %v15499_v3, %v587_v6 }
 0x161   : > { %v19542_v15 = vpop.eup %19541  ;;  %v598_v19 = vmul.f32 %v15499_v3, %v588_v13 }
 0x162   : > { %v607_v17 = vadd.f32 %v15500_v12, %v597_v14  ;;  %v589_v18 = vmul.f32 %v19542_v15, %v20377_v29 }
 0x163   : > { %v608_v22 = vadd.f32 %v15500_v12, %v598_v19 }
 0x164   : > { %v610_v20 = vpack.c.bf16 %v607_v17, %v606_v16  ;;  %v599_v21 = vmul.f32 %v15499_v3, %v589_v18 }
 0x166   : > { %805 = vmatmul.mubr.bf16.vlgmr.msra.gmra.mrb[0].mxu0 %v610_v20  ;;  %16991 = vmatprep.mubr.bf16.mxu1 %v610_v20  ;;  %v609_v24 = vadd.f32 %v15500_v12, %v599_v21 }
 0x167   : > { %814 = vmatprep.mubr.bf16.mxu0 %v24446_v47 }
 0x168   : > { %v611_v25 = vpack.c.bf16 %v609_v24, %v608_v22 }
 0x16a   : > { %16992 = vmatmul.mubr.bf16.vlgmr.msra.gmra.mrb[0].mxu1 %v611_v25 }
 0x16b   : > { %16997 = vmatprep.mubr.msk.bf16.mxu1 %vm20189_vm1, %v24448_v10 }
 0x16e   : > { %815 = vmatmul.mubr.bf16.gmra.mrb[4].mxu0 %v611_v25 }
 0x16f   : > { %17003 = vmatprep.mubr.msk.bf16.mxu0 %vm20189_vm1, %v24448_v10 }
 0x239   : > { %v806_v23 = vpop.f32.mrb[0].mxu0 }
 0x23a   : > { %v808_v26 = vpop.f32.mrb[1].mxu0 }
 0x23b   : > { %v810_v27 = vpop.f32.mrb[2].mxu0 }
 0x23c   : > { %v812_v28 = vpop.f32.mrb[3].mxu0  ;;  %v18357_v29 = vpack.i.bf16 %v810_v27, %v806_v23  ;;  %v962_v30 = vpack.c.bf16 %v810_v27, %v806_v23 }
 0x23d   : > { %v20461_v31 = vpop.f32.mrb[0].mxu1  ;;  %v18327_v32 = vpack.i.bf16 %v812_v28, %v808_v26  ;;  %v1066_v33 = vpack.c.bf16 %v812_v28, %v808_v26 }
 0x23e   : > { %v20463_v34 = vpop.f32.mrb[1].mxu1 }
 0x23f   : > { %18328 = vrot.lane.b32.xlu0 %v18327_v32, %s24456_s20  ;;  %v20466_v35 = vpop.f32.mrb[2].mxu1  ;;  %v1191_v36 = vsel %vm1186_vm2, %v1066_v33, 0 }
 0x240   : > { %v20469_v37 = vpop.f32.mrb[3].mxu1  ;;  %16996 = vmatpush3.bf16.xpose.msra.mxu1 %v1191_v36  ;;  %v20473_v38 = vpack.i.bf16 %v20466_v35, %v20461_v31  ;;  %v1171_v43 = vpack.c.bf16 %v20466_v35, %v20461_v31 }
 0x241   : > { %v816_v39 = vpop.f32.mrb[4].mxu0  ;;  %v20477_v40 = vpack.i.bf16 %v20469_v37, %v20463_v34  ;;  %17007 = vmatprep.subr.bf16.mxu1 %v24448_v10  ;;  %v1170_v42 = vpack.c.bf16 %v20469_v37, %v20463_v34  ;;  %v20612_v34 = vshrl.u32 %v528_v8, 7 }
 0x242   : > { %v818_v41 = vpop.f32.mrb[5].mxu0 }
 0x243   : > { %18348 = vrot.lane.b32.xlu0 %v18327_v32, %s24444_s19  ;;  %v820_v44 = vpop.f32.mrb[6].mxu0  ;;  %v535_v37 = vadd.s32 8, %v20612_v34  ;;  %vm536_vm3 = vcmp.ge.s32.totalorder %v20612_v34, %v20357_v9 }
 0x244   : > { %v822_v45 = vpop.f32.mrb[7].mxu0  ;;  %v18342_v46 = vpack.i.bf16 %v820_v44, %v816_v39  ;;  %v963_v48 = vpack.c.bf16 %v820_v44, %v816_v39 }
 0x245   : > { %v18332_v49 = vpack.i.bf16 %v822_v45, %v818_v41  ;;  %v1067_v50 = vpack.c.bf16 %v822_v45, %v818_v41  ;;  %vm537_vm4 = vcmp.ge.s32.totalorder %v535_v37, %v20357_v9 }
 0x247   : > { %18358 = vrot.lane.b32.xlu0 %v18357_v29, %s24444_s19  ;;  %16998 = vmatmul.mubr.msk.bf16.vlgmr.msra.gmra.mrb[4].mxu1 %vm1186_vm2, %v962_v30  ;;  %v1238_v51 = vsel %vm1186_vm2, %v1067_v50, 0 }
 0x248   : > { %18333 = vrot.lane.b32.xlu1 %v18332_v49, %s24456_s20  ;;  %17002 = vmatpush3.bf16.xpose.msra.mxu0 %v1238_v51 }
 0x249   : > { %17013 = vmatprep.subr.bf16.mxu0 %v24448_v10  ;;  %17009 = vmatprep.mubr.msk.bf16.mxu1 %vm20189_vm1, %v24448_v10 }
 0x24b   : > { %18368 = vrot.lane.b32.xlu0 %v18327_v32, %s24442_s26 }
 0x24c   : > { %18338 = vrot.lane.b32.xlu1 %v18357_v29, %s24456_s20 }
 0x24f   : > { %18378 = vrot.lane.b32.xlu0 %v18357_v29, %s24442_s26  ;;  %17004 = vmatmul.mubr.msk.bf16.vlgmr.msra.gmra.mrb[8].mxu0 %vm1186_vm2, %v963_v48 }
 0x250   : > { %18343 = vrot.lane.b32.xlu1 %v18342_v46, %s24456_s20  ;;  %17015 = vmatprep.mubr.msk.bf16.mxu0 %vm20189_vm1, %v24448_v10 }
 0x253   : > { %18388 = vrot.lane.b32.xlu0 %v18327_v32, %s24440_s28 }
 0x254   : > { %18353 = vrot.lane.b32.xlu1 %v18332_v49, %s24444_s19 }
 0x257   : > { %18398 = vrot.lane.b32.xlu0 %v18357_v29, %s24440_s28 }
 0x258   : > { %18363 = vrot.lane.b32.xlu1 %v18342_v46, %s24444_s19 }
 0x25b   : > { %18408 = vrot.lane.b32.xlu0 %v18327_v32, %s24438_s17 }
 0x25c   : > { %18373 = vrot.lane.b32.xlu1 %v18332_v49, %s24442_s26 }
 0x25f   : > { %18418 = vrot.lane.b32.xlu0 %v18357_v29, %s24438_s17 }
 0x260   : > { %18383 = vrot.lane.b32.xlu1 %v18342_v46, %s24442_s26 }
 0x263   : > { %18428 = vrot.lane.b32.xlu0 %v18327_v32, %s24436_s23 }
 0x264   : > { %18393 = vrot.lane.b32.xlu1 %v18332_v49, %s24440_s28 }
 0x267   : > { %18438 = vrot.lane.b32.xlu0 %v18357_v29, %s24436_s23 }
 0x268   : > { %18403 = vrot.lane.b32.xlu1 %v18342_v46, %s24440_s28 }
 0x26b   : > { %18448 = vrot.lane.b32.xlu0 %v18327_v32, %s24434_s21 }
 0x26c   : > { %18413 = vrot.lane.b32.xlu1 %v18332_v49, %s24438_s17 }
 0x26f   : > { %18458 = vrot.lane.b32.xlu0 %v18357_v29, %s24434_s21 }
 0x270   : > { %18423 = vrot.lane.b32.xlu1 %v18342_v46, %s24438_s17 }
 0x273   : > { %18468 = vrot.lane.b32.xlu0 %v20477_v40, %s24456_s20 }
 0x274   : > { %18433 = vrot.lane.b32.xlu1 %v18332_v49, %s24436_s23 }
 0x277   : > { %18478 = vrot.lane.b32.xlu0 %v20477_v40, %s24444_s19 }
 0x278   : > { %18443 = vrot.lane.b32.xlu1 %v18342_v46, %s24436_s23 }
 0x27b   : > { %18488 = vrot.lane.b32.xlu0 %v20477_v40, %s24442_s26 }
 0x27c   : > { %18453 = vrot.lane.b32.xlu1 %v18332_v49, %s24434_s21 }
 0x27f   : > { %18493 = vrot.lane.b32.xlu0 %v20473_v38, %s24442_s26  ;;  %s24493_s26 = smov 48  }
 0x280   : > { %18463 = vrot.lane.b32.xlu1 %v18342_v46, %s24434_s21 }
 0x284   : > { %18473 = vrot.lane.b32.xlu1 %v20473_v38, %s24456_s20 }
 0x288   : > { %18483 = vrot.lane.b32.xlu1 %v20473_v38, %s24444_s19  ;;  %s24492_s19 = smov 64  }
 0x28c   : > { %18498 = vrot.lane.b32.xlu1 %v20477_v40, %s24440_s28 }
 0x2b1   : > { %v18329_v52 = vpop.permute.xlu0 %18328 }
 0x2b2   : > { %v18331_v53 = vunpack.i.h.bf16 %v18329_v52  ;;  %v18330_v54 = vunpack.i.l.bf16 %v18329_v52 }
 0x2b4   : > { %v1068_v55 = vpack.c.bf16 %v18331_v53, %v18330_v54 }
 0x2b5   : > { %v18349_v56 = vpop.permute.xlu0 %18348 }
 0x2b6   : > { %v1285_v57 = vsel %vm1186_vm2, %v1068_v55, 0  ;;  %v18351_v59 = vunpack.i.h.bf16 %v18349_v56  ;;  %v18350_v60 = vunpack.i.l.bf16 %v18349_v56 }
 0x2b7   : > { %17008 = vmatpush3.bf16.xpose.msra.mxu1 %v1285_v57 }
 0x2b8   : > { %17019 = vmatprep.subr.bf16.mxu1 %v24448_v10  ;;  %v1070_v3 = vpack.c.bf16 %v18351_v59, %v18350_v60 }
 0x2b9   : > { %v18359_v58 = vpop.permute.xlu0 %18358 }
 0x2ba   : > { %v18334_v61 = vpop.permute.xlu1 %18333  ;;  %v1379_v14 = vsel %vm1186_vm2, %v1070_v3, 0  ;;  %v18361_v19 = vunpack.i.h.bf16 %v18359_v58  ;;  %v18360_v20 = vunpack.i.l.bf16 %v18359_v58 }
 0x2bb   : > { %v18336_v62 = vunpack.i.h.bf16 %v18334_v61  ;;  %v18335_v63 = vunpack.i.l.bf16 %v18334_v61 }
 0x2bc   : > { %v966_v27 = vpack.c.bf16 %v18361_v19, %v18360_v20 }
 0x2bd   : > { %v18369_v0 = vpop.permute.xlu0 %18368  ;;  %v1069_v1 = vpack.c.bf16 %v18336_v62, %v18335_v63 }
 0x2be   : > { %v18339_v2 = vpop.permute.xlu1 %18338  ;;  %v18371_v15 = vunpack.i.h.bf16 %v18369_v0  ;;  %v18370_v16 = vunpack.i.l.bf16 %v18369_v0 }
 0x2bf   : > { %v18341_v4 = vunpack.i.h.bf16 %v18339_v2  ;;  %v18340_v5 = vunpack.i.l.bf16 %v18339_v2  ;;  %v1332_v6 = vsel %vm1186_vm2, %v1069_v1, 0 }
 0x2c0   : > { %17014 = vmatpush3.bf16.xpose.msra.mxu0 %v1332_v6  ;;  %v1072_v26 = vpack.c.bf16 %v18371_v15, %v18370_v16 }
 0x2c1   : > { %v964_v7 = vpack.c.bf16 %v18341_v4, %v18340_v5  ;;  %v18379_v12 = vpop.permute.xlu0 %18378  ;;  %17025 = vmatprep.subr.bf16.mxu0 %v24448_v10 }
 0x2c2   : > { %v18344_v13 = vpop.permute.xlu1 %18343  ;;  %v1473_v36 = vsel %vm1186_vm2, %v1072_v26, 0  ;;  %v18381_v41 = vunpack.i.h.bf16 %v18379_v12  ;;  %v18380_v44 = vunpack.i.l.bf16 %v18379_v12 }
 0x2c3   : > { %v18346_v17 = vunpack.i.h.bf16 %v18344_v13  ;;  %v18345_v18 = vunpack.i.l.bf16 %v18344_v13  ;;  %17010 = vmatmul.mubr.msk.bf16.vlgmr.msra.gmra.mrb[8].mxu1 %vm1186_vm2, %v964_v7 }
 0x2c4   : > { %17020 = vmatpush3.bf16.xpose.msra.mxu1 %v1379_v14  ;;  %17021 = vmatprep.mubr.msk.bf16.mxu1 %vm20189_vm1, %v24448_v10  ;;  %v968_v53 = vpack.c.bf16 %v18381_v41, %v18380_v44 }
 0x2c5   : > { %v965_v21 = vpack.c.bf16 %v18346_v17, %v18345_v18  ;;  %v18389_v22 = vpop.permute.xlu0 %18388  ;;  %17031 = vmatprep.subr.bf16.mxu1 %v24448_v10 }
 0x2c6   : > { %v18354_v24 = vpop.permute.xlu1 %18353  ;;  %v18391_v32 = vunpack.i.h.bf16 %v18389_v22  ;;  %v18390_v33 = vunpack.i.l.bf16 %v18389_v22 }
 0x2c7   : > { %v18356_v25 = vunpack.i.h.bf16 %v18354_v24  ;;  %v18355_v23 = vunpack.i.l.bf16 %v18354_v24  ;;  %17016 = vmatmul.mubr.msk.bf16.vlgmr.msra.gmra.mrb[12].mxu0 %vm1186_vm2, %v965_v21 }
 0x2c8   : > { %17027 = vmatprep.mubr.msk.bf16.mxu0 %vm20189_vm1, %v24448_v10  ;;  %v1074_v52 = vpack.c.bf16 %v18391_v32, %v18390_v33 }
 0x2c9   : > { %v18399_v28 = vpop.permute.xlu0 %18398  ;;  %v1071_v29 = vpack.c.bf16 %v18356_v25, %v18355_v23 }
 0x2ca   : > { %v18364_v30 = vpop.permute.xlu1 %18363  ;;  %v1567_v60 = vsel %vm1186_vm2, %v1074_v52, 0  ;;  %v18401_v62 = vunpack.i.h.bf16 %v18399_v28  ;;  %v18400_v63 = vunpack.i.l.bf16 %v18399_v28 }
 0x2cb   : > { %17022 = vmatmul.mubr.msk.bf16.vlgmr.msra.gmra.mrb[12].mxu1 %vm1186_vm2, %v966_v27  ;;  %v1426_v39 = vsel %vm1186_vm2, %v1071_v29, 0  ;;  %v18366_v45 = vunpack.i.h.bf16 %v18364_v30  ;;  %v18365_v46 = vunpack.i.l.bf16 %v18364_v30 }
 0x2cc   : > { %17032 = vmatpush3.bf16.xpose.msra.mxu1 %v1473_v36  ;;  %17026 = vmatpush3.bf16.xpose.msra.mxu0 %v1426_v39  ;;  %v970_v7 = vpack.c.bf16 %v18401_v62, %v18400_v63 }
 0x2cd   : > { %v18409_v48 = vpop.permute.xlu0 %18408  ;;  %17033 = vmatprep.mubr.msk.bf16.mxu1 %vm20189_vm1, %v24448_v10  ;;  %17043 = vmatprep.subr.bf16.mxu1 %v24448_v10  ;;  %v967_v54 = vpack.c.bf16 %v18366_v45, %v18365_v46 }
 0x2ce   : > { %v18374_v49 = vpop.permute.xlu1 %18373  ;;  %17037 = vmatprep.subr.bf16.mxu0 %v24448_v10  ;;  %v18411_v58 = vunpack.i.h.bf16 %v18409_v48  ;;  %v18410_v59 = vunpack.i.l.bf16 %v18409_v48 }
 0x2cf   : > { %v18376_v50 = vunpack.i.h.bf16 %v18374_v49  ;;  %v18375_v51 = vunpack.i.l.bf16 %v18374_v49 }
 0x2d0   : > { %v1076_v6 = vpack.c.bf16 %v18411_v58, %v18410_v59 }
 0x2d1   : > { %v18419_v55 = vpop.permute.xlu0 %18418  ;;  %v1073_v56 = vpack.c.bf16 %v18376_v50, %v18375_v51 }
 0x2d2   : > { %v18384_v57 = vpop.permute.xlu1 %18383  ;;  %v1661_v18 = vsel %vm1186_vm2, %v1076_v6, 0  ;;  %v18421_v20 = vunpack.i.h.bf16 %v18419_v55  ;;  %v18420_v21 = vunpack.i.l.bf16 %v18419_v55 }
 0x2d3   : > { %17028 = vmatmul.mubr.msk.bf16.vlgmr.msra.gmra.mrb[16].mxu0 %vm1186_vm2, %v967_v54  ;;  %17034 = vmatmul.mubr.msk.bf16.vlgmr.msra.gmra.mrb[16].mxu1 %vm1186_vm2, %v968_v53  ;;  %v1520_v61 = vsel %vm1186_vm2, %v1073_v56, 0  ;;  %v18386_v0 = vunpack.i.h.bf16 %v18384_v57  ;;  %v18385_v1 = vunpack.i.l.bf16 %v18384_v57 }
 0x2d4   : > { %17044 = vmatpush3.bf16.xpose.msra.mxu1 %v1567_v60  ;;  %17038 = vmatpush3.bf16.xpose.msra.mxu0 %v1520_v61  ;;  %v972_v29 = vpack.c.bf16 %v18421_v20, %v18420_v21 }
 0x2d5   : > { %v18429_v2 = vpop.permute.xlu0 %18428  ;;  %17039 = vmatprep.mubr.msk.bf16.mxu0 %vm20189_vm1, %v24448_v10  ;;  %17045 = vmatprep.mubr.msk.bf16.mxu1 %vm20189_vm1, %v24448_v10  ;;  %v969_v12 = vpack.c.bf16 %v18386_v0, %v18385_v1 }
 0x2d6   : > { %v18394_v3 = vpop.permute.xlu1 %18393  ;;  %17055 = vmatprep.subr.bf16.mxu1 %v24448_v10  ;;  %17049 = vmatprep.subr.bf16.mxu0 %v24448_v10  ;;  %v18431_v16 = vunpack.i.h.bf16 %v18429_v2  ;;  %v18430_v17 = vunpack.i.l.bf16 %v18429_v2 }
 0x2d7   : > { %v18396_v4 = vunpack.i.h.bf16 %v18394_v3  ;;  %v18395_v5 = vunpack.i.l.bf16 %v18394_v3 }
 0x2d8   : > { %v1078_v27 = vpack.c.bf16 %v18431_v16, %v18430_v17 }
 0x2d9   : > { %v1075_v13 = vpack.c.bf16 %v18396_v4, %v18395_v5  ;;  %v18439_v15 = vpop.permute.xlu0 %18438 }
 0x2da   : > { %v18404_v14 = vpop.permute.xlu1 %18403  ;;  %v1755_v41 = vsel %vm1186_vm2, %v1078_v27, 0  ;;  %v18441_v45 = vunpack.i.h.bf16 %v18439_v15  ;;  %v18440_v46 = vunpack.i.l.bf16 %v18439_v15 }
 0x2db   : > { %17040 = vmatmul.mubr.msk.bf16.vlgmr.msra.gmra.mrb[20].mxu0 %vm1186_vm2, %v969_v12  ;;  %17046 = vmatmul.mubr.msk.bf16.vlgmr.msra.gmra.mrb[20].mxu1 %vm1186_vm2, %v970_v7  ;;  %v1614_v19 = vsel %vm1186_vm2, %v1075_v13, 0  ;;  %v18406_v22 = vunpack.i.h.bf16 %v18404_v14  ;;  %v18405_v24 = vunpack.i.l.bf16 %v18404_v14 }
 0x2dc   : > { %17056 = vmatpush3.bf16.xpose.msra.mxu1 %v1661_v18  ;;  %17050 = vmatpush3.bf16.xpose.msra.mxu0 %v1614_v19  ;;  %v974_v54 = vpack.c.bf16 %v18441_v45, %v18440_v46 }
 0x2dd   : > { %17051 = vmatprep.mubr.msk.bf16.mxu0 %vm20189_vm1, %v24448_v10  ;;  %17057 = vmatprep.mubr.msk.bf16.mxu1 %vm20189_vm1, %v24448_v10  ;;  %v18449_v28 = vpop.permute.xlu0 %18448  ;;  %v971_v30 = vpack.c.bf16 %v18406_v22, %v18405_v24 }
 0x2de   : > { %v18414_v25 = vpop.permute.xlu1 %18413  ;;  %17067 = vmatprep.subr.bf16.mxu1 %v24448_v10  ;;  %17061 = vmatprep.subr.bf16.mxu0 %v24448_v10  ;;  %v18451_v36 = vunpack.i.h.bf16 %v18449_v28  ;;  %v18450_v39 = vunpack.i.l.bf16 %v18449_v28 }
 0x2df   : > { %v18416_v23 = vunpack.i.h.bf16 %v18414_v25  ;;  %v18415_v26 = vunpack.i.l.bf16 %v18414_v25 }
 0x2e0   : > { %v1080_v53 = vpack.c.bf16 %v18451_v36, %v18450_v39 }
 0x2e1   : > { %v1077_v32 = vpack.c.bf16 %v18416_v23, %v18415_v26  ;;  %v18459_v57 = vpop.permute.xlu0 %18458 }
 0x2e2   : > { %v18424_v33 = vpop.permute.xlu1 %18423  ;;  %v1849_v59 = vsel %vm1186_vm2, %v1080_v53, 0  ;;  %v18461_v61 = vunpack.i.h.bf16 %v18459_v57  ;;  %v18460_v62 = vunpack.i.l.bf16 %v18459_v57 }
 0x2e3   : > { %17052 = vmatmul.mubr.msk.bf16.vlgmr.msra.gmra.mrb[24].mxu0 %vm1186_vm2, %v971_v30  ;;  %17058 = vmatmul.mubr.msk.bf16.vlgmr.msra.gmra.mrb[24].mxu1 %vm1186_vm2, %v972_v29  ;;  %v1708_v44 = vsel %vm1186_vm2, %v1077_v32, 0  ;;  %v18426_v48 = vunpack.i.h.bf16 %v18424_v33  ;;  %v18425_v49 = vunpack.i.l.bf16 %v18424_v33 }
 0x2e4   : > { %17068 = vmatpush3.bf16.xpose.msra.mxu1 %v1755_v41  ;;  %17062 = vmatpush3.bf16.xpose.msra.mxu0 %v1708_v44  ;;  %v976_v4 = vpack.c.bf16 %v18461_v61, %v18460_v62 }
 0x2e5   : > { %17063 = vmatprep.mubr.msk.bf16.mxu0 %vm20189_vm1, %v24448_v10  ;;  %17069 = vmatprep.mubr.msk.bf16.mxu1 %vm20189_vm1, %v24448_v10  ;;  %v973_v55 = vpack.c.bf16 %v18426_v48, %v18425_v49 }
 0x2e6   : > { %v18434_v50 = vpop.permute.xlu1 %18433  ;;  %17079 = vmatprep.subr.bf16.mxu1 %v24448_v10  ;;  %17073 = vmatprep.subr.bf16.mxu0 %v24448_v10 }
 0x2e7   : > { %v18436_v51 = vunpack.i.h.bf16 %v18434_v50  ;;  %v18435_v52 = vunpack.i.l.bf16 %v18434_v50 }
 0x2e9   : > { %v1079_v56 = vpack.c.bf16 %v18436_v51, %v18435_v52 }
 0x2ea   : > { %v18444_v58 = vpop.permute.xlu1 %18443 }
 0x2eb   : > { %17064 = vmatmul.mubr.msk.bf16.vlgmr.msra.gmra.mrb[28].mxu0 %vm1186_vm2, %v973_v55  ;;  %17070 = vmatmul.mubr.msk.bf16.vlgmr.msra.gmra.mrb[28].mxu1 %vm1186_vm2, %v974_v54  ;;  %v1802_v60 = vsel %vm1186_vm2, %v1079_v56, 0  ;;  %v18446_v63 = vunpack.i.h.bf16 %v18444_v58  ;;  %v18445_v0 = vunpack.i.l.bf16 %v18444_v58 }
 0x2ec   : > { %17080 = vmatpush3.bf16.xpose.msra.mxu1 %v1849_v59  ;;  %17074 = vmatpush3.bf16.xpose.msra.mxu0 %v1802_v60 }
 0x2ed   : > { %17075 = vmatprep.mubr.msk.bf16.mxu0 %vm20189_vm1, %v24448_v10  ;;  %17081 = vmatprep.mubr.msk.bf16.mxu1 %vm20189_vm1, %v24448_v10  ;;  %v975_v5 = vpack.c.bf16 %v18446_v63, %v18445_v0 }
 0x2ee   : > { %v18454_v1 = vpop.permute.xlu1 %18453  ;;  %17091 = vmatprep.subr.bf16.mxu1 %v24448_v10  ;;  %17085 = vmatprep.subr.bf16.mxu0 %v24448_v10 }
 0x2ef   : > { %v18456_v2 = vunpack.i.h.bf16 %v18454_v1  ;;  %v18455_v3 = vunpack.i.l.bf16 %v18454_v1 }
 0x2f1   : > { %v1081_v6 = vpack.c.bf16 %v18456_v2, %v18455_v3 }
 0x2f2   : > { %v18464_v7 = vpop.permute.xlu1 %18463 }
 0x2f3   : > { %17076 = vmatmul.mubr.msk.bf16.vlgmr.msra.gmra.mrb[32].mxu0 %vm1186_vm2, %v975_v5  ;;  %17082 = vmatmul.mubr.msk.bf16.vlgmr.msra.gmra.mrb[32].mxu1 %vm1186_vm2, %v976_v4  ;;  %v1896_v12 = vsel %vm1186_vm2, %v1081_v6, 0  ;;  %v18466_v13 = vunpack.i.h.bf16 %v18464_v7  ;;  %v18465_v14 = vunpack.i.l.bf16 %v18464_v7 }
 0x2f4   : > { %17092 = vmatpush3.bf16.msra.mxu1 %v1170_v42  ;;  %17086 = vmatpush3.bf16.xpose.msra.mxu0 %v1896_v12  ;;  %v20197_v42 = vmov -1e+30  }
 0x2f5   : > { %17087 = vmatprep.mubr.msk.bf16.mxu0 %vm20189_vm1, %v24448_v10  ;;  %17097 = vmatprep.subr.bf16.mxu0 %v24448_v10  ;;  %v977_v15 = vpack.c.bf16 %v18466_v13, %v18465_v14  ;;  %v20618_v16 = vsel %vm536_vm3, 0.0, %v20197_v42  ;;  %v20620_v31 = vsel %vm537_vm4, 0.0, %v20197_v42 }
 0x2f6   : > { %17093 = vmatprep.mubr.msk.bf16.mxu1 %vm20189_vm1, %v24448_v10  ;;  %17103 = vmatprep.subr.bf16.mxu1 %v24448_v10  ;;  %24485 = vst [vmem:[#allocation14_spill] sm:$0xff] %v20618_v16  ;;  %24486 = vst [vmem:[#allocation15_spill] sm:$0xff] %v20620_v31 }
 0x2fb   : > { %17088 = vmatmul.mubr.msk.bf16.vlgmr.msra.gmra.mrb[36].mxu0 %vm1186_vm2, %v977_v15 }
 0x2fc   : > { %17098 = vmatpush3.bf16.msra.mxu0 %v1171_v43  ;;  %17099 = vmatprep.mubr.msk.bf16.mxu0 %vm20189_vm1, %v24448_v10 }
 0x2fd   : > { %17109 = vmatprep.subr.bf16.mxu0 %v24448_v10 }
 0x31a   : > { %v1227_v35 = vpop.f32.mrb[4].mxu1 }
 0x31b   : > { %v16999_v43 = vpop.f32.mrb[5].mxu1  ;;  %v20623_v17 = vadd.f32 %v1227_v35, %v20618_v16 }
 0x31c   : > { %v1230_v18 = vpop.f32.mrb[6].mxu1 }
 0x31d   : > { %v17000_v8 = vpop.f32.mrb[7].mxu1  ;;  %v1939_v19 = vsel %vm1186_vm2, %v20623_v17, -inf  ;;  %v20628_v20 = vadd.f32 %v1230_v18, %v20620_v31 }
 0x31e   : > { %1940 = vmax.xlane.f32.xlu0 %v1939_v19 }
 0x31f   : > { %v1942_v9 = vsel %vm1186_vm2, %v20628_v20, -inf }
 0x320   : > { %1943 = vmax.xlane.f32.xlu1 %v1942_v9 }
 0x322   : > { %v1274_v21 = vpop.f32.mrb[8].mxu0 }
 0x323   : > { %v17005_v22 = vpop.f32.mrb[9].mxu0  ;;  %v20633_v24 = vadd.f32 %v1274_v21, %v20618_v16 }
 0x324   : > { %v1277_v25 = vpop.f32.mrb[10].mxu0 }
 0x325   : > { %v17006_v23 = vpop.f32.mrb[11].mxu0  ;;  %v1945_v26 = vsel %vm1186_vm2, %v20633_v24, -inf  ;;  %v20638_v27 = vadd.f32 %v1277_v25, %v20620_v31 }
 0x326   : > { %1946 = vmax.xlane.f32.xlu0 %v1945_v26 }
 0x327   : > { %v1948_v28 = vsel %vm1186_vm2, %v20638_v27, -inf }
 0x32a   : > { %1949 = vmax.xlane.f32.xlu0 %v1948_v28 }
 0x396   : > { %v1321_v29 = vpop.f32.mrb[8].mxu1 }
 0x397   : > { %v17011_v30 = vpop.f32.mrb[9].mxu1  ;;  %v20643_v32 = vadd.f32 %v1321_v29, %v20618_v16 }
 0x398   : > { %v1324_v33 = vpop.f32.mrb[10].mxu1 }
 0x399   : > { %v17012_v36 = vpop.f32.mrb[11].mxu1  ;;  %v1951_v39 = vsel %vm1186_vm2, %v20643_v32, -inf  ;;  %v20648_v41 = vadd.f32 %v1324_v33, %v20620_v31 }
 0x39a   : > { %v1368_v44 = vpop.f32.mrb[12].mxu0  ;;  %1952 = vmax.xlane.f32.xlu0 %v1951_v39 }
 0x39b   : > { %v17017_v45 = vpop.f32.mrb[13].mxu0  ;;  %v1954_v46 = vsel %vm1186_vm2, %v20648_v41, -inf  ;;  %v20653_v48 = vadd.f32 %v1368_v44, %v20618_v16 }
 0x39c   : > { %v1371_v49 = vpop.f32.mrb[14].mxu0  ;;  %1955 = vmax.xlane.f32.xlu1 %v1954_v46 }
 0x39d   : > { %v17018_v50 = vpop.f32.mrb[15].mxu0  ;;  %v1957_v51 = vsel %vm1186_vm2, %v20653_v48, -inf  ;;  %v20658_v52 = vadd.f32 %v1371_v49, %v20620_v31 }
 0x39e   : > { %1958 = vmax.xlane.f32.xlu0 %v1957_v51  ;;  %v1415_v53 = vpop.f32.mrb[12].mxu1 }
 0x39f   : > { %v17023_v54 = vpop.f32.mrb[13].mxu1  ;;  %v1960_v55 = vsel %vm1186_vm2, %v20658_v52, -inf  ;;  %v20663_v56 = vadd.f32 %v1415_v53, %v20618_v16 }
 0x3a0   : > { %1961 = vmax.xlane.f32.xlu1 %v1960_v55  ;;  %v1418_v57 = vpop.f32.mrb[14].mxu1 }
 0x3a1   : > { %v17024_v58 = vpop.f32.mrb[15].mxu1  ;;  %v1963_v59 = vsel %vm1186_vm2, %v20663_v56, -inf  ;;  %v20668_v60 = vadd.f32 %v1418_v57, %v20620_v31 }
 0x3a2   : > { %1964 = vmax.xlane.f32.xlu0 %v1963_v59 }
 0x3a3   : > { %v1966_v61 = vsel %vm1186_vm2, %v20668_v60, -inf }
 0x3a4   : > { %1967 = vmax.xlane.f32.xlu1 %v1966_v61 }
 0x3a6   : > { %v1462_v62 = vpop.f32.mrb[16].mxu0  ;;  %v1509_v63 = vpop.f32.mrb[16].mxu1 }
 0x3a7   : > { %v17029_v0 = vpop.f32.mrb[17].mxu0  ;;  %v17035_v1 = vpop.f32.mrb[17].mxu1  ;;  %v20673_v2 = vadd.f32 %v1462_v62, %v20618_v16  ;;  %v20681_v13 = vadd.f32 %v1509_v63, %v20618_v16 }
 0x3a8   : > { %v1465_v3 = vpop.f32.mrb[18].mxu0  ;;  %v1512_v4 = vpop.f32.mrb[18].mxu1 }
 0x3a9   : > { %v17030_v5 = vpop.f32.mrb[19].mxu0  ;;  %v17036_v6 = vpop.f32.mrb[19].mxu1  ;;  %v1969_v7 = vsel %vm1186_vm2, %v20673_v2, -inf  ;;  %v20678_v12 = vadd.f32 %v1465_v3, %v20620_v31  ;;  %v20686_v15 = vadd.f32 %v1512_v4, %v20620_v31  ;;  %v1975_v37 = vsel %vm1186_vm2, %v20681_v13, -inf }
 0x3aa   : > { %1970 = vmax.xlane.f32.xlu0 %v1969_v7  ;;  %v20713_v3 = vpop.permute.xlu0 %18468 }
 0x3ab   : > { %v1972_v14 = vsel %vm1186_vm2, %v20678_v12, -inf  ;;  %v1978_v8 = vsel %vm1186_vm2, %v20686_v15, -inf }
 0x3ac   : > { %1973 = vmax.xlane.f32.xlu1 %v1972_v14 }
 0x3ae   : > { %v1556_v42 = vpop.f32.mrb[20].mxu0  ;;  %1976 = vmax.xlane.f32.xlu0 %v1975_v37  ;;  %v1603_v35 = vpop.f32.mrb[20].mxu1 }
 0x3af   : > { %v17041_v43 = vpop.f32.mrb[21].mxu0  ;;  %v17047_v18 = vpop.f32.mrb[21].mxu1  ;;  %v20693_v19 = vadd.f32 %v1556_v42, %v20618_v16 }
 0x3b0   : > { %v1559_v9 = vpop.f32.mrb[22].mxu0  ;;  %1979 = vmax.xlane.f32.xlu1 %v1978_v8  ;;  %v1606_v21 = vpop.f32.mrb[22].mxu1 }
 0x3b1   : > { %v17042_v22 = vpop.f32.mrb[23].mxu0  ;;  %v17048_v25 = vpop.f32.mrb[23].mxu1  ;;  %v1981_v23 = vsel %vm1186_vm2, %v20693_v19, -inf }
 0x3b2   : > { %1982 = vmax.xlane.f32.xlu0 %v1981_v23  ;;  %v20719_v14 = vpop.permute.xlu0 %18478  ;;  %v20721_v37 = vpop.permute.xlu1 %18473  ;;  %v20732_v22 = vadd.f32 %v1559_v9, %v20620_v31  ;;  %v20735_v23 = vadd.f32 %v1603_v35, %v20618_v16 }
 0x3b6   : > { %v1650_v26 = vpop.f32.mrb[24].mxu0  ;;  %v1697_v28 = vpop.f32.mrb[24].mxu1 }
 0x3b7   : > { %v17053_v29 = vpop.f32.mrb[25].mxu0  ;;  %v17059_v30 = vpop.f32.mrb[25].mxu1  ;;  %v20746_v9 = vadd.f32 %v1650_v26, %v20618_v16 }
 0x3b8   : > { %v1653_v33 = vpop.f32.mrb[26].mxu0  ;;  %v1700_v36 = vpop.f32.mrb[26].mxu1  ;;  %v1984_v30 = vsel %vm1186_vm2, %v20732_v22, -inf }
 0x3b9   : > { %v17054_v39 = vpop.f32.mrb[27].mxu0  ;;  %v17060_v44 = vpop.f32.mrb[27].mxu1 }
 0x3ba   : > { %v20723_v42 = vpop.permute.xlu0 %18488  ;;  %v20725_v43 = vpop.permute.xlu1 %18483  ;;  %v20740_v39 = vadd.f32 %v1606_v21, %v20620_v31 }
 0x3bc   : > { %v1990_v35 = vsel %vm1186_vm2, %v20740_v39, -inf }
 0x3be   : > { %v1744_v45 = vpop.f32.mrb[28].mxu0  ;;  %v20697_v46 = vpop.f32.mrb[28].mxu1 }
 0x3bf   : > { %v17065_v49 = vpop.f32.mrb[29].mxu0  ;;  %v17071_v50 = vpop.f32.mrb[29].mxu1 }
 0x3c0   : > { %v1747_v51 = vpop.f32.mrb[30].mxu0  ;;  %v20699_v53 = vpop.f32.mrb[30].mxu1  ;;  %v1987_v49 = vsel %vm1186_vm2, %v20735_v23, -inf }
 0x3c1   : > { %v17066_v54 = vpop.f32.mrb[31].mxu0  ;;  %18508 = vrot.lane.b32.xlu1 %v20477_v40, %s24438_s17  ;;  %v17072_v55 = vpop.f32.mrb[31].mxu1 }
 0x3c2   : > { %v20727_v18 = vpop.permute.xlu0 %18493  ;;  %v20729_v8 = vpop.permute.xlu1 %18498  ;;  %v20752_v54 = vadd.f32 %v1653_v33, %v20620_v31 }
 0x3c6   : > { %v20703_v57 = vpop.f32.mrb[32].mxu0  ;;  %v20705_v58 = vpop.f32.mrb[32].mxu1 }
 0x3c7   : > { %v17077_v59 = vpop.f32.mrb[33].mxu0  ;;  %v17083_v61 = vpop.f32.mrb[33].mxu1 }
 0x3c8   : > { %v20707_v62 = vpop.f32.mrb[34].mxu0  ;;  %18503 = vrot.lane.b32.xlu0 %v20473_v38, %s24440_s28  ;;  %v20711_v63 = vpop.f32.mrb[34].mxu1  ;;  %v20757_v59 = vadd.f32 %v1697_v28, %v20618_v16  ;;  %v20762_v61 = vadd.f32 %v1700_v36, %v20620_v31  ;;  %s24494_s28 = smov 32  }
 0x3c9   : > { %v17078_v0 = vpop.f32.mrb[35].mxu0  ;;  %v17084_v1 = vpop.f32.mrb[35].mxu1 }
 0x3ca   : > { %v1941_v25 = vpop.xlane.xlu0 %1940  ;;  %v1944_v29 = vpop.xlane.xlu1 %1943  ;;  %v1999_v33 = vsel %vm1186_vm2, %v20757_v59, -inf  ;;  %v20767_v0 = vadd.f32 %v1744_v45, %v20618_v16  ;;  %v2002_v1 = vsel %vm1186_vm2, %v20762_v61, -inf }
 0x3cb   : > { %v2035_v44 = vsub.f32 %v20623_v17, %v1941_v25  ;;  %v2036_v50 = vsub.f32 %v20628_v20, %v1944_v29  ;;  %v1993_v17 = vsel %vm1186_vm2, %v20746_v9, -inf  ;;  %v1996_v20 = vsel %vm1186_vm2, %v20752_v54, -inf }
 0x3cc   : > { %v20779_v25 = vadd.f32 %v20697_v46, %v20618_v16 }
 0x3cd   : > { %v2067_v21 = vmul.f32 1.442695, %v2035_v44  ;;  %v2069_v26 = vmul.f32 1.442695, %v2036_v50  ;;  %v20800_v50 = vadd.f32 %v20703_v57, %v20618_v16 }
 0x3ce   : > { %v20715_v4 = vpop.f32.mrb[36].mxu0  ;;  %v1947_v55 = vpop.xlane.xlu0 %1946 }
 0x3cf   : > { %v17089_v5 = vpop.f32.mrb[37].mxu0  ;;  %19543 = vpow2.f32 %v2067_v21  ;;  %v2037_v36 = vsub.f32 %v20633_v24, %v1947_v55  ;;  %v2011_v24 = vsel %vm1186_vm2, %v20779_v25, -inf  ;;  %v20806_v21 = vadd.f32 %v20707_v62, %v20620_v31 }
 0x3d0   : > { %v20717_v6 = vpop.f32.mrb[38].mxu0  ;;  %19545 = vpow2.f32 %v2069_v26  ;;  %v20772_v5 = vadd.f32 %v1747_v51, %v20620_v31  ;;  %v20786_v51 = vadd.f32 %v20699_v53, %v20620_v31  ;;  %v2017_v55 = vsel %vm1186_vm2, %v20800_v50, -inf }
 0x3d1   : > { %v17090_v7 = vpop.f32.mrb[39].mxu0  ;;  %v2020_v57 = vsel %vm1186_vm2, %v20806_v21, -inf  ;;  %v20818_v26 = vadd.f32 %v20711_v63, %v20620_v31  ;;  %v20832_v63 = vadd.f32 %v20715_v4, %v20618_v16 }
 0x3d2   : > { %v1950_v28 = vpop.xlane.xlu0 %1949  ;;  %v2005_v7 = vsel %vm1186_vm2, %v20767_v0, -inf  ;;  %v2008_v29 = vsel %vm1186_vm2, %v20772_v5, -inf }
 0x3d3   : > { %v2038_v45 = vsub.f32 %v20638_v27, %v1950_v28  ;;  %v2014_v27 = vsel %vm1186_vm2, %v20786_v51, -inf }
 0x3d9   : > { %v20790_v44 = vpop.eup %19543 }
 0x3da   : > { %v20794_v46 = vpop.eup %19545  ;;  %v2131_v53 = vsel %vm1186_vm2, %v20790_v44, 0.0 }
 0x3e5   : > { %1985 = vmax.xlane.f32.xlu1 %v1984_v30  ;;  %v2071_v30 = vmul.f32 1.442695, %v2037_v36  ;;  %v20838_v36 = vadd.f32 %v20717_v6, %v20620_v31 }
 0x3e7   : > { %1988 = vmax.xlane.f32.xlu0 %v1987_v49  ;;  %v2073_v49 = vmul.f32 1.442695, %v2038_v45  ;;  %19547 = vpow2.f32 %v2071_v30  ;;  %v2032_v45 = vsel %vm1186_vm2, %v20838_v36, -inf }
 0x3e9   : > { %1991 = vmax.xlane.f32.xlu1 %v1990_v35  ;;  %19549 = vpow2.f32 %v2073_v49  ;;  %v2134_v35 = vsel %vm1186_vm2, %v20794_v46, 0.0 }
 0x3eb   : > { %1994 = vmax.xlane.f32.xlu0 %v1993_v17  ;;  %v20812_v17 = vadd.f32 %v20705_v58, %v20618_v16 }
 0x3ed   : > { %1997 = vmax.xlane.f32.xlu1 %v1996_v20  ;;  %v2023_v62 = vsel %vm1186_vm2, %v20812_v17, -inf }
 0x3ef   : > { %2000 = vmax.xlane.f32.xlu0 %v1999_v33  ;;  %v2026_v33 = vsel %vm1186_vm2, %v20818_v26, -inf }
 0x3f1   : > { %2003 = vmax.xlane.f32.xlu1 %v2002_v1  ;;  %v20822_v20 = vpop.eup %19547 }
 0x3f2   : > { %v2137_v28 = vsel %vm1186_vm2, %v20822_v20, 0.0 }
 0x3f3   : > { %2006 = vmax.xlane.f32.xlu0 %v2005_v7  ;;  %v20826_v58 = vpop.eup %19549  ;;  %v2029_v7 = vsel %vm1186_vm2, %v20832_v63, -inf }
 0x3f4   : > { %v2140_v1 = vsel %vm1186_vm2, %v20826_v58, 0.0 }
 0x3f5   : > { %2009 = vmax.xlane.f32.xlu1 %v2008_v29 }
 0x3f7   : > { %2012 = vmax.xlane.f32.xlu0 %v2011_v24 }
 0x3f9   : > { %2015 = vmax.xlane.f32.xlu1 %v2014_v27 }
 0x3fb   : > { %2132 = vadd.xlane.f32.xlu0 %v2131_v53 }
 0x3fd   : > { %2135 = vadd.xlane.f32.xlu1 %v2134_v35 }
 0x3ff   : > { %2018 = vmax.xlane.f32.xlu0 %v2017_v55 }
 0x401   : > { %2021 = vmax.xlane.f32.xlu1 %v2020_v57 }
 0x403   : > { %2024 = vmax.xlane.f32.xlu0 %v2023_v62 }
 0x405   : > { %2027 = vmax.xlane.f32.xlu1 %v2026_v33 }
 0x407   : > { %2138 = vadd.xlane.f32.xlu0 %v2137_v28 }
 0x409   : > { %2141 = vadd.xlane.f32.xlu1 %v2140_v1 }
 0x40b   : > { %2030 = vmax.xlane.f32.xlu0 %v2029_v7 }
 0x40d   : > { %2033 = vmax.xlane.f32.xlu1 %v2032_v45 }
 0x427   : > { %v1953_v29 = vpop.xlane.xlu0 %1952 }
 0x428   : > { %v2039_v4 = vsub.f32 %v20643_v32, %v1953_v29 }
 0x429   : > { %v1956_v30 = vpop.xlane.xlu1 %1955 }
 0x42a   : > { %v2075_v24 = vmul.f32 1.442695, %v2039_v4  ;;  %v2040_v49 = vsub.f32 %v20648_v41, %v1956_v30 }
 0x42b   : > { %v1959_v27 = vpop.xlane.xlu0 %1958 }
 0x42c   : > { %19551 = vpow2.f32 %v2075_v24  ;;  %v2077_v6 = vmul.f32 1.442695, %v2040_v49  ;;  %v2041_v53 = vsub.f32 %v20653_v48, %v1959_v27 }
 0x42d   : > { %v1962_v35 = vpop.xlane.xlu1 %1961 }
 0x42e   : > { %19553 = vpow2.f32 %v2077_v6  ;;  %v2079_v55 = vmul.f32 1.442695, %v2041_v53  ;;  %v2042_v57 = vsub.f32 %v20658_v52, %v1962_v35 }
 0x42f   : > { %v1965_v62 = vpop.xlane.xlu0 %1964 }
 0x430   : > { %19555 = vpow2.f32 %v2079_v55  ;;  %v2081_v33 = vmul.f32 1.442695, %v2042_v57  ;;  %v2043_v28 = vsub.f32 %v20663_v56, %v1965_v62 }
 0x431   : > { %v1968_v32 = vpop.xlane.xlu1 %1967 }
 0x432   : > { %19557 = vpow2.f32 %v2081_v33  ;;  %v2083_v1 = vmul.f32 1.442695, %v2043_v28  ;;  %v2044_v41 = vsub.f32 %v20668_v60, %v1968_v32 }
 0x434   : > { %19559 = vpow2.f32 %v2083_v1  ;;  %v2085_v7 = vmul.f32 1.442695, %v2044_v41 }
 0x436   : > { %v20850_v45 = vpop.eup %19551  ;;  %19561 = vpow2.f32 %v2085_v7 }
 0x437   : > { %v1971_v48 = vpop.xlane.xlu0 %1970  ;;  %v2143_v29 = vsel %vm1186_vm2, %v20850_v45, 0.0 }
 0x438   : > { %v20854_v52 = vpop.eup %19553  ;;  %v2045_v4 = vsub.f32 %v20673_v2, %v1971_v48  ;;  %2144 = vadd.xlane.f32.xlu0 %v2143_v29 }
 0x439   : > { %v1974_v56 = vpop.xlane.xlu1 %1973  ;;  %v2146_v30 = vsel %vm1186_vm2, %v20854_v52, 0.0 }
 0x43a   : > { %v20859_v24 = vpop.eup %19555  ;;  %v2087_v60 = vmul.f32 1.442695, %v2045_v4  ;;  %v2046_v49 = vsub.f32 %v20678_v12, %v1974_v56  ;;  %2147 = vadd.xlane.f32.xlu1 %v2146_v30 }
 0x43b   : > { %v1977_v27 = vpop.xlane.xlu0 %1976  ;;  %v2149_v6 = vsel %vm1186_vm2, %v20859_v24, 0.0 }
 0x43c   : > { %v20864_v53 = vpop.eup %19557  ;;  %19563 = vpow2.f32 %v2087_v60  ;;  %v2047_v2 = vsub.f32 %v20681_v13, %v1977_v27  ;;  %2150 = vadd.xlane.f32.xlu0 %v2149_v6  ;;  %v2089_v62 = vmul.f32 1.442695, %v2046_v49 }
 0x43d   : > { %v1980_v35 = vpop.xlane.xlu1 %1979  ;;  %v2152_v55 = vsel %vm1186_vm2, %v20864_v53, 0.0 }
 0x43e   : > { %v20869_v57 = vpop.eup %19559  ;;  %v2091_v33 = vmul.f32 1.442695, %v2047_v2  ;;  %v2048_v12 = vsub.f32 %v20686_v15, %v1980_v35  ;;  %2153 = vadd.xlane.f32.xlu1 %v2152_v55 }
 0x43f   : > { %v1983_v28 = vpop.xlane.xlu0 %1982  ;;  %v2155_v32 = vsel %vm1186_vm2, %v20869_v57, 0.0 }
 0x440   : > { %v20874_v1 = vpop.eup %19561  ;;  %19565 = vpow2.f32 %v2091_v33  ;;  %v2049_v13 = vsub.f32 %v20693_v19, %v1983_v28  ;;  %2156 = vadd.xlane.f32.xlu0 %v2155_v32  ;;  %v2093_v7 = vmul.f32 1.442695, %v2048_v12 }
 0x441   : > { %v2158_v41 = vsel %vm1186_vm2, %v20874_v1, 0.0  ;;  %19567 = vpow2.f32 %v2089_v62  ;;  %v20899_v2 = vpop.permute.xlu1 %18508 }
 0x442   : > { %v2095_v48 = vmul.f32 1.442695, %v2049_v13  ;;  %2159 = vadd.xlane.f32.xlu1 %v2158_v41 }
 0x443   : > { %v20901_v35 = vpop.permute.xlu0 %18503 }
 0x444   : > { %19569 = vpow2.f32 %v2095_v48 }
 0x445   : > { %19571 = vpow2.f32 %v2093_v7 }
 0x446   : > { %v20879_v15 = vpop.eup %19563 }
 0x447   : > { %v2161_v29 = vsel %vm1186_vm2, %v20879_v15, 0.0 }
 0x448   : > { %2162 = vadd.xlane.f32.xlu0 %v2161_v29 }
 0x44a   : > { %v20883_v4 = vpop.eup %19565 }
 0x44b   : > { %v2167_v19 = vsel %vm1186_vm2, %v20883_v4, 0.0  ;;  %v20887_v56 = vpop.eup %19567 }
 0x44c   : > { %2168 = vadd.xlane.f32.xlu1 %v2167_v19  ;;  %v2164_v49 = vsel %vm1186_vm2, %v20887_v56, 0.0 }
 0x44e   : > { %v20889_v30 = vpop.eup %19569 }
 0x44f   : > { %v2173_v60 = vsel %vm1186_vm2, %v20889_v30, 0.0  ;;  %v20895_v27 = vpop.eup %19571 }
 0x450   : > { %2174 = vadd.xlane.f32.xlu0 %v2173_v60  ;;  %2165 = vadd.xlane.f32.xlu1 %v2164_v49  ;;  %v2170_v6 = vsel %vm1186_vm2, %v20895_v27, 0.0 }
 0x454   : > { %2171 = vadd.xlane.f32.xlu1 %v2170_v6 }
 0x472   : > { %v1986_v55 = vpop.xlane.xlu1 %1985 }
 0x473   : > { %v2050_v62 = vsub.f32 %v20732_v22, %v1986_v55 }
 0x474   : > { %v1989_v33 = vpop.xlane.xlu0 %1988 }
 0x475   : > { %v2051_v12 = vsub.f32 %v20735_v23, %v1989_v33  ;;  %v2097_v32 = vmul.f32 1.442695, %v2050_v62 }
 0x476   : > { %v1992_v28 = vpop.xlane.xlu1 %1991 }
 0x477   : > { %v2099_v13 = vmul.f32 1.442695, %v2051_v12  ;;  %v2052_v41 = vsub.f32 %v20740_v39, %v1992_v28 }
 0x478   : > { %v1995_v7 = vpop.xlane.xlu0 %1994 }
 0x479   : > { %19573 = vpow2.f32 %v2099_v13  ;;  %v2053_v48 = vsub.f32 %v20746_v9, %v1995_v7  ;;  %v2101_v19 = vmul.f32 1.442695, %v2052_v41 }
 0x47a   : > { %v1998_v29 = vpop.xlane.xlu1 %1997  ;;  %19575 = vpow2.f32 %v2097_v32 }
 0x47b   : > { %v2103_v60 = vmul.f32 1.442695, %v2053_v48  ;;  %v2054_v6 = vsub.f32 %v20752_v54, %v1998_v29 }
 0x47c   : > { %v2001_v49 = vpop.xlane.xlu0 %2000 }
 0x47d   : > { %19577 = vpow2.f32 %v2103_v60  ;;  %v2055_v22 = vsub.f32 %v20757_v59, %v2001_v49  ;;  %v2105_v33 = vmul.f32 1.442695, %v2054_v6 }
 0x47e   : > { %v2004_v23 = vpop.xlane.xlu1 %2003  ;;  %19579 = vpow2.f32 %v2101_v19 }
 0x47f   : > { %v2107_v55 = vmul.f32 1.442695, %v2055_v22  ;;  %v2056_v39 = vsub.f32 %v20762_v61, %v2004_v23 }
 0x480   : > { %v2007_v62 = vpop.xlane.xlu0 %2006 }
 0x481   : > { %19581 = vpow2.f32 %v2107_v55  ;;  %v2109_v54 = vmul.f32 1.442695, %v2056_v39  ;;  %v2057_v61 = vsub.f32 %v20767_v0, %v2007_v62 }
 0x482   : > { %v2010_v12 = vpop.xlane.xlu1 %2009  ;;  %19583 = vpow2.f32 %v2105_v33 }
 0x483   : > { %v20910_v28 = vpop.eup %19573  ;;  %v2058_v9 = vsub.f32 %v20772_v5, %v2010_v12  ;;  %v2111_v23 = vmul.f32 1.442695, %v2057_v61 }
 0x484   : > { %v2013_v32 = vpop.xlane.xlu0 %2012  ;;  %v2179_v13 = vsel %vm1186_vm2, %v20910_v28, 0.0  ;;  %v20915_v59 = vpop.eup %19575 }
 0x485   : > { %v2113_v41 = vmul.f32 1.442695, %v2058_v9  ;;  %2180 = vadd.xlane.f32.xlu1 %v2179_v13  ;;  %v2176_v60 = vsel %vm1186_vm2, %v20915_v59, 0.0  ;;  %v2059_v6 = vsub.f32 %v20779_v25, %v2013_v32 }
 0x486   : > { %v2016_v7 = vpop.xlane.xlu1 %2015 }
 0x487   : > { %v20917_v48 = vpop.eup %19577  ;;  %19585 = vpow2.f32 %v2113_v41  ;;  %v2060_v29 = vsub.f32 %v20786_v51, %v2016_v7  ;;  %v2115_v39 = vmul.f32 1.442695, %v2059_v6 }
 0x488   : > { %v2133_v19 = vpop.xlane.xlu0 %2132  ;;  %v2185_v5 = vsel %vm1186_vm2, %v20917_v48, 0.0  ;;  %v20925_v49 = vpop.eup %19579  ;;  %19587 = vpow2.f32 %v2109_v54 }
 0x489   : > { %v2117_v22 = vmul.f32 1.442695, %v2060_v29  ;;  %2186 = vadd.xlane.f32.xlu0 %v2185_v5  ;;  %2177 = vadd.xlane.f32.xlu1 %v2176_v60  ;;  %19589 = vrcp.f32 %v2133_v19  ;;  %v2182_v55 = vsel %vm1186_vm2, %v20925_v49, 0.0 }
 0x48a   : > { %v2136_v0 = vpop.xlane.xlu1 %2135 }
 0x48b   : > { %19591 = vpow2.f32 %v2117_v22  ;;  %v20930_v62 = vpop.eup %19581 }
 0x48c   : > { %19593 = vrcp.f32 %v2136_v0  ;;  %v2019_v51 = vpop.xlane.xlu0 %2018  ;;  %v20934_v25 = vpop.eup %19583  ;;  %v2191_v13 = vsel %vm1186_vm2, %v20930_v62, 0.0  ;;  %v18471_v0 = vunpack.i.h.bf16 %v20713_v3 }
 0x48d   : > { %2183 = vadd.xlane.f32.xlu1 %v2182_v55  ;;  %19595 = vpow2.f32 %v2111_v23  ;;  %v2061_v12 = vsub.f32 %v20800_v50, %v2019_v51  ;;  %v2188_v60 = vsel %vm1186_vm2, %v20934_v25, 0.0  ;;  %v18470_v23 = vunpack.i.l.bf16 %v20713_v3 }
 0x48e   : > { %v2022_v33 = vpop.xlane.xlu1 %2021  ;;  %19597 = vpow2.f32 %v2115_v39 }
 0x48f   : > { %v2062_v9 = vsub.f32 %v20806_v21, %v2022_v33  ;;  %v2119_v50 = vmul.f32 1.442695, %v2061_v12 }
 0x490   : > { %v2025_v32 = vpop.xlane.xlu0 %2024 }
 0x491   : > { %v20938_v54 = vpop.eup %19585  ;;  %v2121_v41 = vmul.f32 1.442695, %v2062_v9  ;;  %2192 = vadd.xlane.f32.xlu1 %v2191_v13  ;;  %v2063_v21 = vsub.f32 %v20812_v17, %v2025_v32 }
 0x492   : > { %v20940_v7 = vpop.xlane.xlu1 %2027  ;;  %v2200_v61 = vsel %vm1186_vm2, %v20938_v54, 0.0  ;;  %v20944_v29 = vpop.eup %19587 }
 0x493   : > { %19599 = vpow2.f32 %v2121_v41  ;;  %2201 = vadd.xlane.f32.xlu0 %v2200_v61  ;;  %v19590_v19 = vpop.eup %19589  ;;  %v2123_v33 = vmul.f32 1.442695, %v2063_v21  ;;  %v2194_v9 = vsel %vm1186_vm2, %v20944_v29, 0.0  ;;  %v1172_v41 = vpack.c.bf16 %v18471_v0, %v18470_v23 }
 0x494   : > { %v2139_v5 = vpop.xlane.xlu0 %2138  ;;  %v2259_v17 = vmul.f32 %v19590_v19, %v20790_v44  ;;  %v18475_v0 = vunpack.i.l.bf16 %v20721_v37 }
 0x495   : > { %v20949_v22 = vpop.eup %19591  ;;  %2189 = vadd.xlane.f32.xlu1 %v2188_v60  ;;  %19601 = vrcp.f32 %v2139_v5 }
 0x496   : > { %v19594_v6 = vpop.eup %19593  ;;  %v2142_v51 = vpop.xlane.xlu1 %2141  ;;  %v2206_v55 = vsel %vm1186_vm2, %v20949_v22, 0.0  ;;  %19603 = vpow2.f32 %v2119_v50 }
 0x497   : > { %v2260_v39 = vmul.f32 %v19594_v6, %v20794_v46  ;;  %2207 = vadd.xlane.f32.xlu0 %v2206_v55  ;;  %19605 = vrcp.f32 %v2142_v51  ;;  %v20959_v32 = vpop.eup %19595  ;;  %v18476_v6 = vunpack.i.h.bf16 %v20721_v37 }
 0x498   : > { %v2031_v12 = vpop.xlane.xlu0 %2030  ;;  %19607 = vpow2.f32 %v2123_v33  ;;  %v20963_v44 = vpop.eup %19597  ;;  %v2197_v46 = vsel %vm1186_vm2, %v20959_v32, 0.0 }
 0x499   : > { %v2065_v3 = vsub.f32 %v20832_v63, %v2031_v12  ;;  %2195 = vadd.xlane.f32.xlu1 %v2194_v9  ;;  %v2291_v13 = vpack.c.bf16 %v2260_v39, %v2259_v17  ;;  %v2203_v19 = vsel %vm1186_vm2, %v20963_v44, 0.0  ;;  %v1173_v33 = vpack.c.bf16 %v18476_v6, %v18475_v0 }
 0x49a   : > { %v2034_v9 = vpop.xlane.xlu1 %2033  ;;  %v18480_v6 = vunpack.i.l.bf16 %v20719_v14 }
 0x49b   : > { %v2127_v61 = vmul.f32 1.442695, %v2065_v3  ;;  %17094 = vmatmul.mubr.msk.bf16.vlgmr.msra.gmra.mrb[36].mxu1 %vm1186_vm2, %v2291_v13  ;;  %v2066_v13 = vsub.f32 %v20838_v36, %v2034_v9 }
 0x49c   : > { %17104 = vmatpush3.bf16.msra.mxu1 %v1172_v41  ;;  %17105 = vmatprep.mubr.msk.bf16.mxu1 %vm20189_vm1, %v24448_v10 }
 0x49d   : > { %v20969_v50 = vpop.eup %19599  ;;  %2198 = vadd.xlane.f32.xlu1 %v2197_v46  ;;  %17115 = vmatprep.subr.bf16.mxu1 %v24448_v10  ;;  %19609 = vpow2.f32 %v2127_v61  ;;  %v2129_v41 = vmul.f32 1.442695, %v2066_v13 }
 0x49e   : > { %v2212_v63 = vsel %vm1186_vm2, %v20969_v50, 0.0 }
 0x49f   : > { %2213 = vadd.xlane.f32.xlu0 %v2212_v63  ;;  %v19602_v21 = vpop.eup %19601 }
 0x4a0   : > { %v20976_v5 = vpop.eup %19603  ;;  %v2261_v23 = vmul.f32 %v19602_v21, %v20822_v20 }
 0x4a1   : > { %2204 = vadd.xlane.f32.xlu1 %v2203_v19  ;;  %v19606_v60 = vpop.eup %19605  ;;  %v2209_v55 = vsel %vm1186_vm2, %v20976_v5, 0.0 }
 0x4a2   : > { %v2262_v51 = vmul.f32 %v19606_v60, %v20826_v58  ;;  %v20984_v17 = vpop.eup %19607  ;;  %v2064_v58 = vsub.f32 %v20818_v26, %v20940_v7 }
 0x4a3   : > { %v2215_v12 = vsel %vm1186_vm2, %v20984_v17, 0.0 }
 0x4a4   : > { %v2292_v39 = vpack.c.bf16 %v2262_v51, %v2261_v23  ;;  %v2125_v3 = vmul.f32 1.442695, %v2064_v58  ;;  %v18485_v58 = vunpack.i.l.bf16 %v20725_v43 }
 0x4a5   : > { %2210 = vadd.xlane.f32.xlu1 %v2209_v55 }
 0x4a6   : > { %17100 = vmatmul.mubr.msk.bf16.vlgmr.msra.gmra.mrb[40].mxu0 %vm1186_vm2, %v2292_v39  ;;  %19611 = vpow2.f32 %v2125_v3 }
 0x4a7   : > { %17110 = vmatpush3.bf16.msra.mxu0 %v1173_v33  ;;  %17111 = vmatprep.mubr.msk.bf16.mxu0 %vm20189_vm1, %v24448_v10  ;;  %v20991_v37 = vpop.eup %19609 }
 0x4a8   : > { %17121 = vmatprep.subr.bf16.mxu0 %v24448_v10  ;;  %v2221_v20 = vsel %vm1186_vm2, %v20991_v37, 0.0 }
 0x4a9   : > { %2216 = vadd.xlane.f32.xlu1 %v2215_v12 }
 0x4ad   : > { %2222 = vadd.xlane.f32.xlu1 %v2221_v20  ;;  %v18486_v20 = vunpack.i.h.bf16 %v20725_v43 }
 0x4b0   : > { %v21009_v63 = vpop.eup %19611 }
 0x4b1   : > { %v2218_v51 = vsel %vm1186_vm2, %v21009_v63, 0.0 }
 0x4b5   : > { %18513 = vrot.lane.b32.xlu0 %v20473_v38, %s24438_s17  ;;  %s24495_s17 = smov 16  }
 0x4be   : > { %18518 = vrot.lane.b32.xlu1 %v20477_v40, %s24436_s23 }
 0x4c2   : > { %18523 = vrot.lane.b32.xlu1 %v20473_v38, %s24436_s23  ;;  %s24499_s23 = smov 112  }
 0x4c5   : > { %v2145_v61 = vpop.xlane.xlu0 %2144 }
 0x4c6   : > { %19613 = vrcp.f32 %v2145_v61  ;;  %18528 = vrot.lane.b32.xlu1 %v20477_v40, %s24434_s21  ;;  %v18481_v40 = vunpack.i.h.bf16 %v20719_v14 }
 0x4c7   : > { %v2148_v46 = vpop.xlane.xlu1 %2147 }
 0x4c8   : > { %19615 = vrcp.f32 %v2148_v46  ;;  %v1174_v12 = vpack.c.bf16 %v18481_v40, %v18480_v6 }
 0x4c9   : > { %19617 = vpow2.f32 %v2129_v41  ;;  %v2151_v26 = vpop.xlane.xlu0 %2150  ;;  %v1175_v41 = vpack.c.bf16 %v18486_v20, %v18485_v58 }
 0x4ca   : > { %19619 = vrcp.f32 %v2151_v26  ;;  %18533 = vrot.lane.b32.xlu1 %v20473_v38, %s24434_s21  ;;  %s24490_s21 = smov 96  }
 0x4cb   : > { %v2154_v7 = vpop.xlane.xlu1 %2153 }
 0x4cc   : > { %19621 = vrcp.f32 %v2154_v7 }
 0x4cd   : > { %v2157_v36 = vpop.xlane.xlu0 %2156 }
 0x4ce   : > { %19623 = vrcp.f32 %v2157_v36 }
 0x4cf   : > { %v2160_v21 = vpop.xlane.xlu1 %2159 }
 0x4d0   : > { %v19614_v19 = vpop.eup %19613  ;;  %19625 = vrcp.f32 %v2160_v21 }
 0x4d1   : > { %v2263_v23 = vmul.f32 %v19614_v19, %v20850_v45  ;;  %v18496_v19 = vunpack.i.h.bf16 %v20727_v18 }
 0x4d2   : > { %v19616_v60 = vpop.eup %19615 }
 0x4d3   : > { %v21013_v0 = vpop.eup %19617  ;;  %v2264_v38 = vmul.f32 %v19616_v60, %v20854_v52  ;;  %v18495_v60 = vunpack.i.l.bf16 %v20727_v18 }
 0x4d4   : > { %v19620_v55 = vpop.eup %19619  ;;  %2219 = vadd.xlane.f32.xlu0 %v2218_v51  ;;  %v2224_v45 = vsel %vm1186_vm2, %v21013_v0, 0.0  ;;  %v18501_v51 = vunpack.i.h.bf16 %v20729_v8 }
 0x4d5   : > { %v2293_v39 = vpack.c.bf16 %v2264_v38, %v2263_v23  ;;  %v2265_v14 = vmul.f32 %v19620_v55, %v20859_v24  ;;  %v18491_v24 = vunpack.i.h.bf16 %v20723_v42  ;;  %v2163_v61 = vpop.xlane.xlu0 %2162  ;;  %v18500_v55 = vunpack.i.l.bf16 %v20729_v8 }
 0x4d6   : > { %v19622_v33 = vpop.eup %19621  ;;  %19627 = vrcp.f32 %v2163_v61 }
 0x4d7   : > { %v2266_v9 = vmul.f32 %v19622_v33, %v20864_v53  ;;  %17106 = vmatmul.mubr.msk.bf16.vlgmr.msra.gmra.mrb[40].mxu1 %vm1186_vm2, %v2293_v39  ;;  %v18490_v53 = vunpack.i.l.bf16 %v20723_v42  ;;  %v1177_v33 = vpack.c.bf16 %v18496_v19, %v18495_v60 }
 0x4d8   : > { %v19624_v52 = vpop.eup %19623  ;;  %17116 = vmatpush3.bf16.msra.mxu1 %v1174_v12  ;;  %2225 = vadd.xlane.f32.xlu0 %v2224_v45 }
 0x4d9   : > { %v2169_v3 = vpop.xlane.xlu1 %2168  ;;  %v2294_v13 = vpack.c.bf16 %v2266_v9, %v2265_v14  ;;  %17117 = vmatprep.mubr.msk.bf16.mxu1 %vm20189_vm1, %v24448_v10  ;;  %17127 = vmatprep.subr.bf16.mxu1 %v24448_v10  ;;  %v2267_v46 = vmul.f32 %v19624_v52, %v20869_v57  ;;  %v1176_v21 = vpack.c.bf16 %v18491_v24, %v18490_v53  ;;  %v18506_v52 = vunpack.i.h.bf16 %v20901_v35 }
 0x4da   : > { %v19626_v43 = vpop.eup %19625 }
 0x4db   : > { %v2268_v26 = vmul.f32 %v19626_v43, %v20874_v1  ;;  %17112 = vmatmul.mubr.msk.bf16.vlgmr.msra.gmra.mrb[44].mxu0 %vm1186_vm2, %v2294_v13 }
 0x4dc   : > { %17122 = vmatpush3.bf16.msra.mxu0 %v1175_v41  ;;  %17123 = vmatprep.mubr.msk.bf16.mxu0 %vm20189_vm1, %v24448_v10 }
 0x4dd   : > { %v2166_v7 = vpop.xlane.xlu1 %2165  ;;  %v2295_v36 = vpack.c.bf16 %v2268_v26, %v2267_v46  ;;  %17133 = vmatprep.subr.bf16.mxu0 %v24448_v10  ;;  %v18511_v46 = vunpack.i.h.bf16 %v20899_v2  ;;  %v18510_v26 = vunpack.i.l.bf16 %v20899_v2 }
 0x4de   : > { %19629 = vrcp.f32 %v2166_v7 }
 0x4df   : > { %17118 = vmatmul.mubr.msk.bf16.vlgmr.msra.gmra.mrb[44].mxu1 %vm1186_vm2, %v2295_v36  ;;  %19631 = vrcp.f32 %v2169_v3  ;;  %v18505_v3 = vunpack.i.l.bf16 %v20901_v35 }
 0x4e0   : > { %17128 = vmatpush3.bf16.msra.mxu1 %v1176_v21  ;;  %17129 = vmatprep.mubr.msk.bf16.mxu1 %vm20189_vm1, %v24448_v10  ;;  %v19628_v57 = vpop.eup %19627 }
 0x4e1   : > { %v2172_v42 = vpop.xlane.xlu1 %2171  ;;  %17139 = vmatprep.subr.bf16.mxu1 %v24448_v10  ;;  %v2269_v6 = vmul.f32 %v19628_v57, %v20879_v15  ;;  %v1178_v15 = vpack.c.bf16 %v18501_v51, %v18500_v55  ;;  %v1179_v36 = vpack.c.bf16 %v18506_v52, %v18505_v3  ;;  %v1180_v57 = vpack.c.bf16 %v18511_v46, %v18510_v26 }
 0x4e2   : > { %19633 = vrcp.f32 %v2172_v42 }
 0x4e8   : > { %v19630_v1 = vpop.eup %19629 }
 0x4e9   : > { %v19632_v40 = vpop.eup %19631  ;;  %v2270_v23 = vmul.f32 %v19630_v1, %v20887_v56 }
 0x4ea   : > { %v2271_v12 = vmul.f32 %v19632_v40, %v20883_v4  ;;  %v2175_v4 = vpop.xlane.xlu0 %2174 }
 0x4eb   : > { %v2296_v39 = vpack.c.bf16 %v2270_v23, %v2269_v6  ;;  %19635 = vrcp.f32 %v2175_v4 }
 0x4ec   : > { %v19634_v38 = vpop.eup %19633 }
 0x4ed   : > { %v2272_v20 = vmul.f32 %v19634_v38, %v20895_v27  ;;  %17124 = vmatmul.mubr.msk.bf16.vlgmr.msra.gmra.mrb[48].mxu0 %vm1186_vm2, %v2296_v39 }
 0x4ee   : > { %17134 = vmatpush3.bf16.msra.mxu0 %v1177_v33  ;;  %17135 = vmatprep.mubr.msk.bf16.mxu0 %vm20189_vm1, %v24448_v10 }
 0x4ef   : > { %v2297_v18 = vpack.c.bf16 %v2272_v20, %v2271_v12  ;;  %17145 = vmatprep.subr.bf16.mxu0 %v24448_v10 }
 0x4f1   : > { %17130 = vmatmul.mubr.msk.bf16.vlgmr.msra.gmra.mrb[48].mxu1 %vm1186_vm2, %v2297_v18 }
 0x4f2   : > { %17140 = vmatpush3.bf16.msra.mxu1 %v1178_v15  ;;  %17141 = vmatprep.mubr.msk.bf16.mxu1 %vm20189_vm1, %v24448_v10 }
 0x4f3   : > { %17151 = vmatprep.subr.bf16.mxu1 %v24448_v10 }
 0x4f5   : > { %v19636_v9 = vpop.eup %19635 }
 0x4f6   : > { %v2273_v53 = vmul.f32 %v19636_v9, %v20889_v30 }
 0x512   : > { %v2181_v8 = vpop.xlane.xlu1 %2180 }
 0x516   : > { %v2178_v56 = vpop.xlane.xlu1 %2177  ;;  %v2187_v58 = vpop.xlane.xlu0 %2186 }
 0x517   : > { %19637 = vrcp.f32 %v2178_v56 }
 0x518   : > { %19639 = vrcp.f32 %v2181_v8 }
 0x51a   : > { %v2184_v27 = vpop.xlane.xlu1 %2183 }
 0x51b   : > { %19641 = vrcp.f32 %v2184_v27 }
 0x51c   : > { %19643 = vrcp.f32 %v2187_v58 }
 0x51e   : > { %v2193_v14 = vpop.xlane.xlu1 %2192 }
 0x520   : > { %v2202_v13 = vpop.xlane.xlu0 %2201 }
 0x521   : > { %v19638_v45 = vpop.eup %19637 }
 0x522   : > { %v2190_v43 = vpop.xlane.xlu1 %2189  ;;  %v19640_v24 = vpop.eup %19639  ;;  %v2274_v41 = vmul.f32 %v19638_v45, %v20915_v59 }
 0x523   : > { %19645 = vrcp.f32 %v2190_v43  ;;  %v2275_v21 = vmul.f32 %v19640_v24, %v20910_v28 }
 0x524   : > { %19647 = vrcp.f32 %v2193_v14  ;;  %v2298_v7 = vpack.c.bf16 %v2274_v41, %v2273_v53  ;;  %v2208_v30 = vpop.xlane.xlu0 %2207 }
 0x525   : > { %v19642_v61 = vpop.eup %19641 }
 0x526   : > { %v2276_v35 = vmul.f32 %v19642_v61, %v20925_v49  ;;  %v2196_v42 = vpop.xlane.xlu1 %2195  ;;  %17136 = vmatmul.mubr.msk.bf16.vlgmr.msra.gmra.mrb[52].mxu0 %vm1186_vm2, %v2298_v7  ;;  %v19644_v28 = vpop.eup %19643 }
 0x527   : > { %19649 = vrcp.f32 %v2196_v42  ;;  %17146 = vmatpush3.bf16.msra.mxu0 %v1179_v36  ;;  %17147 = vmatprep.mubr.msk.bf16.mxu0 %vm20189_vm1, %v24448_v10  ;;  %v2277_v19 = vmul.f32 %v19644_v28, %v20917_v48 }
 0x528   : > { %v2299_v59 = vpack.c.bf16 %v2276_v35, %v2275_v21  ;;  %19651 = vrcp.f32 %v2202_v13  ;;  %17157 = vmatprep.subr.bf16.mxu0 %v24448_v10 }
 0x52a   : > { %17142 = vmatmul.mubr.msk.bf16.vlgmr.msra.gmra.mrb[52].mxu1 %vm1186_vm2, %v2299_v59  ;;  %v2199_v2 = vpop.xlane.xlu1 %2198 }
 0x52b   : > { %17152 = vmatpush3.bf16.msra.mxu1 %v1180_v57  ;;  %19653 = vrcp.f32 %v2199_v2  ;;  %17153 = vmatprep.mubr.msk.bf16.mxu1 %vm20189_vm1, %v24448_v10 }
 0x52c   : > { %v2214_v49 = vpop.xlane.xlu0 %2213  ;;  %17163 = vmatprep.subr.bf16.mxu1 %v24448_v10 }
 0x52d   : > { %v19646_v1 = vpop.eup %19645 }
 0x52e   : > { %v2278_v60 = vmul.f32 %v19646_v1, %v20934_v25  ;;  %v2205_v40 = vpop.xlane.xlu1 %2204  ;;  %v19648_v6 = vpop.eup %19647 }
 0x52f   : > { %v2279_v33 = vmul.f32 %v19648_v6, %v20930_v62  ;;  %19655 = vrcp.f32 %v2205_v40 }
 0x530   : > { %v18514_v23 = vpop.permute.xlu0 %18513  ;;  %v2300_v38 = vpack.c.bf16 %v2278_v60, %v2277_v19  ;;  %19657 = vrcp.f32 %v2208_v30 }
 0x531   : > { %v19650_v51 = vpop.eup %19649  ;;  %v18516_v55 = vunpack.i.h.bf16 %v18514_v23  ;;  %v18515_v39 = vunpack.i.l.bf16 %v18514_v23  ;;  %v19200_v23 = vld [vmem:[%s24416_s4 + $0x8] sm:$0xff]  }
 0x532   : > { %v2280_v12 = vmul.f32 %v19650_v51, %v20944_v29  ;;  %17148 = vmatmul.mubr.msk.bf16.vlgmr.msra.gmra.mrb[56].mxu0 %vm1186_vm2, %v2300_v38  ;;  %v2211_v20 = vpop.xlane.xlu1 %2210  ;;  %v19652_v18 = vpop.eup %19651 }
 0x533   : > { %v1181_v15 = vpack.c.bf16 %v18516_v55, %v18515_v39  ;;  %17159 = vmatprep.mubr.msk.bf16.mxu0 %vm20189_vm1, %v24448_v10  ;;  %v2282_v8 = vmul.f32 %v19652_v18, %v20938_v54  ;;  %19659 = vrcp.f32 %v2211_v20 }
 0x534   : > { %v2301_v48 = vpack.c.bf16 %v2280_v12, %v2279_v33  ;;  %19661 = vrcp.f32 %v2214_v49 }
 0x535   : > { %v19654_v25 = vpop.eup %19653  ;;  %17158 = vmatpush3.bf16.msra.mxu0 %v1181_v15 }
 0x536   : > { %v2281_v4 = vmul.f32 %v19654_v25, %v20959_v32  ;;  %17154 = vmatmul.mubr.msk.bf16.vlgmr.msra.gmra.mrb[56].mxu1 %vm1186_vm2, %v2301_v48  ;;  %v2217_v62 = vpop.xlane.xlu1 %2216  ;;  %17169 = vmatprep.subr.bf16.mxu0 %v24448_v10 }
 0x537   : > { %17165 = vmatprep.mubr.msk.bf16.mxu1 %vm20189_vm1, %v24448_v10  ;;  %19663 = vrcp.f32 %v2217_v62 }
 0x538   : > { %v2302_v29 = vpack.c.bf16 %v2282_v8, %v2281_v4 }
 0x539   : > { %v19656_v54 = vpop.eup %19655 }
 0x53a   : > { %17160 = vmatmul.mubr.msk.bf16.vlgmr.msra.gmra.mrb[60].mxu0 %vm1186_vm2, %v2302_v29  ;;  %v2223_v56 = vpop.xlane.xlu1 %2222  ;;  %v19658_v32 = vpop.eup %19657  ;;  %v2283_v9 = vmul.f32 %v19656_v54, %v20963_v44 }
 0x53b   : > { %17171 = vmatprep.mubr.msk.bf16.mxu0 %vm20189_vm1, %v24448_v10  ;;  %v2284_v3 = vmul.f32 %v19658_v32, %v20949_v22 }
 0x53d   : > { %v19660_v45 = vpop.eup %19659  ;;  %v2303_v61 = vpack.c.bf16 %v2284_v3, %v2283_v9 }
 0x53e   : > { %v18519_v27 = vpop.permute.xlu1 %18518  ;;  %v19662_v43 = vpop.eup %19661  ;;  %v2285_v41 = vmul.f32 %v19660_v45, %v20976_v5  ;;  %v19199_v5 = vld [vmem:[%s24416_s4] sm:$0xff]  }
 0x53f   : > { %v18521_v58 = vunpack.i.h.bf16 %v18519_v27  ;;  %v18520_v14 = vunpack.i.l.bf16 %v18519_v27  ;;  %v2286_v26 = vmul.f32 %v19662_v43, %v20969_v50 }
 0x541   : > { %v1182_v52 = vpack.c.bf16 %v18521_v58, %v18520_v14  ;;  %v2304_v22 = vpack.c.bf16 %v2286_v26, %v2285_v41  ;;  %v19664_v2 = vpop.eup %19663  ;;  %v19202_v58 = vld [vmem:[%s24416_s4 + $0x18] sm:$0xff]  }
 0x542   : > { %v18524_v13 = vpop.permute.xlu1 %18523  ;;  %v2287_v49 = vmul.f32 %v19664_v2, %v20984_v17 }
 0x543   : > { %v18526_v24 = vunpack.i.h.bf16 %v18524_v13  ;;  %v18525_v53 = vunpack.i.l.bf16 %v18524_v13  ;;  %17164 = vmatpush3.bf16.msra.mxu1 %v1182_v52 }
 0x544   : > { %17175 = vmatprep.subr.bf16.mxu1 %v24448_v10 }
 0x545   : > { %v1183_v46 = vpack.c.bf16 %v18526_v24, %v18525_v53 }
 0x546   : > { %v18529_v7 = vpop.permute.xlu1 %18528  ;;  %17166 = vmatmul.mubr.msk.bf16.vlgmr.msra.gmra.mrb[60].mxu1 %vm1186_vm2, %v2303_v61 }
 0x547   : > { %v18531_v44 = vunpack.i.h.bf16 %v18529_v7  ;;  %v18530_v36 = vunpack.i.l.bf16 %v18529_v7  ;;  %17170 = vmatpush3.bf16.msra.mxu0 %v1183_v46  ;;  %17177 = vmatprep.mubr.msk.bf16.mxu1 %vm20189_vm1, %v24448_v10  ;;  %v19203_v46 = vld [vmem:[%s24416_s4 + $0x20] sm:$0xff]  }
 0x548   : > { %17181 = vmatprep.subr.bf16.mxu0 %v24448_v10 }
 0x549   : > { %v1184_v21 = vpack.c.bf16 %v18531_v44, %v18530_v36 }
 0x54a   : > { %v18534_v35 = vpop.permute.xlu1 %18533  ;;  %17172 = vmatmul.mubr.msk.bf16.vlgmr.msra.gmra.mrb[64].mxu0 %vm1186_vm2, %v2304_v22 }
 0x54b   : > { %v18536_v50 = vunpack.i.h.bf16 %v18534_v35  ;;  %v18535_v42 = vunpack.i.l.bf16 %v18534_v35  ;;  %17176 = vmatpush3.bf16.msra.mxu1 %v1184_v21  ;;  %17183 = vmatprep.mubr.msk.bf16.mxu0 %vm20189_vm1, %v24448_v10 }
 0x54c   : > { %17187 = vmatprep.subr.bf16.mxu1 %v19199_v5 }
 0x54d   : > { %v1185_v30 = vpack.c.bf16 %v18536_v50, %v18535_v42 }
 0x54f   : > { %17182 = vmatpush3.bf16.msra.mxu0 %v1185_v30  ;;  %v19204_v30 = vld [vmem:[%s24416_s4 + $0x28] sm:$0xff]  }
 0x561   : > { %v2220_v59 = vpop.xlane.xlu0 %2219 }
 0x562   : > { %19665 = vrcp.f32 %v2220_v59 }
 0x563   : > { %19667 = vrcp.f32 %v2223_v56 }
 0x565   : > { %v2226_v57 = vpop.xlane.xlu0 %2225 }
 0x566   : > { %19669 = vrcp.f32 %v2226_v57 }
 0x56c   : > { %v19666_v28 = vpop.eup %19665 }
 0x56d   : > { %v2288_v1 = vmul.f32 %v19666_v28, %v21009_v63  ;;  %v19668_v19 = vpop.eup %19667 }
 0x56e   : > { %v2344_v60 = vpop.f32.mrb[36].mxu1  ;;  %v2289_v55 = vmul.f32 %v19668_v19, %v20991_v37 }
 0x56f   : > { %v17095_v40 = vpop.f32.mrb[37].mxu1  ;;  %v2305_v6 = vpack.c.bf16 %v2288_v1, %v2287_v49 }
 0x570   : > { %v19670_v38 = vpop.eup %19669  ;;  %v2347_v51 = vpop.f32.mrb[38].mxu1 }
 0x571   : > { %v2290_v39 = vmul.f32 %v19670_v38, %v21013_v0  ;;  %v3011_v33 = vpack.c.bf16 %v2347_v51, %v2344_v60  ;;  %v17096_v12 = vpop.f32.mrb[39].mxu1  ;;  %17178 = vmatmul.mubr.msk.bf16.vlgmr.msra.gmra.mrb[64].mxu1 %vm1186_vm2, %v2305_v6  ;;  %v19201_v0 = vld [vmem:[%s24416_s4 + $0x10] sm:$0xff]  }
 0x572   : > { %17188 = vmatpush3.bf16.msra.mxu1 %v19199_v5 }
 0x573   : > { %17189 = vmatprep.mubr.msk.bf16.mxu1 %vm1186_vm2, %v3011_v33  ;;  %v2306_v17 = vpack.c.bf16 %v2290_v39, %v2289_v55  ;;  %17193 = vmatprep.subr.bf16.mxu1 %v19200_v23 }
 0x575   : > { %17184 = vmatmul.mubr.msk.bf16.vlgmr.msra.gmra.mrb[68].mxu0 %vm1186_vm2, %v2306_v17 }
 0x576   : > { %3855 = vmatprep.mubr.bf16.mxu0 %v24446_v47 }
 0x579   : > { %v2388_v63 = vpop.f32.mrb[40].mxu0 }
 0x57a   : > { %v17101_v20 = vpop.f32.mrb[41].mxu0 }
 0x57b   : > { %v2391_v18 = vpop.f32.mrb[42].mxu0 }
 0x57c   : > { %v3012_v15 = vpack.c.bf16 %v2391_v18, %v2388_v63  ;;  %v17102_v37 = vpop.f32.mrb[43].mxu0  ;;  %v19206_v18 = vld [vmem:[%s24416_s4 + $0x38] sm:$0xff]  }
 0x57e   : > { %17190 = vmatmul.mubr.msk.bf16.vlgmr.msra.gmra.mrb[68].mxu1 %vm1186_vm2, %v3012_v15 }
 0x57f   : > { %17194 = vmatpush3.bf16.msra.mxu1 %v19200_v23  ;;  %v19205_v23 = vld [vmem:[%s24416_s4 + $0x30] sm:$0xff]  }
 0x580   : > { %17199 = vmatprep.subr.bf16.mxu1 %v19201_v0 }
 0x5aa   : > { %v2432_v48 = vpop.f32.mrb[40].mxu1 }
 0x5ab   : > { %v17107_v25 = vpop.f32.mrb[41].mxu1 }
 0x5ac   : > { %v2435_v8 = vpop.f32.mrb[42].mxu1 }
 0x5ad   : > { %v17108_v4 = vpop.f32.mrb[43].mxu1  ;;  %v3013_v62 = vpack.c.bf16 %v2435_v8, %v2432_v48 }
 0x5ae   : > { %v2476_v29 = vpop.f32.mrb[44].mxu0 }
 0x5af   : > { %v17113_v56 = vpop.f32.mrb[45].mxu0  ;;  %17195 = vmatprep.mubr.msk.bf16.mxu1 %vm1186_vm2, %v3013_v62 }
 0x5b0   : > { %v2479_v54 = vpop.f32.mrb[46].mxu0 }
 0x5b1   : > { %v3014_v27 = vpack.c.bf16 %v2479_v54, %v2476_v29  ;;  %v17114_v32 = vpop.f32.mrb[47].mxu0 }
 0x5b2   : > { %v2520_v14 = vpop.f32.mrb[44].mxu1 }
 0x5b3   : > { %v17119_v9 = vpop.f32.mrb[45].mxu1  ;;  %17196 = vmatmul.mubr.msk.bf16.vlgmr.msra.gmra.mrb[68].mxu1 %vm1186_vm2, %v3014_v27 }
 0x5b4   : > { %v2523_v45 = vpop.f32.mrb[46].mxu1  ;;  %17200 = vmatpush3.bf16.msra.mxu1 %v19201_v0 }
 0x5b5   : > { %v3015_v52 = vpack.c.bf16 %v2523_v45, %v2520_v14  ;;  %v17120_v3 = vpop.f32.mrb[47].mxu1  ;;  %17205 = vmatprep.subr.bf16.mxu1 %v19202_v58 }
 0x5b7   : > { %17201 = vmatprep.mubr.msk.bf16.mxu1 %vm1186_vm2, %v3015_v52 }
 0x5c0   : > { %v2564_v13 = vpop.f32.mrb[48].mxu0 }
 0x5c1   : > { %v17125_v43 = vpop.f32.mrb[49].mxu0 }
 0x5c2   : > { %v2567_v24 = vpop.f32.mrb[50].mxu0  ;;  %v15560_v43 = vld [vmem:[%s24417_s5] ss:$0 sm:$0xff] }
 0x5c3   : > { %v3016_v53 = vpack.c.bf16 %v2567_v24, %v2564_v13  ;;  %v17126_v41 = vpop.f32.mrb[51].mxu0 }
 0x5c4   : > { %v2608_v61 = vpop.f32.mrb[48].mxu1 }
 0x5c5   : > { %v17131_v26 = vpop.f32.mrb[49].mxu1  ;;  %17202 = vmatmul.mubr.msk.bf16.vlgmr.msra.gmra.mrb[68].mxu1 %vm1186_vm2, %v3016_v53 }
 0x5c6   : > { %v2611_v7 = vpop.f32.mrb[50].mxu1  ;;  %17206 = vmatpush3.bf16.msra.mxu1 %v19202_v58 }
 0x5c7   : > { %v3017_v44 = vpack.c.bf16 %v2611_v7, %v2608_v61  ;;  %v17132_v36 = vpop.f32.mrb[51].mxu1  ;;  %17211 = vmatprep.subr.bf16.mxu1 %v19203_v46  ;;  %v20119_v7 = vld [vmem:[%s20338_s29] sm:$0xff] }
 0x5c9   : > { %17207 = vmatprep.mubr.msk.bf16.mxu1 %vm1186_vm2, %v3017_v44 }
 0x5f9   : > { %v2652_v22 = vpop.f32.mrb[52].mxu0 }
 0x5fa   : > { %v17137_v5 = vpop.f32.mrb[53].mxu0 }
 0x5fb   : > { %v2655_v21 = vpop.f32.mrb[54].mxu0 }
 0x5fc   : > { %v3018_v35 = vpack.c.bf16 %v2655_v21, %v2652_v22  ;;  %v17138_v50 = vpop.f32.mrb[55].mxu0  ;;  %v20120_v22 = vld [vmem:[%s20338_s29 + $0x8] sm:$0xff]  ;;  %v20121_v21 = vld [vmem:[%s20338_s29 + $0x10] sm:$0xff] }
 0x5fd   : > { %v2696_v42 = vpop.f32.mrb[52].mxu1 }
 0x5fe   : > { %v17143_v59 = vpop.f32.mrb[53].mxu1  ;;  %17208 = vmatmul.mubr.msk.bf16.vlgmr.msra.gmra.mrb[68].mxu1 %vm1186_vm2, %v3018_v35 }
 0x5ff   : > { %v2699_v57 = vpop.f32.mrb[54].mxu1  ;;  %17212 = vmatpush3.bf16.msra.mxu1 %v19203_v46  ;;  %v19207_v59 = vld [vmem:[%s24420_s8] ss:$12 sps:$4 sm:$0xff]  }
 0x600   : > { %v3019_v2 = vpack.c.bf16 %v2699_v57, %v2696_v42  ;;  %v17144_v28 = vpop.f32.mrb[55].mxu1  ;;  %17217 = vmatprep.subr.bf16.mxu1 %v19204_v30  ;;  %v20122_v42 = vld [vmem:[%s20338_s29 + $0x18] sm:$0xff]  ;;  %v19209_v57 = vld [vmem:[%s24420_s8 + $0x4] ss:$12 sps:$4 sm:$0xff]   ;;  %s24491_s29 = smov 80  }
 0x601   : > { %3823 = vmatprep.subr.bf16.mxu0 %v19209_v57  ;;  %v19210_v28 = vld [vmem:[%s24420_s8 + $0x18] ss:$12 sps:$4 sm:$0xff]  }
 0x602   : > { %17213 = vmatprep.mubr.msk.bf16.mxu1 %vm1186_vm2, %v3019_v2  ;;  %v19212_v2 = vld [vmem:[%s24420_s8 + $0x1c] ss:$12 sps:$4 sm:$0xff]   ;;  %3824 = vmatpush1.bf16.msra.mxu0 %v19207_v59 }
 0x603   : > { %3825 = vmatprep.subr.bf16.mxu0 %v19212_v2 }
 0x605   : > { %v2740_v49 = vpop.f32.mrb[56].mxu0 }
 0x606   : > { %v17149_v1 = vpop.f32.mrb[57].mxu0  ;;  %3826 = vmatpush1.bf16.msra.mxu0 %v19210_v28 }
 0x607   : > { %v2743_v19 = vpop.f32.mrb[58].mxu0 }
 0x608   : > { %v3020_v60 = vpack.c.bf16 %v2743_v19, %v2740_v49  ;;  %v17150_v40 = vpop.f32.mrb[59].mxu0 }
 0x609   : > { %v2784_v6 = vpop.f32.mrb[56].mxu1 }
 0x60a   : > { %v17155_v38 = vpop.f32.mrb[57].mxu1  ;;  %17214 = vmatmul.mubr.msk.bf16.vlgmr.msra.gmra.mrb[68].mxu1 %vm1186_vm2, %v3020_v60 }
 0x60b   : > { %v2787_v51 = vpop.f32.mrb[58].mxu1  ;;  %17218 = vmatpush3.bf16.msra.mxu1 %v19204_v30 }
 0x60c   : > { %v3021_v55 = vpack.c.bf16 %v2787_v51, %v2784_v6  ;;  %v17156_v39 = vpop.f32.mrb[59].mxu1  ;;  %17223 = vmatprep.subr.bf16.mxu1 %v19205_v23 }
 0x60d   : > { %v2828_v33 = vpop.f32.mrb[60].mxu0 }
 0x60e   : > { %v17161_v12 = vpop.f32.mrb[61].mxu0  ;;  %17219 = vmatprep.mubr.msk.bf16.mxu1 %vm1186_vm2, %v3021_v55 }
 0x60f   : > { %v2831_v17 = vpop.f32.mrb[62].mxu0 }
 0x610   : > { %v3022_v63 = vpack.c.bf16 %v2831_v17, %v2828_v33  ;;  %v17162_v20 = vpop.f32.mrb[63].mxu0 }
 0x616   : > { %17220 = vmatmul.mubr.msk.bf16.vlgmr.msra.gmra.mrb[68].mxu1 %vm1186_vm2, %v3022_v63 }
 0x617   : > { %17224 = vmatpush3.bf16.msra.mxu1 %v19205_v23 }
 0x618   : > { %17229 = vmatprep.subr.bf16.mxu1 %v19206_v18 }
 0x619   : > { %v2872_v15 = vpop.f32.mrb[60].mxu1 }
 0x61a   : > { %v17167_v37 = vpop.f32.mrb[61].mxu1 }
 0x61b   : > { %v2875_v0 = vpop.f32.mrb[62].mxu1 }
 0x61c   : > { %v3023_v48 = vpack.c.bf16 %v2875_v0, %v2872_v15  ;;  %v17168_v25 = vpop.f32.mrb[63].mxu1 }
 0x61d   : > { %v2916_v8 = vpop.f32.mrb[64].mxu0  ;;  %v19215_v25 = vld [vmem:[%s24420_s8 + $0x34] ss:$12 sps:$4 sm:$0xff]  }
 0x61e   : > { %v17173_v4 = vpop.f32.mrb[65].mxu0  ;;  %17225 = vmatprep.mubr.msk.bf16.mxu1 %vm1186_vm2, %v3023_v48  ;;  %v19213_v48 = vld [vmem:[%s24420_s8 + $0x30] ss:$12 sps:$4 sm:$0xff]   ;;  %3827 = vmatprep.subr.bf16.mxu0 %v19215_v25  ;;  %v19233_v25 = vld [vmem:[%s24420_s8 + $0x38] ss:$12 sps:$4 sm:$0xff]  }
 0x61f   : > { %v2919_v62 = vpop.f32.mrb[66].mxu0  ;;  %3828 = vmatpush1.bf16.msra.mxu0 %v19213_v48  ;;  %v19218_v4 = vld [vmem:[%s24420_s8 + $0x4c] ss:$12 sps:$4 sm:$0xff]  }
 0x620   : > { %v3024_v29 = vpack.c.bf16 %v2919_v62, %v2916_v8  ;;  %v17174_v56 = vpop.f32.mrb[67].mxu0  ;;  %v19216_v8 = vld [vmem:[%s24420_s8 + $0x48] ss:$12 sps:$4 sm:$0xff]   ;;  %3829 = vmatprep.subr.bf16.mxu0 %v19218_v4  ;;  %v19219_v62 = vld [vmem:[%s24420_s8 + $0x60] ss:$12 sps:$4 sm:$0xff]  }
 0x621   : > { %v19222_v56 = vld [vmem:[%s24420_s8 + $0x78] ss:$12 sps:$4 sm:$0xff]  }
 0x622   : > { %17226 = vmatmul.mubr.msk.bf16.vlgmr.msra.gmra.mrb[68].mxu1 %vm1186_vm2, %v3024_v29  ;;  %v19221_v29 = vld [vmem:[%s24420_s8 + $0x64] ss:$12 sps:$4 sm:$0xff]  }
 0x623   : > { %17230 = vmatpush3.bf16.msra.mxu1 %v19206_v18  ;;  %3830 = vmatpush1.bf16.msra.mxu0 %v19216_v8 }
 0x624   : > { %3831 = vmatprep.subr.bf16.mxu0 %v19221_v29  ;;  %v19234_v29 = vld [vmem:[%s24420_s8 + $0x50] ss:$12 sps:$4 sm:$0xff]  }
 0x627   : > { %3832 = vmatpush1.bf16.msra.mxu0 %v19219_v62 }
 0x644   : > { %v2960_v54 = vpop.f32.mrb[64].mxu1 }
 0x645   : > { %v17179_v27 = vpop.f32.mrb[65].mxu1 }
 0x646   : > { %v2963_v32 = vpop.f32.mrb[66].mxu1  ;;  %v19227_v27 = vld [vmem:[%s24420_s8 + $0x94] ss:$12 sps:$4 sm:$0xff]  }
 0x647   : > { %v3025_v58 = vpack.c.bf16 %v2963_v32, %v2960_v54  ;;  %v17180_v14 = vpop.f32.mrb[67].mxu1  ;;  %v19224_v54 = vld [vmem:[%s24420_s8 + $0x7c] ss:$12 sps:$4 sm:$0xff]  }
 0x648   : > { %v3004_v9 = vpop.f32.mrb[68].mxu0  ;;  %3833 = vmatprep.subr.bf16.mxu0 %v19224_v54  ;;  %v19225_v32 = vld [vmem:[%s24420_s8 + $0x90] ss:$12 sps:$4 sm:$0xff]   ;;  %v19228_v14 = vld [vmem:[%s24420_s8 + $0xa8] ss:$12 sps:$4 sm:$0xff]  }
 0x649   : > { %v17185_v45 = vpop.f32.mrb[69].mxu0  ;;  %17231 = vmatprep.mubr.msk.bf16.mxu1 %vm1186_vm2, %v3025_v58  ;;  %3834 = vmatpush1.bf16.msra.mxu0 %v19222_v56  ;;  %v19230_v58 = vld [vmem:[%s24420_s8 + $0xac] ss:$12 sps:$4 sm:$0xff]  }
 0x64a   : > { %v3007_v52 = vpop.f32.mrb[70].mxu0  ;;  %3835 = vmatprep.subr.bf16.mxu0 %v19227_v27  ;;  %v19239_v45 = vld [vmem:[%s24422_s10 + $0x40] sm:$0xff]   ;;  %v19238_v27 = vld [vmem:[%s24420_s8 + $0xb0] ss:$12 sps:$4 sm:$0xff]  }
 0x64b   : > { %v3026_v3 = vpack.c.bf16 %v3007_v52, %v3004_v9  ;;  %v17186_v13 = vpop.f32.mrb[71].mxu0  ;;  %v19231_v9 = vld [vmem:[%s24420_s8 + $0x8] ss:$12 sps:$4 sm:$0xff]   ;;  %v19240_v52 = vld [vmem:[%s24422_s10] sm:$0xff]   ;;  %16513 = vmatprep.subr.bf16.mxu1 %v19239_v45  ;;  %v19254_v45 = vld [vmem:[%s24422_s10 + $0x38] sm:$0xff]  }
 0x64c   : > { %v19242_v13 = vld [vmem:[%s24422_s10 + $0x8] sm:$0xff]   ;;  %v19237_v54 = vld [vmem:[%s24420_s8 + $0x98] ss:$12 sps:$4 sm:$0xff]  }
 0x64d   : > { %17232 = vmatmul.mubr.msk.bf16.vlgmr.msra.gmra.mrb[68].mxu1 %vm1186_vm2, %v3026_v3  ;;  %3836 = vmatpush1.bf16.msra.mxu0 %v19225_v32  ;;  %v19241_v3 = vld [vmem:[%s24422_s10 + $0x48] sm:$0xff]  }
 0x64e   : > { %3837 = vmatprep.subr.bf16.mxu0 %v19230_v58  ;;  %16514 = vmatpush3.bf16.msra.mxu1 %v19240_v52  ;;  %v19236_v56 = vld [vmem:[%s24420_s8 + $0x80] ss:$12 sps:$4 sm:$0xff]   ;;  %v19251_v58 = vld [vmem:[%s24422_s10 + $0x70] sm:$0xff]  }
 0x64f   : > { %16515 = vmatprep.subr.bf16.mxu1 %v19241_v3  ;;  %v19250_v32 = vld [vmem:[%s24422_s10 + $0x28] sm:$0xff]   ;;  %v19255_v52 = vld [vmem:[%s24422_s10 + $0x80] sm:$0xff]  }
 0x650   : > { %v19256_v3 = vld [vmem:[%s24422_s10 + $0x88] sm:$0xff]  }
 0x651   : > { %3838 = vmatpush1.bf16.msra.mxu0 %v19228_v14  ;;  %v19252_v14 = vld [vmem:[%s24422_s10 + $0x30] sm:$0xff]  }
 0x652   : > { %17235 = vmatprep.subr.bf16.mxu0 %v19231_v9  ;;  %16516 = vmatpush3.bf16.msra.mxu1 %v19242_v13  ;;  %v21329_v13 = vsub.s32 0, %v20612_v34 }
 0x654   : > { %24487 = vst [vmem:[#allocation16_spill] sm:$0xff] %v21329_v13 }
 0x720   : > { %v17233_v24 = vpop.f32.mrb[68].mxu1 }
 0x721   : > { %v3551_v53 = vpop.f32.mrb[69].mxu1  ;;  %v18147_v26 = vadd.f32 %v17233_v24, %v15560_v43  ;;  %v19244_v24 = vld [vmem:[%s24422_s10 + $0x10] sm:$0xff]  }
 0x722   : > { %v18148_v41 = vadd.f32 %v15560_v43, %v3551_v53  ;;  %v17234_v61 = vpop.f32.mrb[70].mxu1  ;;  %v19245_v53 = vld [vmem:[%s24422_s10 + $0x58] sm:$0xff]  }
 0x723   : > { %v3554_v46 = vpop.f32.mrb[71].mxu1  ;;  %v21159_v35 = vadd.f32 %v20121_v21, %v18147_v26  ;;  %v18149_v50 = vadd.f32 %v17234_v61, %v15560_v43  ;;  %v19247_v61 = vld [vmem:[%s24422_s10 + $0x60] sm:$0xff]   ;;  %v19249_v26 = vld [vmem:[%s24422_s10 + $0x68] sm:$0xff]  }
 0x724   : > { %v21152_v44 = vadd.f32 %v20119_v7, %v18148_v41  ;;  %v18150_v36 = vadd.f32 %v15560_v43, %v3554_v46  ;;  %v19243_v43 = vld [vmem:[%s24422_s10 + $0x50] sm:$0xff]   ;;  %v19246_v41 = vld [vmem:[%s24422_s10 + $0x18] sm:$0xff]   ;;  %v19248_v46 = vld [vmem:[%s24422_s10 + $0x20] sm:$0xff]  }
 0x725   : > { %v21164_v30 = vadd.f32 %v20122_v42, %v18149_v50  ;;  %16517 = vmatprep.subr.bf16.mxu1 %v19243_v43  ;;  %v3678_v43 = vld [vmem:[%s24421_s9] sm:$0x7] }
 0x726   : > { %v21155_v5 = vadd.f32 %v20120_v22, %v18150_v36  ;;  %3576 = vadd.xlane.f32.xlu0 %v21152_v44  ;;  %16518 = vmatpush3.bf16.msra.mxu1 %v19244_v24  ;;  %v21335_v24 = vsub.s32 1, %v20612_v34 }
 0x727   : > { %16519 = vmatprep.subr.bf16.mxu1 %v19245_v53  ;;  %v3683_v53 = vrot.slane %v3678_v43, %v21329_v13 }
 0x728   : > { %3578 = vadd.xlane.f32.xlu1 %v21155_v5  ;;  %24488 = vst [vmem:[#allocation17_spill] sm:$0xff] %v21335_v24 }
 0x72a   : > { %3580 = vadd.xlane.f32.xlu0 %v21159_v35  ;;  %16520 = vmatpush3.bf16.msra.mxu1 %v19246_v41  ;;  %v3687_v41 = vrot.slane %v3678_v43, %v21335_v24 }
 0x72b   : > { %16521 = vmatprep.subr.bf16.mxu1 %v19247_v61 }
 0x72e   : > { %3582 = vadd.xlane.f32.xlu0 %v21164_v30  ;;  %16522 = vmatpush3.bf16.msra.mxu1 %v19248_v46 }
 0x72f   : > { %16523 = vmatprep.subr.bf16.mxu1 %v19249_v26 }
 0x732   : > { %16524 = vmatpush3.bf16.msra.mxu1 %v19250_v32 }
 0x733   : > { %16525 = vmatprep.subr.bf16.mxu1 %v19251_v58 }
 0x736   : > { %16526 = vmatpush3.bf16.msra.mxu1 %v19252_v14 }
 0x7b3   : > { %v3577_v49 = vpop.xlane.xlu0 %3576 }
 0x7b4   : > { %v3584_v1 = vmul.f32 0.013888889, %v3577_v49 }
 0x7b5   : > { %v3579_v19 = vpop.xlane.xlu1 %3578 }
 0x7b6   : > { %v3588_v60 = vsub.f32 %v21152_v44, %v3584_v1  ;;  %v3585_v40 = vmul.f32 0.013888889, %v3579_v19 }
 0x7b7   : > { %v3581_v6 = vpop.xlane.xlu0 %3580 }
 0x7b8   : > { %v21181_v23 = vmul.f32 %v20361_v11, %v3588_v60  ;;  %v3589_v38 = vsub.f32 %v21155_v5, %v3585_v40  ;;  %v3586_v51 = vmul.f32 0.013888889, %v3581_v6  ;;  %v15582_v40 = vld [vmem:[%s24418_s6] ss:$0 sm:$0xff] }
 0x7ba   : > { %v21185_v55 = vmul.f32 %v20361_v11, %v3589_v38  ;;  %v3590_v39 = vsub.f32 %v21159_v35, %v3586_v51  ;;  %v3596_v33 = vmul.f32 %v21181_v23, %v21181_v23 }
 0x7bb   : > { %v3583_v12 = vpop.xlane.xlu0 %3582 }
 0x7bc   : > { %v3587_v17 = vmul.f32 0.013888889, %v3583_v12  ;;  %3600 = vadd.xlane.f32.xlu0 %v3596_v33  ;;  %v21191_v63 = vmul.f32 %v20361_v11, %v3590_v39  ;;  %v3597_v18 = vmul.f32 %v21185_v55, %v21185_v55  ;;  %v15583_v39 = vld [vmem:[%s24419_s7] ss:$0 sm:$0xff] }
 0x7be   : > { %v3591_v20 = vsub.f32 %v21164_v30, %v3587_v17  ;;  %v3598_v37 = vmul.f32 %v21191_v63, %v21191_v63 }
 0x7c0   : > { %3602 = vadd.xlane.f32.xlu0 %v3597_v18  ;;  %v21197_v15 = vmul.f32 %v20361_v11, %v3591_v20 }
 0x7c2   : > { %v3599_v0 = vmul.f32 %v21197_v15, %v21197_v15 }
 0x7c4   : > { %3604 = vadd.xlane.f32.xlu0 %v3598_v37  ;;  %v19232_v37 = vld [vmem:[%s24420_s8 + $0x20] ss:$12 sps:$4 sm:$0xff]  }
 0x7c8   : > { %3606 = vadd.xlane.f32.xlu0 %v3599_v0 }
 0x849   : > { %v3601_v7 = vpop.xlane.xlu0 %3600 }
 0x84a   : > { %v3608_v36 = vmul.f32 0.013888889, %v3601_v7 }
 0x84c   : > { %v3612_v22 = vadd.f32 1e-05, %v3608_v36 }
 0x84d   : > { %v3603_v21 = vpop.xlane.xlu0 %3602 }
 0x84e   : > { %19671 = vrsqrt.f32 %v3612_v22  ;;  %v3609_v50 = vmul.f32 0.013888889, %v3603_v21 }
 0x850   : > { %v3613_v42 = vadd.f32 1e-05, %v3609_v50 }
 0x851   : > { %v3605_v59 = vpop.xlane.xlu0 %3604 }
 0x852   : > { %19673 = vrsqrt.f32 %v3613_v42  ;;  %v3610_v57 = vmul.f32 0.013888889, %v3605_v59 }
 0x854   : > { %v3614_v2 = vadd.f32 1e-05, %v3610_v57 }
 0x855   : > { %v3607_v28 = vpop.xlane.xlu0 %3606 }
 0x856   : > { %19675 = vrsqrt.f32 %v3614_v2  ;;  %v3611_v49 = vmul.f32 0.013888889, %v3607_v28 }
 0x858   : > { %v19672_v1 = vpop.eup %19671  ;;  %v3615_v19 = vadd.f32 1e-05, %v3611_v49 }
 0x859   : > { %v3620_v60 = vmul.f32 %v19672_v1, %v21181_v23 }
 0x85a   : > { %19677 = vrsqrt.f32 %v3615_v19 }
 0x85b   : > { %v3630_v51 = vmul.f32 %v15582_v40, %v3620_v60 }
 0x85c   : > { %v19674_v6 = vpop.eup %19673 }
 0x85d   : > { %v3621_v38 = vmul.f32 %v19674_v6, %v21185_v55  ;;  %v3640_v17 = vadd.f32 %v15583_v39, %v3630_v51 }
 0x85f   : > { %v3631_v33 = vmul.f32 %v15582_v40, %v3621_v38 }
 0x860   : > { %v19676_v12 = vpop.eup %19675 }
 0x861   : > { %v3641_v20 = vadd.f32 %v15583_v39, %v3631_v33  ;;  %v3622_v18 = vmul.f32 %v19676_v12, %v21191_v63 }
 0x863   : > { %v3644_v23 = vpack.c.bf16 %v3641_v20, %v3640_v17  ;;  %v3632_v48 = vmul.f32 %v15582_v40, %v3622_v18 }
 0x864   : > { %v19678_v0 = vpop.eup %19677 }
 0x865   : > { %3856 = vmatmul.mubr.bf16.vlgmr.msra.gmra.mrb[72].mxu0 %v3644_v23  ;;  %v3623_v55 = vmul.f32 %v19678_v0, %v21197_v15  ;;  %v3642_v63 = vadd.f32 %v15583_v39, %v3632_v48  ;;  %v19235_v15 = vld [vmem:[%s24420_s8 + $0x68] ss:$12 sps:$4 sm:$0xff]  }
 0x866   : > { %17236 = vmatpush3.bf16.msra.mxu0 %v19231_v9  ;;  %3865 = vmatprep.mubr.bf16.mxu0 %v24446_v47  ;;  %v19253_v9 = vld [vmem:[%s24422_s10 + $0x78] sm:$0xff]  }
 0x867   : > { %17237 = vmatprep.subr.bf16.mxu0 %v19232_v37  ;;  %v3633_v8 = vmul.f32 %v15582_v40, %v3623_v55  ;;  %16527 = vmatprep.subr.bf16.mxu1 %v19253_v9 }
 0x868   : > { %16528 = vmatpush3.bf16.msra.mxu1 %v19254_v45 }
 0x869   : > { %v3643_v4 = vadd.f32 %v15583_v39, %v3633_v8 }
 0x86a   : > { %17238 = vmatpush3.bf16.msra.mxu0 %v19232_v37  ;;  %v21340_v37 = vsub.s32 2, %v20612_v34 }
 0x86b   : > { %17239 = vmatprep.subr.bf16.mxu0 %v19233_v25  ;;  %v3645_v62 = vpack.c.bf16 %v3643_v4, %v3642_v63 }
 0x86c   : > { %24489 = vst [vmem:[#allocation18_spill] sm:$0xff] %v21340_v37  ;;  %v3691_v0 = vrot.slane %v3678_v43, %v21340_v37 }
 0x86d   : > { %3866 = vmatmul.mubr.bf16.gmra.mrb[76].mxu0 %v3645_v62 }
 0x86e   : > { %17240 = vmatpush3.bf16.msra.mxu0 %v19233_v25  ;;  %17251 = vmatprep.mubr.bf16.mxu0 %v3644_v23 }
 0x86f   : > { %17241 = vmatprep.subr.bf16.mxu0 %v19234_v29 }
 0x872   : > { %17242 = vmatpush3.bf16.msra.mxu0 %v19234_v29 }
 0x873   : > { %17243 = vmatprep.subr.bf16.mxu0 %v19235_v15 }
 0x876   : > { %17244 = vmatpush3.bf16.msra.mxu0 %v19235_v15 }
 0x877   : > { %17245 = vmatprep.subr.bf16.mxu0 %v19236_v56 }
 0x87a   : > { %17246 = vmatpush3.bf16.msra.mxu0 %v19236_v56 }
 0x87b   : > { %17247 = vmatprep.subr.bf16.mxu0 %v19237_v54 }
 0x87e   : > { %17248 = vmatpush3.bf16.msra.mxu0 %v19237_v54 }
 0x87f   : > { %17249 = vmatprep.subr.bf16.mxu0 %v19238_v27 }
 0x882   : > { %17250 = vmatpush3.bf16.msra.mxu0 %v19238_v27 }
 0x883   : > { %17255 = vmatprep.subr.bf16.mxu0 %v19255_v52 }
 0x885   : > { %17252 = vmatmul.mubr.bf16.vlgmr.msra.gmra.mrb[80].mxu0 %v3645_v62 }
 0x886   : > { %17256 = vmatpush3.bf16.msra.mxu0 %v19255_v52 }
 0x887   : > { %17257 = vmatprep.subr.bf16.mxu0 %v19256_v3 }
 0x88a   : > { %17258 = vmatpush3.bf16.msra.mxu0 %v19256_v3 }
 0x938   : > { %v3857_v61 = vpop.f32.mrb[72].mxu0 }
 0x939   : > { %v3858_v46 = vadd.f32 %v3857_v61, %v3683_v53  ;;  %v3859_v26 = vpop.f32.mrb[73].mxu0 }
 0x93a   : > { %v3860_v7 = vadd.f32 %v3859_v26, %v3687_v41  ;;  %v3861_v36 = vpop.f32.mrb[74].mxu0 }
 0x93b   : > { %v3862_v22 = vadd.f32 %v3861_v36, %v3683_v53  ;;  %v3863_v21 = vpop.f32.mrb[75].mxu0  ;;  %v3925_v42 = vmax.f32 %v3858_v46, 0.0 }
 0x93c   : > { %v3864_v50 = vadd.f32 %v3863_v21, %v3687_v41  ;;  %v3926_v57 = vmax.f32 %v3860_v7, 0.0  ;;  %v15608_v7 = vld [vmem:[%s24423_s11] ss:$0 sm:$0xff] }
 0x93d   : > { %v3928_v59 = vmax.f32 %v3862_v22, 0.0 }
 0x93e   : > { %v3929_v2 = vmax.f32 %v3864_v50, 0.0 }
 0x93f   : > { %v3937_v28 = vpack.c.bf16 %v3928_v59, %v3925_v42 }
 0x940   : > { %v3867_v49 = vpop.f32.mrb[76].mxu0  ;;  %v3938_v1 = vpack.c.bf16 %v3929_v2, %v3926_v57 }
 0x941   : > { %v3868_v19 = vadd.f32 %v3867_v49, %v3683_v53  ;;  %v3869_v60 = vpop.f32.mrb[77].mxu0 }
 0x942   : > { %v3870_v40 = vadd.f32 %v3869_v60, %v3687_v41  ;;  %v3871_v6 = vpop.f32.mrb[78].mxu0  ;;  %4133 = vmatprep.mubr.bf16.mxu1 %v3938_v1 }
 0x943   : > { %v3872_v38 = vadd.f32 %v3871_v6, %v3683_v53  ;;  %v3873_v51 = vpop.f32.mrb[79].mxu0  ;;  %4134 = vmatmul.mubr.bf16.vlgmr.msra.gmra.mrb[72].mxu1 %v3937_v28  ;;  %v3931_v33 = vmax.f32 %v3868_v19, 0.0 }
 0x944   : > { %v3874_v39 = vadd.f32 %v3873_v51, %v3687_v41  ;;  %v3932_v17 = vmax.f32 %v3870_v40, 0.0  ;;  %v19263_v51 = vld [vmem:[%s24415_s3 + $0xc8] ss:$12 sps:$4 sm:$0xff]  }
 0x945   : > { %v3934_v12 = vmax.f32 %v3872_v38, 0.0  ;;  %17263 = vmatprep.subr.bf16.mxu1 %v19263_v51 }
 0x946   : > { %v3935_v20 = vmax.f32 %v3874_v39, 0.0  ;;  %17264 = vmatpush3.bf16.msra.mxu1 %v19263_v51 }
 0x947   : > { %v3940_v18 = vpack.c.bf16 %v3934_v12, %v3931_v33 }
 0x948   : > { %v3941_v23 = vpack.c.bf16 %v3935_v20, %v3932_v17 }
 0x94a   : > { %4141 = vmatprep.mubr.bf16.mxu1 %v3941_v23 }
 0x94b   : > { %4142 = vmatmul.mubr.bf16.gmra.mrb[76].mxu1 %v3940_v18 }
 0x958   : > { %v17253_v55 = vpop.f32.mrb[80].mxu0 }
 0x959   : > { %v3919_v48 = vadd.f32 %v17253_v55, %v3691_v0  ;;  %v3910_v25 = vpop.f32.mrb[81].mxu0 }
 0x95a   : > { %v3911_v8 = vadd.f32 %v3910_v25, %v3691_v0  ;;  %v17254_v63 = vpop.f32.mrb[82].mxu0 }
 0x95b   : > { %v3922_v4 = vadd.f32 %v17254_v63, %v3691_v0  ;;  %v3913_v62 = vpop.f32.mrb[83].mxu0  ;;  %v3933_v15 = vmax.f32 %v3919_v48, 0.0 }
 0x95c   : > { %v3914_v29 = vadd.f32 %v3913_v62, %v3691_v0  ;;  %v3927_v54 = vmax.f32 %v3911_v8, 0.0 }
 0x95d   : > { %v3936_v56 = vmax.f32 %v3922_v4, 0.0 }
 0x95e   : > { %v3930_v27 = vmax.f32 %v3914_v29, 0.0 }
 0x95f   : > { %v3942_v32 = vpack.c.bf16 %v3936_v56, %v3933_v15 }
 0x960   : > { %v3939_v58 = vpack.c.bf16 %v3930_v27, %v3927_v54 }
 0x962   : > { %17259 = vmatprep.mubr.msk.bf16.mxu0 %vm4094_vm5, %v3939_v58  ;;  %v19266_v58 = vld [vmem:[%s24415_s3 + $0xf4] ss:$12 sps:$4 sm:$0xff]  }
 0x963   : > { %17260 = vmatmul.mubr.msk.bf16.vlgmr.msra.gmra.mrb[84].mxu0 %vm4094_vm5, %v3942_v32  ;;  %v19264_v32 = vld [vmem:[%s24415_s3 + $0xf0] ss:$12 sps:$4 sm:$0xff]  }
 0x964   : > { %4470 = vmatprep.mubr.bf16.mxu0 %v24446_v47 }
 0xa16   : > { %v16529_v34 = vpop.f32.mrb[72].mxu1 }
 0xa17   : > { %v16530_v14 = vpop.f32.mrb[73].mxu1 }
 0xa18   : > { %v16531_v9 = vadd.f32 %v16530_v14, %v16529_v34  ;;  %v16532_v45 = vpop.f32.mrb[74].mxu1  ;;  %v19267_v34 = vld [vmem:[%s24415_s3 + $0xe0] ss:$12 sps:$4 sm:$0xff]   ;;  %v19268_v14 = vld [vmem:[%s24415_s3 + $0x108] ss:$12 sps:$4 sm:$0xff]  }
 0xa19   : > { %v16533_v52 = vpop.f32.mrb[75].mxu1  ;;  %17265 = vmatprep.subr.bf16.mxu1 %v19267_v34 }
 0xa1a   : > { %v16534_v3 = vadd.f32 %v16533_v52, %v16532_v45  ;;  %v4136_v22 = vadd.f32 %v16531_v9, %v15608_v7  ;;  %17266 = vmatpush3.bf16.msra.mxu1 %v19267_v34  ;;  %v19270_v9 = vld [vmem:[%s24415_s3 + $0x10c] ss:$12 sps:$4 sm:$0xff]   ;;  %v19274_v52 = vld [vmem:[%s24415_s3 + $0x124] ss:$12 sps:$4 sm:$0xff]  }
 0xa1b   : > { %v19271_v45 = vld [vmem:[%s24415_s3 + $0xf8] ss:$12 sps:$4 sm:$0xff]  }
 0xa1c   : > { %v4139_v57 = vadd.f32 %v16534_v3, %v15608_v7  ;;  %17267 = vmatprep.subr.bf16.mxu1 %v19271_v45  ;;  %v19275_v3 = vld [vmem:[%s24415_s3 + $0x110] ss:$12 sps:$4 sm:$0xff]  }
 0xa1e   : > { %v16535_v43 = vpop.f32.mrb[76].mxu1  ;;  %17268 = vmatpush3.bf16.msra.mxu1 %v19271_v45 }
 0xa1f   : > { %v16536_v53 = vpop.f32.mrb[77].mxu1  ;;  %17269 = vmatprep.subr.bf16.mxu1 %v19275_v3 }
 0xa20   : > { %v16537_v41 = vadd.f32 %v16536_v53, %v16535_v43  ;;  %v16538_v61 = vpop.f32.mrb[78].mxu1  ;;  %v19272_v43 = vld [vmem:[%s24415_s3 + $0x120] ss:$12 sps:$4 sm:$0xff]   ;;  %v19278_v53 = vld [vmem:[%s24415_s3 + $0x13c] ss:$12 sps:$4 sm:$0xff]  }
 0xa21   : > { %v16539_v46 = vpop.f32.mrb[79].mxu1 }
 0xa22   : > { %v16540_v26 = vadd.f32 %v16539_v46, %v16538_v61  ;;  %v4144_v36 = vadd.f32 %v16537_v41, %v15608_v7  ;;  %17270 = vmatpush3.bf16.msra.mxu1 %v19275_v3  ;;  %v19279_v41 = vld [vmem:[%s24415_s3 + $0x128] ss:$12 sps:$4 sm:$0xff]   ;;  %v19276_v61 = vld [vmem:[%s24415_s3 + $0x138] ss:$12 sps:$4 sm:$0xff]  }
 0xa23   : > { %17271 = vmatprep.subr.bf16.mxu1 %v19279_v41  ;;  %v19282_v46 = vld [vmem:[%s24415_s3 + $0x154] ss:$12 sps:$4 sm:$0xff]  }
 0xa24   : > { %v4147_v50 = vadd.f32 %v16540_v26, %v15608_v7  ;;  %v19283_v26 = vld [vmem:[%s24415_s3 + $0x140] ss:$12 sps:$4 sm:$0xff]   ;;  %v19280_v7 = vld [vmem:[%s24415_s3 + $0x150] ss:$12 sps:$4 sm:$0xff]  }
 0xa26   : > { %17272 = vmatpush3.bf16.msra.mxu1 %v19279_v41 }
 0xa27   : > { %17273 = vmatprep.subr.bf16.mxu1 %v19283_v26 }
 0xa2a   : > { %17274 = vmatpush3.bf16.msra.mxu1 %v19283_v26 }
 0xa36   : > { %v17261_v21 = vpop.f32.mrb[84].mxu0 }
 0xa37   : > { %v4193_v42 = vadd.f32 %v17261_v21, %v4144_v36  ;;  %v4184_v59 = vpop.f32.mrb[85].mxu0  ;;  %v19286_v36 = vld [vmem:[%s24415_s3 + $0x16c] ss:$12 sps:$4 sm:$0xff]   ;;  %v19284_v21 = vld [vmem:[%s24415_s3 + $0x168] ss:$12 sps:$4 sm:$0xff]  }
 0xa38   : > { %v4185_v2 = vadd.f32 %v4184_v59, %v4136_v22  ;;  %v17262_v28 = vpop.f32.mrb[86].mxu0  ;;  %v19287_v22 = vld [vmem:[%s24415_s3 + $0x158] ss:$12 sps:$4 sm:$0xff]  }
 0xa39   : > { %v4196_v49 = vadd.f32 %v17262_v28, %v4147_v50  ;;  %v4187_v1 = vpop.f32.mrb[87].mxu0  ;;  %v21362_v38 = vadd.f32 %v4193_v42, %v21159_v35  ;;  %v19260_v35 = vld [vmem:[%s24415_s3 + $0xd8] ss:$12 sps:$4 sm:$0xff]   ;;  %17275 = vmatprep.subr.bf16.mxu1 %v19287_v22  ;;  %v19288_v50 = vld [vmem:[%s24415_s3 + $0x170] ss:$12 sps:$4 sm:$0xff]  }
 0xa3a   : > { %v4188_v19 = vadd.f32 %v4187_v1, %v4139_v57  ;;  %v21350_v60 = vadd.f32 %v4185_v2, %v21152_v44  ;;  %v19257_v44 = vld [vmem:[%s24415_s3 + $0xc0] ss:$12 sps:$4 sm:$0xff]   ;;  %17276 = vmatpush3.bf16.msra.mxu1 %v19287_v22 }
 0xa3b   : > { %v21353_v40 = vadd.f32 %v4196_v49, %v21164_v30  ;;  %v19259_v30 = vld [vmem:[%s24415_s3 + $0xc4] ss:$12 sps:$4 sm:$0xff]   ;;  %17277 = vmatprep.subr.bf16.mxu1 %v19288_v50 }
 0xa3c   : > { %4207 = vadd.xlane.f32.xlu0 %v21350_v60  ;;  %v21358_v6 = vadd.f32 %v4188_v19, %v21155_v5  ;;  %v19262_v5 = vld [vmem:[%s24415_s3 + $0xdc] ss:$12 sps:$4 sm:$0xff]   ;;  %4438 = vmatprep.subr.bf16.mxu0 %v19259_v30 }
 0xa3d   : > { %4213 = vadd.xlane.f32.xlu1 %v21353_v40  ;;  %4439 = vmatpush1.bf16.msra.mxu0 %v19257_v44 }
 0xa3e   : > { %4440 = vmatprep.subr.bf16.mxu0 %v19262_v5  ;;  %17278 = vmatpush3.bf16.msra.mxu1 %v19288_v50 }
 0xa3f   : > { %17295 = vmatprep.subr.bf16.mxu1 %v24448_v10 }
 0xa40   : > { %4209 = vadd.xlane.f32.xlu0 %v21358_v6 }
 0xa41   : > { %4441 = vmatpush1.bf16.msra.mxu0 %v19260_v35 }
 0xa42   : > { %4442 = vmatprep.subr.bf16.mxu0 %v19266_v58 }
 0xa44   : > { %4211 = vadd.xlane.f32.xlu0 %v21362_v38 }
 0xa45   : > { %4443 = vmatpush1.bf16.msra.mxu0 %v19264_v32 }
 0xa46   : > { %4444 = vmatprep.subr.bf16.mxu0 %v19270_v9 }
 0xa49   : > { %4445 = vmatpush1.bf16.msra.mxu0 %v19268_v14 }
 0xa4a   : > { %4446 = vmatprep.subr.bf16.mxu0 %v19274_v52 }
 0xa4d   : > { %4447 = vmatpush1.bf16.msra.mxu0 %v19272_v43 }
 0xa4e   : > { %4448 = vmatprep.subr.bf16.mxu0 %v19278_v53 }
 0xa51   : > { %4449 = vmatpush1.bf16.msra.mxu0 %v19276_v61 }
 0xa52   : > { %4450 = vmatprep.subr.bf16.mxu0 %v19282_v46 }
 0xa55   : > { %4451 = vmatpush1.bf16.msra.mxu0 %v19280_v7 }
 0xa56   : > { %4452 = vmatprep.subr.bf16.mxu0 %v19286_v36 }
 0xa59   : > { %4453 = vmatpush1.bf16.msra.mxu0 %v19284_v21 }
 0xa5a   : > { %17283 = vmatprep.subr.bf16.mxu0 %v24448_v10 }
 0xac9   : > { %v4208_v39 = vpop.xlane.xlu0 %4207 }
 0xaca   : > { %v4215_v33 = vmul.f32 0.013888889, %v4208_v39  ;;  %v4214_v12 = vpop.xlane.xlu1 %4213 }
 0xacb   : > { %v4218_v20 = vmul.f32 0.013888889, %v4214_v12 }
 0xacc   : > { %v4219_v17 = vsub.f32 %v21350_v60, %v4215_v33  ;;  %v15631_v33 = vld [vmem:[%s24413_s1 + $0x1] ss:$0 sm:$0xff] }
 0xacd   : > { %v4210_v18 = vpop.xlane.xlu0 %4209  ;;  %v4222_v55 = vsub.f32 %v21353_v40, %v4218_v20 }
 0xace   : > { %v21382_v23 = vmul.f32 %v20361_v11, %v4219_v17  ;;  %v4216_v0 = vmul.f32 0.013888889, %v4210_v18  ;;  %v15632_v18 = vld [vmem:[%s24414_s2 + $0x1] ss:$0 sm:$0xff] }
 0xacf   : > { %v21392_v62 = vmul.f32 %v20361_v11, %v4222_v55 }
 0xad0   : > { %v4220_v48 = vsub.f32 %v21358_v6, %v4216_v0  ;;  %v4227_v25 = vmul.f32 %v21382_v23, %v21382_v23 }
 0xad1   : > { %v4212_v8 = vpop.xlane.xlu0 %4211  ;;  %v4230_v54 = vmul.f32 %v21392_v62, %v21392_v62 }
 0xad2   : > { %v21389_v63 = vmul.f32 %v20361_v11, %v4220_v48  ;;  %v4217_v4 = vmul.f32 0.013888889, %v4212_v8  ;;  %4231 = vadd.xlane.f32.xlu0 %v4227_v25 }
 0xad4   : > { %v4221_v29 = vsub.f32 %v21362_v38, %v4217_v4  ;;  %v4228_v15 = vmul.f32 %v21389_v63, %v21389_v63 }
 0xad6   : > { %v21398_v56 = vmul.f32 %v20361_v11, %v4221_v29  ;;  %4233 = vadd.xlane.f32.xlu1 %v4228_v15 }
 0xad8   : > { %v4229_v27 = vmul.f32 %v21398_v56, %v21398_v56 }
 0xada   : > { %4237 = vadd.xlane.f32.xlu1 %v4230_v54  ;;  %4235 = vadd.xlane.f32.xlu0 %v4229_v27 }
 0xb5f   : > { %v4232_v42 = vpop.xlane.xlu0 %4231 }
 0xb60   : > { %v4239_v59 = vmul.f32 0.013888889, %v4232_v42 }
 0xb62   : > { %v4243_v57 = vadd.f32 1e-05, %v4239_v59 }
 0xb63   : > { %v4234_v2 = vpop.xlane.xlu1 %4233 }
 0xb64   : > { %19679 = vrsqrt.f32 %v4243_v57  ;;  %v4240_v28 = vmul.f32 0.013888889, %v4234_v2 }
 0xb66   : > { %v4244_v49 = vadd.f32 1e-05, %v4240_v28 }
 0xb67   : > { %v4238_v1 = vpop.xlane.xlu1 %4237  ;;  %v4236_v19 = vpop.xlane.xlu0 %4235 }
 0xb68   : > { %19681 = vrsqrt.f32 %v4244_v49  ;;  %v4242_v44 = vmul.f32 0.013888889, %v4238_v1  ;;  %v4241_v30 = vmul.f32 0.013888889, %v4236_v19 }
 0xb6a   : > { %v4246_v5 = vadd.f32 1e-05, %v4242_v44  ;;  %v4245_v51 = vadd.f32 1e-05, %v4241_v30 }
 0xb6c   : > { %19683 = vrsqrt.f32 %v4246_v5 }
 0xb6d   : > { %19685 = vrsqrt.f32 %v4245_v51 }
 0xb6e   : > { %v19680_v35 = vpop.eup %19679 }
 0xb6f   : > { %v4251_v39 = vmul.f32 %v19680_v35, %v21382_v23 }
 0xb71   : > { %v4261_v20 = vmul.f32 %v15631_v33, %v4251_v39 }
 0xb72   : > { %v19682_v12 = vpop.eup %19681 }
 0xb73   : > { %v4252_v17 = vmul.f32 %v19682_v12, %v21389_v63  ;;  %v4271_v8 = vadd.f32 %v15632_v18, %v4261_v20 }
 0xb75   : > { %v4262_v0 = vmul.f32 %v15631_v33, %v4252_v17 }
 0xb76   : > { %v19684_v55 = vpop.eup %19683 }
 0xb77   : > { %v19686_v48 = vpop.eup %19685  ;;  %v4254_v25 = vmul.f32 %v19684_v55, %v21392_v62  ;;  %v4272_v4 = vadd.f32 %v15632_v18, %v4262_v0 }
 0xb78   : > { %v4253_v23 = vmul.f32 %v19686_v48, %v21398_v56 }
 0xb79   : > { %v4275_v29 = vpack.c.bf16 %v4272_v4, %v4271_v8  ;;  %v4264_v15 = vmul.f32 %v15631_v33, %v4254_v25 }
 0xb7a   : > { %v4263_v54 = vmul.f32 %v15631_v33, %v4253_v23 }
 0xb7b   : > { %4471 = vmatmul.mubr.bf16.vlgmr.msra.gmra.mrb[88].mxu0 %v4275_v29  ;;  %17279 = vmatprep.mubr.bf16.mxu1 %v4275_v29  ;;  %v4274_v63 = vadd.f32 %v15632_v18, %v4264_v15 }
 0xb7c   : > { %v4273_v27 = vadd.f32 %v15632_v18, %v4263_v54  ;;  %4480 = vmatprep.mubr.bf16.mxu0 %v24446_v47 }
 0xb7e   : > { %v4276_v32 = vpack.c.bf16 %v4274_v63, %v4273_v27 }
 0xb80   : > { %17280 = vmatmul.mubr.bf16.vlgmr.msra.gmra.mrb[80].mxu1 %v4276_v32 }
 0xb81   : > { %17297 = vmatprep.mubr.msk.bf16.mxu1 %vm20189_vm1, %v24448_v10 }
 0xb83   : > { %4481 = vmatmul.mubr.bf16.gmra.mrb[92].mxu0 %v4276_v32 }
 0xb84   : > { %17285 = vmatprep.mubr.msk.bf16.mxu0 %vm20189_vm1, %v24448_v10 }
 0xc4e   : > { %v4472_v62 = vpop.f32.mrb[88].mxu0 }
 0xc4f   : > { %v4474_v56 = vpop.f32.mrb[89].mxu0 }
 0xc50   : > { %v4476_v58 = vpop.f32.mrb[90].mxu0 }
 0xc51   : > { %v4478_v34 = vpop.f32.mrb[91].mxu0  ;;  %v18567_v14 = vpack.i.bf16 %v4476_v58, %v4472_v62  ;;  %v4628_v9 = vpack.c.bf16 %v4476_v58, %v4472_v62 }
 0xc52   : > { %v18537_v45 = vpack.i.bf16 %v4478_v34, %v4474_v56  ;;  %v4732_v52 = vpack.c.bf16 %v4478_v34, %v4474_v56 }
 0xc53   : > { %v21478_v3 = vpop.f32.mrb[80].mxu1 }
 0xc54   : > { %v21480_v43 = vpop.f32.mrb[81].mxu1  ;;  %18538 = vrot.lane.b32.xlu0 %v18537_v45, %s24456_s20  ;;  %v4856_v53 = vsel %vm1186_vm2, %v4732_v52, 0 }
 0xc55   : > { %v21484_v41 = vpop.f32.mrb[82].mxu1  ;;  %17284 = vmatpush3.bf16.xpose.msra.mxu0 %v4856_v53 }
 0xc56   : > { %v21486_v61 = vpop.f32.mrb[83].mxu1  ;;  %v4482_v46 = vpop.f32.mrb[92].mxu0  ;;  %17289 = vmatprep.subr.bf16.mxu0 %v24448_v10  ;;  %v21491_v26 = vpack.i.bf16 %v21484_v41, %v21478_v3  ;;  %v4837_v7 = vpack.c.bf16 %v21484_v41, %v21478_v3 }
 0xc57   : > { %v4484_v36 = vpop.f32.mrb[93].mxu0  ;;  %v21497_v22 = vpack.i.bf16 %v21486_v61, %v21480_v43  ;;  %v4836_v50 = vpack.c.bf16 %v21486_v61, %v21480_v43 }
 0xc58   : > { %18558 = vrot.lane.b32.xlu0 %v18537_v45, %s24490_s21  ;;  %v4486_v21 = vpop.f32.mrb[94].mxu0 }
 0xc59   : > { %v4488_v42 = vpop.f32.mrb[95].mxu0  ;;  %v18552_v59 = vpack.i.bf16 %v4486_v21, %v4482_v46  ;;  %v4629_v57 = vpack.c.bf16 %v4486_v21, %v4482_v46 }
 0xc5a   : > { %v18542_v2 = vpack.i.bf16 %v4488_v42, %v4484_v36  ;;  %v4733_v28 = vpack.c.bf16 %v4488_v42, %v4484_v36 }
 0xc5c   : > { %18568 = vrot.lane.b32.xlu0 %v18567_v14, %s24490_s21  ;;  %17286 = vmatmul.mubr.msk.bf16.vlgmr.msra.gmra.mrb[96].mxu0 %vm1186_vm2, %v4628_v9  ;;  %v4903_v49 = vsel %vm1186_vm2, %v4733_v28, 0 }
 0xc5d   : > { %18543 = vrot.lane.b32.xlu1 %v18542_v2, %s24456_s20  ;;  %17290 = vmatpush3.bf16.xpose.msra.mxu0 %v4903_v49 }
 0xc5e   : > { %17291 = vmatprep.mubr.msk.bf16.mxu0 %vm20189_vm1, %v24448_v10  ;;  %17301 = vmatprep.subr.bf16.mxu0 %v24448_v10 }
 0xc60   : > { %18578 = vrot.lane.b32.xlu0 %v18537_v45, %s24491_s29 }
 0xc61   : > { %18548 = vrot.lane.b32.xlu1 %v18567_v14, %s24456_s20 }
 0xc64   : > { %18588 = vrot.lane.b32.xlu0 %v18567_v14, %s24491_s29  ;;  %17292 = vmatmul.mubr.msk.bf16.vlgmr.msra.gmra.mrb[100].mxu0 %vm1186_vm2, %v4629_v57 }
 0xc65   : > { %18553 = vrot.lane.b32.xlu1 %v18552_v59, %s24456_s20  ;;  %17303 = vmatprep.mubr.msk.bf16.mxu0 %vm20189_vm1, %v24448_v10 }
 0xc68   : > { %18598 = vrot.lane.b32.xlu0 %v18537_v45, %s24492_s19 }
 0xc69   : > { %18563 = vrot.lane.b32.xlu1 %v18542_v2, %s24490_s21 }
 0xc6c   : > { %18608 = vrot.lane.b32.xlu0 %v18567_v14, %s24492_s19 }
 0xc6d   : > { %18573 = vrot.lane.b32.xlu1 %v18552_v59, %s24490_s21 }
 0xc70   : > { %18618 = vrot.lane.b32.xlu0 %v18537_v45, %s24493_s26 }
 0xc71   : > { %18583 = vrot.lane.b32.xlu1 %v18542_v2, %s24491_s29 }
 0xc74   : > { %18628 = vrot.lane.b32.xlu0 %v18567_v14, %s24493_s26 }
 0xc75   : > { %18593 = vrot.lane.b32.xlu1 %v18552_v59, %s24491_s29 }
 0xc78   : > { %18638 = vrot.lane.b32.xlu0 %v18537_v45, %s24494_s28 }
 0xc79   : > { %18603 = vrot.lane.b32.xlu1 %v18542_v2, %s24492_s19 }
 0xc7c   : > { %18648 = vrot.lane.b32.xlu0 %v18567_v14, %s24494_s28 }
 0xc7d   : > { %18613 = vrot.lane.b32.xlu1 %v18552_v59, %s24492_s19 }
 0xc80   : > { %18658 = vrot.lane.b32.xlu0 %v18537_v45, %s24495_s17 }
 0xc81   : > { %18623 = vrot.lane.b32.xlu1 %v18542_v2, %s24493_s26 }
 0xc84   : > { %18668 = vrot.lane.b32.xlu0 %v18567_v14, %s24495_s17 }
 0xc85   : > { %18633 = vrot.lane.b32.xlu1 %v18552_v59, %s24493_s26 }
 0xc88   : > { %18678 = vrot.lane.b32.xlu0 %v21497_v22, %s24456_s20 }
 0xc89   : > { %18643 = vrot.lane.b32.xlu1 %v18542_v2, %s24494_s28 }
 0xc8c   : > { %18688 = vrot.lane.b32.xlu0 %v21497_v22, %s24490_s21 }
 0xc8d   : > { %18653 = vrot.lane.b32.xlu1 %v18552_v59, %s24494_s28 }
 0xc90   : > { %18698 = vrot.lane.b32.xlu0 %v21497_v22, %s24491_s29 }
 0xc91   : > { %18663 = vrot.lane.b32.xlu1 %v18542_v2, %s24495_s17 }
 0xc94   : > { %18703 = vrot.lane.b32.xlu0 %v21491_v26, %s24491_s29 }
 0xc95   : > { %18673 = vrot.lane.b32.xlu1 %v18552_v59, %s24495_s17 }
 0xc99   : > { %18683 = vrot.lane.b32.xlu1 %v21491_v26, %s24456_s20 }
 0xc9d   : > { %18693 = vrot.lane.b32.xlu1 %v21491_v26, %s24490_s21 }
 0xca1   : > { %18708 = vrot.lane.b32.xlu1 %v21497_v22, %s24492_s19 }
 0xcc6   : > { %v18539_v1 = vpop.permute.xlu0 %18538 }
 0xcc7   : > { %v18541_v19 = vunpack.i.h.bf16 %v18539_v1  ;;  %v18540_v44 = vunpack.i.l.bf16 %v18539_v1 }
 0xcc9   : > { %v4734_v30 = vpack.c.bf16 %v18541_v19, %v18540_v44 }
 0xcca   : > { %v18559_v5 = vpop.permute.xlu0 %18558 }
 0xccb   : > { %v4950_v51 = vsel %vm1186_vm2, %v4734_v30, 0  ;;  %v18561_v39 = vunpack.i.h.bf16 %v18559_v5  ;;  %v18560_v33 = vunpack.i.l.bf16 %v18559_v5 }
 0xccc   : > { %17296 = vmatpush3.bf16.xpose.msra.mxu1 %v4950_v51 }
 0xccd   : > { %17307 = vmatprep.subr.bf16.mxu1 %v24448_v10  ;;  %v4736_v48 = vpack.c.bf16 %v18561_v39, %v18560_v33 }
 0xcce   : > { %v18569_v35 = vpop.permute.xlu0 %18568 }
 0xccf   : > { %v18544_v12 = vpop.permute.xlu1 %18543  ;;  %v5044_v54 = vsel %vm1186_vm2, %v4736_v48, 0  ;;  %v18571_v56 = vunpack.i.h.bf16 %v18569_v35  ;;  %v18570_v58 = vunpack.i.l.bf16 %v18569_v35 }
 0xcd0   : > { %v18546_v17 = vunpack.i.h.bf16 %v18544_v12  ;;  %v18545_v20 = vunpack.i.l.bf16 %v18544_v12 }
 0xcd1   : > { %v4632_v46 = vpack.c.bf16 %v18571_v56, %v18570_v58 }
 0xcd2   : > { %v18579_v18 = vpop.permute.xlu0 %18578  ;;  %v4735_v0 = vpack.c.bf16 %v18546_v17, %v18545_v20 }
 0xcd3   : > { %v18549_v55 = vpop.permute.xlu1 %18548  ;;  %v18581_v63 = vunpack.i.h.bf16 %v18579_v18  ;;  %v18580_v27 = vunpack.i.l.bf16 %v18579_v18 }
 0xcd4   : > { %v18551_v25 = vunpack.i.h.bf16 %v18549_v55  ;;  %v18550_v8 = vunpack.i.l.bf16 %v18549_v55  ;;  %v4997_v4 = vsel %vm1186_vm2, %v4735_v0, 0 }
 0xcd5   : > { %17302 = vmatpush3.bf16.xpose.msra.mxu0 %v4997_v4  ;;  %v4738_v53 = vpack.c.bf16 %v18581_v63, %v18580_v27 }
 0xcd6   : > { %v4630_v23 = vpack.c.bf16 %v18551_v25, %v18550_v8  ;;  %v18589_v29 = vpop.permute.xlu0 %18588  ;;  %17313 = vmatprep.subr.bf16.mxu0 %v24448_v10 }
 0xcd7   : > { %v18554_v15 = vpop.permute.xlu1 %18553  ;;  %v5138_v2 = vsel %vm1186_vm2, %v4738_v53, 0  ;;  %v18591_v49 = vunpack.i.h.bf16 %v18589_v29  ;;  %v18590_v1 = vunpack.i.l.bf16 %v18589_v29 }
 0xcd8   : > { %v18556_v32 = vunpack.i.h.bf16 %v18554_v15  ;;  %v18555_v62 = vunpack.i.l.bf16 %v18554_v15  ;;  %17298 = vmatmul.mubr.msk.bf16.vlgmr.msra.gmra.mrb[84].mxu1 %vm1186_vm2, %v4630_v23 }
 0xcd9   : > { %17308 = vmatpush3.bf16.xpose.msra.mxu1 %v5044_v54  ;;  %17309 = vmatprep.mubr.msk.bf16.mxu1 %vm20189_vm1, %v24448_v10  ;;  %v4634_v33 = vpack.c.bf16 %v18591_v49, %v18590_v1 }
 0xcda   : > { %v4631_v34 = vpack.c.bf16 %v18556_v32, %v18555_v62  ;;  %v18599_v14 = vpop.permute.xlu0 %18598  ;;  %17319 = vmatprep.subr.bf16.mxu1 %v24448_v10 }
 0xcdb   : > { %v18564_v9 = vpop.permute.xlu1 %18563  ;;  %v18601_v59 = vunpack.i.h.bf16 %v18599_v14  ;;  %v18600_v57 = vunpack.i.l.bf16 %v18599_v14 }
 0xcdc   : > { %v18566_v45 = vunpack.i.h.bf16 %v18564_v9  ;;  %v18565_v52 = vunpack.i.l.bf16 %v18564_v9  ;;  %17304 = vmatmul.mubr.msk.bf16.vlgmr.msra.gmra.mrb[104].mxu0 %vm1186_vm2, %v4631_v34 }
 0xcdd   : > { %17315 = vmatprep.mubr.msk.bf16.mxu0 %vm20189_vm1, %v24448_v10  ;;  %v4740_v39 = vpack.c.bf16 %v18601_v59, %v18600_v57 }
 0xcde   : > { %v18609_v36 = vpop.permute.xlu0 %18608  ;;  %v4737_v21 = vpack.c.bf16 %v18566_v45, %v18565_v52 }
 0xcdf   : > { %v18574_v42 = vpop.permute.xlu1 %18573  ;;  %v5232_v48 = vsel %vm1186_vm2, %v4740_v39, 0  ;;  %v18611_v8 = vunpack.i.h.bf16 %v18609_v36  ;;  %v18610_v4 = vunpack.i.l.bf16 %v18609_v36 }
 0xce0   : > { %17310 = vmatmul.mubr.msk.bf16.vlgmr.msra.gmra.mrb[88].mxu1 %vm1186_vm2, %v4632_v46  ;;  %v5091_v28 = vsel %vm1186_vm2, %v4737_v21, 0  ;;  %v18576_v19 = vunpack.i.h.bf16 %v18574_v42  ;;  %v18575_v44 = vunpack.i.l.bf16 %v18574_v42 }
 0xce1   : > { %17320 = vmatpush3.bf16.xpose.msra.mxu1 %v5138_v2  ;;  %17314 = vmatpush3.bf16.xpose.msra.mxu0 %v5091_v28  ;;  %v4636_v62 = vpack.c.bf16 %v18611_v8, %v18610_v4 }
 0xce2   : > { %v18619_v30 = vpop.permute.xlu0 %18618  ;;  %17321 = vmatprep.mubr.msk.bf16.mxu1 %vm20189_vm1, %v24448_v10  ;;  %17331 = vmatprep.subr.bf16.mxu1 %v24448_v10  ;;  %v4633_v12 = vpack.c.bf16 %v18576_v19, %v18575_v44 }
 0xce3   : > { %v18584_v5 = vpop.permute.xlu1 %18583  ;;  %17325 = vmatprep.subr.bf16.mxu0 %v24448_v10  ;;  %v18621_v0 = vunpack.i.h.bf16 %v18619_v30  ;;  %v18620_v55 = vunpack.i.l.bf16 %v18619_v30 }
 0xce4   : > { %v18586_v51 = vunpack.i.h.bf16 %v18584_v5  ;;  %v18585_v35 = vunpack.i.l.bf16 %v18584_v5 }
 0xce5   : > { %v4742_v32 = vpack.c.bf16 %v18621_v0, %v18620_v55 }
 0xce6   : > { %v18629_v17 = vpop.permute.xlu0 %18628  ;;  %v4739_v20 = vpack.c.bf16 %v18586_v51, %v18585_v35 }
 0xce7   : > { %v18594_v18 = vpop.permute.xlu1 %18593  ;;  %v5326_v52 = vsel %vm1186_vm2, %v4742_v32, 0  ;;  %v18631_v46 = vunpack.i.h.bf16 %v18629_v17  ;;  %v18630_v36 = vunpack.i.l.bf16 %v18629_v17 }
 0xce8   : > { %17316 = vmatmul.mubr.msk.bf16.vlgmr.msra.gmra.mrb[108].mxu0 %vm1186_vm2, %v4633_v12  ;;  %17322 = vmatmul.mubr.msk.bf16.vlgmr.msra.gmra.mrb[92].mxu1 %vm1186_vm2, %v4634_v33  ;;  %v5185_v25 = vsel %vm1186_vm2, %v4739_v20, 0  ;;  %v18596_v23 = vunpack.i.h.bf16 %v18594_v18  ;;  %v18595_v29 = vunpack.i.l.bf16 %v18594_v18 }
 0xce9   : > { %17332 = vmatpush3.bf16.xpose.msra.mxu1 %v5232_v48  ;;  %17326 = vmatpush3.bf16.xpose.msra.mxu0 %v5185_v25  ;;  %v4638_v1 = vpack.c.bf16 %v18631_v46, %v18630_v36 }
 0xcea   : > { %v18639_v15 = vpop.permute.xlu0 %18638  ;;  %17327 = vmatprep.mubr.msk.bf16.mxu0 %vm20189_vm1, %v24448_v10  ;;  %17333 = vmatprep.mubr.msk.bf16.mxu1 %vm20189_vm1, %v24448_v10  ;;  %v4635_v56 = vpack.c.bf16 %v18596_v23, %v18595_v29 }
 0xceb   : > { %v18604_v54 = vpop.permute.xlu1 %18603  ;;  %17343 = vmatprep.subr.bf16.mxu1 %v24448_v10  ;;  %17337 = vmatprep.subr.bf16.mxu0 %v24448_v10  ;;  %v18641_v9 = vunpack.i.h.bf16 %v18639_v15  ;;  %v18640_v45 = vunpack.i.l.bf16 %v18639_v15 }
 0xcec   : > { %v18606_v63 = vunpack.i.h.bf16 %v18604_v54  ;;  %v18605_v27 = vunpack.i.l.bf16 %v18604_v54 }
 0xced   : > { %v4744_v28 = vpack.c.bf16 %v18641_v9, %v18640_v45 }
 0xcee   : > { %v4741_v58 = vpack.c.bf16 %v18606_v63, %v18605_v27  ;;  %v18649_v14 = vpop.permute.xlu0 %18648 }
 0xcef   : > { %v18614_v34 = vpop.permute.xlu1 %18613  ;;  %v5420_v35 = vsel %vm1186_vm2, %v4744_v28, 0  ;;  %v18651_v33 = vunpack.i.h.bf16 %v18649_v14  ;;  %v18650_v12 = vunpack.i.l.bf16 %v18649_v14 }
 0xcf0   : > { %17328 = vmatmul.mubr.msk.bf16.vlgmr.msra.gmra.mrb[112].mxu0 %vm1186_vm2, %v4635_v56  ;;  %17334 = vmatmul.mubr.msk.bf16.vlgmr.msra.gmra.mrb[96].mxu1 %vm1186_vm2, %v4636_v62  ;;  %v5279_v53 = vsel %vm1186_vm2, %v4741_v58, 0  ;;  %v18616_v21 = vunpack.i.h.bf16 %v18614_v34  ;;  %v18615_v42 = vunpack.i.l.bf16 %v18614_v34 }
 0xcf1   : > { %17344 = vmatpush3.bf16.xpose.msra.mxu1 %v5326_v52  ;;  %17338 = vmatpush3.bf16.xpose.msra.mxu0 %v5279_v53  ;;  %v4640_v25 = vpack.c.bf16 %v18651_v33, %v18650_v12 }
 0xcf2   : > { %17339 = vmatprep.mubr.msk.bf16.mxu0 %vm20189_vm1, %v24448_v10  ;;  %17345 = vmatprep.mubr.msk.bf16.mxu1 %vm20189_vm1, %v24448_v10  ;;  %v18659_v49 = vpop.permute.xlu0 %18658  ;;  %v4637_v19 = vpack.c.bf16 %v18616_v21, %v18615_v42 }
 0xcf3   : > { %v18624_v59 = vpop.permute.xlu1 %18623  ;;  %17355 = vmatprep.subr.bf16.mxu1 %v24448_v10  ;;  %17349 = vmatprep.subr.bf16.mxu0 %v24448_v10  ;;  %v18661_v5 = vunpack.i.h.bf16 %v18659_v49  ;;  %v18660_v51 = vunpack.i.l.bf16 %v18659_v49 }
 0xcf4   : > { %v18626_v57 = vunpack.i.h.bf16 %v18624_v59  ;;  %v18625_v2 = vunpack.i.l.bf16 %v18624_v59 }
 0xcf5   : > { %v4746_v48 = vpack.c.bf16 %v18661_v5, %v18660_v51 }
 0xcf6   : > { %v4743_v44 = vpack.c.bf16 %v18626_v57, %v18625_v2  ;;  %v18669_v23 = vpop.permute.xlu0 %18668 }
 0xcf7   : > { %v18634_v30 = vpop.permute.xlu1 %18633  ;;  %v5514_v15 = vsel %vm1186_vm2, %v4746_v48, 0  ;;  %v18671_v63 = vunpack.i.h.bf16 %v18669_v23  ;;  %v18670_v27 = vunpack.i.l.bf16 %v18669_v23 }
 0xcf8   : > { %17340 = vmatmul.mubr.msk.bf16.vlgmr.msra.gmra.mrb[116].mxu0 %vm1186_vm2, %v4637_v19  ;;  %17346 = vmatmul.mubr.msk.bf16.vlgmr.msra.gmra.mrb[100].mxu1 %vm1186_vm2, %v4638_v1  ;;  %v5373_v39 = vsel %vm1186_vm2, %v4743_v44, 0  ;;  %v18636_v17 = vunpack.i.h.bf16 %v18634_v30  ;;  %v18635_v20 = vunpack.i.l.bf16 %v18634_v30 }
 0xcf9   : > { %17356 = vmatpush3.bf16.xpose.msra.mxu1 %v5420_v35  ;;  %17350 = vmatpush3.bf16.xpose.msra.mxu0 %v5373_v39  ;;  %v4642_v14 = vpack.c.bf16 %v18671_v63, %v18670_v27 }
 0xcfa   : > { %17351 = vmatprep.mubr.msk.bf16.mxu0 %vm20189_vm1, %v24448_v10  ;;  %17357 = vmatprep.mubr.msk.bf16.mxu1 %vm20189_vm1, %v24448_v10  ;;  %v4639_v8 = vpack.c.bf16 %v18636_v17, %v18635_v20 }
 0xcfb   : > { %v18644_v18 = vpop.permute.xlu1 %18643  ;;  %17367 = vmatprep.subr.bf16.mxu1 %v24448_v10  ;;  %17361 = vmatprep.subr.bf16.mxu0 %v24448_v10 }
 0xcfc   : > { %v18646_v0 = vunpack.i.h.bf16 %v18644_v18  ;;  %v18645_v55 = vunpack.i.l.bf16 %v18644_v18 }
 0xcfe   : > { %v4745_v4 = vpack.c.bf16 %v18646_v0, %v18645_v55 }
 0xcff   : > { %v18654_v29 = vpop.permute.xlu1 %18653 }
 0xd00   : > { %17352 = vmatmul.mubr.msk.bf16.vlgmr.msra.gmra.mrb[120].mxu0 %vm1186_vm2, %v4639_v8  ;;  %17358 = vmatmul.mubr.msk.bf16.vlgmr.msra.gmra.mrb[104].mxu1 %vm1186_vm2, %v4640_v25  ;;  %v5467_v54 = vsel %vm1186_vm2, %v4745_v4, 0  ;;  %v18656_v32 = vunpack.i.h.bf16 %v18654_v29  ;;  %v18655_v62 = vunpack.i.l.bf16 %v18654_v29 }
 0xd01   : > { %17368 = vmatpush3.bf16.xpose.msra.mxu1 %v5514_v15  ;;  %17362 = vmatpush3.bf16.xpose.msra.mxu0 %v5467_v54 }
 0xd02   : > { %17363 = vmatprep.mubr.msk.bf16.mxu0 %vm20189_vm1, %v24448_v10  ;;  %17369 = vmatprep.mubr.msk.bf16.mxu1 %vm20189_vm1, %v24448_v10  ;;  %v4641_v9 = vpack.c.bf16 %v18656_v32, %v18655_v62 }
 0xd03   : > { %v18664_v56 = vpop.permute.xlu1 %18663  ;;  %17379 = vmatprep.subr.bf16.mxu1 %v24448_v10  ;;  %17373 = vmatprep.subr.bf16.mxu0 %v24448_v10 }
 0xd04   : > { %v18666_v58 = vunpack.i.h.bf16 %v18664_v56  ;;  %v18665_v34 = vunpack.i.l.bf16 %v18664_v56 }
 0xd06   : > { %v4747_v45 = vpack.c.bf16 %v18666_v58, %v18665_v34 }
 0xd07   : > { %v18674_v52 = vpop.permute.xlu1 %18673 }
 0xd08   : > { %17364 = vmatmul.mubr.msk.bf16.vlgmr.msra.gmra.mrb[124].mxu0 %vm1186_vm2, %v4641_v9  ;;  %17370 = vmatmul.mubr.msk.bf16.vlgmr.msra.gmra.mrb[108].mxu1 %vm1186_vm2, %v4642_v14  ;;  %v5561_v53 = vsel %vm1186_vm2, %v4747_v45, 0  ;;  %v18676_v46 = vunpack.i.h.bf16 %v18674_v52  ;;  %v18675_v36 = vunpack.i.l.bf16 %v18674_v52 }
 0xd09   : > { %17380 = vmatpush3.bf16.msra.mxu1 %v4836_v50  ;;  %17374 = vmatpush3.bf16.xpose.msra.mxu0 %v5561_v53 }
 0xd0a   : > { %17375 = vmatprep.mubr.msk.bf16.mxu0 %vm20189_vm1, %v24448_v10  ;;  %17385 = vmatprep.subr.bf16.mxu0 %v24448_v10  ;;  %v4643_v21 = vpack.c.bf16 %v18676_v46, %v18675_v36 }
 0xd0b   : > { %17381 = vmatprep.mubr.msk.bf16.mxu1 %vm20189_vm1, %v24448_v10  ;;  %17391 = vmatprep.subr.bf16.mxu1 %v24448_v10 }
 0xd10   : > { %17376 = vmatmul.mubr.msk.bf16.vlgmr.msra.gmra.mrb[128].mxu0 %vm1186_vm2, %v4643_v21 }
 0xd11   : > { %17386 = vmatpush3.bf16.msra.mxu0 %v4837_v7  ;;  %17387 = vmatprep.mubr.msk.bf16.mxu0 %vm20189_vm1, %v24448_v10 }
 0xd12   : > { %17397 = vmatprep.subr.bf16.mxu0 %v24448_v10 }
 0xd2f   : > { %v4892_v43 = vpop.f32.mrb[96].mxu0 }
 0xd30   : > { %v21629_v61 = vadd.f32 %v4892_v43, %v20618_v16  ;;  %v17287_v50 = vpop.f32.mrb[97].mxu0 }
 0xd31   : > { %v4895_v42 = vpop.f32.mrb[98].mxu0 }
 0xd32   : > { %v21632_v59 = vadd.f32 %v4895_v42, %v20620_v31  ;;  %v17288_v57 = vpop.f32.mrb[99].mxu0  ;;  %v5604_v2 = vsel %vm1186_vm2, %v21629_v61, -inf }
 0xd33   : > { %5605 = vmax.xlane.f32.xlu0 %v5604_v2 }
 0xd34   : > { %v5607_v3 = vsel %vm1186_vm2, %v21632_v59, -inf }
 0xd35   : > { %5608 = vmax.xlane.f32.xlu1 %v5607_v3 }
 0xd37   : > { %v4939_v41 = vpop.f32.mrb[100].mxu0 }
 0xd38   : > { %v21639_v7 = vadd.f32 %v4939_v41, %v20618_v16  ;;  %v17293_v28 = vpop.f32.mrb[101].mxu0 }
 0xd39   : > { %v4942_v49 = vpop.f32.mrb[102].mxu0 }
 0xd3a   : > { %v21642_v1 = vadd.f32 %v4942_v49, %v20620_v31  ;;  %v17294_v19 = vpop.f32.mrb[103].mxu0  ;;  %v5610_v44 = vsel %vm1186_vm2, %v21639_v7, -inf }
 0xd3b   : > { %5611 = vmax.xlane.f32.xlu0 %v5610_v44 }
 0xd3c   : > { %v5613_v30 = vsel %vm1186_vm2, %v21642_v1, -inf }
 0xd3f   : > { %5614 = vmax.xlane.f32.xlu0 %v5613_v30 }
 0xdab   : > { %v4986_v5 = vpop.f32.mrb[84].mxu1 }
 0xdac   : > { %v21649_v51 = vadd.f32 %v4986_v5, %v20618_v16  ;;  %v17299_v35 = vpop.f32.mrb[85].mxu1 }
 0xdad   : > { %v4989_v39 = vpop.f32.mrb[86].mxu1 }
 0xdae   : > { %v21652_v33 = vadd.f32 %v4989_v39, %v20620_v31  ;;  %v17300_v12 = vpop.f32.mrb[87].mxu1  ;;  %v5616_v17 = vsel %vm1186_vm2, %v21649_v51, -inf }
 0xdaf   : > { %v5033_v20 = vpop.f32.mrb[104].mxu0  ;;  %5617 = vmax.xlane.f32.xlu0 %v5616_v17 }
 0xdb0   : > { %v21657_v18 = vadd.f32 %v5033_v20, %v20618_v16  ;;  %v17305_v0 = vpop.f32.mrb[105].mxu0  ;;  %v5619_v55 = vsel %vm1186_vm2, %v21652_v33, -inf }
 0xdb1   : > { %v5036_v48 = vpop.f32.mrb[106].mxu0  ;;  %5620 = vmax.xlane.f32.xlu1 %v5619_v55 }
 0xdb2   : > { %v21662_v25 = vadd.f32 %v5036_v48, %v20620_v31  ;;  %v17306_v8 = vpop.f32.mrb[107].mxu0  ;;  %v5622_v4 = vsel %vm1186_vm2, %v21657_v18, -inf }
 0xdb3   : > { %5623 = vmax.xlane.f32.xlu0 %v5622_v4  ;;  %v5080_v23 = vpop.f32.mrb[88].mxu1 }
 0xdb4   : > { %v21667_v29 = vadd.f32 %v5080_v23, %v20618_v16  ;;  %v17311_v15 = vpop.f32.mrb[89].mxu1  ;;  %v5625_v54 = vsel %vm1186_vm2, %v21662_v25, -inf }
 0xdb5   : > { %5626 = vmax.xlane.f32.xlu1 %v5625_v54  ;;  %v5083_v63 = vpop.f32.mrb[90].mxu1 }
 0xdb6   : > { %v21672_v27 = vadd.f32 %v5083_v63, %v20620_v31  ;;  %v17312_v32 = vpop.f32.mrb[91].mxu1  ;;  %v5628_v62 = vsel %vm1186_vm2, %v21667_v29, -inf }
 0xdb7   : > { %5629 = vmax.xlane.f32.xlu0 %v5628_v62 }
 0xdb8   : > { %v5631_v56 = vsel %vm1186_vm2, %v21672_v27, -inf }
 0xdb9   : > { %5632 = vmax.xlane.f32.xlu1 %v5631_v56 }
 0xdbb   : > { %v5127_v58 = vpop.f32.mrb[108].mxu0  ;;  %v5174_v34 = vpop.f32.mrb[92].mxu1 }
 0xdbc   : > { %v21679_v14 = vadd.f32 %v5127_v58, %v20618_v16  ;;  %v17317_v9 = vpop.f32.mrb[109].mxu0  ;;  %v17323_v45 = vpop.f32.mrb[93].mxu1  ;;  %v21682_v46 = vadd.f32 %v5174_v34, %v20618_v16 }
 0xdbd   : > { %v5130_v52 = vpop.f32.mrb[110].mxu0  ;;  %v5177_v53 = vpop.f32.mrb[94].mxu1 }
 0xdbe   : > { %v21685_v36 = vadd.f32 %v5130_v52, %v20620_v31  ;;  %v17318_v21 = vpop.f32.mrb[111].mxu0  ;;  %v17324_v43 = vpop.f32.mrb[95].mxu1  ;;  %v5634_v50 = vsel %vm1186_vm2, %v21679_v14, -inf  ;;  %v21690_v42 = vadd.f32 %v5177_v53, %v20620_v31  ;;  %v5640_v2 = vsel %vm1186_vm2, %v21682_v46, -inf }
 0xdbf   : > { %5635 = vmax.xlane.f32.xlu0 %v5634_v50 }
 0xdc0   : > { %v5637_v57 = vsel %vm1186_vm2, %v21685_v36, -inf  ;;  %v5643_v44 = vsel %vm1186_vm2, %v21690_v42, -inf }
 0xdc1   : > { %5638 = vmax.xlane.f32.xlu1 %v5637_v57 }
 0xdc3   : > { %v5221_v3 = vpop.f32.mrb[112].mxu0  ;;  %5641 = vmax.xlane.f32.xlu0 %v5640_v2  ;;  %v5268_v41 = vpop.f32.mrb[96].mxu1 }
 0xdc4   : > { %v21697_v28 = vadd.f32 %v5221_v3, %v20618_v16  ;;  %v17329_v49 = vpop.f32.mrb[113].mxu0  ;;  %v17335_v19 = vpop.f32.mrb[97].mxu1 }
 0xdc5   : > { %v5224_v30 = vpop.f32.mrb[114].mxu0  ;;  %5644 = vmax.xlane.f32.xlu1 %v5643_v44  ;;  %v5271_v5 = vpop.f32.mrb[98].mxu1 }
 0xdc6   : > { %v17330_v35 = vpop.f32.mrb[115].mxu0  ;;  %v17336_v39 = vpop.f32.mrb[99].mxu1  ;;  %v5646_v12 = vsel %vm1186_vm2, %v21697_v28, -inf }
 0xdc7   : > { %5647 = vmax.xlane.f32.xlu0 %v5646_v12  ;;  %v21715_v2 = vpop.permute.xlu0 %18678  ;;  %v21723_v39 = vpop.permute.xlu1 %18683 }
 0xdcb   : > { %v5315_v17 = vpop.f32.mrb[116].mxu0  ;;  %v5362_v20 = vpop.f32.mrb[100].mxu1 }
 0xdcc   : > { %v17341_v0 = vpop.f32.mrb[117].mxu0  ;;  %v17347_v55 = vpop.f32.mrb[101].mxu1 }
 0xdcd   : > { %v5318_v48 = vpop.f32.mrb[118].mxu0  ;;  %v5365_v8 = vpop.f32.mrb[102].mxu1 }
 0xdce   : > { %v17342_v4 = vpop.f32.mrb[119].mxu0  ;;  %v17348_v23 = vpop.f32.mrb[103].mxu1 }
 0xdcf   : > { %v21721_v35 = vpop.permute.xlu0 %18688  ;;  %v21727_v0 = vpop.permute.xlu1 %18693  ;;  %v21734_v23 = vadd.f32 %v5224_v30, %v20620_v31 }
 0xdd3   : > { %v5409_v15 = vpop.f32.mrb[120].mxu0  ;;  %v5456_v54 = vpop.f32.mrb[104].mxu1 }
 0xdd4   : > { %v17353_v63 = vpop.f32.mrb[121].mxu0  ;;  %v17359_v32 = vpop.f32.mrb[105].mxu1 }
 0xdd5   : > { %v5412_v62 = vpop.f32.mrb[122].mxu0  ;;  %v5459_v56 = vpop.f32.mrb[106].mxu1  ;;  %v21737_v32 = vadd.f32 %v5268_v41, %v20618_v16  ;;  %v21752_v41 = vadd.f32 %v5318_v48, %v20620_v31 }
 0xdd6   : > { %v17354_v58 = vpop.f32.mrb[123].mxu0  ;;  %18718 = vrot.lane.b32.xlu1 %v21497_v22, %s24493_s26  ;;  %v17360_v34 = vpop.f32.mrb[107].mxu1 }
 0xdd7   : > { %v21725_v12 = vpop.permute.xlu0 %18698  ;;  %v21731_v4 = vpop.permute.xlu1 %18708  ;;  %v21740_v34 = vadd.f32 %v5271_v5, %v20620_v31  ;;  %v5652_v30 = vsel %vm1186_vm2, %v21737_v32, -inf  ;;  %v5661_v48 = vsel %vm1186_vm2, %v21752_v41, -inf }
 0xdd9   : > { %v5655_v5 = vsel %vm1186_vm2, %v21740_v34, -inf }
 0xddb   : > { %v21705_v9 = vpop.f32.mrb[124].mxu0  ;;  %v21707_v45 = vpop.f32.mrb[108].mxu1 }
 0xddc   : > { %v17365_v52 = vpop.f32.mrb[125].mxu0  ;;  %v17371_v53 = vpop.f32.mrb[109].mxu1 }
 0xddd   : > { %v21709_v21 = vpop.f32.mrb[126].mxu0  ;;  %18713 = vrot.lane.b32.xlu0 %v21491_v26, %s24492_s19  ;;  %v21713_v43 = vpop.f32.mrb[110].mxu1  ;;  %v5649_v52 = vsel %vm1186_vm2, %v21734_v23, -inf }
 0xdde   : > { %v17366_v50 = vpop.f32.mrb[127].mxu0  ;;  %v17372_v57 = vpop.f32.mrb[111].mxu1 }
 0xddf   : > { %v21729_v55 = vpop.permute.xlu0 %18703  ;;  %v5609_v58 = vpop.xlane.xlu1 %5608  ;;  %v21746_v50 = vadd.f32 %v5315_v17, %v20618_v16 }
 0xde0   : > { %v5701_v57 = vsub.f32 %v21632_v59, %v5609_v58  ;;  %v21762_v59 = vadd.f32 %v5365_v8, %v20620_v31  ;;  %v21767_v58 = vadd.f32 %v5409_v15, %v20618_v16 }
 0xde1   : > { %v5658_v17 = vsel %vm1186_vm2, %v21746_v50, -inf }
 0xde2   : > { %v5667_v8 = vsel %vm1186_vm2, %v21762_v59, -inf  ;;  %v5670_v15 = vsel %vm1186_vm2, %v21767_v58, -inf }
 0xde3   : > { %v21717_v3 = vpop.f32.mrb[128].mxu0  ;;  %v5606_v63 = vpop.xlane.xlu0 %5605 }
 0xde4   : > { %v17377_v49 = vpop.f32.mrb[129].mxu0  ;;  %v5700_v53 = vsub.f32 %v21629_v61, %v5606_v63  ;;  %v21757_v61 = vadd.f32 %v5362_v20, %v20618_v16  ;;  %v5734_v63 = vmul.f32 1.442695, %v5701_v57  ;;  %v21778_v57 = vadd.f32 %v5456_v54, %v20618_v16 }
 0xde5   : > { %v21719_v19 = vpop.f32.mrb[130].mxu0 }
 0xde6   : > { %v17378_v44 = vpop.f32.mrb[131].mxu0  ;;  %v5732_v49 = vmul.f32 1.442695, %v5700_v53  ;;  %v5664_v20 = vsel %vm1186_vm2, %v21757_v61, -inf  ;;  %v21772_v53 = vadd.f32 %v5412_v62, %v20620_v31 }
 0xde7   : > { %v5612_v44 = vpop.xlane.xlu0 %5611 }
 0xde8   : > { %19687 = vpow2.f32 %v5732_v49  ;;  %v21784_v49 = vadd.f32 %v5459_v56, %v20620_v31  ;;  %v5673_v62 = vsel %vm1186_vm2, %v21772_v53, -inf  ;;  %v21798_v56 = vadd.f32 %v21705_v9, %v20618_v16 }
 0xde9   : > { %19689 = vpow2.f32 %v5734_v63 }
 0xdea   : > { %v5679_v63 = vsel %vm1186_vm2, %v21784_v49, -inf  ;;  %v5682_v9 = vsel %vm1186_vm2, %v21798_v56, -inf }
 0xdfa   : > { %5650 = vmax.xlane.f32.xlu1 %v5649_v52  ;;  %v5615_v52 = vpop.xlane.xlu0 %5614 }
 0xdfc   : > { %5653 = vmax.xlane.f32.xlu0 %v5652_v30  ;;  %v5702_v30 = vsub.f32 %v21639_v7, %v5612_v44  ;;  %v5676_v7 = vsel %vm1186_vm2, %v21778_v57, -inf  ;;  %v21790_v44 = vpop.eup %19687 }
 0xdfe   : > { %5656 = vmax.xlane.f32.xlu1 %v5655_v5  ;;  %v5703_v5 = vsub.f32 %v21642_v1, %v5615_v52  ;;  %v21794_v1 = vpop.eup %19689 }
 0xdff   : > { %v5799_v52 = vsel %vm1186_vm2, %v21794_v1, 0.0 }
 0xe00   : > { %5659 = vmax.xlane.f32.xlu0 %v5658_v17  ;;  %v5736_v17 = vmul.f32 1.442695, %v5702_v30  ;;  %v5738_v54 = vmul.f32 1.442695, %v5703_v5  ;;  %v21816_v30 = vadd.f32 %v21713_v43, %v20620_v31  ;;  %v21830_v43 = vadd.f32 %v21717_v3, %v20618_v16 }
 0xe02   : > { %5662 = vmax.xlane.f32.xlu1 %v5661_v48  ;;  %19691 = vpow2.f32 %v5736_v17  ;;  %v5796_v48 = vsel %vm1186_vm2, %v21790_v44, 0.0 }
 0xe03   : > { %19693 = vpow2.f32 %v5738_v54 }
 0xe04   : > { %5665 = vmax.xlane.f32.xlu0 %v5664_v20  ;;  %v21804_v20 = vadd.f32 %v21709_v21, %v20620_v31 }
 0xe06   : > { %5668 = vmax.xlane.f32.xlu1 %v5667_v8  ;;  %v21810_v8 = vadd.f32 %v21707_v45, %v20618_v16  ;;  %v5685_v21 = vsel %vm1186_vm2, %v21804_v20, -inf  ;;  %v5691_v45 = vsel %vm1186_vm2, %v21816_v30, -inf }
 0xe08   : > { %5671 = vmax.xlane.f32.xlu0 %v5670_v15  ;;  %v5688_v15 = vsel %vm1186_vm2, %v21810_v8, -inf }
 0xe0a   : > { %5674 = vmax.xlane.f32.xlu1 %v5673_v62 }
 0xe0c   : > { %5677 = vmax.xlane.f32.xlu0 %v5676_v7  ;;  %v21822_v5 = vpop.eup %19691  ;;  %v21836_v7 = vadd.f32 %v21719_v19, %v20620_v31 }
 0xe0d   : > { %v21826_v62 = vpop.eup %19693  ;;  %v5802_v17 = vsel %vm1186_vm2, %v21822_v5, 0.0 }
 0xe0e   : > { %5680 = vmax.xlane.f32.xlu1 %v5679_v63  ;;  %v5805_v54 = vsel %vm1186_vm2, %v21826_v62, 0.0  ;;  %v5694_v63 = vsel %vm1186_vm2, %v21830_v43, -inf  ;;  %v5697_v3 = vsel %vm1186_vm2, %v21836_v7, -inf }
 0xe10   : > { %5797 = vadd.xlane.f32.xlu0 %v5796_v48 }
 0xe12   : > { %5800 = vadd.xlane.f32.xlu1 %v5799_v52 }
 0xe14   : > { %5683 = vmax.xlane.f32.xlu0 %v5682_v9 }
 0xe16   : > { %5686 = vmax.xlane.f32.xlu1 %v5685_v21 }
 0xe18   : > { %5689 = vmax.xlane.f32.xlu0 %v5688_v15 }
 0xe1a   : > { %5692 = vmax.xlane.f32.xlu1 %v5691_v45 }
 0xe1c   : > { %5803 = vadd.xlane.f32.xlu0 %v5802_v17 }
 0xe1e   : > { %5806 = vadd.xlane.f32.xlu1 %v5805_v54 }
 0xe20   : > { %5695 = vmax.xlane.f32.xlu0 %v5694_v63 }
 0xe22   : > { %5698 = vmax.xlane.f32.xlu1 %v5697_v3 }
 0xe3c   : > { %v5618_v48 = vpop.xlane.xlu0 %5617 }
 0xe3d   : > { %v5704_v52 = vsub.f32 %v21649_v51, %v5618_v48 }
 0xe3e   : > { %v5621_v9 = vpop.xlane.xlu1 %5620 }
 0xe3f   : > { %v5740_v21 = vmul.f32 1.442695, %v5704_v52  ;;  %v5705_v19 = vsub.f32 %v21652_v33, %v5621_v9 }
 0xe40   : > { %v5624_v15 = vpop.xlane.xlu0 %5623 }
 0xe41   : > { %19695 = vpow2.f32 %v5740_v21  ;;  %v5742_v45 = vmul.f32 1.442695, %v5705_v19  ;;  %v5706_v17 = vsub.f32 %v21657_v18, %v5624_v15 }
 0xe42   : > { %v5627_v54 = vpop.xlane.xlu1 %5626 }
 0xe43   : > { %19697 = vpow2.f32 %v5742_v45  ;;  %v5744_v47 = vmul.f32 1.442695, %v5706_v17  ;;  %v5707_v63 = vsub.f32 %v21662_v25, %v5627_v54 }
 0xe44   : > { %v5630_v10 = vpop.xlane.xlu0 %5629 }
 0xe45   : > { %19699 = vpow2.f32 %v5744_v47  ;;  %v5746_v3 = vmul.f32 1.442695, %v5707_v63  ;;  %v5708_v31 = vsub.f32 %v21667_v29, %v5630_v10 }
 0xe46   : > { %v5633_v51 = vpop.xlane.xlu1 %5632 }
 0xe47   : > { %19701 = vpow2.f32 %v5746_v3  ;;  %v5748_v48 = vmul.f32 1.442695, %v5708_v31  ;;  %v5709_v33 = vsub.f32 %v21672_v27, %v5633_v51 }
 0xe49   : > { %19703 = vpow2.f32 %v5748_v48  ;;  %v5750_v52 = vmul.f32 1.442695, %v5709_v33 }
 0xe4b   : > { %v21850_v9 = vpop.eup %19695  ;;  %19705 = vpow2.f32 %v5750_v52 }
 0xe4c   : > { %v5636_v18 = vpop.xlane.xlu0 %5635  ;;  %v5808_v21 = vsel %vm1186_vm2, %v21850_v9, 0.0 }
 0xe4d   : > { %v21854_v25 = vpop.eup %19697  ;;  %v5710_v47 = vsub.f32 %v21679_v14, %v5636_v18  ;;  %5809 = vadd.xlane.f32.xlu0 %v5808_v21 }
 0xe4e   : > { %v5639_v10 = vpop.xlane.xlu1 %5638  ;;  %v5811_v31 = vsel %vm1186_vm2, %v21854_v25, 0.0 }
 0xe4f   : > { %v21859_v29 = vpop.eup %19699  ;;  %v5752_v27 = vmul.f32 1.442695, %v5710_v47  ;;  %v5711_v19 = vsub.f32 %v21685_v36, %v5639_v10  ;;  %5812 = vadd.xlane.f32.xlu1 %v5811_v31 }
 0xe50   : > { %v5642_v15 = vpop.xlane.xlu0 %5641  ;;  %v5814_v45 = vsel %vm1186_vm2, %v21859_v29, 0.0 }
 0xe51   : > { %v21864_v17 = vpop.eup %19701  ;;  %19707 = vpow2.f32 %v5752_v27  ;;  %v5712_v14 = vsub.f32 %v21682_v46, %v5642_v15  ;;  %5815 = vadd.xlane.f32.xlu0 %v5814_v45  ;;  %v5754_v51 = vmul.f32 1.442695, %v5711_v19 }
 0xe52   : > { %v5645_v54 = vpop.xlane.xlu1 %5644  ;;  %v5817_v63 = vsel %vm1186_vm2, %v21864_v17, 0.0 }
 0xe53   : > { %v21869_v3 = vpop.eup %19703  ;;  %v5756_v48 = vmul.f32 1.442695, %v5712_v14  ;;  %v5713_v36 = vsub.f32 %v21690_v42, %v5645_v54  ;;  %5818 = vadd.xlane.f32.xlu1 %v5817_v63 }
 0xe54   : > { %v5648_v33 = vpop.xlane.xlu0 %5647  ;;  %v5820_v52 = vsel %vm1186_vm2, %v21869_v3, 0.0 }
 0xe55   : > { %v21874_v18 = vpop.eup %19705  ;;  %19709 = vpow2.f32 %v5756_v48  ;;  %v5714_v46 = vsub.f32 %v21697_v28, %v5648_v33  ;;  %5821 = vadd.xlane.f32.xlu0 %v5820_v52  ;;  %v5758_v47 = vmul.f32 1.442695, %v5713_v36 }
 0xe56   : > { %v5823_v21 = vsel %vm1186_vm2, %v21874_v18, 0.0  ;;  %19711 = vpow2.f32 %v5754_v51  ;;  %v21899_v51 = vpop.permute.xlu1 %18718 }
 0xe57   : > { %v5760_v10 = vmul.f32 1.442695, %v5714_v46  ;;  %5824 = vadd.xlane.f32.xlu1 %v5823_v21 }
 0xe58   : > { %v21901_v48 = vpop.permute.xlu0 %18713 }
 0xe59   : > { %19713 = vpow2.f32 %v5760_v10 }
 0xe5a   : > { %19715 = vpow2.f32 %v5758_v47 }
 0xe5b   : > { %v21879_v42 = vpop.eup %19707 }
 0xe5c   : > { %v5826_v31 = vsel %vm1186_vm2, %v21879_v42, 0.0 }
 0xe5d   : > { %5827 = vadd.xlane.f32.xlu0 %v5826_v31 }
 0xe5f   : > { %v21883_v27 = vpop.eup %19709 }
 0xe60   : > { %v5832_v28 = vsel %vm1186_vm2, %v21883_v27, 0.0  ;;  %v21887_v19 = vpop.eup %19711 }
 0xe61   : > { %5833 = vadd.xlane.f32.xlu1 %v5832_v28  ;;  %v5829_v14 = vsel %vm1186_vm2, %v21887_v19, 0.0 }
 0xe63   : > { %v21889_v15 = vpop.eup %19713 }
 0xe64   : > { %v5838_v45 = vsel %vm1186_vm2, %v21889_v15, 0.0  ;;  %v21895_v54 = vpop.eup %19715 }
 0xe65   : > { %5839 = vadd.xlane.f32.xlu0 %v5838_v45  ;;  %5830 = vadd.xlane.f32.xlu1 %v5829_v14  ;;  %v5835_v63 = vsel %vm1186_vm2, %v21895_v54, 0.0 }
 0xe69   : > { %5836 = vadd.xlane.f32.xlu1 %v5835_v63 }
 0xe87   : > { %v5651_v36 = vpop.xlane.xlu1 %5650 }
 0xe88   : > { %v5715_v33 = vsub.f32 %v21734_v23, %v5651_v36 }
 0xe89   : > { %v5654_v52 = vpop.xlane.xlu0 %5653 }
 0xe8a   : > { %v5716_v46 = vsub.f32 %v21737_v32, %v5654_v52  ;;  %v5762_v47 = vmul.f32 1.442695, %v5715_v33 }
 0xe8b   : > { %v5657_v21 = vpop.xlane.xlu1 %5656 }
 0xe8c   : > { %v5764_v10 = vmul.f32 1.442695, %v5716_v46  ;;  %v5717_v31 = vsub.f32 %v21740_v34, %v5657_v21 }
 0xe8d   : > { %v5660_v28 = vpop.xlane.xlu0 %5659 }
 0xe8e   : > { %19717 = vpow2.f32 %v5764_v10  ;;  %v5718_v45 = vsub.f32 %v21746_v50, %v5660_v28  ;;  %v5766_v63 = vmul.f32 1.442695, %v5717_v31 }
 0xe8f   : > { %v5663_v14 = vpop.xlane.xlu1 %5662  ;;  %19719 = vpow2.f32 %v5762_v47 }
 0xe90   : > { %v5768_v16 = vmul.f32 1.442695, %v5718_v45  ;;  %v5719_v36 = vsub.f32 %v21752_v41, %v5663_v14 }
 0xe91   : > { %v5666_v37 = vpop.xlane.xlu0 %5665 }
 0xe92   : > { %19721 = vpow2.f32 %v5768_v16  ;;  %v5720_v23 = vsub.f32 %v21757_v61, %v5666_v37  ;;  %v5770_v46 = vmul.f32 1.442695, %v5719_v36 }
 0xe93   : > { %v5669_v32 = vpop.xlane.xlu1 %5668  ;;  %19723 = vpow2.f32 %v5766_v63 }
 0xe94   : > { %v5772_v33 = vmul.f32 1.442695, %v5720_v23  ;;  %v5721_v34 = vsub.f32 %v21762_v59, %v5669_v32 }
 0xe95   : > { %v5672_v52 = vpop.xlane.xlu0 %5671 }
 0xe96   : > { %19725 = vpow2.f32 %v5772_v33  ;;  %v5774_v41 = vmul.f32 1.442695, %v5721_v34  ;;  %v5722_v59 = vsub.f32 %v21767_v58, %v5672_v52 }
 0xe97   : > { %v5675_v21 = vpop.xlane.xlu1 %5674  ;;  %19727 = vpow2.f32 %v5770_v46 }
 0xe98   : > { %v21910_v10 = vpop.eup %19717  ;;  %v5723_v50 = vsub.f32 %v21772_v53, %v5675_v21  ;;  %v5776_v33 = vmul.f32 1.442695, %v5722_v59 }
 0xe99   : > { %v5678_v47 = vpop.xlane.xlu0 %5677  ;;  %v5844_v16 = vsel %vm1186_vm2, %v21910_v10, 0.0  ;;  %v21915_v37 = vpop.eup %19719 }
 0xe9a   : > { %v5778_v61 = vmul.f32 1.442695, %v5723_v50  ;;  %5845 = vadd.xlane.f32.xlu1 %v5844_v16  ;;  %v5841_v63 = vsel %vm1186_vm2, %v21915_v37, 0.0  ;;  %v5724_v32 = vsub.f32 %v21778_v57, %v5678_v47 }
 0xe9b   : > { %v5681_v31 = vpop.xlane.xlu1 %5680 }
 0xe9c   : > { %v21917_v28 = vpop.eup %19721  ;;  %19729 = vpow2.f32 %v5778_v61  ;;  %v5725_v45 = vsub.f32 %v21784_v49, %v5681_v31  ;;  %v5780_v46 = vmul.f32 1.442695, %v5724_v32 }
 0xe9d   : > { %v5798_v14 = vpop.xlane.xlu0 %5797  ;;  %v5850_v53 = vsel %vm1186_vm2, %v21917_v28, 0.0  ;;  %v21925_v23 = vpop.eup %19723  ;;  %19731 = vpow2.f32 %v5774_v41 }
 0xe9e   : > { %v5782_v36 = vmul.f32 1.442695, %v5725_v45  ;;  %5851 = vadd.xlane.f32.xlu0 %v5850_v53  ;;  %5842 = vadd.xlane.f32.xlu1 %v5841_v63  ;;  %19733 = vrcp.f32 %v5798_v14  ;;  %v5847_v52 = vsel %vm1186_vm2, %v21925_v23, 0.0 }
 0xe9f   : > { %v5801_v58 = vpop.xlane.xlu1 %5800 }
 0xea0   : > { %19735 = vpow2.f32 %v5782_v36  ;;  %v21930_v34 = vpop.eup %19725 }
 0xea1   : > { %19737 = vrcp.f32 %v5801_v58  ;;  %v5684_v49 = vpop.xlane.xlu0 %5683  ;;  %v21934_v57 = vpop.eup %19727  ;;  %v5856_v41 = vsel %vm1186_vm2, %v21930_v34, 0.0 }
 0xea2   : > { %5848 = vadd.xlane.f32.xlu1 %v5847_v52  ;;  %19739 = vpow2.f32 %v5776_v33  ;;  %v5726_v50 = vsub.f32 %v21798_v56, %v5684_v49  ;;  %v5853_v36 = vsel %vm1186_vm2, %v21934_v57, 0.0  ;;  %v18681_v33 = vunpack.i.h.bf16 %v21715_v2 }
 0xea3   : > { %v5687_v21 = vpop.xlane.xlu1 %5686  ;;  %19741 = vpow2.f32 %v5780_v46  ;;  %v18680_v49 = vunpack.i.l.bf16 %v21715_v2 }
 0xea4   : > { %v5727_v16 = vsub.f32 %v21804_v20, %v5687_v21  ;;  %v5784_v56 = vmul.f32 1.442695, %v5726_v50 }
 0xea5   : > { %v5690_v47 = vpop.xlane.xlu0 %5689 }
 0xea6   : > { %v21938_v61 = vpop.eup %19729  ;;  %v5786_v31 = vmul.f32 1.442695, %v5727_v16  ;;  %5857 = vadd.xlane.f32.xlu1 %v5856_v41  ;;  %v5728_v20 = vsub.f32 %v21810_v8, %v5690_v47 }
 0xea7   : > { %v21940_v59 = vpop.xlane.xlu1 %5692  ;;  %v5865_v45 = vsel %vm1186_vm2, %v21938_v61, 0.0  ;;  %v21944_v14 = vpop.eup %19731 }
 0xea8   : > { %19743 = vpow2.f32 %v5786_v31  ;;  %5866 = vadd.xlane.f32.xlu0 %v5865_v45  ;;  %v19734_v53 = vpop.eup %19733  ;;  %v5788_v50 = vmul.f32 1.442695, %v5728_v20  ;;  %v5859_v47 = vsel %vm1186_vm2, %v21944_v14, 0.0  ;;  %v4838_v45 = vpack.c.bf16 %v18681_v33, %v18680_v49 }
 0xea9   : > { %v5804_v63 = vpop.xlane.xlu0 %5803  ;;  %v5924_v8 = vmul.f32 %v19734_v53, %v21790_v44  ;;  %v18686_v49 = vunpack.i.h.bf16 %v21723_v39 }
 0xeaa   : > { %v21949_v32 = vpop.eup %19735  ;;  %5854 = vadd.xlane.f32.xlu1 %v5853_v36  ;;  %19745 = vrcp.f32 %v5804_v63 }
 0xeab   : > { %v19738_v58 = vpop.eup %19737  ;;  %v5807_v52 = vpop.xlane.xlu1 %5806  ;;  %v5871_v46 = vsel %vm1186_vm2, %v21949_v32, 0.0  ;;  %19747 = vpow2.f32 %v5784_v56  ;;  %v24496_v56 = vmov 0.0  }
 0xeac   : > { %v5925_v21 = vmul.f32 %v19738_v58, %v21794_v1  ;;  %5872 = vadd.xlane.f32.xlu0 %v5871_v46  ;;  %19749 = vrcp.f32 %v5807_v52  ;;  %v21959_v41 = vpop.eup %19739  ;;  %v18685_v52 = vunpack.i.l.bf16 %v21723_v39 }
 0xead   : > { %v5696_v16 = vpop.xlane.xlu0 %5695  ;;  %19751 = vpow2.f32 %v5788_v50  ;;  %v21963_v44 = vpop.eup %19741  ;;  %v5862_v1 = vsel %vm1186_vm2, %v21959_v41, 0.0 }
 0xeae   : > { %v5730_v2 = vsub.f32 %v21830_v43, %v5696_v16  ;;  %5860 = vadd.xlane.f32.xlu1 %v5859_v47  ;;  %v5956_v31 = vpack.c.bf16 %v5925_v21, %v5924_v8  ;;  %v5868_v36 = vsel %vm1186_vm2, %v21963_v44, 0.0  ;;  %v4839_v47 = vpack.c.bf16 %v18686_v49, %v18685_v52 }
 0xeb0   : > { %v5792_v63 = vmul.f32 1.442695, %v5730_v2  ;;  %17382 = vmatmul.mubr.msk.bf16.vlgmr.msra.gmra.mrb[112].mxu1 %vm1186_vm2, %v5956_v31  ;;  %v5699_v31 = vpop.xlane.xlu1 %5698 }
 0xeb1   : > { %17392 = vmatpush3.bf16.msra.mxu1 %v4838_v45  ;;  %17393 = vmatprep.mubr.msk.bf16.mxu1 %vm20189_vm1, %v24496_v56 }
 0xeb2   : > { %v21969_v20 = vpop.eup %19743  ;;  %5863 = vadd.xlane.f32.xlu1 %v5862_v1  ;;  %17403 = vmatprep.subr.bf16.mxu1 %v24496_v56  ;;  %19753 = vpow2.f32 %v5792_v63  ;;  %v5731_v63 = vsub.f32 %v21836_v7, %v5699_v31  ;;  %v18696_v31 = vunpack.i.h.bf16 %v21727_v0 }
 0xeb3   : > { %v5877_v43 = vsel %vm1186_vm2, %v21969_v20, 0.0 }
 0xeb4   : > { %5878 = vadd.xlane.f32.xlu0 %v5877_v43  ;;  %v19746_v53 = vpop.eup %19745  ;;  %v5794_v1 = vmul.f32 1.442695, %v5731_v63 }
 0xeb5   : > { %v21976_v58 = vpop.eup %19747  ;;  %v5926_v46 = vmul.f32 %v19746_v53, %v21822_v5 }
 0xeb6   : > { %5869 = vadd.xlane.f32.xlu1 %v5868_v36  ;;  %v19750_v33 = vpop.eup %19749  ;;  %v5874_v21 = vsel %vm1186_vm2, %v21976_v58, 0.0 }
 0xeb7   : > { %v5927_v8 = vmul.f32 %v19750_v33, %v21826_v62  ;;  %v21984_v50 = vpop.eup %19751  ;;  %v5729_v62 = vsub.f32 %v21816_v30, %v21940_v59 }
 0xeb8   : > { %v5880_v2 = vsel %vm1186_vm2, %v21984_v50, 0.0 }
 0xeb9   : > { %v5957_v16 = vpack.c.bf16 %v5927_v8, %v5926_v46  ;;  %v5790_v45 = vmul.f32 1.442695, %v5729_v62  ;;  %v18690_v46 = vunpack.i.l.bf16 %v21721_v35 }
 0xeba   : > { %5875 = vadd.xlane.f32.xlu1 %v5874_v21 }
 0xebb   : > { %17388 = vmatmul.mubr.msk.bf16.vlgmr.msra.gmra.mrb[132].mxu0 %vm1186_vm2, %v5957_v16  ;;  %19755 = vpow2.f32 %v5790_v45  ;;  %v18695_v45 = vunpack.i.l.bf16 %v21727_v0 }
 0xebc   : > { %17398 = vmatpush3.bf16.msra.mxu0 %v4839_v47  ;;  %17399 = vmatprep.mubr.msk.bf16.mxu0 %vm20189_vm1, %v24496_v56  ;;  %v21991_v39 = vpop.eup %19753 }
 0xebd   : > { %17409 = vmatprep.subr.bf16.mxu0 %v24496_v56  ;;  %v5886_v5 = vsel %vm1186_vm2, %v21991_v39, 0.0 }
 0xebe   : > { %5881 = vadd.xlane.f32.xlu1 %v5880_v2 }
 0xec2   : > { %5887 = vadd.xlane.f32.xlu1 %v5886_v5 }
 0xec5   : > { %v22009_v36 = vpop.eup %19755 }
 0xec6   : > { %v5883_v16 = vsel %vm1186_vm2, %v22009_v36, 0.0 }
 0xeca   : > { %18723 = vrot.lane.b32.xlu0 %v21491_v26, %s24493_s26 }
 0xed3   : > { %18728 = vrot.lane.b32.xlu1 %v21497_v22, %s24494_s28 }
 0xed7   : > { %18733 = vrot.lane.b32.xlu1 %v21491_v26, %s24494_s28 }
 0xeda   : > { %v5810_v43 = vpop.xlane.xlu0 %5809 }
 0xedb   : > { %19757 = vrcp.f32 %v5810_v43  ;;  %18738 = vrot.lane.b32.xlu1 %v21497_v22, %s24495_s17  ;;  %v18691_v22 = vunpack.i.h.bf16 %v21721_v35 }
 0xedc   : > { %v5813_v53 = vpop.xlane.xlu1 %5812 }
 0xedd   : > { %19759 = vrcp.f32 %v5813_v53  ;;  %v4840_v62 = vpack.c.bf16 %v18691_v22, %v18690_v46  ;;  %v4841_v53 = vpack.c.bf16 %v18696_v31, %v18695_v45  ;;  %v18706_v22 = vunpack.i.h.bf16 %v21729_v55 }
 0xede   : > { %19761 = vpow2.f32 %v5794_v1  ;;  %v5816_v30 = vpop.xlane.xlu0 %5815  ;;  %v18705_v46 = vunpack.i.l.bf16 %v21729_v55 }
 0xedf   : > { %19763 = vrcp.f32 %v5816_v30  ;;  %18743 = vrot.lane.b32.xlu1 %v21491_v26, %s24495_s17 }
 0xee0   : > { %v5819_v59 = vpop.xlane.xlu1 %5818  ;;  %v4843_v31 = vpack.c.bf16 %v18706_v22, %v18705_v46 }
 0xee1   : > { %19765 = vrcp.f32 %v5819_v59 }
 0xee2   : > { %v5822_v7 = vpop.xlane.xlu0 %5821 }
 0xee3   : > { %19767 = vrcp.f32 %v5822_v7 }
 0xee4   : > { %v5825_v33 = vpop.xlane.xlu1 %5824 }
 0xee5   : > { %v19758_v49 = vpop.eup %19757  ;;  %19769 = vrcp.f32 %v5825_v33 }
 0xee6   : > { %v5928_v21 = vmul.f32 %v19758_v49, %v21850_v9 }
 0xee7   : > { %v19760_v52 = vpop.eup %19759 }
 0xee8   : > { %v22013_v8 = vpop.eup %19761  ;;  %v5929_v26 = vmul.f32 %v19760_v52, %v21854_v25 }
 0xee9   : > { %v19764_v47 = vpop.eup %19763  ;;  %5884 = vadd.xlane.f32.xlu0 %v5883_v16  ;;  %v5889_v9 = vsel %vm1186_vm2, %v22013_v8, 0.0 }
 0xeea   : > { %v5958_v2 = vpack.c.bf16 %v5929_v26, %v5928_v21  ;;  %v5930_v35 = vmul.f32 %v19764_v47, %v21859_v29  ;;  %v18701_v29 = vunpack.i.h.bf16 %v21725_v12  ;;  %v5828_v30 = vpop.xlane.xlu0 %5827 }
 0xeeb   : > { %v19766_v5 = vpop.eup %19765  ;;  %19771 = vrcp.f32 %v5828_v30 }
 0xeec   : > { %v5931_v63 = vmul.f32 %v19766_v5, %v21864_v17  ;;  %17394 = vmatmul.mubr.msk.bf16.vlgmr.msra.gmra.mrb[116].mxu1 %vm1186_vm2, %v5958_v2  ;;  %v18700_v17 = vunpack.i.l.bf16 %v21725_v12  ;;  %v18711_v2 = vunpack.i.h.bf16 %v21731_v4  ;;  %v18710_v5 = vunpack.i.l.bf16 %v21731_v4 }
 0xeed   : > { %v19768_v25 = vpop.eup %19767  ;;  %17404 = vmatpush3.bf16.msra.mxu1 %v4840_v62  ;;  %5890 = vadd.xlane.f32.xlu0 %v5889_v9 }
 0xeee   : > { %v5834_v1 = vpop.xlane.xlu1 %5833  ;;  %v5959_v43 = vpack.c.bf16 %v5931_v63, %v5930_v35  ;;  %17405 = vmatprep.mubr.msk.bf16.mxu1 %vm20189_vm1, %v24496_v56  ;;  %17415 = vmatprep.subr.bf16.mxu1 %v24496_v56  ;;  %v5932_v59 = vmul.f32 %v19768_v25, %v21869_v3  ;;  %v4842_v52 = vpack.c.bf16 %v18701_v29, %v18700_v17 }
 0xeef   : > { %v19770_v0 = vpop.eup %19769 }
 0xef0   : > { %v5933_v7 = vmul.f32 %v19770_v0, %v21874_v18  ;;  %17400 = vmatmul.mubr.msk.bf16.vlgmr.msra.gmra.mrb[136].mxu0 %vm1186_vm2, %v5959_v43  ;;  %v18716_v43 = vunpack.i.h.bf16 %v21901_v48  ;;  %v18715_v0 = vunpack.i.l.bf16 %v21901_v48 }
 0xef1   : > { %17410 = vmatpush3.bf16.msra.mxu0 %v4841_v53  ;;  %17411 = vmatprep.mubr.msk.bf16.mxu0 %vm20189_vm1, %v24496_v56 }
 0xef2   : > { %v5831_v33 = vpop.xlane.xlu1 %5830  ;;  %v5960_v49 = vpack.c.bf16 %v5933_v7, %v5932_v59  ;;  %17421 = vmatprep.subr.bf16.mxu0 %v24496_v56 }
 0xef3   : > { %19773 = vrcp.f32 %v5831_v33  ;;  %v18721_v33 = vunpack.i.h.bf16 %v21899_v51 }
 0xef4   : > { %17406 = vmatmul.mubr.msk.bf16.vlgmr.msra.gmra.mrb[120].mxu1 %vm1186_vm2, %v5960_v49  ;;  %19775 = vrcp.f32 %v5834_v1  ;;  %v18720_v49 = vunpack.i.l.bf16 %v21899_v51 }
 0xef5   : > { %17416 = vmatpush3.bf16.msra.mxu1 %v4842_v52  ;;  %17417 = vmatprep.mubr.msk.bf16.mxu1 %vm20189_vm1, %v24496_v56  ;;  %v19772_v3 = vpop.eup %19771 }
 0xef6   : > { %v5837_v12 = vpop.xlane.xlu1 %5836  ;;  %17427 = vmatprep.subr.bf16.mxu1 %v24496_v56  ;;  %v5934_v26 = vmul.f32 %v19772_v3, %v21879_v42  ;;  %v4844_v42 = vpack.c.bf16 %v18711_v2, %v18710_v5  ;;  %v4846_v22 = vpack.c.bf16 %v18721_v33, %v18720_v49 }
 0xef7   : > { %19777 = vrcp.f32 %v5837_v12  ;;  %v4845_v12 = vpack.c.bf16 %v18716_v43, %v18715_v0 }
 0xefd   : > { %v19774_v18 = vpop.eup %19773 }
 0xefe   : > { %v19776_v21 = vpop.eup %19775  ;;  %v5935_v16 = vmul.f32 %v19774_v18, %v21887_v19 }
 0xeff   : > { %v5936_v45 = vmul.f32 %v19776_v21, %v21883_v27  ;;  %v5840_v27 = vpop.xlane.xlu0 %5839 }
 0xf00   : > { %v5961_v62 = vpack.c.bf16 %v5935_v16, %v5934_v26  ;;  %19779 = vrcp.f32 %v5840_v27 }
 0xf01   : > { %v19778_v47 = vpop.eup %19777 }
 0xf02   : > { %v5937_v35 = vmul.f32 %v19778_v47, %v21895_v54  ;;  %17412 = vmatmul.mubr.msk.bf16.vlgmr.msra.gmra.mrb[140].mxu0 %vm1186_vm2, %v5961_v62 }
 0xf03   : > { %17422 = vmatpush3.bf16.msra.mxu0 %v4843_v31  ;;  %17423 = vmatprep.mubr.msk.bf16.mxu0 %vm20189_vm1, %v24496_v56 }
 0xf04   : > { %v5962_v55 = vpack.c.bf16 %v5937_v35, %v5936_v45  ;;  %17433 = vmatprep.subr.bf16.mxu0 %v24496_v56 }
 0xf06   : > { %17418 = vmatmul.mubr.msk.bf16.vlgmr.msra.gmra.mrb[124].mxu1 %vm1186_vm2, %v5962_v55 }
 0xf07   : > { %17428 = vmatpush3.bf16.msra.mxu1 %v4844_v42  ;;  %17429 = vmatprep.mubr.msk.bf16.mxu1 %vm20189_vm1, %v24496_v56 }
 0xf08   : > { %17439 = vmatprep.subr.bf16.mxu1 %v24496_v56 }
 0xf0a   : > { %v19780_v25 = vpop.eup %19779 }
 0xf0b   : > { %v5938_v30 = vmul.f32 %v19780_v25, %v21889_v15 }
 0xf27   : > { %v5846_v4 = vpop.xlane.xlu1 %5845 }
 0xf2b   : > { %v5843_v19 = vpop.xlane.xlu1 %5842  ;;  %v5852_v63 = vpop.xlane.xlu0 %5851 }
 0xf2c   : > { %19781 = vrcp.f32 %v5843_v19 }
 0xf2d   : > { %19783 = vrcp.f32 %v5846_v4 }
 0xf2f   : > { %v5849_v54 = vpop.xlane.xlu1 %5848 }
 0xf30   : > { %19785 = vrcp.f32 %v5849_v54 }
 0xf31   : > { %19787 = vrcp.f32 %v5852_v63 }
 0xf33   : > { %v5858_v9 = vpop.xlane.xlu1 %5857 }
 0xf35   : > { %v5867_v29 = vpop.xlane.xlu0 %5866 }
 0xf36   : > { %v19782_v1 = vpop.eup %19781 }
 0xf37   : > { %v5855_v17 = vpop.xlane.xlu1 %5854  ;;  %v19784_v53 = vpop.eup %19783  ;;  %v5939_v59 = vmul.f32 %v19782_v1, %v21915_v37 }
 0xf38   : > { %19789 = vrcp.f32 %v5855_v17  ;;  %v5940_v3 = vmul.f32 %v19784_v53, %v21910_v10 }
 0xf39   : > { %19791 = vrcp.f32 %v5858_v9  ;;  %v5963_v52 = vpack.c.bf16 %v5939_v59, %v5938_v30  ;;  %v5873_v15 = vpop.xlane.xlu0 %5872 }
 0xf3a   : > { %v19786_v7 = vpop.eup %19785 }
 0xf3b   : > { %v5941_v48 = vmul.f32 %v19786_v7, %v21925_v23  ;;  %v5861_v18 = vpop.xlane.xlu1 %5860  ;;  %17424 = vmatmul.mubr.msk.bf16.vlgmr.msra.gmra.mrb[144].mxu0 %vm1186_vm2, %v5963_v52  ;;  %v19788_v10 = vpop.eup %19787 }
 0xf3c   : > { %19793 = vrcp.f32 %v5861_v18  ;;  %17434 = vmatpush3.bf16.msra.mxu0 %v4845_v12  ;;  %17435 = vmatprep.mubr.msk.bf16.mxu0 %vm20189_vm1, %v24496_v56  ;;  %v5942_v21 = vmul.f32 %v19788_v10, %v21917_v28 }
 0xf3d   : > { %v5964_v37 = vpack.c.bf16 %v5941_v48, %v5940_v3  ;;  %19795 = vrcp.f32 %v5867_v29  ;;  %17445 = vmatprep.subr.bf16.mxu0 %v24496_v56 }
 0xf3f   : > { %17430 = vmatmul.mubr.msk.bf16.vlgmr.msra.gmra.mrb[128].mxu1 %vm1186_vm2, %v5964_v37  ;;  %v5864_v51 = vpop.xlane.xlu1 %5863 }
 0xf40   : > { %17440 = vmatpush3.bf16.msra.mxu1 %v4846_v22  ;;  %19797 = vrcp.f32 %v5864_v51  ;;  %17441 = vmatprep.mubr.msk.bf16.mxu1 %vm20189_vm1, %v24496_v56 }
 0xf41   : > { %v5879_v23 = vpop.xlane.xlu0 %5878  ;;  %17451 = vmatprep.subr.bf16.mxu1 %v24496_v56 }
 0xf42   : > { %v19790_v46 = vpop.eup %19789 }
 0xf43   : > { %v5943_v26 = vmul.f32 %v19790_v46, %v21934_v57  ;;  %v5870_v16 = vpop.xlane.xlu1 %5869  ;;  %v19792_v47 = vpop.eup %19791 }
 0xf44   : > { %v5944_v35 = vmul.f32 %v19792_v47, %v21930_v34  ;;  %19799 = vrcp.f32 %v5870_v16 }
 0xf45   : > { %v18724_v2 = vpop.permute.xlu0 %18723  ;;  %v5965_v5 = vpack.c.bf16 %v5943_v26, %v5942_v21  ;;  %19801 = vrcp.f32 %v5873_v15 }
 0xf46   : > { %v19794_v62 = vpop.eup %19793  ;;  %v18726_v31 = vunpack.i.h.bf16 %v18724_v2  ;;  %v18725_v45 = vunpack.i.l.bf16 %v18724_v2 }
 0xf47   : > { %v5945_v55 = vmul.f32 %v19794_v62, %v21944_v14  ;;  %17436 = vmatmul.mubr.msk.bf16.vlgmr.msra.gmra.mrb[148].mxu0 %vm1186_vm2, %v5965_v5  ;;  %v5876_v42 = vpop.xlane.xlu1 %5875  ;;  %v19796_v4 = vpop.eup %19795  ;;  %v19290_v62 = vld [vmem:[%s24416_s4 + $0x48] sm:$0xff]  }
 0xf48   : > { %v4847_v27 = vpack.c.bf16 %v18726_v31, %v18725_v45  ;;  %17447 = vmatprep.mubr.msk.bf16.mxu0 %vm20189_vm1, %v24496_v56  ;;  %v5947_v19 = vmul.f32 %v19796_v4, %v21938_v61  ;;  %19803 = vrcp.f32 %v5876_v42 }
 0xf49   : > { %v5966_v28 = vpack.c.bf16 %v5945_v55, %v5944_v35  ;;  %19805 = vrcp.f32 %v5879_v23 }
 0xf4a   : > { %v19798_v57 = vpop.eup %19797  ;;  %17446 = vmatpush3.bf16.msra.mxu0 %v4847_v27 }
 0xf4b   : > { %v5946_v54 = vmul.f32 %v19798_v57, %v21959_v41  ;;  %17442 = vmatmul.mubr.msk.bf16.vlgmr.msra.gmra.mrb[132].mxu1 %vm1186_vm2, %v5966_v28  ;;  %v5882_v34 = vpop.xlane.xlu1 %5881  ;;  %17457 = vmatprep.subr.bf16.mxu0 %v24496_v56 }
 0xf4c   : > { %17453 = vmatprep.mubr.msk.bf16.mxu1 %vm20189_vm1, %v24496_v56  ;;  %19807 = vrcp.f32 %v5882_v34 }
 0xf4d   : > { %v5967_v14 = vpack.c.bf16 %v5947_v19, %v5946_v54 }
 0xf4e   : > { %v19800_v61 = vpop.eup %19799 }
 0xf4f   : > { %17448 = vmatmul.mubr.msk.bf16.vlgmr.msra.gmra.mrb[152].mxu0 %vm1186_vm2, %v5967_v14  ;;  %v5888_v63 = vpop.xlane.xlu1 %5887  ;;  %v19802_v41 = vpop.eup %19801  ;;  %v5948_v43 = vmul.f32 %v19800_v61, %v21963_v44 }
 0xf50   : > { %17459 = vmatprep.mubr.msk.bf16.mxu0 %vm20189_vm1, %v24496_v56  ;;  %v5949_v17 = vmul.f32 %v19802_v41, %v21949_v32 }
 0xf52   : > { %v19804_v0 = vpop.eup %19803  ;;  %v5968_v49 = vpack.c.bf16 %v5949_v17, %v5948_v43 }
 0xf53   : > { %v18729_v9 = vpop.permute.xlu1 %18728  ;;  %v19806_v30 = vpop.eup %19805  ;;  %v5950_v33 = vmul.f32 %v19804_v0, %v21976_v58  ;;  %v19289_v58 = vld [vmem:[%s24416_s4 + $0x40] sm:$0xff]   ;;  %v19292_v0 = vld [vmem:[%s24416_s4 + $0x58] sm:$0xff]  }
 0xf54   : > { %v18731_v25 = vunpack.i.h.bf16 %v18729_v9  ;;  %v18730_v1 = vunpack.i.l.bf16 %v18729_v9  ;;  %v5951_v12 = vmul.f32 %v19806_v30, %v21969_v20 }
 0xf56   : > { %v4848_v29 = vpack.c.bf16 %v18731_v25, %v18730_v1  ;;  %v5969_v32 = vpack.c.bf16 %v5951_v12, %v5950_v33  ;;  %v19808_v23 = vpop.eup %19807 }
 0xf57   : > { %v18734_v53 = vpop.permute.xlu1 %18733  ;;  %v5952_v21 = vmul.f32 %v19808_v23, %v21984_v50  ;;  %v19294_v23 = vld [vmem:[%s24416_s4 + $0x68] sm:$0xff]  }
 0xf58   : > { %v18736_v59 = vunpack.i.h.bf16 %v18734_v53  ;;  %v18735_v7 = vunpack.i.l.bf16 %v18734_v53  ;;  %17452 = vmatpush3.bf16.msra.mxu1 %v4848_v29 }
 0xf59   : > { %17463 = vmatprep.subr.bf16.mxu1 %v24496_v56 }
 0xf5a   : > { %v4849_v52 = vpack.c.bf16 %v18736_v59, %v18735_v7 }
 0xf5b   : > { %v18739_v3 = vpop.permute.xlu1 %18738  ;;  %17454 = vmatmul.mubr.msk.bf16.vlgmr.msra.gmra.mrb[136].mxu1 %vm1186_vm2, %v5968_v49 }
 0xf5c   : > { %v18741_v44 = vunpack.i.h.bf16 %v18739_v3  ;;  %v18740_v48 = vunpack.i.l.bf16 %v18739_v3  ;;  %17458 = vmatpush3.bf16.msra.mxu0 %v4849_v52  ;;  %17465 = vmatprep.mubr.msk.bf16.mxu1 %vm20189_vm1, %v24496_v56 }
 0xf5d   : > { %17469 = vmatprep.subr.bf16.mxu0 %v24496_v56 }
 0xf5e   : > { %v4850_v18 = vpack.c.bf16 %v18741_v44, %v18740_v48  ;;  %v19293_v44 = vld [vmem:[%s24416_s4 + $0x60] sm:$0xff]  }
 0xf5f   : > { %v18744_v15 = vpop.permute.xlu1 %18743  ;;  %17460 = vmatmul.mubr.msk.bf16.vlgmr.msra.gmra.mrb[156].mxu0 %vm1186_vm2, %v5969_v32 }
 0xf60   : > { %v18746_v20 = vunpack.i.h.bf16 %v18744_v15  ;;  %v18745_v37 = vunpack.i.l.bf16 %v18744_v15  ;;  %17464 = vmatpush3.bf16.msra.mxu1 %v4850_v18  ;;  %17471 = vmatprep.mubr.msk.bf16.mxu0 %vm20189_vm1, %v24496_v56 }
 0xf61   : > { %17475 = vmatprep.subr.bf16.mxu1 %v19289_v58 }
 0xf62   : > { %v4851_v22 = vpack.c.bf16 %v18746_v20, %v18745_v37 }
 0xf64   : > { %17470 = vmatpush3.bf16.msra.mxu0 %v4851_v22 }
 0xf76   : > { %v5885_v51 = vpop.xlane.xlu0 %5884 }
 0xf77   : > { %19809 = vrcp.f32 %v5885_v51 }
 0xf78   : > { %19811 = vrcp.f32 %v5888_v63 }
 0xf7a   : > { %v5891_v10 = vpop.xlane.xlu0 %5890 }
 0xf7b   : > { %19813 = vrcp.f32 %v5891_v10 }
 0xf81   : > { %v19810_v46 = vpop.eup %19809 }
 0xf82   : > { %v5953_v26 = vmul.f32 %v19810_v46, %v22009_v36  ;;  %v19812_v16 = vpop.eup %19811  ;;  %v24497_v36 = vmov 0  }
 0xf83   : > { %v6009_v47 = vpop.f32.mrb[112].mxu1  ;;  %v5954_v35 = vmul.f32 %v19812_v16, %v21991_v39 }
 0xf84   : > { %v17383_v2 = vpop.f32.mrb[113].mxu1  ;;  %v5970_v5 = vpack.c.bf16 %v5953_v26, %v5952_v21 }
 0xf85   : > { %v19814_v31 = vpop.eup %19813  ;;  %v6012_v45 = vpop.f32.mrb[114].mxu1 }
 0xf86   : > { %v5955_v55 = vmul.f32 %v19814_v31, %v22013_v8  ;;  %v6676_v42 = vpack.c.bf16 %v6012_v45, %v6009_v47  ;;  %v17384_v4 = vpop.f32.mrb[115].mxu1  ;;  %17466 = vmatmul.mubr.msk.bf16.vlgmr.msra.gmra.mrb[140].mxu1 %vm1186_vm2, %v5970_v5  ;;  %v19291_v8 = vld [vmem:[%s24416_s4 + $0x50] sm:$0xff]  }
 0xf87   : > { %17476 = vmatpush3.bf16.msra.mxu1 %v19289_v58 }
 0xf88   : > { %17477 = vmatprep.mubr.msk.bf16.mxu1 %vm1186_vm2, %v6676_v42  ;;  %v5971_v50 = vpack.c.bf16 %v5955_v55, %v5954_v35  ;;  %17481 = vmatprep.subr.bf16.mxu1 %v19290_v62  ;;  %v19295_v35 = vld [vmem:[%s24416_s4 + $0x70] sm:$0xff]  }
 0xf8a   : > { %17472 = vmatmul.mubr.msk.bf16.vlgmr.msra.gmra.mrb[160].mxu0 %vm1186_vm2, %v5971_v50 }
 0xf8b   : > { %7526 = vmatprep.mubr.bf16.mxu0 %v24497_v36 }
 0xf8e   : > { %v6053_v27 = vpop.f32.mrb[132].mxu0 }
 0xf8f   : > { %v17389_v28 = vpop.f32.mrb[133].mxu0 }
 0xf90   : > { %v6056_v57 = vpop.f32.mrb[134].mxu0 }
 0xf91   : > { %v6677_v19 = vpack.c.bf16 %v6056_v57, %v6053_v27  ;;  %v17390_v39 = vpop.f32.mrb[135].mxu0 }
 0xf93   : > { %17478 = vmatmul.mubr.msk.bf16.vlgmr.msra.gmra.mrb[144].mxu1 %vm1186_vm2, %v6677_v19 }
 0xf94   : > { %17482 = vmatpush3.bf16.msra.mxu1 %v19290_v62 }
 0xf95   : > { %17487 = vmatprep.subr.bf16.mxu1 %v19291_v8 }
 0xfbf   : > { %v6097_v54 = vpop.f32.mrb[116].mxu1 }
 0xfc0   : > { %v17395_v34 = vpop.f32.mrb[117].mxu1 }
 0xfc1   : > { %v6100_v14 = vpop.f32.mrb[118].mxu1 }
 0xfc2   : > { %v6678_v63 = vpack.c.bf16 %v6100_v14, %v6097_v54  ;;  %v17396_v61 = vpop.f32.mrb[119].mxu1 }
 0xfc3   : > { %v6141_v9 = vpop.f32.mrb[136].mxu0 }
 0xfc4   : > { %v17401_v41 = vpop.f32.mrb[137].mxu0  ;;  %17483 = vmatprep.mubr.msk.bf16.mxu1 %vm1186_vm2, %v6678_v63 }
 0xfc5   : > { %v6144_v25 = vpop.f32.mrb[138].mxu0 }
 0xfc6   : > { %v6679_v1 = vpack.c.bf16 %v6144_v25, %v6141_v9  ;;  %v17402_v43 = vpop.f32.mrb[139].mxu0 }
 0xfc7   : > { %v6185_v29 = vpop.f32.mrb[120].mxu1 }
 0xfc8   : > { %v17407_v17 = vpop.f32.mrb[121].mxu1  ;;  %17484 = vmatmul.mubr.msk.bf16.vlgmr.msra.gmra.mrb[144].mxu1 %vm1186_vm2, %v6679_v1 }
 0xfc9   : > { %v6188_v53 = vpop.f32.mrb[122].mxu1  ;;  %17488 = vmatpush3.bf16.msra.mxu1 %v19291_v8  ;;  %v19296_v8 = vld [vmem:[%s24416_s4 + $0x78] sm:$0xff]  }
 0xfca   : > { %v6680_v30 = vpack.c.bf16 %v6188_v53, %v6185_v29  ;;  %v17408_v59 = vpop.f32.mrb[123].mxu1  ;;  %17493 = vmatprep.subr.bf16.mxu1 %v19292_v0 }
 0xfcc   : > { %17489 = vmatprep.mubr.msk.bf16.mxu1 %vm1186_vm2, %v6680_v30 }
 0xfd5   : > { %v6229_v7 = vpop.f32.mrb[140].mxu0 }
 0xfd6   : > { %v17413_v33 = vpop.f32.mrb[141].mxu0 }
 0xfd7   : > { %v6232_v49 = vpop.f32.mrb[142].mxu0 }
 0xfd8   : > { %v6681_v52 = vpack.c.bf16 %v6232_v49, %v6229_v7  ;;  %v17414_v12 = vpop.f32.mrb[143].mxu0 }
 0xfd9   : > { %v6273_v3 = vpop.f32.mrb[124].mxu1  ;;  %v15741_v12 = vld [vmem:[%s24417_s5 + $0x1] ss:$0 sm:$0xff] }
 0xfda   : > { %v17419_v48 = vpop.f32.mrb[125].mxu1  ;;  %17490 = vmatmul.mubr.msk.bf16.vlgmr.msra.gmra.mrb[144].mxu1 %vm1186_vm2, %v6681_v52 }
 0xfdb   : > { %v6276_v32 = vpop.f32.mrb[126].mxu1  ;;  %17494 = vmatpush3.bf16.msra.mxu1 %v19292_v0 }
 0xfdc   : > { %v6682_v58 = vpack.c.bf16 %v6276_v32, %v6273_v3  ;;  %v17420_v18 = vpop.f32.mrb[127].mxu1  ;;  %17499 = vmatprep.subr.bf16.mxu1 %v19293_v44 }
 0xfde   : > { %17495 = vmatprep.mubr.msk.bf16.mxu1 %vm1186_vm2, %v6682_v58 }
0x100e   : > { %v6317_v15 = vpop.f32.mrb[144].mxu0 }
0x100f   : > { %v17425_v20 = vpop.f32.mrb[145].mxu0 }
0x1010   : > { %v6320_v37 = vpop.f32.mrb[146].mxu0 }
0x1011   : > { %v6683_v22 = vpack.c.bf16 %v6320_v37, %v6317_v15  ;;  %v17426_v51 = vpop.f32.mrb[147].mxu0 }
0x1012   : > { %v6361_v10 = vpop.f32.mrb[128].mxu1 }
0x1013   : > { %v17431_v46 = vpop.f32.mrb[129].mxu1  ;;  %17496 = vmatmul.mubr.msk.bf16.vlgmr.msra.gmra.mrb[144].mxu1 %vm1186_vm2, %v6683_v22 }
0x1014   : > { %v6364_v21 = vpop.f32.mrb[130].mxu1  ;;  %17500 = vmatpush3.bf16.msra.mxu1 %v19293_v44 }
0x1015   : > { %v6684_v26 = vpack.c.bf16 %v6364_v21, %v6361_v10  ;;  %v17432_v16 = vpop.f32.mrb[131].mxu1  ;;  %17505 = vmatprep.subr.bf16.mxu1 %v19294_v23 }
0x1017   : > { %17501 = vmatprep.mubr.msk.bf16.mxu1 %vm1186_vm2, %v6684_v26 }
0x101a   : > { %v6405_v47 = vpop.f32.mrb[148].mxu0 }
0x101b   : > { %v17437_v2 = vpop.f32.mrb[149].mxu0 }
0x101c   : > { %v6408_v5 = vpop.f32.mrb[150].mxu0 }
0x101d   : > { %v6685_v62 = vpack.c.bf16 %v6408_v5, %v6405_v47  ;;  %v17438_v31 = vpop.f32.mrb[151].mxu0 }
0x101e   : > { %v6449_v45 = vpop.f32.mrb[132].mxu1 }
0x101f   : > { %v17443_v55 = vpop.f32.mrb[133].mxu1  ;;  %17502 = vmatmul.mubr.msk.bf16.vlgmr.msra.gmra.mrb[144].mxu1 %vm1186_vm2, %v6685_v62 }
0x1020   : > { %v6452_v42 = vpop.f32.mrb[134].mxu1  ;;  %17506 = vmatpush3.bf16.msra.mxu1 %v19294_v23 }
0x1021   : > { %v6686_v4 = vpack.c.bf16 %v6452_v42, %v6449_v45  ;;  %v17444_v50 = vpop.f32.mrb[135].mxu1  ;;  %17511 = vmatprep.subr.bf16.mxu1 %v19295_v35 }
0x1022   : > { %v6493_v27 = vpop.f32.mrb[152].mxu0 }
0x1023   : > { %v17449_v28 = vpop.f32.mrb[153].mxu0  ;;  %17507 = vmatprep.mubr.msk.bf16.mxu1 %vm1186_vm2, %v6686_v4 }
0x1024   : > { %v6496_v57 = vpop.f32.mrb[154].mxu0 }
0x1025   : > { %v6687_v19 = vpack.c.bf16 %v6496_v57, %v6493_v27  ;;  %v17450_v39 = vpop.f32.mrb[155].mxu0 }
0x1026   : > { %v19303_v39 = vld [vmem:[%s24420_s8 + $0xf0] ss:$12 sps:$4 sm:$0xff]  }
0x102b   : > { %17508 = vmatmul.mubr.msk.bf16.vlgmr.msra.gmra.mrb[144].mxu1 %vm1186_vm2, %v6687_v19 }
0x102c   : > { %17512 = vmatpush3.bf16.msra.mxu1 %v19295_v35 }
0x102d   : > { %17517 = vmatprep.subr.bf16.mxu1 %v19296_v8 }
0x102e   : > { %v6537_v54 = vpop.f32.mrb[136].mxu1 }
0x102f   : > { %v17455_v34 = vpop.f32.mrb[137].mxu1 }
0x1030   : > { %v6540_v14 = vpop.f32.mrb[138].mxu1  ;;  %v19308_v34 = vld [vmem:[%s24420_s8 + $0x10c] ss:$12 sps:$4 sm:$0xff]  }
0x1031   : > { %v6688_v63 = vpack.c.bf16 %v6540_v14, %v6537_v54  ;;  %v17456_v61 = vpop.f32.mrb[139].mxu1  ;;  %v19306_v54 = vld [vmem:[%s24420_s8 + $0x108] ss:$12 sps:$4 sm:$0xff]   ;;  %v19309_v14 = vld [vmem:[%s24420_s8 + $0x120] ss:$12 sps:$4 sm:$0xff]  }
0x1032   : > { %v6581_v9 = vpop.f32.mrb[156].mxu0  ;;  %v19312_v61 = vld [vmem:[%s24420_s8 + $0x138] ss:$12 sps:$4 sm:$0xff]  }
0x1033   : > { %v17461_v41 = vpop.f32.mrb[157].mxu0  ;;  %17513 = vmatprep.mubr.msk.bf16.mxu1 %vm1186_vm2, %v6688_v63  ;;  %v19311_v63 = vld [vmem:[%s24420_s8 + $0x124] ss:$12 sps:$4 sm:$0xff]  }
0x1034   : > { %v6584_v25 = vpop.f32.mrb[158].mxu0  ;;  %v19317_v41 = vld [vmem:[%s24420_s8 + $0x154] ss:$12 sps:$4 sm:$0xff]  }
0x1035   : > { %v6689_v1 = vpack.c.bf16 %v6584_v25, %v6581_v9  ;;  %v17462_v43 = vpop.f32.mrb[159].mxu0  ;;  %v19314_v9 = vld [vmem:[%s24420_s8 + $0x13c] ss:$12 sps:$4 sm:$0xff]  }
0x1036   : > { %v19315_v25 = vld [vmem:[%s24420_s8 + $0x150] ss:$12 sps:$4 sm:$0xff]   ;;  %v19318_v43 = vld [vmem:[%s24420_s8 + $0x168] ss:$12 sps:$4 sm:$0xff]  }
0x1037   : > { %17514 = vmatmul.mubr.msk.bf16.vlgmr.msra.gmra.mrb[144].mxu1 %vm1186_vm2, %v6689_v1  ;;  %v19320_v1 = vld [vmem:[%s24420_s8 + $0x16c] ss:$12 sps:$4 sm:$0xff]  }
0x1038   : > { %17518 = vmatpush3.bf16.msra.mxu1 %v19296_v8  ;;  %v19305_v8 = vld [vmem:[%s24420_s8 + $0xf4] ss:$12 sps:$4 sm:$0xff]  }
0x1059   : > { %v6625_v0 = vpop.f32.mrb[140].mxu1 }
0x105a   : > { %v17467_v29 = vpop.f32.mrb[141].mxu1 }
0x105b   : > { %v6628_v17 = vpop.f32.mrb[142].mxu1  ;;  %v19329_v29 = vld [vmem:[%s24422_s10 + $0xd0] sm:$0xff]  }
0x105c   : > { %v6690_v53 = vpack.c.bf16 %v6628_v17, %v6625_v0  ;;  %v17468_v30 = vpop.f32.mrb[143].mxu1  ;;  %v19321_v0 = vld [vmem:[%s24420_s8 + $0xc8] ss:$12 sps:$4 sm:$0xff]   ;;  %16653 = vmatprep.subr.bf16.mxu1 %v19329_v29 }
0x105d   : > { %v6669_v59 = vpop.f32.mrb[160].mxu0  ;;  %v19330_v17 = vld [vmem:[%s24422_s10 + $0x90] sm:$0xff]   ;;  %v19332_v30 = vld [vmem:[%s24422_s10 + $0x98] sm:$0xff]  }
0x105e   : > { %v17473_v7 = vpop.f32.mrb[161].mxu0  ;;  %17519 = vmatprep.mubr.msk.bf16.mxu1 %vm1186_vm2, %v6690_v53  ;;  %v19331_v53 = vld [vmem:[%s24422_s10 + $0xd8] sm:$0xff]   ;;  %v19345_v29 = vld [vmem:[%s24422_s10 + $0x110] sm:$0xff]  }
0x105f   : > { %v6672_v33 = vpop.f32.mrb[162].mxu0  ;;  %v19334_v7 = vld [vmem:[%s24422_s10 + $0xa0] sm:$0xff]  }
0x1060   : > { %v6691_v49 = vpack.c.bf16 %v6672_v33, %v6669_v59  ;;  %v17474_v52 = vpop.f32.mrb[163].mxu0  ;;  %v19333_v59 = vld [vmem:[%s24422_s10 + $0xe0] sm:$0xff]   ;;  %v19335_v33 = vld [vmem:[%s24422_s10 + $0xe8] sm:$0xff]  }
0x1061   : > { %v19337_v52 = vld [vmem:[%s24422_s10 + $0xf0] sm:$0xff]  }
0x1062   : > { %17520 = vmatmul.mubr.msk.bf16.vlgmr.msra.gmra.mrb[144].mxu1 %vm1186_vm2, %v6691_v49  ;;  %v19336_v49 = vld [vmem:[%s24422_s10 + $0xa8] sm:$0xff]  }
0x1063   : > { %16654 = vmatpush3.bf16.msra.mxu1 %v19330_v17  ;;  %v19346_v17 = vld [vmem:[%s24422_s10 + $0x118] sm:$0xff]  }
0x1064   : > { %16655 = vmatprep.subr.bf16.mxu1 %v19331_v53  ;;  %v15799_v53 = vld [vmem:[%s24421_s9 + $0x3] sm:$0x7] }
0x1067   : > { %16656 = vmatpush3.bf16.msra.mxu1 %v19332_v30  ;;  %v7354_v30 = vrot.slane %v15799_v53, %v21329_v13 }
0x1068   : > { %16657 = vmatprep.subr.bf16.mxu1 %v19333_v59  ;;  %v7358_v59 = vrot.slane %v15799_v53, %v21335_v24 }
0x106b   : > { %16658 = vmatpush3.bf16.msra.mxu1 %v19334_v7 }
0x106c   : > { %16659 = vmatprep.subr.bf16.mxu1 %v19335_v33 }
0x106f   : > { %16660 = vmatpush3.bf16.msra.mxu1 %v19336_v49 }
0x1070   : > { %16661 = vmatprep.subr.bf16.mxu1 %v19337_v52 }
0x1135   : > { %v17521_v3 = vpop.f32.mrb[144].mxu1 }
0x1136   : > { %v7218_v44 = vpop.f32.mrb[145].mxu1  ;;  %v18151_v18 = vadd.f32 %v17521_v3, %v15741_v12  ;;  %v19339_v3 = vld [vmem:[%s24422_s10 + $0xf8] sm:$0xff]  }
0x1137   : > { %v18152_v48 = vadd.f32 %v15741_v12, %v7218_v44  ;;  %v17522_v32 = vpop.f32.mrb[146].mxu1 }
0x1138   : > { %v7221_v58 = vpop.f32.mrb[147].mxu1  ;;  %v22159_v22 = vadd.f32 %v18151_v18, %v21362_v38  ;;  %v18153_v51 = vadd.f32 %v17522_v32, %v15741_v12  ;;  %v19302_v38 = vld [vmem:[%s24420_s8 + $0xdc] ss:$12 sps:$4 sm:$0xff]  }
0x1139   : > { %v22152_v15 = vadd.f32 %v18152_v48, %v21350_v60  ;;  %v18154_v20 = vadd.f32 %v15741_v12, %v7221_v58  ;;  %v19297_v60 = vld [vmem:[%s24420_s8 + $0xc0] ss:$12 sps:$4 sm:$0xff]   ;;  %v19338_v12 = vld [vmem:[%s24422_s10 + $0xb0] sm:$0xff]  }
0x113a   : > { %v22164_v10 = vadd.f32 %v18153_v51, %v21353_v40  ;;  %v19300_v40 = vld [vmem:[%s24420_s8 + $0xd8] ss:$12 sps:$4 sm:$0xff]   ;;  %16662 = vmatpush3.bf16.msra.mxu1 %v19338_v12 }
0x113b   : > { %v22155_v37 = vadd.f32 %v18154_v20, %v21358_v6  ;;  %7245 = vadd.xlane.f32.xlu0 %v22152_v15  ;;  %v19299_v6 = vld [vmem:[%s24420_s8 + $0xc4] ss:$12 sps:$4 sm:$0xff]   ;;  %16663 = vmatprep.subr.bf16.mxu1 %v19339_v3 }
0x113c   : > { %7494 = vmatprep.subr.bf16.mxu0 %v19299_v6 }
0x113d   : > { %7247 = vadd.xlane.f32.xlu1 %v22155_v37  ;;  %7495 = vmatpush1.bf16.msra.mxu0 %v19297_v60 }
0x113e   : > { %7496 = vmatprep.subr.bf16.mxu0 %v19302_v38 }
0x113f   : > { %7249 = vadd.xlane.f32.xlu0 %v22159_v22 }
0x1141   : > { %7497 = vmatpush1.bf16.msra.mxu0 %v19300_v40 }
0x1142   : > { %7498 = vmatprep.subr.bf16.mxu0 %v19305_v8 }
0x1143   : > { %7251 = vadd.xlane.f32.xlu0 %v22164_v10 }
0x1145   : > { %7499 = vmatpush1.bf16.msra.mxu0 %v19303_v39  ;;  %v19323_v39 = vld [vmem:[%s24420_s8 + $0xf8] ss:$12 sps:$4 sm:$0xff]  }
0x1146   : > { %7500 = vmatprep.subr.bf16.mxu0 %v19308_v34 }
0x1149   : > { %7501 = vmatpush1.bf16.msra.mxu0 %v19306_v54 }
0x114a   : > { %7502 = vmatprep.subr.bf16.mxu0 %v19311_v63  ;;  %v19326_v63 = vld [vmem:[%s24420_s8 + $0x140] ss:$12 sps:$4 sm:$0xff]  }
0x114d   : > { %7503 = vmatpush1.bf16.msra.mxu0 %v19309_v14  ;;  %v19324_v14 = vld [vmem:[%s24420_s8 + $0x110] ss:$12 sps:$4 sm:$0xff]  }
0x114e   : > { %7504 = vmatprep.subr.bf16.mxu0 %v19314_v9  ;;  %v19328_v9 = vld [vmem:[%s24420_s8 + $0x170] ss:$12 sps:$4 sm:$0xff]  }
0x1151   : > { %7505 = vmatpush1.bf16.msra.mxu0 %v19312_v61  ;;  %v19327_v61 = vld [vmem:[%s24420_s8 + $0x158] ss:$12 sps:$4 sm:$0xff]  }
0x1152   : > { %7506 = vmatprep.subr.bf16.mxu0 %v19317_v41  ;;  %v19340_v41 = vld [vmem:[%s24422_s10 + $0xb8] sm:$0xff]  }
0x1153   : > { %16664 = vmatpush3.bf16.msra.mxu1 %v19340_v41 }
0x1155   : > { %7507 = vmatpush1.bf16.msra.mxu0 %v19315_v25  ;;  %v19341_v25 = vld [vmem:[%s24422_s10 + $0x100] sm:$0xff]  }
0x1156   : > { %7508 = vmatprep.subr.bf16.mxu0 %v19320_v1  ;;  %v19342_v1 = vld [vmem:[%s24422_s10 + $0xc0] sm:$0xff]   ;;  %16665 = vmatprep.subr.bf16.mxu1 %v19341_v25 }
0x1157   : > { %16666 = vmatpush3.bf16.msra.mxu1 %v19342_v1 }
0x1159   : > { %7509 = vmatpush1.bf16.msra.mxu0 %v19318_v43  ;;  %v19343_v43 = vld [vmem:[%s24422_s10 + $0x108] sm:$0xff]  }
0x115a   : > { %17523 = vmatprep.subr.bf16.mxu0 %v19321_v0  ;;  %16667 = vmatprep.subr.bf16.mxu1 %v19343_v43 }
0x11c8   : > { %v7246_v23 = vpop.xlane.xlu0 %7245 }
0x11c9   : > { %v7253_v46 = vmul.f32 0.013888889, %v7246_v23 }
0x11ca   : > { %v7248_v21 = vpop.xlane.xlu1 %7247 }
0x11cb   : > { %v7257_v26 = vsub.f32 %v22152_v15, %v7253_v46  ;;  %v7254_v16 = vmul.f32 0.013888889, %v7248_v21 }
0x11cc   : > { %v7250_v47 = vpop.xlane.xlu0 %7249 }
0x11cd   : > { %v22181_v2 = vmul.f32 %v20361_v11, %v7257_v26  ;;  %v7258_v5 = vsub.f32 %v22155_v37, %v7254_v16  ;;  %v7255_v62 = vmul.f32 0.013888889, %v7250_v47  ;;  %v15765_v26 = vld [vmem:[%s24418_s6 + $0x1] ss:$0 sm:$0xff] }
0x11cf   : > { %v22185_v31 = vmul.f32 %v20361_v11, %v7258_v5  ;;  %v7259_v45 = vsub.f32 %v22159_v22, %v7255_v62  ;;  %v7265_v35 = vmul.f32 %v22181_v2, %v22181_v2  ;;  %v15766_v62 = vld [vmem:[%s24419_s7 + $0x1] ss:$0 sm:$0xff] }
0x11d0   : > { %v7252_v55 = vpop.xlane.xlu0 %7251 }
0x11d1   : > { %v7256_v42 = vmul.f32 0.013888889, %v7252_v55  ;;  %7269 = vadd.xlane.f32.xlu0 %v7265_v35  ;;  %v22191_v4 = vmul.f32 %v20361_v11, %v7259_v45  ;;  %v7266_v27 = vmul.f32 %v22185_v31, %v22185_v31 }
0x11d3   : > { %v7260_v50 = vsub.f32 %v22164_v10, %v7256_v42  ;;  %v7267_v57 = vmul.f32 %v22191_v4, %v22191_v4 }
0x11d5   : > { %7271 = vadd.xlane.f32.xlu0 %v7266_v27  ;;  %v22197_v28 = vmul.f32 %v20361_v11, %v7260_v50  ;;  %v19322_v27 = vld [vmem:[%s24420_s8 + $0xe0] ss:$12 sps:$4 sm:$0xff]  }
0x11d7   : > { %v7268_v19 = vmul.f32 %v22197_v28, %v22197_v28 }
0x11d9   : > { %7273 = vadd.xlane.f32.xlu0 %v7267_v57 }
0x11dd   : > { %7275 = vadd.xlane.f32.xlu0 %v7268_v19 }
0x125e   : > { %v7270_v44 = vpop.xlane.xlu0 %7269 }
0x125f   : > { %v7277_v48 = vmul.f32 0.013888889, %v7270_v44 }
0x1261   : > { %v7281_v32 = vadd.f32 1e-05, %v7277_v48 }
0x1262   : > { %v7272_v58 = vpop.xlane.xlu0 %7271 }
0x1263   : > { %19815 = vrsqrt.f32 %v7281_v32  ;;  %v7278_v18 = vmul.f32 0.013888889, %v7272_v58 }
0x1265   : > { %v7282_v20 = vadd.f32 1e-05, %v7278_v18 }
0x1266   : > { %v7274_v51 = vpop.xlane.xlu0 %7273 }
0x1267   : > { %19817 = vrsqrt.f32 %v7282_v20  ;;  %v7279_v60 = vmul.f32 0.013888889, %v7274_v51 }
0x1269   : > { %v7283_v6 = vadd.f32 1e-05, %v7279_v60 }
0x126a   : > { %v7276_v38 = vpop.xlane.xlu0 %7275 }
0x126b   : > { %19819 = vrsqrt.f32 %v7283_v6  ;;  %v7280_v40 = vmul.f32 0.013888889, %v7276_v38 }
0x126d   : > { %v19816_v23 = vpop.eup %19815  ;;  %v7284_v46 = vadd.f32 1e-05, %v7280_v40 }
0x126e   : > { %v7289_v21 = vmul.f32 %v19816_v23, %v22181_v2 }
0x126f   : > { %19821 = vrsqrt.f32 %v7284_v46 }
0x1270   : > { %v7299_v5 = vmul.f32 %v15765_v26, %v7289_v21 }
0x1271   : > { %v19818_v16 = vpop.eup %19817 }
0x1272   : > { %v7290_v47 = vmul.f32 %v19818_v16, %v22185_v31  ;;  %v7309_v55 = vadd.f32 %v15766_v62, %v7299_v5 }
0x1274   : > { %v7300_v45 = vmul.f32 %v15765_v26, %v7290_v47 }
0x1275   : > { %v19820_v35 = vpop.eup %19819 }
0x1276   : > { %v7310_v42 = vadd.f32 %v15766_v62, %v7300_v45  ;;  %v7291_v50 = vmul.f32 %v19820_v35, %v22191_v4 }
0x1278   : > { %v7313_v2 = vpack.c.bf16 %v7310_v42, %v7309_v55  ;;  %v7301_v19 = vmul.f32 %v15765_v26, %v7291_v50  ;;  %v24498_v42 = vld [vmem:[#allocation18_spill] sm:$0xff] }
0x1279   : > { %v19822_v57 = vpop.eup %19821  ;;  %v7362_v50 = vrot.slane %v15799_v53, %v24498_v42 }
0x127a   : > { %7527 = vmatmul.mubr.bf16.vlgmr.msra.gmra.mrb[164].mxu0 %v7313_v2  ;;  %v7292_v31 = vmul.f32 %v19822_v57, %v22197_v28  ;;  %v7311_v4 = vadd.f32 %v15766_v62, %v7301_v19  ;;  %v19325_v28 = vld [vmem:[%s24420_s8 + $0x128] ss:$12 sps:$4 sm:$0xff]  }
0x127b   : > { %17524 = vmatpush3.bf16.msra.mxu0 %v19321_v0  ;;  %7536 = vmatprep.mubr.bf16.mxu0 %v24497_v36  ;;  %v19344_v0 = vld [vmem:[%s24422_s10 + $0xc8] sm:$0xff]  }
0x127c   : > { %17525 = vmatprep.subr.bf16.mxu0 %v19322_v27  ;;  %v7302_v8 = vmul.f32 %v15765_v26, %v7292_v31  ;;  %16668 = vmatpush3.bf16.msra.mxu1 %v19344_v0 }
0x127e   : > { %v7312_v54 = vadd.f32 %v15766_v62, %v7302_v8 }
0x127f   : > { %17526 = vmatpush3.bf16.msra.mxu0 %v19322_v27 }
0x1280   : > { %17527 = vmatprep.subr.bf16.mxu0 %v19323_v39  ;;  %v7314_v34 = vpack.c.bf16 %v7312_v54, %v7311_v4 }
0x1282   : > { %7537 = vmatmul.mubr.bf16.gmra.mrb[168].mxu0 %v7314_v34 }
0x1283   : > { %17528 = vmatpush3.bf16.msra.mxu0 %v19323_v39  ;;  %17539 = vmatprep.mubr.bf16.mxu0 %v7313_v2 }
0x1284   : > { %17529 = vmatprep.subr.bf16.mxu0 %v19324_v14 }
0x1287   : > { %17530 = vmatpush3.bf16.msra.mxu0 %v19324_v14 }
0x1288   : > { %17531 = vmatprep.subr.bf16.mxu0 %v19325_v28 }
0x128b   : > { %17532 = vmatpush3.bf16.msra.mxu0 %v19325_v28 }
0x128c   : > { %17533 = vmatprep.subr.bf16.mxu0 %v19326_v63 }
0x128f   : > { %17534 = vmatpush3.bf16.msra.mxu0 %v19326_v63 }
0x1290   : > { %17535 = vmatprep.subr.bf16.mxu0 %v19327_v61 }
0x1293   : > { %17536 = vmatpush3.bf16.msra.mxu0 %v19327_v61 }
0x1294   : > { %17537 = vmatprep.subr.bf16.mxu0 %v19328_v9 }
0x1297   : > { %17538 = vmatpush3.bf16.msra.mxu0 %v19328_v9 }
0x1298   : > { %17543 = vmatprep.subr.bf16.mxu0 %v19345_v29 }
0x129a   : > { %17540 = vmatmul.mubr.bf16.vlgmr.msra.gmra.mrb[172].mxu0 %v7314_v34 }
0x129b   : > { %17544 = vmatpush3.bf16.msra.mxu0 %v19345_v29 }
0x129c   : > { %17545 = vmatprep.subr.bf16.mxu0 %v19346_v17 }
0x129f   : > { %17546 = vmatpush3.bf16.msra.mxu0 %v19346_v17 }
0x134d   : > { %v7528_v7 = vpop.f32.mrb[164].mxu0 }
0x134e   : > { %v7529_v33 = vadd.f32 %v7528_v7, %v7354_v30  ;;  %v7530_v49 = vpop.f32.mrb[165].mxu0 }
0x134f   : > { %v7531_v52 = vadd.f32 %v7530_v49, %v7358_v59  ;;  %v7532_v12 = vpop.f32.mrb[166].mxu0 }
0x1350   : > { %v7533_v3 = vadd.f32 %v7532_v12, %v7354_v30  ;;  %v7534_v44 = vpop.f32.mrb[167].mxu0  ;;  %v7596_v32 = vmax.f32 %v7529_v33, 0.0  ;;  %v15861_v33 = vld [vmem:[%s24423_s11 + $0x1] ss:$0 sm:$0xff] }
0x1351   : > { %v7535_v48 = vadd.f32 %v7534_v44, %v7358_v59  ;;  %v7597_v18 = vmax.f32 %v7531_v52, 0.0 }
0x1352   : > { %v7599_v58 = vmax.f32 %v7533_v3, 0.0 }
0x1353   : > { %v7600_v20 = vmax.f32 %v7535_v48, 0.0 }
0x1354   : > { %v7608_v51 = vpack.c.bf16 %v7599_v58, %v7596_v32 }
0x1355   : > { %v7609_v60 = vpack.c.bf16 %v7600_v20, %v7597_v18  ;;  %v7538_v6 = vpop.f32.mrb[168].mxu0 }
0x1356   : > { %v7539_v38 = vadd.f32 %v7538_v6, %v7354_v30  ;;  %v7540_v40 = vpop.f32.mrb[169].mxu0 }
0x1357   : > { %v7541_v23 = vadd.f32 %v7540_v40, %v7358_v59  ;;  %v7542_v46 = vpop.f32.mrb[170].mxu0  ;;  %7805 = vmatprep.mubr.bf16.mxu1 %v7609_v60 }
0x1358   : > { %v7543_v21 = vadd.f32 %v7542_v46, %v7354_v30  ;;  %v7544_v26 = vpop.f32.mrb[171].mxu0  ;;  %7806 = vmatmul.mubr.bf16.vlgmr.msra.gmra.mrb[148].mxu1 %v7608_v51  ;;  %v7602_v47 = vmax.f32 %v7539_v38, 0.0  ;;  %v19353_v46 = vld [vmem:[%s24415_s3 + $0x188] ss:$12 sps:$4 sm:$0xff]  }
0x1359   : > { %v7545_v16 = vadd.f32 %v7544_v26, %v7358_v59  ;;  %v7603_v62 = vmax.f32 %v7541_v23, 0.0  ;;  %17551 = vmatprep.subr.bf16.mxu1 %v19353_v46 }
0x135a   : > { %v7605_v5 = vmax.f32 %v7543_v21, 0.0  ;;  %17552 = vmatpush3.bf16.msra.mxu1 %v19353_v46 }
0x135b   : > { %v7606_v45 = vmax.f32 %v7545_v16, 0.0 }
0x135c   : > { %v7611_v35 = vpack.c.bf16 %v7605_v5, %v7602_v47 }
0x135d   : > { %v7612_v55 = vpack.c.bf16 %v7606_v45, %v7603_v62 }
0x135f   : > { %7813 = vmatprep.mubr.bf16.mxu1 %v7612_v55 }
0x1360   : > { %7814 = vmatmul.mubr.bf16.gmra.mrb[152].mxu1 %v7611_v35 }
0x136d   : > { %v17541_v2 = vpop.f32.mrb[172].mxu0 }
0x136e   : > { %v7590_v27 = vadd.f32 %v17541_v2, %v7362_v50  ;;  %v7581_v57 = vpop.f32.mrb[173].mxu0 }
0x136f   : > { %v7582_v31 = vadd.f32 %v7581_v57, %v7362_v50  ;;  %v17542_v19 = vpop.f32.mrb[174].mxu0 }
0x1370   : > { %v7593_v39 = vadd.f32 %v17542_v19, %v7362_v50  ;;  %v7584_v8 = vpop.f32.mrb[175].mxu0  ;;  %v7604_v54 = vmax.f32 %v7590_v27, 0.0 }
0x1371   : > { %v7585_v4 = vadd.f32 %v7584_v8, %v7362_v50  ;;  %v7598_v14 = vmax.f32 %v7582_v31, 0.0 }
0x1372   : > { %v7607_v34 = vmax.f32 %v7593_v39, 0.0 }
0x1373   : > { %v7601_v28 = vmax.f32 %v7585_v4, 0.0 }
0x1374   : > { %v7613_v63 = vpack.c.bf16 %v7607_v34, %v7604_v54 }
0x1375   : > { %v7610_v61 = vpack.c.bf16 %v7601_v28, %v7598_v14  ;;  %v19354_v14 = vld [vmem:[%s24415_s3 + $0x1b0] ss:$12 sps:$4 sm:$0xff]   ;;  %v19356_v28 = vld [vmem:[%s24415_s3 + $0x1b4] ss:$12 sps:$4 sm:$0xff]  }
0x1377   : > { %17547 = vmatprep.mubr.msk.bf16.mxu0 %vm4094_vm5, %v7610_v61  ;;  %v19358_v61 = vld [vmem:[%s24415_s3 + $0x1c8] ss:$12 sps:$4 sm:$0xff]  }
0x1378   : > { %17548 = vmatmul.mubr.msk.bf16.vlgmr.msra.gmra.mrb[176].mxu0 %vm4094_vm5, %v7613_v63  ;;  %v19357_v63 = vld [vmem:[%s24415_s3 + $0x1a0] ss:$12 sps:$4 sm:$0xff]  }
0x1379   : > { %8142 = vmatprep.mubr.bf16.mxu0 %v24497_v36  ;;  %17553 = vmatprep.subr.bf16.mxu1 %v19357_v63 }
0x137a   : > { %17554 = vmatpush3.bf16.msra.mxu1 %v19357_v63 }
0x142b   : > { %v16669_v9 = vpop.f32.mrb[148].mxu1 }
0x142c   : > { %v16670_v41 = vpop.f32.mrb[149].mxu1 }
0x142d   : > { %v16671_v25 = vadd.f32 %v16670_v41, %v16669_v9  ;;  %v16672_v1 = vpop.f32.mrb[150].mxu1  ;;  %v19360_v9 = vld [vmem:[%s24415_s3 + $0x1cc] ss:$12 sps:$4 sm:$0xff]  }
0x142e   : > { %v16673_v43 = vpop.f32.mrb[151].mxu1  ;;  %v19361_v41 = vld [vmem:[%s24415_s3 + $0x1b8] ss:$12 sps:$4 sm:$0xff]  }
0x142f   : > { %v16674_v0 = vadd.f32 %v16673_v43, %v16672_v1  ;;  %v7808_v12 = vadd.f32 %v16671_v25, %v15861_v33  ;;  %17555 = vmatprep.subr.bf16.mxu1 %v19361_v41  ;;  %v19364_v25 = vld [vmem:[%s24415_s3 + $0x1e4] ss:$12 sps:$4 sm:$0xff]   ;;  %v19362_v43 = vld [vmem:[%s24415_s3 + $0x1e0] ss:$12 sps:$4 sm:$0xff]  }
0x1430   : > { %17556 = vmatpush3.bf16.msra.mxu1 %v19361_v41  ;;  %v19365_v1 = vld [vmem:[%s24415_s3 + $0x1d0] ss:$12 sps:$4 sm:$0xff]  }
0x1431   : > { %v7811_v18 = vadd.f32 %v16674_v0, %v15861_v33  ;;  %17557 = vmatprep.subr.bf16.mxu1 %v19365_v1  ;;  %v19368_v0 = vld [vmem:[%s24415_s3 + $0x1fc] ss:$12 sps:$4 sm:$0xff]  }
0x1433   : > { %v16675_v29 = vpop.f32.mrb[152].mxu1 }
0x1434   : > { %v16676_v17 = vpop.f32.mrb[153].mxu1  ;;  %17558 = vmatpush3.bf16.msra.mxu1 %v19365_v1 }
0x1435   : > { %v16677_v53 = vadd.f32 %v16676_v17, %v16675_v29  ;;  %v16678_v30 = vpop.f32.mrb[154].mxu1  ;;  %v19369_v29 = vld [vmem:[%s24415_s3 + $0x1e8] ss:$12 sps:$4 sm:$0xff]   ;;  %v19366_v17 = vld [vmem:[%s24415_s3 + $0x1f8] ss:$12 sps:$4 sm:$0xff]  }
0x1436   : > { %v16679_v59 = vpop.f32.mrb[155].mxu1  ;;  %17559 = vmatprep.subr.bf16.mxu1 %v19369_v29 }
0x1437   : > { %v16680_v7 = vadd.f32 %v16679_v59, %v16678_v30  ;;  %v7816_v49 = vadd.f32 %v16677_v53, %v15861_v33  ;;  %v19370_v53 = vld [vmem:[%s24415_s3 + $0x210] ss:$12 sps:$4 sm:$0xff]   ;;  %v19372_v30 = vld [vmem:[%s24415_s3 + $0x214] ss:$12 sps:$4 sm:$0xff]  }
0x1438   : > { %17560 = vmatpush3.bf16.msra.mxu1 %v19369_v29  ;;  %v19373_v59 = vld [vmem:[%s24415_s3 + $0x200] ss:$12 sps:$4 sm:$0xff]  }
0x1439   : > { %v7819_v48 = vadd.f32 %v16680_v7, %v15861_v33  ;;  %v19376_v7 = vld [vmem:[%s24415_s3 + $0x22c] ss:$12 sps:$4 sm:$0xff]   ;;  %17561 = vmatprep.subr.bf16.mxu1 %v19373_v59 }
0x143a   : > { %v19377_v33 = vld [vmem:[%s24415_s3 + $0x218] ss:$12 sps:$4 sm:$0xff]  }
0x143c   : > { %17562 = vmatpush3.bf16.msra.mxu1 %v19373_v59 }
0x143d   : > { %17563 = vmatprep.subr.bf16.mxu1 %v19377_v33 }
0x1440   : > { %17564 = vmatpush3.bf16.msra.mxu1 %v19377_v33 }
0x144b   : > { %v17549_v52 = vpop.f32.mrb[176].mxu0 }
0x144c   : > { %v7865_v3 = vadd.f32 %v17549_v52, %v7816_v49  ;;  %v7856_v44 = vpop.f32.mrb[177].mxu0  ;;  %v19374_v49 = vld [vmem:[%s24415_s3 + $0x228] ss:$12 sps:$4 sm:$0xff]   ;;  %v19378_v52 = vld [vmem:[%s24415_s3 + $0x230] ss:$12 sps:$4 sm:$0xff]  }
0x144d   : > { %v7857_v32 = vadd.f32 %v7856_v44, %v7808_v12  ;;  %v17550_v58 = vpop.f32.mrb[178].mxu0  ;;  %17565 = vmatprep.subr.bf16.mxu1 %v19378_v52 }
0x144e   : > { %v7868_v20 = vadd.f32 %v17550_v58, %v7819_v48  ;;  %v7859_v51 = vpop.f32.mrb[179].mxu0  ;;  %v22353_v23 = vadd.f32 %v7865_v3, %v22159_v22  ;;  %v19350_v22 = vld [vmem:[%s24415_s3 + $0x198] ss:$12 sps:$4 sm:$0xff]   ;;  %17566 = vmatpush3.bf16.msra.mxu1 %v19378_v52 }
0x144f   : > { %v22341_v60 = vadd.f32 %v7857_v32, %v22152_v15  ;;  %v7860_v6 = vadd.f32 %v7859_v51, %v7811_v18  ;;  %v19347_v15 = vld [vmem:[%s24415_s3 + $0x180] ss:$12 sps:$4 sm:$0xff]   ;;  %17583 = vmatprep.subr.bf16.mxu1 %v24496_v56 }
0x1450   : > { %v22344_v38 = vadd.f32 %v7868_v20, %v22164_v10  ;;  %v19349_v10 = vld [vmem:[%s24415_s3 + $0x184] ss:$12 sps:$4 sm:$0xff]  }
0x1451   : > { %7879 = vadd.xlane.f32.xlu0 %v22341_v60  ;;  %v22349_v40 = vadd.f32 %v7860_v6, %v22155_v37  ;;  %v19352_v37 = vld [vmem:[%s24415_s3 + $0x19c] ss:$12 sps:$4 sm:$0xff]   ;;  %8110 = vmatprep.subr.bf16.mxu0 %v19349_v10 }
0x1452   : > { %7885 = vadd.xlane.f32.xlu1 %v22344_v38  ;;  %8111 = vmatpush1.bf16.msra.mxu0 %v19347_v15 }
0x1453   : > { %8112 = vmatprep.subr.bf16.mxu0 %v19352_v37 }
0x1455   : > { %7881 = vadd.xlane.f32.xlu0 %v22349_v40 }
0x1456   : > { %8113 = vmatpush1.bf16.msra.mxu0 %v19350_v22  ;;  %v15884_v22 = vld [vmem:[%s24413_s1 + $0x2] ss:$0 sm:$0xff] }
0x1457   : > { %8114 = vmatprep.subr.bf16.mxu0 %v19356_v28 }
0x1459   : > { %7883 = vadd.xlane.f32.xlu0 %v22353_v23 }
0x145a   : > { %8115 = vmatpush1.bf16.msra.mxu0 %v19354_v14 }
0x145b   : > { %8116 = vmatprep.subr.bf16.mxu0 %v19360_v9 }
0x145e   : > { %8117 = vmatpush1.bf16.msra.mxu0 %v19358_v61 }
0x145f   : > { %8118 = vmatprep.subr.bf16.mxu0 %v19364_v25 }
0x1462   : > { %8119 = vmatpush1.bf16.msra.mxu0 %v19362_v43 }
0x1463   : > { %8120 = vmatprep.subr.bf16.mxu0 %v19368_v0 }
0x1466   : > { %8121 = vmatpush1.bf16.msra.mxu0 %v19366_v17 }
0x1467   : > { %8122 = vmatprep.subr.bf16.mxu0 %v19372_v30 }
0x146a   : > { %8123 = vmatpush1.bf16.msra.mxu0 %v19370_v53 }
0x146b   : > { %8124 = vmatprep.subr.bf16.mxu0 %v19376_v7 }
0x146e   : > { %8125 = vmatpush1.bf16.msra.mxu0 %v19374_v49 }
0x146f   : > { %17571 = vmatprep.subr.bf16.mxu0 %v24496_v56 }
0x14de   : > { %v7880_v21 = vpop.xlane.xlu0 %7879 }
0x14df   : > { %v7887_v26 = vmul.f32 0.013888889, %v7880_v21  ;;  %v7886_v16 = vpop.xlane.xlu1 %7885 }
0x14e0   : > { %v7890_v5 = vmul.f32 0.013888889, %v7886_v16 }
0x14e1   : > { %v7891_v47 = vsub.f32 %v22341_v60, %v7887_v26 }
0x14e2   : > { %v7882_v62 = vpop.xlane.xlu0 %7881  ;;  %v7894_v55 = vsub.f32 %v22344_v38, %v7890_v5 }
0x14e3   : > { %v22373_v45 = vmul.f32 %v20361_v11, %v7891_v47  ;;  %v7888_v35 = vmul.f32 0.013888889, %v7882_v62  ;;  %v15885_v47 = vld [vmem:[%s24414_s2 + $0x2] ss:$0 sm:$0xff] }
0x14e4   : > { %v22383_v19 = vmul.f32 %v20361_v11, %v7894_v55 }
0x14e5   : > { %v7892_v50 = vsub.f32 %v22349_v40, %v7888_v35  ;;  %v7899_v2 = vmul.f32 %v22373_v45, %v22373_v45 }
0x14e6   : > { %v7884_v27 = vpop.xlane.xlu0 %7883  ;;  %v7902_v54 = vmul.f32 %v22383_v19, %v22383_v19 }
0x14e7   : > { %v22380_v57 = vmul.f32 %v20361_v11, %v7892_v50  ;;  %v7889_v31 = vmul.f32 0.013888889, %v7884_v27  ;;  %7903 = vadd.xlane.f32.xlu0 %v7899_v2 }
0x14e9   : > { %v7893_v39 = vsub.f32 %v22353_v23, %v7889_v31  ;;  %v7900_v8 = vmul.f32 %v22380_v57, %v22380_v57 }
0x14eb   : > { %v22389_v4 = vmul.f32 %v20361_v11, %v7893_v39  ;;  %7905 = vadd.xlane.f32.xlu1 %v7900_v8 }
0x14ed   : > { %v7901_v34 = vmul.f32 %v22389_v4, %v22389_v4 }
0x14ef   : > { %7909 = vadd.xlane.f32.xlu1 %v7902_v54  ;;  %7907 = vadd.xlane.f32.xlu0 %v7901_v34 }
0x1574   : > { %v7904_v12 = vpop.xlane.xlu0 %7903 }
0x1575   : > { %v7911_v3 = vmul.f32 0.013888889, %v7904_v12 }
0x1577   : > { %v7915_v44 = vadd.f32 1e-05, %v7911_v3 }
0x1578   : > { %v7906_v48 = vpop.xlane.xlu1 %7905 }
0x1579   : > { %19823 = vrsqrt.f32 %v7915_v44  ;;  %v7912_v32 = vmul.f32 0.013888889, %v7906_v48 }
0x157b   : > { %v7916_v58 = vadd.f32 1e-05, %v7912_v32 }
0x157c   : > { %v7910_v18 = vpop.xlane.xlu1 %7909  ;;  %v7908_v20 = vpop.xlane.xlu0 %7907 }
0x157d   : > { %19825 = vrsqrt.f32 %v7916_v58  ;;  %v7914_v51 = vmul.f32 0.013888889, %v7910_v18  ;;  %v7913_v6 = vmul.f32 0.013888889, %v7908_v20 }
0x157f   : > { %v7918_v15 = vadd.f32 1e-05, %v7914_v51  ;;  %v7917_v10 = vadd.f32 1e-05, %v7913_v6 }
0x1581   : > { %19827 = vrsqrt.f32 %v7918_v15 }
0x1582   : > { %19829 = vrsqrt.f32 %v7917_v10 }
0x1583   : > { %v19824_v37 = vpop.eup %19823 }
0x1584   : > { %v7923_v46 = vmul.f32 %v19824_v37, %v22373_v45 }
0x1586   : > { %v7933_v16 = vmul.f32 %v15884_v22, %v7923_v46 }
0x1587   : > { %v19826_v21 = vpop.eup %19825 }
0x1588   : > { %v7924_v26 = vmul.f32 %v19826_v21, %v22380_v57  ;;  %v7943_v50 = vadd.f32 %v15885_v47, %v7933_v16 }
0x158a   : > { %v7934_v5 = vmul.f32 %v15884_v22, %v7924_v26 }
0x158b   : > { %v19828_v62 = vpop.eup %19827 }
0x158c   : > { %v19830_v35 = vpop.eup %19829  ;;  %v7926_v55 = vmul.f32 %v19828_v62, %v22383_v19  ;;  %v7944_v2 = vadd.f32 %v15885_v47, %v7934_v5 }
0x158d   : > { %v7925_v45 = vmul.f32 %v19830_v35, %v22389_v4 }
0x158e   : > { %v7947_v27 = vpack.c.bf16 %v7944_v2, %v7943_v50  ;;  %v7936_v31 = vmul.f32 %v15884_v22, %v7926_v55 }
0x158f   : > { %v7935_v39 = vmul.f32 %v15884_v22, %v7925_v45 }
0x1590   : > { %8143 = vmatmul.mubr.bf16.vlgmr.msra.gmra.mrb[180].mxu0 %v7947_v27  ;;  %17567 = vmatprep.mubr.bf16.mxu1 %v7947_v27  ;;  %v7946_v57 = vadd.f32 %v15885_v47, %v7936_v31 }
0x1591   : > { %v7945_v8 = vadd.f32 %v15885_v47, %v7935_v39  ;;  %8152 = vmatprep.mubr.bf16.mxu0 %v24497_v36 }
0x1593   : > { %v7948_v54 = vpack.c.bf16 %v7946_v57, %v7945_v8 }
0x1595   : > { %17568 = vmatmul.mubr.bf16.vlgmr.msra.gmra.mrb[156].mxu1 %v7948_v54 }
0x1596   : > { %17585 = vmatprep.mubr.msk.bf16.mxu1 %vm20189_vm1, %v24496_v56 }
0x1598   : > { %8153 = vmatmul.mubr.bf16.gmra.mrb[184].mxu0 %v7948_v54 }
0x1599   : > { %17573 = vmatprep.mubr.msk.bf16.mxu0 %vm20189_vm1, %v24496_v56 }
0x1663   : > { %v8144_v19 = vpop.f32.mrb[180].mxu0 }
0x1664   : > { %v8146_v4 = vpop.f32.mrb[181].mxu0 }
0x1665   : > { %v8148_v34 = vpop.f32.mrb[182].mxu0 }
0x1666   : > { %v8150_v14 = vpop.f32.mrb[183].mxu0  ;;  %v18777_v28 = vpack.i.bf16 %v8148_v34, %v8144_v19  ;;  %v8300_v63 = vpack.c.bf16 %v8148_v34, %v8144_v19 }
0x1667   : > { %v18747_v61 = vpack.i.bf16 %v8150_v14, %v8146_v4  ;;  %v8404_v9 = vpack.c.bf16 %v8150_v14, %v8146_v4 }
0x1668   : > { %v22469_v41 = vpop.f32.mrb[156].mxu1 }
0x1669   : > { %v22471_v25 = vpop.f32.mrb[157].mxu1  ;;  %18748 = vrot.lane.b32.xlu0 %v18747_v61, %s24499_s23  ;;  %v8528_v1 = vsel %vm1186_vm2, %v8404_v9, 0 }
0x166a   : > { %v22475_v43 = vpop.f32.mrb[158].mxu1  ;;  %17572 = vmatpush3.bf16.xpose.msra.mxu0 %v8528_v1 }
0x166b   : > { %v22477_v0 = vpop.f32.mrb[159].mxu1  ;;  %v8154_v29 = vpop.f32.mrb[184].mxu0  ;;  %17577 = vmatprep.subr.bf16.mxu0 %v24496_v56  ;;  %v22482_v17 = vpack.i.bf16 %v22475_v43, %v22469_v41  ;;  %v8509_v53 = vpack.c.bf16 %v22475_v43, %v22469_v41 }
0x166c   : > { %v8156_v30 = vpop.f32.mrb[185].mxu0  ;;  %v22488_v59 = vpack.i.bf16 %v22477_v0, %v22471_v25  ;;  %v8508_v33 = vpack.c.bf16 %v22477_v0, %v22471_v25  ;;  %v24500_v0 = vld [vmem:[#allocation14_spill] sm:$0xff] }
0x166d   : > { %18768 = vrot.lane.b32.xlu0 %v18747_v61, %s24490_s21  ;;  %v8158_v7 = vpop.f32.mrb[186].mxu0 }
0x166e   : > { %v8160_v49 = vpop.f32.mrb[187].mxu0  ;;  %v18762_v52 = vpack.i.bf16 %v8158_v7, %v8154_v29  ;;  %v8301_v12 = vpack.c.bf16 %v8158_v7, %v8154_v29 }
0x166f   : > { %v18752_v3 = vpack.i.bf16 %v8160_v49, %v8156_v30  ;;  %v8405_v44 = vpack.c.bf16 %v8160_v49, %v8156_v30 }
0x1671   : > { %18778 = vrot.lane.b32.xlu0 %v18777_v28, %s24490_s21  ;;  %17574 = vmatmul.mubr.msk.bf16.vlgmr.msra.gmra.mrb[188].mxu0 %vm1186_vm2, %v8300_v63  ;;  %v8575_v48 = vsel %vm1186_vm2, %v8405_v44, 0 }
0x1672   : > { %18753 = vrot.lane.b32.xlu1 %v18752_v3, %s24499_s23  ;;  %17578 = vmatpush3.bf16.xpose.msra.mxu0 %v8575_v48 }
0x1673   : > { %17579 = vmatprep.mubr.msk.bf16.mxu0 %vm20189_vm1, %v24496_v56  ;;  %17589 = vmatprep.subr.bf16.mxu0 %v24496_v56 }
0x1675   : > { %18788 = vrot.lane.b32.xlu0 %v18747_v61, %s24491_s29 }
0x1676   : > { %18758 = vrot.lane.b32.xlu1 %v18777_v28, %s24499_s23 }
0x1679   : > { %18798 = vrot.lane.b32.xlu0 %v18777_v28, %s24491_s29  ;;  %17580 = vmatmul.mubr.msk.bf16.vlgmr.msra.gmra.mrb[192].mxu0 %vm1186_vm2, %v8301_v12 }
0x167a   : > { %18763 = vrot.lane.b32.xlu1 %v18762_v52, %s24499_s23  ;;  %17591 = vmatprep.mubr.msk.bf16.mxu0 %vm20189_vm1, %v24496_v56 }
0x167d   : > { %18808 = vrot.lane.b32.xlu0 %v18747_v61, %s24492_s19 }
0x167e   : > { %18773 = vrot.lane.b32.xlu1 %v18752_v3, %s24490_s21 }
0x1681   : > { %18818 = vrot.lane.b32.xlu0 %v18777_v28, %s24492_s19 }
0x1682   : > { %18783 = vrot.lane.b32.xlu1 %v18762_v52, %s24490_s21 }
0x1685   : > { %18828 = vrot.lane.b32.xlu0 %v18747_v61, %s24493_s26 }
0x1686   : > { %18793 = vrot.lane.b32.xlu1 %v18752_v3, %s24491_s29 }
0x1689   : > { %18838 = vrot.lane.b32.xlu0 %v18777_v28, %s24493_s26 }
0x168a   : > { %18803 = vrot.lane.b32.xlu1 %v18762_v52, %s24491_s29 }
0x168d   : > { %18848 = vrot.lane.b32.xlu0 %v18747_v61, %s24494_s28 }
0x168e   : > { %18813 = vrot.lane.b32.xlu1 %v18752_v3, %s24492_s19 }
0x1691   : > { %18858 = vrot.lane.b32.xlu0 %v18777_v28, %s24494_s28 }
0x1692   : > { %18823 = vrot.lane.b32.xlu1 %v18762_v52, %s24492_s19 }
0x1695   : > { %18868 = vrot.lane.b32.xlu0 %v18747_v61, %s24495_s17 }
0x1696   : > { %18833 = vrot.lane.b32.xlu1 %v18752_v3, %s24493_s26 }
0x1699   : > { %18878 = vrot.lane.b32.xlu0 %v18777_v28, %s24495_s17 }
0x169a   : > { %18843 = vrot.lane.b32.xlu1 %v18762_v52, %s24493_s26 }
0x169d   : > { %18888 = vrot.lane.b32.xlu0 %v22488_v59, %s24499_s23 }
0x169e   : > { %18853 = vrot.lane.b32.xlu1 %v18752_v3, %s24494_s28 }
0x16a1   : > { %18898 = vrot.lane.b32.xlu0 %v22488_v59, %s24490_s21 }
0x16a2   : > { %18863 = vrot.lane.b32.xlu1 %v18762_v52, %s24494_s28 }
0x16a5   : > { %18908 = vrot.lane.b32.xlu0 %v22488_v59, %s24491_s29 }
0x16a6   : > { %18873 = vrot.lane.b32.xlu1 %v18752_v3, %s24495_s17 }
0x16a9   : > { %18913 = vrot.lane.b32.xlu0 %v22482_v17, %s24491_s29 }
0x16aa   : > { %18883 = vrot.lane.b32.xlu1 %v18762_v52, %s24495_s17 }
0x16ae   : > { %18893 = vrot.lane.b32.xlu1 %v22482_v17, %s24499_s23 }
0x16b2   : > { %18903 = vrot.lane.b32.xlu1 %v22482_v17, %s24490_s21 }
0x16b6   : > { %18918 = vrot.lane.b32.xlu1 %v22488_v59, %s24492_s19 }
0x16db   : > { %v18749_v32 = vpop.permute.xlu0 %18748 }
0x16dc   : > { %v18751_v58 = vunpack.i.h.bf16 %v18749_v32  ;;  %v18750_v18 = vunpack.i.l.bf16 %v18749_v32 }
0x16de   : > { %v8406_v20 = vpack.c.bf16 %v18751_v58, %v18750_v18 }
0x16df   : > { %v18769_v51 = vpop.permute.xlu0 %18768 }
0x16e0   : > { %v8622_v6 = vsel %vm1186_vm2, %v8406_v20, 0  ;;  %v18771_v10 = vunpack.i.h.bf16 %v18769_v51  ;;  %v18770_v37 = vunpack.i.l.bf16 %v18769_v51 }
0x16e1   : > { %17584 = vmatpush3.bf16.xpose.msra.mxu1 %v8622_v6 }
0x16e2   : > { %17595 = vmatprep.subr.bf16.mxu1 %v24496_v56  ;;  %v8408_v5 = vpack.c.bf16 %v18771_v10, %v18770_v37 }
0x16e3   : > { %v18779_v15 = vpop.permute.xlu0 %18778 }
0x16e4   : > { %v18754_v46 = vpop.permute.xlu1 %18753  ;;  %v8716_v27 = vsel %vm1186_vm2, %v8408_v5, 0  ;;  %v18781_v54 = vunpack.i.h.bf16 %v18779_v15  ;;  %v18780_v19 = vunpack.i.l.bf16 %v18779_v15 }
0x16e5   : > { %v18756_v22 = vunpack.i.h.bf16 %v18754_v46  ;;  %v18755_v21 = vunpack.i.l.bf16 %v18754_v46 }
0x16e6   : > { %v8304_v9 = vpack.c.bf16 %v18781_v54, %v18780_v19 }
0x16e7   : > { %v18789_v26 = vpop.permute.xlu0 %18788  ;;  %v8407_v16 = vpack.c.bf16 %v18756_v22, %v18755_v21 }
0x16e8   : > { %v18759_v47 = vpop.permute.xlu1 %18758  ;;  %v18791_v31 = vunpack.i.h.bf16 %v18789_v26  ;;  %v18790_v39 = vunpack.i.l.bf16 %v18789_v26 }
0x16e9   : > { %v18761_v62 = vunpack.i.h.bf16 %v18759_v47  ;;  %v18760_v35 = vunpack.i.l.bf16 %v18759_v47  ;;  %v8669_v55 = vsel %vm1186_vm2, %v8407_v16, 0 }
0x16ea   : > { %17590 = vmatpush3.bf16.xpose.msra.mxu0 %v8669_v55  ;;  %v8410_v61 = vpack.c.bf16 %v18791_v31, %v18790_v39 }
0x16eb   : > { %v8302_v50 = vpack.c.bf16 %v18761_v62, %v18760_v35  ;;  %v18799_v2 = vpop.permute.xlu0 %18798  ;;  %17601 = vmatprep.subr.bf16.mxu0 %v24496_v56 }
0x16ec   : > { %v18764_v45 = vpop.permute.xlu1 %18763  ;;  %v8810_v52 = vsel %vm1186_vm2, %v8410_v61, 0  ;;  %v18801_v3 = vunpack.i.h.bf16 %v18799_v2  ;;  %v18800_v44 = vunpack.i.l.bf16 %v18799_v2 }
0x16ed   : > { %v18766_v57 = vunpack.i.h.bf16 %v18764_v45  ;;  %v18765_v8 = vunpack.i.l.bf16 %v18764_v45  ;;  %17586 = vmatmul.mubr.msk.bf16.vlgmr.msra.gmra.mrb[160].mxu1 %vm1186_vm2, %v8302_v50 }
0x16ee   : > { %17596 = vmatpush3.bf16.xpose.msra.mxu1 %v8716_v27  ;;  %17597 = vmatprep.mubr.msk.bf16.mxu1 %vm20189_vm1, %v24496_v56  ;;  %v8306_v15 = vpack.c.bf16 %v18801_v3, %v18800_v44 }
0x16ef   : > { %v8303_v4 = vpack.c.bf16 %v18766_v57, %v18765_v8  ;;  %v18809_v34 = vpop.permute.xlu0 %18808  ;;  %17607 = vmatprep.subr.bf16.mxu1 %v24496_v56 }
0x16f0   : > { %v18774_v14 = vpop.permute.xlu1 %18773  ;;  %v18811_v7 = vunpack.i.h.bf16 %v18809_v34  ;;  %v18810_v49 = vunpack.i.l.bf16 %v18809_v34 }
0x16f1   : > { %v18776_v28 = vunpack.i.h.bf16 %v18774_v14  ;;  %v18775_v63 = vunpack.i.l.bf16 %v18774_v14  ;;  %17592 = vmatmul.mubr.msk.bf16.vlgmr.msra.gmra.mrb[196].mxu0 %vm1186_vm2, %v8303_v4 }
0x16f2   : > { %17603 = vmatprep.mubr.msk.bf16.mxu0 %vm20189_vm1, %v24496_v56  ;;  %v8412_v6 = vpack.c.bf16 %v18811_v7, %v18810_v49 }
0x16f3   : > { %v18819_v1 = vpop.permute.xlu0 %18818  ;;  %v8409_v29 = vpack.c.bf16 %v18776_v28, %v18775_v63 }
0x16f4   : > { %v18784_v30 = vpop.permute.xlu1 %18783  ;;  %v8904_v16 = vsel %vm1186_vm2, %v8412_v6, 0  ;;  %v18821_v5 = vunpack.i.h.bf16 %v18819_v1  ;;  %v18820_v62 = vunpack.i.l.bf16 %v18819_v1 }
0x16f5   : > { %17598 = vmatmul.mubr.msk.bf16.vlgmr.msra.gmra.mrb[164].mxu1 %vm1186_vm2, %v8304_v9  ;;  %v8763_v12 = vsel %vm1186_vm2, %v8409_v29, 0  ;;  %v18786_v48 = vunpack.i.h.bf16 %v18784_v30  ;;  %v18785_v32 = vunpack.i.l.bf16 %v18784_v30 }
0x16f6   : > { %17608 = vmatpush3.bf16.xpose.msra.mxu1 %v8810_v52  ;;  %17602 = vmatpush3.bf16.xpose.msra.mxu0 %v8763_v12  ;;  %v8308_v39 = vpack.c.bf16 %v18821_v5, %v18820_v62 }
0x16f7   : > { %v18829_v58 = vpop.permute.xlu0 %18828  ;;  %17609 = vmatprep.mubr.msk.bf16.mxu1 %vm20189_vm1, %v24496_v56  ;;  %17619 = vmatprep.subr.bf16.mxu1 %v24496_v56  ;;  %v8305_v10 = vpack.c.bf16 %v18786_v48, %v18785_v32 }
0x16f8   : > { %v18794_v18 = vpop.permute.xlu1 %18793  ;;  %17613 = vmatprep.subr.bf16.mxu0 %v24496_v56  ;;  %v18831_v21 = vunpack.i.h.bf16 %v18829_v58  ;;  %v18830_v26 = vunpack.i.l.bf16 %v18829_v58 }
0x16f9   : > { %v18796_v20 = vunpack.i.h.bf16 %v18794_v18  ;;  %v18795_v51 = vunpack.i.l.bf16 %v18794_v18 }
0x16fa   : > { %v8414_v31 = vpack.c.bf16 %v18831_v21, %v18830_v26 }
0x16fb   : > { %v18839_v37 = vpop.permute.xlu0 %18838  ;;  %v8411_v46 = vpack.c.bf16 %v18796_v20, %v18795_v51 }
0x16fc   : > { %v18804_v22 = vpop.permute.xlu1 %18803  ;;  %v8998_v14 = vsel %vm1186_vm2, %v8414_v31, 0  ;;  %v18841_v63 = vunpack.i.h.bf16 %v18839_v37  ;;  %v18840_v61 = vunpack.i.l.bf16 %v18839_v37 }
0x16fd   : > { %17604 = vmatmul.mubr.msk.bf16.vlgmr.msra.gmra.mrb[200].mxu0 %vm1186_vm2, %v8305_v10  ;;  %17610 = vmatmul.mubr.msk.bf16.vlgmr.msra.gmra.mrb[168].mxu1 %vm1186_vm2, %v8306_v15  ;;  %v8857_v47 = vsel %vm1186_vm2, %v8411_v46, 0  ;;  %v18806_v35 = vunpack.i.h.bf16 %v18804_v22  ;;  %v18805_v55 = vunpack.i.l.bf16 %v18804_v22 }
0x16fe   : > { %17620 = vmatpush3.bf16.xpose.msra.mxu1 %v8904_v16  ;;  %17614 = vmatpush3.bf16.xpose.msra.mxu0 %v8857_v47  ;;  %v8310_v12 = vpack.c.bf16 %v18841_v63, %v18840_v61 }
0x16ff   : > { %v18849_v50 = vpop.permute.xlu0 %18848  ;;  %17615 = vmatprep.mubr.msk.bf16.mxu0 %vm20189_vm1, %v24496_v56  ;;  %17621 = vmatprep.mubr.msk.bf16.mxu1 %vm20189_vm1, %v24496_v56  ;;  %v8307_v57 = vpack.c.bf16 %v18806_v35, %v18805_v55 }
0x1700   : > { %v18814_v2 = vpop.permute.xlu1 %18813  ;;  %17631 = vmatprep.subr.bf16.mxu1 %v24496_v56  ;;  %17625 = vmatprep.subr.bf16.mxu0 %v24496_v56  ;;  %v18851_v4 = vunpack.i.h.bf16 %v18849_v50  ;;  %v18850_v34 = vunpack.i.l.bf16 %v18849_v50 }
0x1701   : > { %v18816_v45 = vunpack.i.h.bf16 %v18814_v2  ;;  %v18815_v27 = vunpack.i.l.bf16 %v18814_v2 }
0x1702   : > { %v8416_v49 = vpack.c.bf16 %v18851_v4, %v18850_v34 }
0x1703   : > { %v8413_v8 = vpack.c.bf16 %v18816_v45, %v18815_v27  ;;  %v18859_v19 = vpop.permute.xlu0 %18858 }
0x1704   : > { %v18824_v54 = vpop.permute.xlu1 %18823  ;;  %v9092_v18 = vsel %vm1186_vm2, %v8416_v49, 0  ;;  %v18861_v51 = vunpack.i.h.bf16 %v18859_v19  ;;  %v18860_v6 = vunpack.i.l.bf16 %v18859_v19 }
0x1705   : > { %17616 = vmatmul.mubr.msk.bf16.vlgmr.msra.gmra.mrb[204].mxu0 %vm1186_vm2, %v8307_v57  ;;  %17622 = vmatmul.mubr.msk.bf16.vlgmr.msra.gmra.mrb[172].mxu1 %vm1186_vm2, %v8308_v39  ;;  %v8951_v28 = vsel %vm1186_vm2, %v8413_v8, 0  ;;  %v18826_v9 = vunpack.i.h.bf16 %v18824_v54  ;;  %v18825_v1 = vunpack.i.l.bf16 %v18824_v54 }
0x1706   : > { %17632 = vmatpush3.bf16.xpose.msra.mxu1 %v8998_v14  ;;  %17626 = vmatpush3.bf16.xpose.msra.mxu0 %v8951_v28  ;;  %v8312_v26 = vpack.c.bf16 %v18861_v51, %v18860_v6 }
0x1707   : > { %17627 = vmatprep.mubr.msk.bf16.mxu0 %vm20189_vm1, %v24496_v56  ;;  %17633 = vmatprep.mubr.msk.bf16.mxu1 %vm20189_vm1, %v24496_v56  ;;  %v18869_v52 = vpop.permute.xlu0 %18868  ;;  %v8309_v3 = vpack.c.bf16 %v18826_v9, %v18825_v1  ;;  %v24501_v1 = vld [vmem:[#allocation15_spill] sm:$0xff] }
0x1708   : > { %v18834_v29 = vpop.permute.xlu1 %18833  ;;  %17643 = vmatprep.subr.bf16.mxu1 %v24496_v56  ;;  %17637 = vmatprep.subr.bf16.mxu0 %v24496_v56  ;;  %v18871_v32 = vunpack.i.h.bf16 %v18869_v52  ;;  %v18870_v58 = vunpack.i.l.bf16 %v18869_v52 }
0x1709   : > { %v18836_v30 = vunpack.i.h.bf16 %v18834_v29  ;;  %v18835_v7 = vunpack.i.l.bf16 %v18834_v29 }
0x170a   : > { %v8418_v21 = vpack.c.bf16 %v18871_v32, %v18870_v58 }
0x170b   : > { %v8415_v44 = vpack.c.bf16 %v18836_v30, %v18835_v7  ;;  %v18879_v5 = vpop.permute.xlu0 %18878 }
0x170c   : > { %v18844_v48 = vpop.permute.xlu1 %18843  ;;  %v9186_v35 = vsel %vm1186_vm2, %v8418_v21, 0  ;;  %v18881_v50 = vunpack.i.h.bf16 %v18879_v5  ;;  %v18880_v2 = vunpack.i.l.bf16 %v18879_v5 }
0x170d   : > { %17628 = vmatmul.mubr.msk.bf16.vlgmr.msra.gmra.mrb[208].mxu0 %vm1186_vm2, %v8309_v3  ;;  %17634 = vmatmul.mubr.msk.bf16.vlgmr.msra.gmra.mrb[176].mxu1 %vm1186_vm2, %v8310_v12  ;;  %v9045_v20 = vsel %vm1186_vm2, %v8415_v44, 0  ;;  %v18846_v15 = vunpack.i.h.bf16 %v18844_v48  ;;  %v18845_v10 = vunpack.i.l.bf16 %v18844_v48 }
0x170e   : > { %17644 = vmatpush3.bf16.xpose.msra.mxu1 %v9092_v18  ;;  %17638 = vmatpush3.bf16.xpose.msra.mxu0 %v9045_v20  ;;  %v8314_v8 = vpack.c.bf16 %v18881_v50, %v18880_v2 }
0x170f   : > { %17639 = vmatprep.mubr.msk.bf16.mxu0 %vm20189_vm1, %v24496_v56  ;;  %17645 = vmatprep.mubr.msk.bf16.mxu1 %vm20189_vm1, %v24496_v56  ;;  %v8311_v16 = vpack.c.bf16 %v18846_v15, %v18845_v10 }
0x1710   : > { %v18854_v37 = vpop.permute.xlu1 %18853  ;;  %17655 = vmatprep.subr.bf16.mxu1 %v24496_v56  ;;  %17649 = vmatprep.subr.bf16.mxu0 %v24496_v56 }
0x1711   : > { %v18856_v46 = vunpack.i.h.bf16 %v18854_v37  ;;  %v18855_v22 = vunpack.i.l.bf16 %v18854_v37 }
0x1713   : > { %v8417_v47 = vpack.c.bf16 %v18856_v46, %v18855_v22 }
0x1714   : > { %v18864_v62 = vpop.permute.xlu1 %18863 }
0x1715   : > { %17640 = vmatmul.mubr.msk.bf16.vlgmr.msra.gmra.mrb[212].mxu0 %vm1186_vm2, %v8311_v16  ;;  %17646 = vmatmul.mubr.msk.bf16.vlgmr.msra.gmra.mrb[180].mxu1 %vm1186_vm2, %v8312_v26  ;;  %v9139_v55 = vsel %vm1186_vm2, %v8417_v47, 0  ;;  %v18866_v45 = vunpack.i.h.bf16 %v18864_v62  ;;  %v18865_v27 = vunpack.i.l.bf16 %v18864_v62 }
0x1716   : > { %17656 = vmatpush3.bf16.xpose.msra.mxu1 %v9186_v35  ;;  %17650 = vmatpush3.bf16.xpose.msra.mxu0 %v9139_v55 }
0x1717   : > { %17651 = vmatprep.mubr.msk.bf16.mxu0 %vm20189_vm1, %v24496_v56  ;;  %17657 = vmatprep.mubr.msk.bf16.mxu1 %vm20189_vm1, %v24496_v56  ;;  %v8313_v54 = vpack.c.bf16 %v18866_v45, %v18865_v27 }
0x1718   : > { %v18874_v31 = vpop.permute.xlu1 %18873  ;;  %17667 = vmatprep.subr.bf16.mxu1 %v24496_v56  ;;  %17661 = vmatprep.subr.bf16.mxu0 %v24496_v56 }
0x1719   : > { %v18876_v39 = vunpack.i.h.bf16 %v18874_v31  ;;  %v18875_v57 = vunpack.i.l.bf16 %v18874_v31 }
0x171b   : > { %v8419_v19 = vpack.c.bf16 %v18876_v39, %v18875_v57 }
0x171c   : > { %v18884_v4 = vpop.permute.xlu1 %18883 }
0x171d   : > { %17652 = vmatmul.mubr.msk.bf16.vlgmr.msra.gmra.mrb[216].mxu0 %vm1186_vm2, %v8313_v54  ;;  %17658 = vmatmul.mubr.msk.bf16.vlgmr.msra.gmra.mrb[184].mxu1 %vm1186_vm2, %v8314_v8  ;;  %v9233_v34 = vsel %vm1186_vm2, %v8419_v19, 0  ;;  %v18886_v14 = vunpack.i.h.bf16 %v18884_v4  ;;  %v18885_v28 = vunpack.i.l.bf16 %v18884_v4 }
0x171e   : > { %17668 = vmatpush3.bf16.msra.mxu1 %v8508_v33  ;;  %17662 = vmatpush3.bf16.xpose.msra.mxu0 %v9233_v34 }
0x171f   : > { %17663 = vmatprep.mubr.msk.bf16.mxu0 %vm20189_vm1, %v24496_v56  ;;  %17673 = vmatprep.subr.bf16.mxu0 %v24496_v56  ;;  %v8315_v63 = vpack.c.bf16 %v18886_v14, %v18885_v28 }
0x1720   : > { %17669 = vmatprep.mubr.msk.bf16.mxu1 %vm20189_vm1, %v24496_v56  ;;  %17679 = vmatprep.subr.bf16.mxu1 %v24496_v56 }
0x1725   : > { %17664 = vmatmul.mubr.msk.bf16.vlgmr.msra.gmra.mrb[220].mxu0 %vm1186_vm2, %v8315_v63 }
0x1726   : > { %17674 = vmatpush3.bf16.msra.mxu0 %v8509_v53  ;;  %17675 = vmatprep.mubr.msk.bf16.mxu0 %vm20189_vm1, %v24496_v56 }
0x1727   : > { %17685 = vmatprep.subr.bf16.mxu0 %v24496_v56 }
0x1744   : > { %v8564_v25 = vpop.f32.mrb[188].mxu0 }
0x1745   : > { %v22620_v33 = vadd.f32 %v8564_v25, %v24500_v0  ;;  %v17575_v61 = vpop.f32.mrb[189].mxu0 }
0x1746   : > { %v8567_v9 = vpop.f32.mrb[190].mxu0 }
0x1747   : > { %v22623_v29 = vadd.f32 %v8567_v9, %v24501_v1  ;;  %v17576_v30 = vpop.f32.mrb[191].mxu0  ;;  %v9276_v7 = vsel %vm1186_vm2, %v22620_v33, -inf }
0x1748   : > { %9277 = vmax.xlane.f32.xlu0 %v9276_v7 }
0x1749   : > { %v9279_v41 = vsel %vm1186_vm2, %v22623_v29, -inf }
0x174a   : > { %9280 = vmax.xlane.f32.xlu1 %v9279_v41 }
0x174c   : > { %v8611_v43 = vpop.f32.mrb[192].mxu0 }
0x174d   : > { %v22630_v53 = vadd.f32 %v8611_v43, %v24500_v0  ;;  %v17581_v49 = vpop.f32.mrb[193].mxu0 }
0x174e   : > { %v8614_v52 = vpop.f32.mrb[194].mxu0 }
0x174f   : > { %v22633_v12 = vadd.f32 %v8614_v52, %v24501_v1  ;;  %v17582_v3 = vpop.f32.mrb[195].mxu0  ;;  %v9282_v44 = vsel %vm1186_vm2, %v22630_v53, -inf }
0x1750   : > { %9283 = vmax.xlane.f32.xlu0 %v9282_v44 }
0x1751   : > { %v9285_v48 = vsel %vm1186_vm2, %v22633_v12, -inf }
0x1754   : > { %9286 = vmax.xlane.f32.xlu0 %v9285_v48 }
0x17c0   : > { %v8658_v32 = vpop.f32.mrb[160].mxu1 }
0x17c1   : > { %v22640_v58 = vadd.f32 %v8658_v32, %v24500_v0  ;;  %v17587_v18 = vpop.f32.mrb[161].mxu1 }
0x17c2   : > { %v8661_v20 = vpop.f32.mrb[162].mxu1 }
0x17c3   : > { %v22643_v51 = vadd.f32 %v8661_v20, %v24501_v1  ;;  %v17588_v6 = vpop.f32.mrb[163].mxu1  ;;  %v9288_v15 = vsel %vm1186_vm2, %v22640_v58, -inf }
0x17c4   : > { %v8705_v10 = vpop.f32.mrb[196].mxu0  ;;  %9289 = vmax.xlane.f32.xlu0 %v9288_v15 }
0x17c5   : > { %v22648_v37 = vadd.f32 %v8705_v10, %v24500_v0  ;;  %v17593_v46 = vpop.f32.mrb[197].mxu0  ;;  %v9291_v22 = vsel %vm1186_vm2, %v22643_v51, -inf }
0x17c6   : > { %v8708_v21 = vpop.f32.mrb[198].mxu0  ;;  %9292 = vmax.xlane.f32.xlu1 %v9291_v22 }
0x17c7   : > { %v22653_v26 = vadd.f32 %v8708_v21, %v24501_v1  ;;  %v17594_v16 = vpop.f32.mrb[199].mxu0  ;;  %v9294_v47 = vsel %vm1186_vm2, %v22648_v37, -inf }
0x17c8   : > { %9295 = vmax.xlane.f32.xlu0 %v9294_v47  ;;  %v8752_v5 = vpop.f32.mrb[164].mxu1 }
0x17c9   : > { %v22658_v62 = vadd.f32 %v8752_v5, %v24500_v0  ;;  %v17599_v35 = vpop.f32.mrb[165].mxu1  ;;  %v9297_v55 = vsel %vm1186_vm2, %v22653_v26, -inf }
0x17ca   : > { %9298 = vmax.xlane.f32.xlu1 %v9297_v55  ;;  %v8755_v50 = vpop.f32.mrb[166].mxu1 }
0x17cb   : > { %v22663_v2 = vadd.f32 %v8755_v50, %v24501_v1  ;;  %v17600_v45 = vpop.f32.mrb[167].mxu1  ;;  %v9300_v27 = vsel %vm1186_vm2, %v22658_v62, -inf }
0x17cc   : > { %9301 = vmax.xlane.f32.xlu0 %v9300_v27 }
0x17cd   : > { %v9303_v31 = vsel %vm1186_vm2, %v22663_v2, -inf }
0x17ce   : > { %9304 = vmax.xlane.f32.xlu1 %v9303_v31 }
0x17d0   : > { %v8799_v39 = vpop.f32.mrb[200].mxu0  ;;  %v8846_v57 = vpop.f32.mrb[168].mxu1 }
0x17d1   : > { %v22670_v8 = vadd.f32 %v8799_v39, %v24500_v0  ;;  %v17605_v54 = vpop.f32.mrb[201].mxu0  ;;  %v17611_v19 = vpop.f32.mrb[169].mxu1  ;;  %v22673_v14 = vadd.f32 %v8846_v57, %v24500_v0 }
0x17d2   : > { %v8802_v4 = vpop.f32.mrb[202].mxu0  ;;  %v8849_v34 = vpop.f32.mrb[170].mxu1 }
0x17d3   : > { %v22676_v28 = vadd.f32 %v8802_v4, %v24501_v1  ;;  %v17606_v63 = vpop.f32.mrb[203].mxu0  ;;  %v17612_v25 = vpop.f32.mrb[171].mxu1  ;;  %v9306_v61 = vsel %vm1186_vm2, %v22670_v8, -inf  ;;  %v22681_v9 = vadd.f32 %v8849_v34, %v24501_v1  ;;  %v9312_v7 = vsel %vm1186_vm2, %v22673_v14, -inf }
0x17d4   : > { %9307 = vmax.xlane.f32.xlu0 %v9306_v61 }
0x17d5   : > { %v9309_v30 = vsel %vm1186_vm2, %v22676_v28, -inf  ;;  %v9315_v44 = vsel %vm1186_vm2, %v22681_v9, -inf }
0x17d6   : > { %9310 = vmax.xlane.f32.xlu1 %v9309_v30 }
0x17d8   : > { %v8893_v41 = vpop.f32.mrb[204].mxu0  ;;  %9313 = vmax.xlane.f32.xlu0 %v9312_v7  ;;  %v8940_v43 = vpop.f32.mrb[172].mxu1 }
0x17d9   : > { %v22688_v49 = vadd.f32 %v8893_v41, %v24500_v0  ;;  %v17617_v52 = vpop.f32.mrb[205].mxu0  ;;  %v17623_v3 = vpop.f32.mrb[173].mxu1 }
0x17da   : > { %v8896_v48 = vpop.f32.mrb[206].mxu0  ;;  %9316 = vmax.xlane.f32.xlu1 %v9315_v44  ;;  %v8943_v32 = vpop.f32.mrb[174].mxu1 }
0x17db   : > { %v17618_v18 = vpop.f32.mrb[207].mxu0  ;;  %v17624_v20 = vpop.f32.mrb[175].mxu1  ;;  %v9318_v6 = vsel %vm1186_vm2, %v22688_v49, -inf }
0x17dc   : > { %9319 = vmax.xlane.f32.xlu0 %v9318_v6  ;;  %v22706_v7 = vpop.permute.xlu0 %18888  ;;  %v22714_v20 = vpop.permute.xlu1 %18893 }
0x17e0   : > { %v8987_v15 = vpop.f32.mrb[208].mxu0  ;;  %v9034_v10 = vpop.f32.mrb[176].mxu1 }
0x17e1   : > { %v17629_v46 = vpop.f32.mrb[209].mxu0  ;;  %v17635_v22 = vpop.f32.mrb[177].mxu1 }
0x17e2   : > { %v8990_v21 = vpop.f32.mrb[210].mxu0  ;;  %v9037_v16 = vpop.f32.mrb[178].mxu1 }
0x17e3   : > { %v17630_v47 = vpop.f32.mrb[211].mxu0  ;;  %v17636_v5 = vpop.f32.mrb[179].mxu1 }
0x17e4   : > { %v22712_v18 = vpop.permute.xlu0 %18898  ;;  %v22718_v46 = vpop.permute.xlu1 %18903  ;;  %v22725_v5 = vadd.f32 %v8896_v48, %v24501_v1 }
0x17e8   : > { %v9081_v35 = vpop.f32.mrb[212].mxu0  ;;  %v9128_v55 = vpop.f32.mrb[180].mxu1 }
0x17e9   : > { %v17641_v50 = vpop.f32.mrb[213].mxu0  ;;  %v17647_v45 = vpop.f32.mrb[181].mxu1 }
0x17ea   : > { %v9084_v27 = vpop.f32.mrb[214].mxu0  ;;  %v9131_v31 = vpop.f32.mrb[182].mxu1  ;;  %v22728_v45 = vadd.f32 %v8940_v43, %v24500_v0  ;;  %v22743_v43 = vadd.f32 %v8990_v21, %v24501_v1 }
0x17eb   : > { %v17642_v39 = vpop.f32.mrb[215].mxu0  ;;  %18928 = vrot.lane.b32.xlu1 %v22488_v59, %s24493_s26  ;;  %v17648_v57 = vpop.f32.mrb[183].mxu1 }
0x17ec   : > { %v22716_v6 = vpop.permute.xlu0 %18908  ;;  %v22722_v47 = vpop.permute.xlu1 %18918  ;;  %v22731_v57 = vadd.f32 %v8943_v32, %v24501_v1  ;;  %v9324_v48 = vsel %vm1186_vm2, %v22728_v45, -inf  ;;  %v9333_v21 = vsel %vm1186_vm2, %v22743_v43, -inf }
0x17ee   : > { %v9327_v32 = vsel %vm1186_vm2, %v22731_v57, -inf }
0x17f0   : > { %v22696_v54 = vpop.f32.mrb[216].mxu0  ;;  %v22698_v19 = vpop.f32.mrb[184].mxu1 }
0x17f1   : > { %v17653_v4 = vpop.f32.mrb[217].mxu0  ;;  %v17659_v34 = vpop.f32.mrb[185].mxu1 }
0x17f2   : > { %v22700_v63 = vpop.f32.mrb[218].mxu0  ;;  %18923 = vrot.lane.b32.xlu0 %v22482_v17, %s24492_s19  ;;  %v22704_v25 = vpop.f32.mrb[186].mxu1  ;;  %v9321_v4 = vsel %vm1186_vm2, %v22725_v5, -inf }
0x17f3   : > { %v17654_v61 = vpop.f32.mrb[219].mxu0  ;;  %v17660_v30 = vpop.f32.mrb[187].mxu1 }
0x17f4   : > { %v22720_v22 = vpop.permute.xlu0 %18913  ;;  %v9281_v39 = vpop.xlane.xlu1 %9280  ;;  %v22737_v61 = vadd.f32 %v8987_v15, %v24500_v0 }
0x17f5   : > { %v9373_v30 = vsub.f32 %v22623_v29, %v9281_v39  ;;  %v22753_v29 = vadd.f32 %v9037_v16, %v24501_v1  ;;  %v22758_v39 = vadd.f32 %v9081_v35, %v24500_v0 }
0x17f6   : > { %v9330_v15 = vsel %vm1186_vm2, %v22737_v61, -inf }
0x17f7   : > { %v9339_v16 = vsel %vm1186_vm2, %v22753_v29, -inf  ;;  %v9342_v35 = vsel %vm1186_vm2, %v22758_v39, -inf }
0x17f8   : > { %v22708_v41 = vpop.f32.mrb[220].mxu0  ;;  %v9278_v50 = vpop.xlane.xlu0 %9277 }
0x17f9   : > { %v17665_v52 = vpop.f32.mrb[221].mxu0  ;;  %v9372_v34 = vsub.f32 %v22620_v33, %v9278_v50  ;;  %v22748_v33 = vadd.f32 %v9034_v10, %v24500_v0  ;;  %v9406_v50 = vmul.f32 1.442695, %v9373_v30  ;;  %v22769_v30 = vadd.f32 %v9128_v55, %v24500_v0 }
0x17fa   : > { %v22710_v3 = vpop.f32.mrb[222].mxu0 }
0x17fb   : > { %v17666_v44 = vpop.f32.mrb[223].mxu0  ;;  %v9404_v52 = vmul.f32 1.442695, %v9372_v34  ;;  %v9336_v10 = vsel %vm1186_vm2, %v22748_v33, -inf  ;;  %v22763_v34 = vadd.f32 %v9084_v27, %v24501_v1 }
0x17fc   : > { %v9284_v44 = vpop.xlane.xlu0 %9283 }
0x17fd   : > { %19831 = vpow2.f32 %v9404_v52  ;;  %v22775_v52 = vadd.f32 %v9131_v31, %v24501_v1  ;;  %v9345_v27 = vsel %vm1186_vm2, %v22763_v34, -inf  ;;  %v22789_v31 = vadd.f32 %v22696_v54, %v24500_v0 }
0x17fe   : > { %19833 = vpow2.f32 %v9406_v50 }
0x17ff   : > { %v9351_v50 = vsel %vm1186_vm2, %v22775_v52, -inf  ;;  %v9354_v54 = vsel %vm1186_vm2, %v22789_v31, -inf }
0x180f   : > { %9322 = vmax.xlane.f32.xlu1 %v9321_v4  ;;  %v9287_v4 = vpop.xlane.xlu0 %9286 }
0x1811   : > { %9325 = vmax.xlane.f32.xlu0 %v9324_v48  ;;  %v9374_v48 = vsub.f32 %v22630_v53, %v9284_v44  ;;  %v9348_v53 = vsel %vm1186_vm2, %v22769_v30, -inf  ;;  %v22781_v44 = vpop.eup %19831 }
0x1813   : > { %9328 = vmax.xlane.f32.xlu1 %v9327_v32  ;;  %v9375_v32 = vsub.f32 %v22633_v12, %v9287_v4  ;;  %v22785_v12 = vpop.eup %19833 }
0x1814   : > { %v9471_v4 = vsel %vm1186_vm2, %v22785_v12, 0.0 }
0x1815   : > { %9331 = vmax.xlane.f32.xlu0 %v9330_v15  ;;  %v9408_v15 = vmul.f32 1.442695, %v9374_v48  ;;  %v9410_v55 = vmul.f32 1.442695, %v9375_v32  ;;  %v22807_v48 = vadd.f32 %v22704_v25, %v24501_v1  ;;  %v22821_v25 = vadd.f32 %v22708_v41, %v24500_v0 }
0x1817   : > { %9334 = vmax.xlane.f32.xlu1 %v9333_v21  ;;  %19835 = vpow2.f32 %v9408_v15  ;;  %v9468_v21 = vsel %vm1186_vm2, %v22781_v44, 0.0 }
0x1818   : > { %19837 = vpow2.f32 %v9410_v55 }
0x1819   : > { %9337 = vmax.xlane.f32.xlu0 %v9336_v10  ;;  %v22795_v10 = vadd.f32 %v22700_v63, %v24501_v1 }
0x181b   : > { %9340 = vmax.xlane.f32.xlu1 %v9339_v16  ;;  %v22801_v16 = vadd.f32 %v22698_v19, %v24500_v0  ;;  %v9357_v63 = vsel %vm1186_vm2, %v22795_v10, -inf  ;;  %v9363_v19 = vsel %vm1186_vm2, %v22807_v48, -inf }
0x181d   : > { %9343 = vmax.xlane.f32.xlu0 %v9342_v35  ;;  %v9360_v35 = vsel %vm1186_vm2, %v22801_v16, -inf }
0x181f   : > { %9346 = vmax.xlane.f32.xlu1 %v9345_v27 }
0x1821   : > { %9349 = vmax.xlane.f32.xlu0 %v9348_v53  ;;  %v22813_v32 = vpop.eup %19835  ;;  %v22827_v53 = vadd.f32 %v22710_v3, %v24501_v1 }
0x1822   : > { %v22817_v27 = vpop.eup %19837  ;;  %v9474_v15 = vsel %vm1186_vm2, %v22813_v32, 0.0 }
0x1823   : > { %9352 = vmax.xlane.f32.xlu1 %v9351_v50  ;;  %v9477_v55 = vsel %vm1186_vm2, %v22817_v27, 0.0  ;;  %v9366_v50 = vsel %vm1186_vm2, %v22821_v25, -inf  ;;  %v9369_v41 = vsel %vm1186_vm2, %v22827_v53, -inf }
0x1825   : > { %9469 = vadd.xlane.f32.xlu0 %v9468_v21 }
0x1827   : > { %9472 = vadd.xlane.f32.xlu1 %v9471_v4 }
0x1829   : > { %9355 = vmax.xlane.f32.xlu0 %v9354_v54 }
0x182b   : > { %9358 = vmax.xlane.f32.xlu1 %v9357_v63 }
0x182d   : > { %9361 = vmax.xlane.f32.xlu0 %v9360_v35 }
0x182f   : > { %9364 = vmax.xlane.f32.xlu1 %v9363_v19 }
0x1831   : > { %9475 = vadd.xlane.f32.xlu0 %v9474_v15 }
0x1833   : > { %9478 = vadd.xlane.f32.xlu1 %v9477_v55 }
0x1835   : > { %9367 = vmax.xlane.f32.xlu0 %v9366_v50 }
0x1837   : > { %9370 = vmax.xlane.f32.xlu1 %v9369_v41 }
0x1851   : > { %v9290_v21 = vpop.xlane.xlu0 %9289 }
0x1852   : > { %v9376_v4 = vsub.f32 %v22640_v58, %v9290_v21 }
0x1853   : > { %v9293_v54 = vpop.xlane.xlu1 %9292 }
0x1854   : > { %v9412_v63 = vmul.f32 1.442695, %v9376_v4  ;;  %v9377_v3 = vsub.f32 %v22643_v51, %v9293_v54 }
0x1855   : > { %v9296_v35 = vpop.xlane.xlu0 %9295 }
0x1856   : > { %19839 = vpow2.f32 %v9412_v63  ;;  %v9414_v19 = vmul.f32 1.442695, %v9377_v3  ;;  %v9378_v15 = vsub.f32 %v22648_v37, %v9296_v35 }
0x1857   : > { %v9299_v55 = vpop.xlane.xlu1 %9298 }
0x1858   : > { %19841 = vpow2.f32 %v9414_v19  ;;  %v9416_v1 = vmul.f32 1.442695, %v9378_v15  ;;  %v9379_v50 = vsub.f32 %v22653_v26, %v9299_v55 }
0x1859   : > { %v9302_v0 = vpop.xlane.xlu0 %9301 }
0x185a   : > { %19843 = vpow2.f32 %v9416_v1  ;;  %v9418_v41 = vmul.f32 1.442695, %v9379_v50  ;;  %v9380_v42 = vsub.f32 %v22658_v62, %v9302_v0 }
0x185b   : > { %v9305_v58 = vpop.xlane.xlu1 %9304 }
0x185c   : > { %19845 = vpow2.f32 %v9418_v41  ;;  %v9420_v21 = vmul.f32 1.442695, %v9380_v42  ;;  %v9381_v51 = vsub.f32 %v22663_v2, %v9305_v58 }
0x185e   : > { %19847 = vpow2.f32 %v9420_v21  ;;  %v9422_v4 = vmul.f32 1.442695, %v9381_v51 }
0x1860   : > { %v22841_v54 = vpop.eup %19839  ;;  %19849 = vpow2.f32 %v9422_v4 }
0x1861   : > { %v9308_v37 = vpop.xlane.xlu0 %9307  ;;  %v9480_v63 = vsel %vm1186_vm2, %v22841_v54, 0.0 }
0x1862   : > { %v22845_v26 = vpop.eup %19841  ;;  %v9382_v1 = vsub.f32 %v22670_v8, %v9308_v37  ;;  %9481 = vadd.xlane.f32.xlu0 %v9480_v63 }
0x1863   : > { %v9311_v0 = vpop.xlane.xlu1 %9310  ;;  %v9483_v42 = vsel %vm1186_vm2, %v22845_v26, 0.0 }
0x1864   : > { %v22850_v62 = vpop.eup %19843  ;;  %v9424_v2 = vmul.f32 1.442695, %v9382_v1  ;;  %v9383_v3 = vsub.f32 %v22676_v28, %v9311_v0  ;;  %9484 = vadd.xlane.f32.xlu1 %v9483_v42 }
0x1865   : > { %v9314_v35 = vpop.xlane.xlu0 %9313  ;;  %v9486_v19 = vsel %vm1186_vm2, %v22850_v62, 0.0 }
0x1866   : > { %v22855_v15 = vpop.eup %19845  ;;  %19851 = vpow2.f32 %v9424_v2  ;;  %v9384_v8 = vsub.f32 %v22673_v14, %v9314_v35  ;;  %9487 = vadd.xlane.f32.xlu0 %v9486_v19  ;;  %v9426_v58 = vmul.f32 1.442695, %v9383_v3 }
0x1867   : > { %v9317_v55 = vpop.xlane.xlu1 %9316  ;;  %v9489_v50 = vsel %vm1186_vm2, %v22855_v15, 0.0 }
0x1868   : > { %v22860_v41 = vpop.eup %19847  ;;  %v9428_v21 = vmul.f32 1.442695, %v9384_v8  ;;  %v9385_v28 = vsub.f32 %v22681_v9, %v9317_v55  ;;  %9490 = vadd.xlane.f32.xlu1 %v9489_v50 }
0x1869   : > { %v9320_v51 = vpop.xlane.xlu0 %9319  ;;  %v9492_v4 = vsel %vm1186_vm2, %v22860_v41, 0.0 }
0x186a   : > { %v22865_v37 = vpop.eup %19849  ;;  %19853 = vpow2.f32 %v9428_v21  ;;  %v9386_v14 = vsub.f32 %v22688_v49, %v9320_v51  ;;  %9493 = vadd.xlane.f32.xlu0 %v9492_v4  ;;  %v9430_v1 = vmul.f32 1.442695, %v9385_v28 }
0x186b   : > { %v9495_v63 = vsel %vm1186_vm2, %v22865_v37, 0.0  ;;  %19855 = vpow2.f32 %v9426_v58  ;;  %v22890_v58 = vpop.permute.xlu1 %18928 }
0x186c   : > { %v9432_v0 = vmul.f32 1.442695, %v9386_v14  ;;  %9496 = vadd.xlane.f32.xlu1 %v9495_v63 }
0x186d   : > { %v22892_v21 = vpop.permute.xlu0 %18923 }
0x186e   : > { %19857 = vpow2.f32 %v9432_v0 }
0x186f   : > { %19859 = vpow2.f32 %v9430_v1 }
0x1870   : > { %v22870_v9 = vpop.eup %19851 }
0x1871   : > { %v9498_v42 = vsel %vm1186_vm2, %v22870_v9, 0.0 }
0x1872   : > { %9499 = vadd.xlane.f32.xlu0 %v9498_v42 }
0x1874   : > { %v22874_v2 = vpop.eup %19853 }
0x1875   : > { %v9504_v49 = vsel %vm1186_vm2, %v22874_v2, 0.0  ;;  %v22878_v3 = vpop.eup %19855 }
0x1876   : > { %9505 = vadd.xlane.f32.xlu1 %v9504_v49  ;;  %v9501_v8 = vsel %vm1186_vm2, %v22878_v3, 0.0 }
0x1878   : > { %v22880_v35 = vpop.eup %19857 }
0x1879   : > { %v9510_v19 = vsel %vm1186_vm2, %v22880_v35, 0.0  ;;  %v22886_v55 = vpop.eup %19859 }
0x187a   : > { %9511 = vadd.xlane.f32.xlu0 %v9510_v19  ;;  %9502 = vadd.xlane.f32.xlu1 %v9501_v8  ;;  %v9507_v50 = vsel %vm1186_vm2, %v22886_v55, 0.0 }
0x187e   : > { %9508 = vadd.xlane.f32.xlu1 %v9507_v50 }
0x189c   : > { %v9323_v28 = vpop.xlane.xlu1 %9322 }
0x189d   : > { %v9387_v51 = vsub.f32 %v22725_v5, %v9323_v28 }
0x189e   : > { %v9326_v4 = vpop.xlane.xlu0 %9325 }
0x189f   : > { %v9388_v14 = vsub.f32 %v22728_v45, %v9326_v4  ;;  %v9434_v1 = vmul.f32 1.442695, %v9387_v51 }
0x18a0   : > { %v9329_v63 = vpop.xlane.xlu1 %9328 }
0x18a1   : > { %v9436_v0 = vmul.f32 1.442695, %v9388_v14  ;;  %v9389_v42 = vsub.f32 %v22731_v57, %v9329_v63 }
0x18a2   : > { %v9332_v49 = vpop.xlane.xlu0 %9331 }
0x18a3   : > { %19861 = vpow2.f32 %v9436_v0  ;;  %v9390_v19 = vsub.f32 %v22737_v61, %v9332_v49  ;;  %v9438_v50 = vmul.f32 1.442695, %v9389_v42 }
0x18a4   : > { %v9335_v8 = vpop.xlane.xlu1 %9334  ;;  %19863 = vpow2.f32 %v9434_v1 }
0x18a5   : > { %v9440_v24 = vmul.f32 1.442695, %v9390_v19  ;;  %v9391_v28 = vsub.f32 %v22743_v43, %v9335_v8 }
0x18a6   : > { %v9338_v13 = vpop.xlane.xlu0 %9337 }
0x18a7   : > { %19865 = vpow2.f32 %v9440_v24  ;;  %v9392_v5 = vsub.f32 %v22748_v33, %v9338_v13  ;;  %v9442_v14 = vmul.f32 1.442695, %v9391_v28 }
0x18a8   : > { %v9341_v45 = vpop.xlane.xlu1 %9340  ;;  %19867 = vpow2.f32 %v9438_v50 }
0x18a9   : > { %v9444_v51 = vmul.f32 1.442695, %v9392_v5  ;;  %v9393_v57 = vsub.f32 %v22753_v29, %v9341_v45 }
0x18aa   : > { %v9344_v4 = vpop.xlane.xlu0 %9343 }
0x18ab   : > { %19869 = vpow2.f32 %v9444_v51  ;;  %v9446_v43 = vmul.f32 1.442695, %v9393_v57  ;;  %v9394_v29 = vsub.f32 %v22758_v39, %v9344_v4 }
0x18ac   : > { %v9347_v63 = vpop.xlane.xlu1 %9346  ;;  %19871 = vpow2.f32 %v9442_v14 }
0x18ad   : > { %v22901_v0 = vpop.eup %19861  ;;  %v9395_v61 = vsub.f32 %v22763_v34, %v9347_v63  ;;  %v9448_v51 = vmul.f32 1.442695, %v9394_v29 }
0x18ae   : > { %v9350_v1 = vpop.xlane.xlu0 %9349  ;;  %v9516_v24 = vsel %vm1186_vm2, %v22901_v0, 0.0  ;;  %v22906_v13 = vpop.eup %19863 }
0x18af   : > { %v9450_v33 = vmul.f32 1.442695, %v9395_v61  ;;  %9517 = vadd.xlane.f32.xlu1 %v9516_v24  ;;  %v9513_v50 = vsel %vm1186_vm2, %v22906_v13, 0.0  ;;  %v9396_v45 = vsub.f32 %v22769_v30, %v9350_v1 }
0x18b0   : > { %v9353_v42 = vpop.xlane.xlu1 %9352 }
0x18b1   : > { %v22908_v49 = vpop.eup %19865  ;;  %19873 = vpow2.f32 %v9450_v33  ;;  %v9397_v19 = vsub.f32 %v22775_v52, %v9353_v42  ;;  %v9452_v14 = vmul.f32 1.442695, %v9396_v45 }
0x18b2   : > { %v9470_v8 = vpop.xlane.xlu0 %9469  ;;  %v9522_v34 = vsel %vm1186_vm2, %v22908_v49, 0.0  ;;  %v22916_v5 = vpop.eup %19867  ;;  %19875 = vpow2.f32 %v9446_v43 }
0x18b3   : > { %v9454_v28 = vmul.f32 1.442695, %v9397_v19  ;;  %9523 = vadd.xlane.f32.xlu0 %v9522_v34  ;;  %9514 = vadd.xlane.f32.xlu1 %v9513_v50  ;;  %19877 = vrcp.f32 %v9470_v8  ;;  %v9519_v4 = vsel %vm1186_vm2, %v22916_v5, 0.0 }
0x18b4   : > { %v9473_v39 = vpop.xlane.xlu1 %9472 }
0x18b5   : > { %19879 = vpow2.f32 %v9454_v28  ;;  %v22921_v57 = vpop.eup %19869 }
0x18b6   : > { %19881 = vrcp.f32 %v9473_v39  ;;  %v9356_v52 = vpop.xlane.xlu0 %9355  ;;  %v22925_v30 = vpop.eup %19871  ;;  %v9528_v43 = vsel %vm1186_vm2, %v22921_v57, 0.0 }
0x18b7   : > { %9520 = vadd.xlane.f32.xlu1 %v9519_v4  ;;  %19883 = vpow2.f32 %v9448_v51  ;;  %v9398_v61 = vsub.f32 %v22789_v31, %v9356_v52  ;;  %v9525_v28 = vsel %vm1186_vm2, %v22925_v30, 0.0  ;;  %v18891_v51 = vunpack.i.h.bf16 %v22706_v7 }
0x18b8   : > { %v9359_v63 = vpop.xlane.xlu1 %9358  ;;  %19885 = vpow2.f32 %v9452_v14  ;;  %v18890_v52 = vunpack.i.l.bf16 %v22706_v7 }
0x18b9   : > { %v9399_v24 = vsub.f32 %v22795_v10, %v9359_v63  ;;  %v9456_v31 = vmul.f32 1.442695, %v9398_v61 }
0x18ba   : > { %v9362_v1 = vpop.xlane.xlu0 %9361 }
0x18bb   : > { %v22929_v33 = vpop.eup %19873  ;;  %v9458_v42 = vmul.f32 1.442695, %v9399_v24  ;;  %9529 = vadd.xlane.f32.xlu1 %v9528_v43  ;;  %v9400_v10 = vsub.f32 %v22801_v16, %v9362_v1 }
0x18bc   : > { %v22931_v29 = vpop.xlane.xlu1 %9364  ;;  %v9537_v19 = vsel %vm1186_vm2, %v22929_v33, 0.0  ;;  %v22935_v8 = vpop.eup %19875 }
0x18bd   : > { %19887 = vpow2.f32 %v9458_v42  ;;  %9538 = vadd.xlane.f32.xlu0 %v9537_v19  ;;  %v19878_v34 = vpop.eup %19877  ;;  %v9460_v61 = vmul.f32 1.442695, %v9400_v10  ;;  %v9531_v1 = vsel %vm1186_vm2, %v22935_v8, 0.0  ;;  %v8510_v19 = vpack.c.bf16 %v18891_v51, %v18890_v52 }
0x18be   : > { %v9476_v50 = vpop.xlane.xlu0 %9475  ;;  %v9596_v16 = vmul.f32 %v19878_v34, %v22781_v44  ;;  %v18896_v51 = vunpack.i.h.bf16 %v22714_v20  ;;  %v18895_v52 = vunpack.i.l.bf16 %v22714_v20 }
0x18bf   : > { %v22940_v45 = vpop.eup %19879  ;;  %9526 = vadd.xlane.f32.xlu1 %v9525_v28  ;;  %19889 = vrcp.f32 %v9476_v50 }
0x18c0   : > { %v19882_v39 = vpop.eup %19881  ;;  %v9479_v4 = vpop.xlane.xlu1 %9478  ;;  %v9543_v14 = vsel %vm1186_vm2, %v22940_v45, 0.0  ;;  %19891 = vpow2.f32 %v9456_v31 }
0x18c1   : > { %v9597_v63 = vmul.f32 %v19882_v39, %v22785_v12  ;;  %9544 = vadd.xlane.f32.xlu0 %v9543_v14  ;;  %19893 = vrcp.f32 %v9479_v4  ;;  %v22950_v43 = vpop.eup %19883 }
0x18c2   : > { %v9368_v24 = vpop.xlane.xlu0 %9367  ;;  %19895 = vpow2.f32 %v9460_v61  ;;  %v22954_v44 = vpop.eup %19885  ;;  %v9534_v12 = vsel %vm1186_vm2, %v22950_v43, 0.0 }
0x18c3   : > { %v9402_v7 = vsub.f32 %v22821_v25, %v9368_v24  ;;  %9532 = vadd.xlane.f32.xlu1 %v9531_v1  ;;  %v9628_v42 = vpack.c.bf16 %v9597_v63, %v9596_v16  ;;  %v9540_v34 = vsel %vm1186_vm2, %v22954_v44, 0.0  ;;  %v8511_v24 = vpack.c.bf16 %v18896_v51, %v18895_v52 }
0x18c4   : > { %v18900_v52 = vunpack.i.l.bf16 %v22712_v18 }
0x18c5   : > { %v9464_v50 = vmul.f32 1.442695, %v9402_v7  ;;  %17670 = vmatmul.mubr.msk.bf16.vlgmr.msra.gmra.mrb[188].mxu1 %vm1186_vm2, %v9628_v42  ;;  %v9371_v7 = vpop.xlane.xlu1 %9370 }
0x18c6   : > { %17680 = vmatpush3.bf16.msra.mxu1 %v8510_v19  ;;  %17681 = vmatprep.mubr.msk.bf16.mxu1 %vm20189_vm1, %v24496_v56  ;;  %v9403_v19 = vsub.f32 %v22827_v53, %v9371_v7  ;;  %v18905_v7 = vunpack.i.l.bf16 %v22718_v46 }
0x18c7   : > { %v22960_v31 = vpop.eup %19887  ;;  %9535 = vadd.xlane.f32.xlu1 %v9534_v12  ;;  %17691 = vmatprep.subr.bf16.mxu1 %v24496_v56  ;;  %19897 = vpow2.f32 %v9464_v50 }
0x18c8   : > { %v9549_v25 = vsel %vm1186_vm2, %v22960_v31, 0.0  ;;  %v9466_v50 = vmul.f32 1.442695, %v9403_v19 }
0x18c9   : > { %9550 = vadd.xlane.f32.xlu0 %v9549_v25  ;;  %v19890_v10 = vpop.eup %19889 }
0x18ca   : > { %v22967_v28 = vpop.eup %19891  ;;  %v9598_v4 = vmul.f32 %v19890_v10, %v22813_v32 }
0x18cb   : > { %9541 = vadd.xlane.f32.xlu1 %v9540_v34  ;;  %v19894_v39 = vpop.eup %19893  ;;  %v9546_v16 = vsel %vm1186_vm2, %v22967_v28, 0.0 }
0x18cc   : > { %v9599_v14 = vmul.f32 %v19894_v39, %v22817_v27  ;;  %v22975_v63 = vpop.eup %19895  ;;  %v9401_v27 = vsub.f32 %v22807_v48, %v22931_v29 }
0x18cd   : > { %v9552_v1 = vsel %vm1186_vm2, %v22975_v63, 0.0 }
0x18ce   : > { %v9629_v61 = vpack.c.bf16 %v9599_v14, %v9598_v4  ;;  %v9462_v42 = vmul.f32 1.442695, %v9401_v27  ;;  %v18906_v27 = vunpack.i.h.bf16 %v22718_v46 }
0x18cf   : > { %9547 = vadd.xlane.f32.xlu1 %v9546_v16 }
0x18d0   : > { %17676 = vmatmul.mubr.msk.bf16.vlgmr.msra.gmra.mrb[224].mxu0 %vm1186_vm2, %v9629_v61  ;;  %19899 = vpow2.f32 %v9462_v42 }
0x18d1   : > { %17686 = vmatpush3.bf16.msra.mxu0 %v8511_v24  ;;  %17687 = vmatprep.mubr.msk.bf16.mxu0 %vm20189_vm1, %v24496_v56  ;;  %v22982_v20 = vpop.eup %19897 }
0x18d2   : > { %17697 = vmatprep.subr.bf16.mxu0 %v24496_v56  ;;  %v9558_v32 = vsel %vm1186_vm2, %v22982_v20, 0.0 }
0x18d3   : > { %9553 = vadd.xlane.f32.xlu1 %v9552_v1 }
0x18d7   : > { %9559 = vadd.xlane.f32.xlu1 %v9558_v32 }
0x18da   : > { %v23000_v10 = vpop.eup %19899 }
0x18db   : > { %v9555_v16 = vsel %vm1186_vm2, %v23000_v10, 0.0 }
0x18df   : > { %18933 = vrot.lane.b32.xlu0 %v22482_v17, %s24493_s26 }
0x18e8   : > { %18938 = vrot.lane.b32.xlu1 %v22488_v59, %s24494_s28 }
0x18ec   : > { %18943 = vrot.lane.b32.xlu1 %v22482_v17, %s24494_s28 }
0x18ef   : > { %v9482_v12 = vpop.xlane.xlu0 %9481 }
0x18f0   : > { %19901 = vrcp.f32 %v9482_v12  ;;  %18948 = vrot.lane.b32.xlu1 %v22488_v59, %s24495_s17  ;;  %v18901_v59 = vunpack.i.h.bf16 %v22712_v18  ;;  %v8513_v12 = vpack.c.bf16 %v18906_v27, %v18905_v7 }
0x18f1   : > { %v9485_v25 = vpop.xlane.xlu1 %9484 }
0x18f2   : > { %19903 = vrcp.f32 %v9485_v25  ;;  %v8512_v32 = vpack.c.bf16 %v18901_v59, %v18900_v52  ;;  %v18915_v59 = vunpack.i.l.bf16 %v22720_v22 }
0x18f3   : > { %19905 = vpow2.f32 %v9466_v50  ;;  %v9488_v48 = vpop.xlane.xlu0 %9487 }
0x18f4   : > { %19907 = vrcp.f32 %v9488_v48  ;;  %18953 = vrot.lane.b32.xlu1 %v22482_v17, %s24495_s17 }
0x18f5   : > { %v9491_v29 = vpop.xlane.xlu1 %9490 }
0x18f6   : > { %19909 = vrcp.f32 %v9491_v29 }
0x18f7   : > { %v9494_v53 = vpop.xlane.xlu0 %9493 }
0x18f8   : > { %19911 = vrcp.f32 %v9494_v53 }
0x18f9   : > { %v9497_v34 = vpop.xlane.xlu1 %9496 }
0x18fa   : > { %v19902_v39 = vpop.eup %19901  ;;  %19913 = vrcp.f32 %v9497_v34 }
0x18fb   : > { %v9600_v14 = vmul.f32 %v19902_v39, %v22841_v54 }
0x18fc   : > { %v19904_v51 = vpop.eup %19903 }
0x18fd   : > { %v23004_v4 = vpop.eup %19905  ;;  %v9601_v17 = vmul.f32 %v19904_v51, %v22845_v26  ;;  %v18916_v51 = vunpack.i.h.bf16 %v22720_v22 }
0x18fe   : > { %v19908_v61 = vpop.eup %19907  ;;  %9556 = vadd.xlane.f32.xlu0 %v9555_v16  ;;  %v9561_v54 = vsel %vm1186_vm2, %v23004_v4, 0.0 }
0x18ff   : > { %v9630_v24 = vpack.c.bf16 %v9601_v17, %v9600_v14  ;;  %v9602_v18 = vmul.f32 %v19908_v61, %v22850_v62  ;;  %v18911_v62 = vunpack.i.h.bf16 %v22716_v6  ;;  %v9500_v25 = vpop.xlane.xlu0 %9499  ;;  %v18921_v61 = vunpack.i.h.bf16 %v22722_v47 }
0x1900   : > { %v19910_v1 = vpop.eup %19909  ;;  %19915 = vrcp.f32 %v9500_v25 }
0x1901   : > { %v9603_v42 = vmul.f32 %v19910_v1, %v22855_v15  ;;  %17682 = vmatmul.mubr.msk.bf16.vlgmr.msra.gmra.mrb[192].mxu1 %vm1186_vm2, %v9630_v24  ;;  %v18910_v15 = vunpack.i.l.bf16 %v22716_v6  ;;  %v18920_v24 = vunpack.i.l.bf16 %v22722_v47 }
0x1902   : > { %v19912_v26 = vpop.eup %19911  ;;  %17692 = vmatpush3.bf16.msra.mxu1 %v8512_v32  ;;  %9562 = vadd.xlane.f32.xlu0 %v9561_v54  ;;  %v8515_v32 = vpack.c.bf16 %v18916_v51, %v18915_v59 }
0x1903   : > { %v9506_v19 = vpop.xlane.xlu1 %9505  ;;  %v9631_v50 = vpack.c.bf16 %v9603_v42, %v9602_v18  ;;  %17693 = vmatprep.mubr.msk.bf16.mxu1 %vm20189_vm1, %v24496_v56  ;;  %17703 = vmatprep.subr.bf16.mxu1 %v24496_v56  ;;  %v9604_v48 = vmul.f32 %v19912_v26, %v22860_v41  ;;  %v8514_v39 = vpack.c.bf16 %v18911_v62, %v18910_v15 }
0x1904   : > { %v19914_v46 = vpop.eup %19913 }
0x1905   : > { %v9605_v29 = vmul.f32 %v19914_v46, %v22865_v37  ;;  %17688 = vmatmul.mubr.msk.bf16.vlgmr.msra.gmra.mrb[228].mxu0 %vm1186_vm2, %v9631_v50  ;;  %v18925_v50 = vunpack.i.l.bf16 %v22892_v21 }
0x1906   : > { %17698 = vmatpush3.bf16.msra.mxu0 %v8513_v12  ;;  %17699 = vmatprep.mubr.msk.bf16.mxu0 %vm20189_vm1, %v24496_v56 }
0x1907   : > { %v9503_v53 = vpop.xlane.xlu1 %9502  ;;  %v9632_v34 = vpack.c.bf16 %v9605_v29, %v9604_v48  ;;  %17709 = vmatprep.subr.bf16.mxu0 %v24496_v56  ;;  %v18931_v29 = vunpack.i.h.bf16 %v22890_v58 }
0x1908   : > { %19917 = vrcp.f32 %v9503_v53  ;;  %v18930_v53 = vunpack.i.l.bf16 %v22890_v58 }
0x1909   : > { %17694 = vmatmul.mubr.msk.bf16.vlgmr.msra.gmra.mrb[196].mxu1 %vm1186_vm2, %v9632_v34  ;;  %19919 = vrcp.f32 %v9506_v19  ;;  %v18926_v19 = vunpack.i.h.bf16 %v22892_v21 }
0x190a   : > { %17704 = vmatpush3.bf16.msra.mxu1 %v8514_v39  ;;  %17705 = vmatprep.mubr.msk.bf16.mxu1 %vm20189_vm1, %v24496_v56  ;;  %v19916_v41 = vpop.eup %19915 }
0x190b   : > { %v9509_v6 = vpop.xlane.xlu1 %9508  ;;  %17715 = vmatprep.subr.bf16.mxu1 %v24496_v56  ;;  %v9606_v14 = vmul.f32 %v19916_v41, %v22870_v9  ;;  %v8516_v9 = vpack.c.bf16 %v18921_v61, %v18920_v24  ;;  %v8517_v39 = vpack.c.bf16 %v18926_v19, %v18925_v50 }
0x190c   : > { %19921 = vrcp.f32 %v9509_v6 }
0x1912   : > { %v19918_v37 = vpop.eup %19917 }
0x1913   : > { %v19920_v52 = vpop.eup %19919  ;;  %v9607_v17 = vmul.f32 %v19918_v37, %v22878_v3  ;;  %v8518_v37 = vpack.c.bf16 %v18931_v29, %v18930_v53 }
0x1914   : > { %v9608_v27 = vmul.f32 %v19920_v52, %v22874_v2  ;;  %v9512_v2 = vpop.xlane.xlu0 %9511 }
0x1915   : > { %v9633_v1 = vpack.c.bf16 %v9607_v17, %v9606_v14  ;;  %19923 = vrcp.f32 %v9512_v2 }
0x1916   : > { %v19922_v16 = vpop.eup %19921 }
0x1917   : > { %v9609_v7 = vmul.f32 %v19922_v16, %v22886_v55  ;;  %17700 = vmatmul.mubr.msk.bf16.vlgmr.msra.gmra.mrb[232].mxu0 %vm1186_vm2, %v9633_v1 }
0x1918   : > { %17710 = vmatpush3.bf16.msra.mxu0 %v8515_v32  ;;  %17711 = vmatprep.mubr.msk.bf16.mxu0 %vm20189_vm1, %v24496_v56 }
0x1919   : > { %v9634_v22 = vpack.c.bf16 %v9609_v7, %v9608_v27  ;;  %17721 = vmatprep.subr.bf16.mxu0 %v24496_v56 }
0x191b   : > { %17706 = vmatmul.mubr.msk.bf16.vlgmr.msra.gmra.mrb[200].mxu1 %vm1186_vm2, %v9634_v22 }
0x191c   : > { %17716 = vmatpush3.bf16.msra.mxu1 %v8516_v9  ;;  %17717 = vmatprep.mubr.msk.bf16.mxu1 %vm20189_vm1, %v24496_v56 }
0x191d   : > { %17727 = vmatprep.subr.bf16.mxu1 %v24496_v56 }
0x191f   : > { %v19924_v54 = vpop.eup %19923 }
0x1920   : > { %v9610_v12 = vmul.f32 %v19924_v54, %v22880_v35 }
0x193c   : > { %v9518_v47 = vpop.xlane.xlu1 %9517 }
0x1940   : > { %v9515_v3 = vpop.xlane.xlu1 %9514  ;;  %v9524_v18 = vpop.xlane.xlu0 %9523 }
0x1941   : > { %19925 = vrcp.f32 %v9515_v3 }
0x1942   : > { %19927 = vrcp.f32 %v9518_v47 }
0x1944   : > { %v9521_v55 = vpop.xlane.xlu1 %9520 }
0x1945   : > { %19929 = vrcp.f32 %v9521_v55 }
0x1946   : > { %19931 = vrcp.f32 %v9524_v18 }
0x1948   : > { %v9530_v42 = vpop.xlane.xlu1 %9529 }
0x194a   : > { %v9539_v46 = vpop.xlane.xlu0 %9538 }
0x194b   : > { %v19926_v26 = vpop.eup %19925 }
0x194c   : > { %v9527_v62 = vpop.xlane.xlu1 %9526  ;;  %v19928_v15 = vpop.eup %19927  ;;  %v9611_v25 = vmul.f32 %v19926_v26, %v22906_v13 }
0x194d   : > { %19933 = vrcp.f32 %v9527_v62  ;;  %v9612_v6 = vmul.f32 %v19928_v15, %v22901_v0 }
0x194e   : > { %19935 = vrcp.f32 %v9530_v42  ;;  %v9635_v34 = vpack.c.bf16 %v9611_v25, %v9610_v12  ;;  %v9545_v35 = vpop.xlane.xlu0 %9544 }
0x194f   : > { %v19930_v48 = vpop.eup %19929 }
0x1950   : > { %v9613_v21 = vmul.f32 %v19930_v48, %v22916_v5  ;;  %v9533_v41 = vpop.xlane.xlu1 %9532  ;;  %17712 = vmatmul.mubr.msk.bf16.vlgmr.msra.gmra.mrb[236].mxu0 %vm1186_vm2, %v9635_v34  ;;  %v19932_v0 = vpop.eup %19931 }
0x1951   : > { %19937 = vrcp.f32 %v9533_v41  ;;  %17722 = vmatpush3.bf16.msra.mxu0 %v8517_v39  ;;  %17723 = vmatprep.mubr.msk.bf16.mxu0 %vm20189_vm1, %v24496_v56  ;;  %v9614_v59 = vmul.f32 %v19932_v0, %v22908_v49 }
0x1952   : > { %v9636_v13 = vpack.c.bf16 %v9613_v21, %v9612_v6  ;;  %19939 = vrcp.f32 %v9539_v46  ;;  %17733 = vmatprep.subr.bf16.mxu0 %v24496_v56 }
0x1954   : > { %17718 = vmatmul.mubr.msk.bf16.vlgmr.msra.gmra.mrb[204].mxu1 %vm1186_vm2, %v9636_v13  ;;  %v9536_v58 = vpop.xlane.xlu1 %9535 }
0x1955   : > { %17728 = vmatpush3.bf16.msra.mxu1 %v8518_v37  ;;  %19941 = vrcp.f32 %v9536_v58  ;;  %17729 = vmatprep.mubr.msk.bf16.mxu1 %vm20189_vm1, %v24496_v56 }
0x1956   : > { %v9551_v5 = vpop.xlane.xlu0 %9550  ;;  %17739 = vmatprep.subr.bf16.mxu1 %v24496_v56 }
0x1957   : > { %v19934_v51 = vpop.eup %19933 }
0x1958   : > { %v9615_v52 = vmul.f32 %v19934_v51, %v22925_v30  ;;  %v9542_v14 = vpop.xlane.xlu1 %9541  ;;  %v19936_v17 = vpop.eup %19935 }
0x1959   : > { %v9616_v27 = vmul.f32 %v19936_v17, %v22921_v57  ;;  %19943 = vrcp.f32 %v9542_v14 }
0x195a   : > { %v18934_v16 = vpop.permute.xlu0 %18933  ;;  %v9637_v61 = vpack.c.bf16 %v9615_v52, %v9614_v59  ;;  %19945 = vrcp.f32 %v9545_v35 }
0x195b   : > { %v19938_v24 = vpop.eup %19937  ;;  %v18936_v1 = vunpack.i.h.bf16 %v18934_v16  ;;  %v18935_v32 = vunpack.i.l.bf16 %v18934_v16 }
0x195c   : > { %v9617_v7 = vmul.f32 %v19938_v24, %v22935_v8  ;;  %17724 = vmatmul.mubr.msk.bf16.vlgmr.msra.gmra.mrb[240].mxu0 %vm1186_vm2, %v9637_v61  ;;  %v9548_v22 = vpop.xlane.xlu1 %9547  ;;  %v19940_v9 = vpop.eup %19939  ;;  %v19380_v61 = vld [vmem:[%s24416_s4 + $0x88] sm:$0xff]  }
0x195d   : > { %v8519_v47 = vpack.c.bf16 %v18936_v1, %v18935_v32  ;;  %17735 = vmatprep.mubr.msk.bf16.mxu0 %vm20189_vm1, %v24496_v56  ;;  %v9619_v2 = vmul.f32 %v19940_v9, %v22929_v33  ;;  %19947 = vrcp.f32 %v9548_v22 }
0x195e   : > { %v9638_v49 = vpack.c.bf16 %v9617_v7, %v9616_v27  ;;  %19949 = vrcp.f32 %v9551_v5 }
0x195f   : > { %v19942_v30 = vpop.eup %19941  ;;  %17734 = vmatpush3.bf16.msra.mxu0 %v8519_v47 }
0x1960   : > { %v9618_v3 = vmul.f32 %v19942_v30, %v22950_v43  ;;  %17730 = vmatmul.mubr.msk.bf16.vlgmr.msra.gmra.mrb[208].mxu1 %vm1186_vm2, %v9638_v49  ;;  %v9554_v57 = vpop.xlane.xlu1 %9553  ;;  %17745 = vmatprep.subr.bf16.mxu0 %v24496_v56 }
0x1961   : > { %17741 = vmatprep.mubr.msk.bf16.mxu1 %vm20189_vm1, %v24496_v56  ;;  %19951 = vrcp.f32 %v9554_v57 }
0x1962   : > { %v9639_v8 = vpack.c.bf16 %v9619_v2, %v9618_v3 }
0x1963   : > { %v19944_v33 = vpop.eup %19943 }
0x1964   : > { %17736 = vmatmul.mubr.msk.bf16.vlgmr.msra.gmra.mrb[244].mxu0 %vm1186_vm2, %v9639_v8  ;;  %v9560_v55 = vpop.xlane.xlu1 %9559  ;;  %v19946_v43 = vpop.eup %19945  ;;  %v9620_v26 = vmul.f32 %v19944_v33, %v22954_v44 }
0x1965   : > { %17747 = vmatprep.mubr.msk.bf16.mxu0 %vm20189_vm1, %v24496_v56  ;;  %v9621_v46 = vmul.f32 %v19946_v43, %v22940_v45 }
0x1967   : > { %v19948_v19 = vpop.eup %19947  ;;  %v9640_v29 = vpack.c.bf16 %v9621_v46, %v9620_v26 }
0x1968   : > { %v18939_v18 = vpop.permute.xlu1 %18938  ;;  %v19950_v15 = vpop.eup %19949  ;;  %v9622_v48 = vmul.f32 %v19948_v19, %v22967_v28  ;;  %v19379_v28 = vld [vmem:[%s24416_s4 + $0x80] sm:$0xff]  }
0x1969   : > { %v18941_v42 = vunpack.i.h.bf16 %v18939_v18  ;;  %v18940_v54 = vunpack.i.l.bf16 %v18939_v18  ;;  %v9623_v34 = vmul.f32 %v19950_v15, %v22960_v31 }
0x196b   : > { %v8520_v50 = vpack.c.bf16 %v18941_v42, %v18940_v54  ;;  %v9641_v45 = vpack.c.bf16 %v9623_v34, %v9622_v48  ;;  %v19952_v0 = vpop.eup %19951  ;;  %v19382_v54 = vld [vmem:[%s24416_s4 + $0x98] sm:$0xff]   ;;  %v19383_v34 = vld [vmem:[%s24416_s4 + $0xa0] sm:$0xff]  }
0x196c   : > { %v18944_v62 = vpop.permute.xlu1 %18943  ;;  %v9624_v51 = vmul.f32 %v19952_v0, %v22975_v63 }
0x196d   : > { %v18946_v12 = vunpack.i.h.bf16 %v18944_v62  ;;  %v18945_v25 = vunpack.i.l.bf16 %v18944_v62  ;;  %17740 = vmatpush3.bf16.msra.mxu1 %v8520_v50 }
0x196e   : > { %17751 = vmatprep.subr.bf16.mxu1 %v24496_v56 }
0x196f   : > { %v8521_v53 = vpack.c.bf16 %v18946_v12, %v18945_v25 }
0x1970   : > { %v18949_v39 = vpop.permute.xlu1 %18948  ;;  %17742 = vmatmul.mubr.msk.bf16.vlgmr.msra.gmra.mrb[212].mxu1 %vm1186_vm2, %v9640_v29 }
0x1971   : > { %v18951_v44 = vunpack.i.h.bf16 %v18949_v39  ;;  %v18950_v6 = vunpack.i.l.bf16 %v18949_v39  ;;  %17746 = vmatpush3.bf16.msra.mxu0 %v8521_v53  ;;  %17753 = vmatprep.mubr.msk.bf16.mxu1 %vm20189_vm1, %v24496_v56 }
0x1972   : > { %17757 = vmatprep.subr.bf16.mxu0 %v24496_v56 }
0x1973   : > { %v8522_v21 = vpack.c.bf16 %v18951_v44, %v18950_v6 }
0x1974   : > { %v18954_v41 = vpop.permute.xlu1 %18953  ;;  %17748 = vmatmul.mubr.msk.bf16.vlgmr.msra.gmra.mrb[248].mxu0 %vm1186_vm2, %v9641_v45 }
0x1975   : > { %v18956_v31 = vunpack.i.h.bf16 %v18954_v41  ;;  %v18955_v35 = vunpack.i.l.bf16 %v18954_v41  ;;  %17752 = vmatpush3.bf16.msra.mxu1 %v8522_v21  ;;  %17759 = vmatprep.mubr.msk.bf16.mxu0 %vm20189_vm1, %v24496_v56 }
0x1976   : > { %17763 = vmatprep.subr.bf16.mxu1 %v19379_v28 }
0x1977   : > { %v8523_v13 = vpack.c.bf16 %v18956_v31, %v18955_v35 }
0x1979   : > { %17758 = vmatpush3.bf16.msra.mxu0 %v8523_v13 }
0x198b   : > { %v9557_v37 = vpop.xlane.xlu0 %9556 }
0x198c   : > { %19953 = vrcp.f32 %v9557_v37  ;;  %v19384_v37 = vld [vmem:[%s24416_s4 + $0xa8] sm:$0xff]  }
0x198d   : > { %19955 = vrcp.f32 %v9560_v55 }
0x198f   : > { %v9563_v58 = vpop.xlane.xlu0 %9562 }
0x1990   : > { %19957 = vrcp.f32 %v9563_v58 }
0x1996   : > { %v19954_v5 = vpop.eup %19953 }
0x1997   : > { %v9625_v59 = vmul.f32 %v19954_v5, %v23000_v10  ;;  %v19956_v52 = vpop.eup %19955 }
0x1998   : > { %v9681_v14 = vpop.f32.mrb[188].mxu1  ;;  %v9626_v32 = vmul.f32 %v19956_v52, %v22982_v20 }
0x1999   : > { %v17671_v17 = vpop.f32.mrb[189].mxu1  ;;  %v9642_v16 = vpack.c.bf16 %v9625_v59, %v9624_v51 }
0x199a   : > { %v19958_v24 = vpop.eup %19957  ;;  %v9684_v1 = vpop.f32.mrb[190].mxu1 }
0x199b   : > { %v9627_v27 = vmul.f32 %v19958_v24, %v23004_v4  ;;  %v10348_v7 = vpack.c.bf16 %v9684_v1, %v9681_v14  ;;  %v17672_v22 = vpop.f32.mrb[191].mxu1  ;;  %17754 = vmatmul.mubr.msk.bf16.vlgmr.msra.gmra.mrb[216].mxu1 %vm1186_vm2, %v9642_v16  ;;  %v19381_v4 = vld [vmem:[%s24416_s4 + $0x90] sm:$0xff]  }
0x199c   : > { %17764 = vmatpush3.bf16.msra.mxu1 %v19379_v28  ;;  %v19385_v24 = vld [vmem:[%s24416_s4 + $0xb0] sm:$0xff]  }
0x199d   : > { %17765 = vmatprep.mubr.msk.bf16.mxu1 %vm1186_vm2, %v10348_v7  ;;  %v9643_v63 = vpack.c.bf16 %v9627_v27, %v9626_v32  ;;  %17769 = vmatprep.subr.bf16.mxu1 %v19380_v61 }
0x199f   : > { %17760 = vmatmul.mubr.msk.bf16.vlgmr.msra.gmra.mrb[252].mxu0 %vm1186_vm2, %v9643_v63 }
0x19a0   : > { %11198 = vmatprep.mubr.bf16.mxu0 %v24497_v36 }
0x19a3   : > { %v9725_v10 = vpop.f32.mrb[224].mxu0 }
0x19a4   : > { %v17677_v9 = vpop.f32.mrb[225].mxu0 }
0x19a5   : > { %v9728_v47 = vpop.f32.mrb[226].mxu0 }
0x19a6   : > { %v10349_v49 = vpack.c.bf16 %v9728_v47, %v9725_v10  ;;  %v17678_v20 = vpop.f32.mrb[227].mxu0 }
0x19a8   : > { %17766 = vmatmul.mubr.msk.bf16.vlgmr.msra.gmra.mrb[220].mxu1 %vm1186_vm2, %v10349_v49  ;;  %v19386_v49 = vld [vmem:[%s24416_s4 + $0xb8] sm:$0xff]  }
0x19a9   : > { %17770 = vmatpush3.bf16.msra.mxu1 %v19380_v61 }
0x19aa   : > { %17775 = vmatprep.subr.bf16.mxu1 %v19381_v4 }
0x19d4   : > { %v9769_v30 = vpop.f32.mrb[192].mxu1 }
0x19d5   : > { %v17683_v2 = vpop.f32.mrb[193].mxu1 }
0x19d6   : > { %v9772_v3 = vpop.f32.mrb[194].mxu1 }
0x19d7   : > { %v10350_v57 = vpack.c.bf16 %v9772_v3, %v9769_v30  ;;  %v17684_v8 = vpop.f32.mrb[195].mxu1 }
0x19d8   : > { %v9813_v55 = vpop.f32.mrb[228].mxu0 }
0x19d9   : > { %v17689_v33 = vpop.f32.mrb[229].mxu0  ;;  %17771 = vmatprep.mubr.msk.bf16.mxu1 %vm1186_vm2, %v10350_v57 }
0x19da   : > { %v9816_v18 = vpop.f32.mrb[230].mxu0 }
0x19db   : > { %v10351_v43 = vpack.c.bf16 %v9816_v18, %v9813_v55  ;;  %v17690_v42 = vpop.f32.mrb[231].mxu0 }
0x19dc   : > { %v9857_v26 = vpop.f32.mrb[196].mxu1 }
0x19dd   : > { %v17695_v19 = vpop.f32.mrb[197].mxu1  ;;  %17772 = vmatmul.mubr.msk.bf16.vlgmr.msra.gmra.mrb[220].mxu1 %vm1186_vm2, %v10351_v43 }
0x19de   : > { %v9860_v50 = vpop.f32.mrb[198].mxu1  ;;  %17776 = vmatpush3.bf16.msra.mxu1 %v19381_v4 }
0x19df   : > { %v10352_v46 = vpack.c.bf16 %v9860_v50, %v9857_v26  ;;  %v17696_v62 = vpop.f32.mrb[199].mxu1  ;;  %17781 = vmatprep.subr.bf16.mxu1 %v19382_v54 }
0x19e1   : > { %17777 = vmatprep.mubr.msk.bf16.mxu1 %vm1186_vm2, %v10352_v46 }
0x19ea   : > { %v9901_v15 = vpop.f32.mrb[232].mxu0 }
0x19eb   : > { %v17701_v12 = vpop.f32.mrb[233].mxu0 }
0x19ec   : > { %v9904_v25 = vpop.f32.mrb[234].mxu0 }
0x19ed   : > { %v10353_v48 = vpack.c.bf16 %v9904_v25, %v9901_v15  ;;  %v17702_v29 = vpop.f32.mrb[235].mxu0  ;;  %v15994_v25 = vld [vmem:[%s24417_s5 + $0x2] ss:$0 sm:$0xff] }
0x19ee   : > { %v9945_v53 = vpop.f32.mrb[200].mxu1 }
0x19ef   : > { %v17707_v39 = vpop.f32.mrb[201].mxu1  ;;  %17778 = vmatmul.mubr.msk.bf16.vlgmr.msra.gmra.mrb[220].mxu1 %vm1186_vm2, %v10353_v48 }
0x19f0   : > { %v9948_v44 = vpop.f32.mrb[202].mxu1  ;;  %17782 = vmatpush3.bf16.msra.mxu1 %v19382_v54 }
0x19f1   : > { %v10354_v6 = vpack.c.bf16 %v9948_v44, %v9945_v53  ;;  %v17708_v45 = vpop.f32.mrb[203].mxu1  ;;  %17787 = vmatprep.subr.bf16.mxu1 %v19383_v34 }
0x19f3   : > { %17783 = vmatprep.mubr.msk.bf16.mxu1 %vm1186_vm2, %v10354_v6 }
0x1a23   : > { %v9989_v28 = vpop.f32.mrb[236].mxu0 }
0x1a24   : > { %v17713_v21 = vpop.f32.mrb[237].mxu0 }
0x1a25   : > { %v9992_v41 = vpop.f32.mrb[238].mxu0 }
0x1a26   : > { %v10355_v31 = vpack.c.bf16 %v9992_v41, %v9989_v28  ;;  %v17714_v35 = vpop.f32.mrb[239].mxu0 }
0x1a27   : > { %v10033_v13 = vpop.f32.mrb[204].mxu1 }
0x1a28   : > { %v17719_v58 = vpop.f32.mrb[205].mxu1  ;;  %17784 = vmatmul.mubr.msk.bf16.vlgmr.msra.gmra.mrb[220].mxu1 %vm1186_vm2, %v10355_v31 }
0x1a29   : > { %v10036_v0 = vpop.f32.mrb[206].mxu1  ;;  %17788 = vmatpush3.bf16.msra.mxu1 %v19383_v34 }
0x1a2a   : > { %v10356_v5 = vpack.c.bf16 %v10036_v0, %v10033_v13  ;;  %v17720_v51 = vpop.f32.mrb[207].mxu1  ;;  %17793 = vmatprep.subr.bf16.mxu1 %v19384_v37 }
0x1a2c   : > { %17789 = vmatprep.mubr.msk.bf16.mxu1 %vm1186_vm2, %v10356_v5 }
0x1a2f   : > { %v10077_v59 = vpop.f32.mrb[240].mxu0 }
0x1a30   : > { %v17725_v52 = vpop.f32.mrb[241].mxu0 }
0x1a31   : > { %v10080_v14 = vpop.f32.mrb[242].mxu0 }
0x1a32   : > { %v10357_v17 = vpack.c.bf16 %v10080_v14, %v10077_v59  ;;  %v17726_v16 = vpop.f32.mrb[243].mxu0 }
0x1a33   : > { %v10121_v61 = vpop.f32.mrb[208].mxu1 }
0x1a34   : > { %v17731_v1 = vpop.f32.mrb[209].mxu1  ;;  %17790 = vmatmul.mubr.msk.bf16.vlgmr.msra.gmra.mrb[220].mxu1 %vm1186_vm2, %v10357_v17 }
0x1a35   : > { %v10124_v32 = vpop.f32.mrb[210].mxu1  ;;  %17794 = vmatpush3.bf16.msra.mxu1 %v19384_v37 }
0x1a36   : > { %v10358_v27 = vpack.c.bf16 %v10124_v32, %v10121_v61  ;;  %v17732_v7 = vpop.f32.mrb[211].mxu1  ;;  %17799 = vmatprep.subr.bf16.mxu1 %v19385_v24 }
0x1a37   : > { %v10165_v22 = vpop.f32.mrb[244].mxu0 }
0x1a38   : > { %v17737_v63 = vpop.f32.mrb[245].mxu0  ;;  %17795 = vmatprep.mubr.msk.bf16.mxu1 %vm1186_vm2, %v10358_v27 }
0x1a39   : > { %v10168_v10 = vpop.f32.mrb[246].mxu0 }
0x1a3a   : > { %v10359_v9 = vpack.c.bf16 %v10168_v10, %v10165_v22  ;;  %v17738_v47 = vpop.f32.mrb[247].mxu0  ;;  %v19395_v10 = vld [vmem:[%s24420_s8 + $0x1b4] ss:$12 sps:$4 sm:$0xff]  }
0x1a3b   : > { %v19398_v47 = vld [vmem:[%s24420_s8 + $0x1cc] ss:$12 sps:$4 sm:$0xff]  }
0x1a40   : > { %17796 = vmatmul.mubr.msk.bf16.vlgmr.msra.gmra.mrb[220].mxu1 %vm1186_vm2, %v10359_v9  ;;  %v19393_v9 = vld [vmem:[%s24420_s8 + $0x1b0] ss:$12 sps:$4 sm:$0xff]  }
0x1a41   : > { %17800 = vmatpush3.bf16.msra.mxu1 %v19385_v24 }
0x1a42   : > { %17805 = vmatprep.subr.bf16.mxu1 %v19386_v49 }
0x1a43   : > { %v10209_v20 = vpop.f32.mrb[212].mxu1 }
0x1a44   : > { %v17743_v4 = vpop.f32.mrb[213].mxu1 }
0x1a45   : > { %v10212_v30 = vpop.f32.mrb[214].mxu1  ;;  %v19399_v4 = vld [vmem:[%s24420_s8 + $0x1e0] ss:$12 sps:$4 sm:$0xff]  }
0x1a46   : > { %v10360_v2 = vpack.c.bf16 %v10212_v30, %v10209_v20  ;;  %v17744_v3 = vpop.f32.mrb[215].mxu1  ;;  %v19401_v20 = vld [vmem:[%s24420_s8 + $0x1e4] ss:$12 sps:$4 sm:$0xff]   ;;  %v19404_v30 = vld [vmem:[%s24420_s8 + $0x1fc] ss:$12 sps:$4 sm:$0xff]  }
0x1a47   : > { %v10253_v57 = vpop.f32.mrb[248].mxu0  ;;  %v19407_v3 = vld [vmem:[%s24420_s8 + $0x214] ss:$12 sps:$4 sm:$0xff]  }
0x1a48   : > { %v17749_v8 = vpop.f32.mrb[249].mxu0  ;;  %17801 = vmatprep.mubr.msk.bf16.mxu1 %vm1186_vm2, %v10360_v2  ;;  %v19402_v2 = vld [vmem:[%s24420_s8 + $0x1f8] ss:$12 sps:$4 sm:$0xff]  }
0x1a49   : > { %v10256_v55 = vpop.f32.mrb[250].mxu0  ;;  %v19410_v8 = vld [vmem:[%s24420_s8 + $0x22c] ss:$12 sps:$4 sm:$0xff]  }
0x1a4a   : > { %v10361_v33 = vpack.c.bf16 %v10256_v55, %v10253_v57  ;;  %v17750_v18 = vpop.f32.mrb[251].mxu0  ;;  %v19405_v57 = vld [vmem:[%s24420_s8 + $0x210] ss:$12 sps:$4 sm:$0xff]   ;;  %v19408_v55 = vld [vmem:[%s24420_s8 + $0x228] ss:$12 sps:$4 sm:$0xff]  }
0x1a4b   : > { %v19419_v18 = vld [vmem:[%s24422_s10 + $0x160] sm:$0xff]  }
0x1a4c   : > { %17802 = vmatmul.mubr.msk.bf16.vlgmr.msra.gmra.mrb[220].mxu1 %vm1186_vm2, %v10361_v33  ;;  %v19411_v33 = vld [vmem:[%s24420_s8 + $0x188] ss:$12 sps:$4 sm:$0xff]  }
0x1a4d   : > { %17806 = vmatpush3.bf16.msra.mxu1 %v19386_v49  ;;  %v19396_v49 = vld [vmem:[%s24420_s8 + $0x1c8] ss:$12 sps:$4 sm:$0xff]  }
0x1a4e   : > { %16793 = vmatprep.subr.bf16.mxu1 %v19419_v18  ;;  %v16052_v18 = vld [vmem:[%s24421_s9 + $0x6] sm:$0x7] }
0x1a6e   : > { %v10297_v43 = vpop.f32.mrb[216].mxu1 }
0x1a6f   : > { %v17755_v42 = vpop.f32.mrb[217].mxu1 }
0x1a70   : > { %v10300_v54 = vpop.f32.mrb[218].mxu1  ;;  %v19421_v42 = vld [vmem:[%s24422_s10 + $0x168] sm:$0xff]  }
0x1a71   : > { %v10362_v26 = vpack.c.bf16 %v10300_v54, %v10297_v43  ;;  %v17756_v19 = vpop.f32.mrb[219].mxu1  ;;  %v19420_v43 = vld [vmem:[%s24422_s10 + $0x120] sm:$0xff]   ;;  %v19422_v54 = vld [vmem:[%s24422_s10 + $0x128] sm:$0xff]  }
0x1a72   : > { %v10341_v50 = vpop.f32.mrb[252].mxu0  ;;  %v19424_v19 = vld [vmem:[%s24422_s10 + $0x130] sm:$0xff]  }
0x1a73   : > { %v17761_v46 = vpop.f32.mrb[253].mxu0  ;;  %17807 = vmatprep.mubr.msk.bf16.mxu1 %vm1186_vm2, %v10362_v26  ;;  %v19423_v26 = vld [vmem:[%s24422_s10 + $0x170] sm:$0xff]  }
0x1a74   : > { %v10344_v62 = vpop.f32.mrb[254].mxu0  ;;  %v19426_v46 = vld [vmem:[%s24422_s10 + $0x138] sm:$0xff]  }
0x1a75   : > { %v10363_v15 = vpack.c.bf16 %v10344_v62, %v10341_v50  ;;  %v17762_v12 = vpop.f32.mrb[255].mxu0  ;;  %v19425_v50 = vld [vmem:[%s24422_s10 + $0x178] sm:$0xff]   ;;  %v19427_v62 = vld [vmem:[%s24422_s10 + $0x180] sm:$0xff]  }
0x1a76   : > { %v19429_v12 = vld [vmem:[%s24422_s10 + $0x188] sm:$0xff]  }
0x1a77   : > { %17808 = vmatmul.mubr.msk.bf16.vlgmr.msra.gmra.mrb[220].mxu1 %vm1186_vm2, %v10363_v15  ;;  %v19428_v15 = vld [vmem:[%s24422_s10 + $0x140] sm:$0xff]  }
0x1a78   : > { %16794 = vmatpush3.bf16.msra.mxu1 %v19420_v43  ;;  %v24502_v43 = vld [vmem:[#allocation16_spill] sm:$0xff] }
0x1a79   : > { %16795 = vmatprep.subr.bf16.mxu1 %v19421_v42  ;;  %v11026_v42 = vrot.slane %v16052_v18, %v24502_v43 }
0x1a7c   : > { %16796 = vmatpush3.bf16.msra.mxu1 %v19422_v54  ;;  %v24503_v54 = vld [vmem:[#allocation17_spill] sm:$0xff] }
0x1a7d   : > { %16797 = vmatprep.subr.bf16.mxu1 %v19423_v26  ;;  %v11030_v26 = vrot.slane %v16052_v18, %v24503_v54 }
0x1a80   : > { %16798 = vmatpush3.bf16.msra.mxu1 %v19424_v19 }
0x1a81   : > { %16799 = vmatprep.subr.bf16.mxu1 %v19425_v50 }
0x1a84   : > { %16800 = vmatpush3.bf16.msra.mxu1 %v19426_v46 }
0x1a85   : > { %16801 = vmatprep.subr.bf16.mxu1 %v19427_v62 }
0x1a88   : > { %16802 = vmatpush3.bf16.msra.mxu1 %v19428_v15 }
0x1a89   : > { %16803 = vmatprep.subr.bf16.mxu1 %v19429_v12 }
0x1b4a   : > { %v17809_v48 = vpop.f32.mrb[220].mxu1 }
0x1b4b   : > { %v10890_v29 = vpop.f32.mrb[221].mxu1  ;;  %v18155_v44 = vadd.f32 %v17809_v48, %v15994_v25 }
0x1b4c   : > { %v18156_v53 = vadd.f32 %v15994_v25, %v10890_v29  ;;  %v17810_v34 = vpop.f32.mrb[222].mxu1 }
0x1b4d   : > { %v10893_v39 = vpop.f32.mrb[223].mxu1  ;;  %v23150_v21 = vadd.f32 %v18155_v44, %v22353_v23  ;;  %v18157_v41 = vadd.f32 %v17810_v34, %v15994_v25  ;;  %v19392_v23 = vld [vmem:[%s24420_s8 + $0x19c] ss:$12 sps:$4 sm:$0xff]  }
0x1b4e   : > { %v23143_v6 = vadd.f32 %v18156_v53, %v22341_v60  ;;  %v18158_v45 = vadd.f32 %v15994_v25, %v10893_v39  ;;  %v19387_v60 = vld [vmem:[%s24420_s8 + $0x180] ss:$12 sps:$4 sm:$0xff]  }
0x1b4f   : > { %v23155_v31 = vadd.f32 %v18157_v41, %v22344_v38  ;;  %v19390_v38 = vld [vmem:[%s24420_s8 + $0x198] ss:$12 sps:$4 sm:$0xff]  }
0x1b50   : > { %v23146_v28 = vadd.f32 %v18158_v45, %v22349_v40  ;;  %10917 = vadd.xlane.f32.xlu0 %v23143_v6  ;;  %v19389_v40 = vld [vmem:[%s24420_s8 + $0x184] ss:$12 sps:$4 sm:$0xff]  }
0x1b51   : > { %11166 = vmatprep.subr.bf16.mxu0 %v19389_v40 }
0x1b52   : > { %10919 = vadd.xlane.f32.xlu1 %v23146_v28  ;;  %11167 = vmatpush1.bf16.msra.mxu0 %v19387_v60 }
0x1b53   : > { %11168 = vmatprep.subr.bf16.mxu0 %v19392_v23 }
0x1b54   : > { %10921 = vadd.xlane.f32.xlu0 %v23150_v21 }
0x1b56   : > { %11169 = vmatpush1.bf16.msra.mxu0 %v19390_v38 }
0x1b57   : > { %11170 = vmatprep.subr.bf16.mxu0 %v19395_v10 }
0x1b58   : > { %10923 = vadd.xlane.f32.xlu0 %v23155_v31 }
0x1b5a   : > { %11171 = vmatpush1.bf16.msra.mxu0 %v19393_v9 }
0x1b5b   : > { %11172 = vmatprep.subr.bf16.mxu0 %v19398_v47  ;;  %v19414_v47 = vld [vmem:[%s24420_s8 + $0x1d0] ss:$12 sps:$4 sm:$0xff]  }
0x1b5e   : > { %11173 = vmatpush1.bf16.msra.mxu0 %v19396_v49  ;;  %v19416_v49 = vld [vmem:[%s24420_s8 + $0x200] ss:$12 sps:$4 sm:$0xff]  }
0x1b5f   : > { %11174 = vmatprep.subr.bf16.mxu0 %v19401_v20  ;;  %v19417_v20 = vld [vmem:[%s24420_s8 + $0x218] ss:$12 sps:$4 sm:$0xff]  }
0x1b62   : > { %11175 = vmatpush1.bf16.msra.mxu0 %v19399_v4  ;;  %v19418_v4 = vld [vmem:[%s24420_s8 + $0x230] ss:$12 sps:$4 sm:$0xff]  }
0x1b63   : > { %11176 = vmatprep.subr.bf16.mxu0 %v19404_v30  ;;  %v19430_v30 = vld [vmem:[%s24422_s10 + $0x148] sm:$0xff]  }
0x1b64   : > { %16804 = vmatpush3.bf16.msra.mxu1 %v19430_v30 }
0x1b66   : > { %11177 = vmatpush1.bf16.msra.mxu0 %v19402_v2  ;;  %v19431_v2 = vld [vmem:[%s24422_s10 + $0x190] sm:$0xff]  }
0x1b67   : > { %11178 = vmatprep.subr.bf16.mxu0 %v19407_v3  ;;  %v19432_v3 = vld [vmem:[%s24422_s10 + $0x150] sm:$0xff]   ;;  %16805 = vmatprep.subr.bf16.mxu1 %v19431_v2 }
0x1b68   : > { %16806 = vmatpush3.bf16.msra.mxu1 %v19432_v3 }
0x1b6a   : > { %11179 = vmatpush1.bf16.msra.mxu0 %v19405_v57  ;;  %v19433_v57 = vld [vmem:[%s24422_s10 + $0x198] sm:$0xff]  }
0x1b6b   : > { %11180 = vmatprep.subr.bf16.mxu0 %v19410_v8  ;;  %v19434_v8 = vld [vmem:[%s24422_s10 + $0x158] sm:$0xff]   ;;  %16807 = vmatprep.subr.bf16.mxu1 %v19433_v57 }
0x1b6c   : > { %16808 = vmatpush3.bf16.msra.mxu1 %v19434_v8 }
0x1b6e   : > { %11181 = vmatpush1.bf16.msra.mxu0 %v19408_v55  ;;  %v19435_v55 = vld [vmem:[%s24422_s10 + $0x1a0] sm:$0xff]  }
0x1b6f   : > { %17811 = vmatprep.subr.bf16.mxu0 %v19411_v33 }
0x1bdd   : > { %v10918_v35 = vpop.xlane.xlu0 %10917 }
0x1bde   : > { %v10925_v13 = vmul.f32 0.013888889, %v10918_v35 }
0x1bdf   : > { %v10920_v37 = vpop.xlane.xlu1 %10919 }
0x1be0   : > { %v10929_v58 = vsub.f32 %v23143_v6, %v10925_v13  ;;  %v10926_v0 = vmul.f32 0.013888889, %v10920_v37  ;;  %v16018_v13 = vld [vmem:[%s24418_s6 + $0x2] ss:$0 sm:$0xff] }
0x1be1   : > { %v10922_v5 = vpop.xlane.xlu0 %10921 }
0x1be2   : > { %v23172_v51 = vmul.f32 %v20361_v11, %v10929_v58  ;;  %v10930_v59 = vsub.f32 %v23146_v28, %v10926_v0  ;;  %v10927_v52 = vmul.f32 0.013888889, %v10922_v5  ;;  %v16019_v5 = vld [vmem:[%s24419_s7 + $0x2] ss:$0 sm:$0xff] }
0x1be4   : > { %v23176_v14 = vmul.f32 %v20361_v11, %v10930_v59  ;;  %v10931_v17 = vsub.f32 %v23150_v21, %v10927_v52  ;;  %v10937_v16 = vmul.f32 %v23172_v51, %v23172_v51 }
0x1be5   : > { %v10924_v61 = vpop.xlane.xlu0 %10923 }
0x1be6   : > { %v10928_v24 = vmul.f32 0.013888889, %v10924_v61  ;;  %10941 = vadd.xlane.f32.xlu0 %v10937_v16  ;;  %v23182_v1 = vmul.f32 %v20361_v11, %v10931_v17  ;;  %v10938_v27 = vmul.f32 %v23176_v14, %v23176_v14 }
0x1be8   : > { %v10932_v32 = vsub.f32 %v23155_v31, %v10928_v24  ;;  %v10939_v22 = vmul.f32 %v23182_v1, %v23182_v1  ;;  %v19412_v24 = vld [vmem:[%s24420_s8 + $0x1a0] ss:$12 sps:$4 sm:$0xff]  }
0x1bea   : > { %10943 = vadd.xlane.f32.xlu0 %v10938_v27  ;;  %v23188_v7 = vmul.f32 %v20361_v11, %v10932_v32 }
0x1bec   : > { %v10940_v63 = vmul.f32 %v23188_v7, %v23188_v7 }
0x1bee   : > { %10945 = vadd.xlane.f32.xlu0 %v10939_v22 }
0x1bf2   : > { %10947 = vadd.xlane.f32.xlu0 %v10940_v63  ;;  %v19413_v63 = vld [vmem:[%s24420_s8 + $0x1b8] ss:$12 sps:$4 sm:$0xff]  }
0x1c73   : > { %v10942_v25 = vpop.xlane.xlu0 %10941 }
0x1c74   : > { %v10949_v48 = vmul.f32 0.013888889, %v10942_v25 }
0x1c76   : > { %v10953_v29 = vadd.f32 1e-05, %v10949_v48 }
0x1c77   : > { %v10944_v53 = vpop.xlane.xlu0 %10943 }
0x1c78   : > { %19959 = vrsqrt.f32 %v10953_v29  ;;  %v10950_v34 = vmul.f32 0.013888889, %v10944_v53 }
0x1c7a   : > { %v10954_v39 = vadd.f32 1e-05, %v10950_v34 }
0x1c7b   : > { %v10946_v44 = vpop.xlane.xlu0 %10945 }
0x1c7c   : > { %19961 = vrsqrt.f32 %v10954_v39  ;;  %v10951_v45 = vmul.f32 0.013888889, %v10946_v44 }
0x1c7e   : > { %v10955_v41 = vadd.f32 1e-05, %v10951_v45 }
0x1c7f   : > { %v10948_v60 = vpop.xlane.xlu0 %10947 }
0x1c80   : > { %19963 = vrsqrt.f32 %v10955_v41  ;;  %v10952_v40 = vmul.f32 0.013888889, %v10948_v60 }
0x1c82   : > { %v19960_v23 = vpop.eup %19959  ;;  %v10956_v38 = vadd.f32 1e-05, %v10952_v40 }
0x1c83   : > { %v10961_v35 = vmul.f32 %v19960_v23, %v23172_v51 }
0x1c84   : > { %19965 = vrsqrt.f32 %v10956_v38 }
0x1c85   : > { %v10971_v58 = vmul.f32 %v16018_v13, %v10961_v35 }
0x1c86   : > { %v19962_v37 = vpop.eup %19961 }
0x1c87   : > { %v10962_v0 = vmul.f32 %v19962_v37, %v23176_v14  ;;  %v10981_v17 = vadd.f32 %v16019_v5, %v10971_v58 }
0x1c89   : > { %v10972_v59 = vmul.f32 %v16018_v13, %v10962_v0 }
0x1c8a   : > { %v19964_v52 = vpop.eup %19963 }
0x1c8b   : > { %v10982_v16 = vadd.f32 %v16019_v5, %v10972_v59  ;;  %v10963_v61 = vmul.f32 %v19964_v52, %v23182_v1 }
0x1c8d   : > { %v10985_v51 = vpack.c.bf16 %v10982_v16, %v10981_v17  ;;  %v10973_v27 = vmul.f32 %v16018_v13, %v10963_v61  ;;  %v24504_v16 = vld [vmem:[#allocation18_spill] sm:$0xff] }
0x1c8e   : > { %v19966_v32 = vpop.eup %19965  ;;  %v11034_v61 = vrot.slane %v16052_v18, %v24504_v16 }
0x1c8f   : > { %v10964_v22 = vmul.f32 %v19966_v32, %v23188_v7  ;;  %11199 = vmatmul.mubr.bf16.vlgmr.msra.gmra.mrb[0].mxu0 %v10985_v51  ;;  %v10983_v1 = vadd.f32 %v16019_v5, %v10973_v27  ;;  %v19415_v7 = vld [vmem:[%s24420_s8 + $0x1e8] ss:$12 sps:$4 sm:$0xff]  }
0x1c90   : > { %17812 = vmatpush3.bf16.msra.mxu0 %v19411_v33  ;;  %11208 = vmatprep.mubr.bf16.mxu0 %v24497_v36  ;;  %v19436_v33 = vld [vmem:[%s24422_s10 + $0x1a8] sm:$0xff]  }
0x1c91   : > { %v10974_v14 = vmul.f32 %v16018_v13, %v10964_v22  ;;  %17813 = vmatprep.subr.bf16.mxu0 %v19412_v24 }
0x1c93   : > { %v10984_v10 = vadd.f32 %v16019_v5, %v10974_v14 }
0x1c94   : > { %17814 = vmatpush3.bf16.msra.mxu0 %v19412_v24 }
0x1c95   : > { %v10986_v9 = vpack.c.bf16 %v10984_v10, %v10983_v1  ;;  %17815 = vmatprep.subr.bf16.mxu0 %v19413_v63 }
0x1c97   : > { %11209 = vmatmul.mubr.bf16.gmra.mrb[4].mxu0 %v10986_v9 }
0x1c98   : > { %17816 = vmatpush3.bf16.msra.mxu0 %v19413_v63  ;;  %17827 = vmatprep.mubr.bf16.mxu0 %v10985_v51 }
0x1c99   : > { %17817 = vmatprep.subr.bf16.mxu0 %v19414_v47 }
0x1c9c   : > { %17818 = vmatpush3.bf16.msra.mxu0 %v19414_v47 }
0x1c9d   : > { %17819 = vmatprep.subr.bf16.mxu0 %v19415_v7 }
0x1ca0   : > { %17820 = vmatpush3.bf16.msra.mxu0 %v19415_v7 }
0x1ca1   : > { %17821 = vmatprep.subr.bf16.mxu0 %v19416_v49 }
0x1ca4   : > { %17822 = vmatpush3.bf16.msra.mxu0 %v19416_v49 }
0x1ca5   : > { %17823 = vmatprep.subr.bf16.mxu0 %v19417_v20 }
0x1ca8   : > { %17824 = vmatpush3.bf16.msra.mxu0 %v19417_v20 }
0x1ca9   : > { %17825 = vmatprep.subr.bf16.mxu0 %v19418_v4 }
0x1cac   : > { %17826 = vmatpush3.bf16.msra.mxu0 %v19418_v4 }
0x1cad   : > { %17831 = vmatprep.subr.bf16.mxu0 %v19435_v55 }
0x1caf   : > { %17828 = vmatmul.mubr.bf16.vlgmr.msra.gmra.mrb[8].mxu0 %v10986_v9 }
0x1cb0   : > { %17832 = vmatpush3.bf16.msra.mxu0 %v19435_v55 }
0x1cb1   : > { %17833 = vmatprep.subr.bf16.mxu0 %v19436_v33 }
0x1cb4   : > { %17834 = vmatpush3.bf16.msra.mxu0 %v19436_v33 }
0x1d62   : > { %v11200_v19 = vpop.f32.mrb[0].mxu0 }
0x1d63   : > { %v11201_v50 = vadd.f32 %v11200_v19, %v11026_v42  ;;  %v11202_v46 = vpop.f32.mrb[1].mxu0 }
0x1d64   : > { %v11203_v62 = vadd.f32 %v11202_v46, %v11030_v26  ;;  %v11204_v15 = vpop.f32.mrb[2].mxu0 }
0x1d65   : > { %v11205_v12 = vadd.f32 %v11204_v15, %v11026_v42  ;;  %v11206_v25 = vpop.f32.mrb[3].mxu0  ;;  %v11268_v29 = vmax.f32 %v11201_v50, 0.0  ;;  %v16114_v50 = vld [vmem:[%s24423_s11 + $0x2] ss:$0 sm:$0xff] }
0x1d66   : > { %v11207_v48 = vadd.f32 %v11206_v25, %v11030_v26  ;;  %v11269_v34 = vmax.f32 %v11203_v62, 0.0 }
0x1d67   : > { %v11271_v53 = vmax.f32 %v11205_v12, 0.0 }
0x1d68   : > { %v11272_v39 = vmax.f32 %v11207_v48, 0.0 }
0x1d69   : > { %v11280_v44 = vpack.c.bf16 %v11271_v53, %v11268_v29 }
0x1d6a   : > { %v11281_v45 = vpack.c.bf16 %v11272_v39, %v11269_v34  ;;  %v11210_v41 = vpop.f32.mrb[4].mxu0 }
0x1d6b   : > { %v11211_v60 = vadd.f32 %v11210_v41, %v11026_v42  ;;  %v11212_v40 = vpop.f32.mrb[5].mxu0 }
0x1d6c   : > { %v11213_v23 = vadd.f32 %v11212_v40, %v11030_v26  ;;  %v11214_v38 = vpop.f32.mrb[6].mxu0  ;;  %11477 = vmatprep.mubr.bf16.mxu1 %v11281_v45 }
0x1d6d   : > { %v11215_v35 = vadd.f32 %v11214_v38, %v11026_v42  ;;  %v11216_v13 = vpop.f32.mrb[7].mxu0  ;;  %11478 = vmatmul.mubr.bf16.vlgmr.msra.gmra.mrb[224].mxu1 %v11280_v44  ;;  %v11274_v58 = vmax.f32 %v11211_v60, 0.0  ;;  %v19443_v38 = vld [vmem:[%s24415_s3 + $0x248] ss:$12 sps:$4 sm:$0xff]  }
0x1d6e   : > { %v11217_v37 = vadd.f32 %v11216_v13, %v11030_v26  ;;  %v11275_v5 = vmax.f32 %v11213_v23, 0.0  ;;  %17839 = vmatprep.subr.bf16.mxu1 %v19443_v38 }
0x1d6f   : > { %v11277_v0 = vmax.f32 %v11215_v35, 0.0  ;;  %17840 = vmatpush3.bf16.msra.mxu1 %v19443_v38 }
0x1d70   : > { %v11278_v59 = vmax.f32 %v11217_v37, 0.0 }
0x1d71   : > { %v11283_v52 = vpack.c.bf16 %v11277_v0, %v11274_v58 }
0x1d72   : > { %v11284_v17 = vpack.c.bf16 %v11278_v59, %v11275_v5 }
0x1d74   : > { %11485 = vmatprep.mubr.bf16.mxu1 %v11284_v17 }
0x1d75   : > { %11486 = vmatmul.mubr.bf16.gmra.mrb[228].mxu1 %v11283_v52 }
0x1d82   : > { %v17829_v51 = vpop.f32.mrb[8].mxu0 }
0x1d83   : > { %v11262_v24 = vadd.f32 %v17829_v51, %v11034_v61  ;;  %v11253_v32 = vpop.f32.mrb[9].mxu0 }
0x1d84   : > { %v11254_v27 = vadd.f32 %v11253_v32, %v11034_v61  ;;  %v17830_v22 = vpop.f32.mrb[10].mxu0 }
0x1d85   : > { %v11265_v14 = vadd.f32 %v17830_v22, %v11034_v61  ;;  %v11256_v63 = vpop.f32.mrb[11].mxu0  ;;  %v11276_v10 = vmax.f32 %v11262_v24, 0.0 }
0x1d86   : > { %v11257_v1 = vadd.f32 %v11256_v63, %v11034_v61  ;;  %v11270_v47 = vmax.f32 %v11254_v27, 0.0 }
0x1d87   : > { %v11279_v9 = vmax.f32 %v11265_v14, 0.0 }
0x1d88   : > { %v11273_v7 = vmax.f32 %v11257_v1, 0.0 }
0x1d89   : > { %v11285_v49 = vpack.c.bf16 %v11279_v9, %v11276_v10 }
0x1d8a   : > { %v11282_v20 = vpack.c.bf16 %v11273_v7, %v11270_v47  ;;  %v19446_v47 = vld [vmem:[%s24415_s3 + $0x274] ss:$12 sps:$4 sm:$0xff]  }
0x1d8b   : > { %v19447_v7 = vld [vmem:[%s24415_s3 + $0x260] ss:$12 sps:$4 sm:$0xff]  }
0x1d8c   : > { %17835 = vmatprep.mubr.msk.bf16.mxu0 %vm4094_vm5, %v11282_v20  ;;  %17841 = vmatprep.subr.bf16.mxu1 %v19447_v7  ;;  %v19450_v20 = vld [vmem:[%s24415_s3 + $0x28c] ss:$12 sps:$4 sm:$0xff]  }
0x1d8d   : > { %17836 = vmatmul.mubr.msk.bf16.vlgmr.msra.gmra.mrb[12].mxu0 %vm4094_vm5, %v11285_v49  ;;  %v19444_v49 = vld [vmem:[%s24415_s3 + $0x270] ss:$12 sps:$4 sm:$0xff]   ;;  %17842 = vmatpush3.bf16.msra.mxu1 %v19447_v7 }
0x1d8e   : > { %11814 = vmatprep.mubr.bf16.mxu0 %v24497_v36 }
0x1e40   : > { %v16809_v4 = vpop.f32.mrb[224].mxu1 }
0x1e41   : > { %v16810_v30 = vpop.f32.mrb[225].mxu1 }
0x1e42   : > { %v16811_v2 = vadd.f32 %v16810_v30, %v16809_v4  ;;  %v16812_v3 = vpop.f32.mrb[226].mxu1  ;;  %v19451_v4 = vld [vmem:[%s24415_s3 + $0x278] ss:$12 sps:$4 sm:$0xff]   ;;  %v19448_v30 = vld [vmem:[%s24415_s3 + $0x288] ss:$12 sps:$4 sm:$0xff]  }
0x1e43   : > { %v16813_v57 = vpop.f32.mrb[227].mxu1  ;;  %17843 = vmatprep.subr.bf16.mxu1 %v19451_v4 }
0x1e44   : > { %v16814_v8 = vadd.f32 %v16813_v57, %v16812_v3  ;;  %v11480_v15 = vadd.f32 %v16811_v2, %v16114_v50  ;;  %17844 = vmatpush3.bf16.msra.mxu1 %v19451_v4  ;;  %v19454_v2 = vld [vmem:[%s24415_s3 + $0x2a4] ss:$12 sps:$4 sm:$0xff]   ;;  %v19452_v57 = vld [vmem:[%s24415_s3 + $0x2a0] ss:$12 sps:$4 sm:$0xff]  }
0x1e45   : > { %v19455_v3 = vld [vmem:[%s24415_s3 + $0x290] ss:$12 sps:$4 sm:$0xff]  }
0x1e46   : > { %v11483_v34 = vadd.f32 %v16814_v8, %v16114_v50  ;;  %17845 = vmatprep.subr.bf16.mxu1 %v19455_v3  ;;  %v19458_v8 = vld [vmem:[%s24415_s3 + $0x2bc] ss:$12 sps:$4 sm:$0xff]  }
0x1e48   : > { %v16815_v55 = vpop.f32.mrb[228].mxu1  ;;  %17846 = vmatpush3.bf16.msra.mxu1 %v19455_v3 }
0x1e49   : > { %v16816_v33 = vpop.f32.mrb[229].mxu1 }
0x1e4a   : > { %v16817_v18 = vadd.f32 %v16816_v33, %v16815_v55  ;;  %v16818_v42 = vpop.f32.mrb[230].mxu1  ;;  %v19459_v55 = vld [vmem:[%s24415_s3 + $0x2a8] ss:$12 sps:$4 sm:$0xff]   ;;  %v19456_v33 = vld [vmem:[%s24415_s3 + $0x2b8] ss:$12 sps:$4 sm:$0xff]  }
0x1e4b   : > { %v16819_v26 = vpop.f32.mrb[231].mxu1  ;;  %17847 = vmatprep.subr.bf16.mxu1 %v19459_v55 }
0x1e4c   : > { %v16820_v19 = vadd.f32 %v16819_v26, %v16818_v42  ;;  %v11488_v46 = vadd.f32 %v16817_v18, %v16114_v50  ;;  %17848 = vmatpush3.bf16.msra.mxu1 %v19459_v55  ;;  %v19462_v18 = vld [vmem:[%s24415_s3 + $0x2d4] ss:$12 sps:$4 sm:$0xff]   ;;  %v19460_v26 = vld [vmem:[%s24415_s3 + $0x2d0] ss:$12 sps:$4 sm:$0xff]  }
0x1e4d   : > { %v19463_v42 = vld [vmem:[%s24415_s3 + $0x2c0] ss:$12 sps:$4 sm:$0xff]  }
0x1e4e   : > { %v11491_v48 = vadd.f32 %v16820_v19, %v16114_v50  ;;  %17849 = vmatprep.subr.bf16.mxu1 %v19463_v42  ;;  %v19466_v19 = vld [vmem:[%s24415_s3 + $0x2ec] ss:$12 sps:$4 sm:$0xff]  }
0x1e4f   : > { %v19467_v50 = vld [vmem:[%s24415_s3 + $0x2d8] ss:$12 sps:$4 sm:$0xff]  }
0x1e50   : > { %17850 = vmatpush3.bf16.msra.mxu1 %v19463_v42 }
0x1e51   : > { %17851 = vmatprep.subr.bf16.mxu1 %v19467_v50 }
0x1e54   : > { %17852 = vmatpush3.bf16.msra.mxu1 %v19467_v50 }
0x1e60   : > { %v17837_v62 = vpop.f32.mrb[12].mxu0 }
0x1e61   : > { %v11537_v12 = vadd.f32 %v17837_v62, %v11488_v46  ;;  %v11528_v25 = vpop.f32.mrb[13].mxu0  ;;  %v19464_v46 = vld [vmem:[%s24415_s3 + $0x2e8] ss:$12 sps:$4 sm:$0xff]   ;;  %v19468_v62 = vld [vmem:[%s24415_s3 + $0x2f0] ss:$12 sps:$4 sm:$0xff]  }
0x1e62   : > { %v11529_v29 = vadd.f32 %v11528_v25, %v11480_v15  ;;  %v17838_v53 = vpop.f32.mrb[14].mxu0  ;;  %17853 = vmatprep.subr.bf16.mxu1 %v19468_v62 }
0x1e63   : > { %v11540_v39 = vadd.f32 %v17838_v53, %v11491_v48  ;;  %v11531_v44 = vpop.f32.mrb[15].mxu0  ;;  %v23344_v23 = vadd.f32 %v11537_v12, %v23150_v21  ;;  %v19440_v21 = vld [vmem:[%s24415_s3 + $0x258] ss:$12 sps:$4 sm:$0xff]   ;;  %17854 = vmatpush3.bf16.msra.mxu1 %v19468_v62 }
0x1e64   : > { %v23332_v45 = vadd.f32 %v11529_v29, %v23143_v6  ;;  %v11532_v41 = vadd.f32 %v11531_v44, %v11483_v34  ;;  %v19437_v6 = vld [vmem:[%s24415_s3 + $0x240] ss:$12 sps:$4 sm:$0xff]   ;;  %17871 = vmatprep.subr.bf16.mxu1 %v24496_v56 }
0x1e65   : > { %v23335_v60 = vadd.f32 %v11540_v39, %v23155_v31  ;;  %v19439_v31 = vld [vmem:[%s24415_s3 + $0x244] ss:$12 sps:$4 sm:$0xff]  }
0x1e66   : > { %11551 = vadd.xlane.f32.xlu0 %v23332_v45  ;;  %v23340_v40 = vadd.f32 %v11532_v41, %v23146_v28  ;;  %v19442_v28 = vld [vmem:[%s24415_s3 + $0x25c] ss:$12 sps:$4 sm:$0xff]   ;;  %11782 = vmatprep.subr.bf16.mxu0 %v19439_v31 }
0x1e67   : > { %11557 = vadd.xlane.f32.xlu1 %v23335_v60  ;;  %11783 = vmatpush1.bf16.msra.mxu0 %v19437_v6 }
0x1e68   : > { %11784 = vmatprep.subr.bf16.mxu0 %v19442_v28 }
0x1e6a   : > { %11553 = vadd.xlane.f32.xlu0 %v23340_v40 }
0x1e6b   : > { %11785 = vmatpush1.bf16.msra.mxu0 %v19440_v21  ;;  %v16137_v21 = vld [vmem:[%s24413_s1 + $0x3] ss:$0 sm:$0xff] }
0x1e6c   : > { %11786 = vmatprep.subr.bf16.mxu0 %v19446_v47 }
0x1e6e   : > { %11555 = vadd.xlane.f32.xlu0 %v23344_v23 }
0x1e6f   : > { %11787 = vmatpush1.bf16.msra.mxu0 %v19444_v49 }
0x1e70   : > { %11788 = vmatprep.subr.bf16.mxu0 %v19450_v20 }
0x1e73   : > { %11789 = vmatpush1.bf16.msra.mxu0 %v19448_v30 }
0x1e74   : > { %11790 = vmatprep.subr.bf16.mxu0 %v19454_v2 }
0x1e77   : > { %11791 = vmatpush1.bf16.msra.mxu0 %v19452_v57 }
0x1e78   : > { %11792 = vmatprep.subr.bf16.mxu0 %v19458_v8 }
0x1e7b   : > { %11793 = vmatpush1.bf16.msra.mxu0 %v19456_v33 }
0x1e7c   : > { %11794 = vmatprep.subr.bf16.mxu0 %v19462_v18 }
0x1e7f   : > { %11795 = vmatpush1.bf16.msra.mxu0 %v19460_v26 }
0x1e80   : > { %11796 = vmatprep.subr.bf16.mxu0 %v19466_v19 }
0x1e83   : > { %11797 = vmatpush1.bf16.msra.mxu0 %v19464_v46 }
0x1e84   : > { %17859 = vmatprep.subr.bf16.mxu0 %v24496_v56 }
0x1ef3   : > { %v11552_v35 = vpop.xlane.xlu0 %11551 }
0x1ef4   : > { %v11559_v13 = vmul.f32 0.013888889, %v11552_v35  ;;  %v11558_v37 = vpop.xlane.xlu1 %11557 }
0x1ef5   : > { %v11562_v0 = vmul.f32 0.013888889, %v11558_v37 }
0x1ef6   : > { %v11563_v58 = vsub.f32 %v23332_v45, %v11559_v13 }
0x1ef7   : > { %v11554_v5 = vpop.xlane.xlu0 %11553  ;;  %v11566_v17 = vsub.f32 %v23335_v60, %v11562_v0 }
0x1ef8   : > { %v23364_v59 = vmul.f32 %v20361_v11, %v11563_v58  ;;  %v11560_v52 = vmul.f32 0.013888889, %v11554_v5  ;;  %v16138_v58 = vld [vmem:[%s24414_s2 + $0x3] ss:$0 sm:$0xff] }
0x1ef9   : > { %v23374_v22 = vmul.f32 %v20361_v11, %v11566_v17 }
0x1efa   : > { %v11564_v61 = vsub.f32 %v23340_v40, %v11560_v52  ;;  %v11571_v51 = vmul.f32 %v23364_v59, %v23364_v59 }
0x1efb   : > { %v11556_v24 = vpop.xlane.xlu0 %11555  ;;  %v11574_v10 = vmul.f32 %v23374_v22, %v23374_v22 }
0x1efc   : > { %v23371_v32 = vmul.f32 %v20361_v11, %v11564_v61  ;;  %v11561_v27 = vmul.f32 0.013888889, %v11556_v24  ;;  %11575 = vadd.xlane.f32.xlu0 %v11571_v51 }
0x1efe   : > { %v11565_v14 = vsub.f32 %v23344_v23, %v11561_v27  ;;  %v11572_v63 = vmul.f32 %v23371_v32, %v23371_v32 }
0x1f00   : > { %v23380_v1 = vmul.f32 %v20361_v11, %v11565_v14  ;;  %11577 = vadd.xlane.f32.xlu1 %v11572_v63 }
0x1f02   : > { %v11573_v9 = vmul.f32 %v23380_v1, %v23380_v1 }
0x1f04   : > { %11581 = vadd.xlane.f32.xlu1 %v11574_v10  ;;  %11579 = vadd.xlane.f32.xlu0 %v11573_v9 }
0x1f89   : > { %v11576_v15 = vpop.xlane.xlu0 %11575 }
0x1f8a   : > { %v11583_v12 = vmul.f32 0.013888889, %v11576_v15 }
0x1f8c   : > { %v11587_v25 = vadd.f32 1e-05, %v11583_v12 }
0x1f8d   : > { %v11578_v48 = vpop.xlane.xlu1 %11577 }
0x1f8e   : > { %19967 = vrsqrt.f32 %v11587_v25  ;;  %v11584_v29 = vmul.f32 0.013888889, %v11578_v48 }
0x1f90   : > { %v11588_v53 = vadd.f32 1e-05, %v11584_v29 }
0x1f91   : > { %v11582_v34 = vpop.xlane.xlu1 %11581  ;;  %v11580_v39 = vpop.xlane.xlu0 %11579 }
0x1f92   : > { %19969 = vrsqrt.f32 %v11588_v53  ;;  %v11586_v44 = vmul.f32 0.013888889, %v11582_v34  ;;  %v11585_v41 = vmul.f32 0.013888889, %v11580_v39 }
0x1f94   : > { %v11590_v6 = vadd.f32 1e-05, %v11586_v44  ;;  %v11589_v31 = vadd.f32 1e-05, %v11585_v41 }
0x1f96   : > { %19971 = vrsqrt.f32 %v11590_v6 }
0x1f97   : > { %19973 = vrsqrt.f32 %v11589_v31 }
0x1f98   : > { %v19968_v28 = vpop.eup %19967 }
0x1f99   : > { %v11595_v38 = vmul.f32 %v19968_v28, %v23364_v59 }
0x1f9b   : > { %v11605_v13 = vmul.f32 %v16137_v21, %v11595_v38 }
0x1f9c   : > { %v19970_v35 = vpop.eup %19969 }
0x1f9d   : > { %v11596_v37 = vmul.f32 %v19970_v35, %v23371_v32  ;;  %v11615_v17 = vadd.f32 %v16138_v58, %v11605_v13 }
0x1f9f   : > { %v11606_v0 = vmul.f32 %v16137_v21, %v11596_v37 }
0x1fa0   : > { %v19972_v5 = vpop.eup %19971 }
0x1fa1   : > { %v19974_v52 = vpop.eup %19973  ;;  %v11616_v61 = vadd.f32 %v16138_v58, %v11606_v0  ;;  %v11598_v51 = vmul.f32 %v19972_v5, %v23374_v22 }
0x1fa2   : > { %v11597_v59 = vmul.f32 %v19974_v52, %v23380_v1 }
0x1fa3   : > { %v11619_v24 = vpack.c.bf16 %v11616_v61, %v11615_v17  ;;  %v11608_v27 = vmul.f32 %v16137_v21, %v11598_v51 }
0x1fa4   : > { %v11607_v14 = vmul.f32 %v16137_v21, %v11597_v59 }
0x1fa5   : > { %11815 = vmatmul.mubr.bf16.vlgmr.msra.gmra.mrb[16].mxu0 %v11619_v24  ;;  %17855 = vmatprep.mubr.bf16.mxu1 %v11619_v24  ;;  %v11618_v63 = vadd.f32 %v16138_v58, %v11608_v27 }
0x1fa6   : > { %v11617_v32 = vadd.f32 %v16138_v58, %v11607_v14  ;;  %11824 = vmatprep.mubr.bf16.mxu0 %v24497_v36 }
0x1fa8   : > { %v11620_v10 = vpack.c.bf16 %v11618_v63, %v11617_v32 }
0x1faa   : > { %17856 = vmatmul.mubr.bf16.vlgmr.msra.gmra.mrb[232].mxu1 %v11620_v10 }
0x1fab   : > { %17873 = vmatprep.mubr.msk.bf16.mxu1 %vm20189_vm1, %v24496_v56 }
0x1fad   : > { %11825 = vmatmul.mubr.bf16.gmra.mrb[20].mxu0 %v11620_v10 }
0x1fae   : > { %17861 = vmatprep.mubr.msk.bf16.mxu0 %vm20189_vm1, %v24496_v56 }
0x2078   : > { %v11816_v22 = vpop.f32.mrb[16].mxu0 }
0x2079   : > { %v11818_v1 = vpop.f32.mrb[17].mxu0 }
0x207a   : > { %v11820_v9 = vpop.f32.mrb[18].mxu0 }
0x207b   : > { %v11972_v47 = vpack.c.bf16 %v11820_v9, %v11816_v22  ;;  %v11822_v7 = vpop.f32.mrb[19].mxu0  ;;  %v18987_v49 = vpack.i.bf16 %v11820_v9, %v11816_v22 }
0x207c   : > { %v18957_v20 = vpack.i.bf16 %v11822_v7, %v11818_v1  ;;  %v12076_v4 = vpack.c.bf16 %v11822_v7, %v11818_v1 }
0x207d   : > { %v23460_v30 = vpop.f32.mrb[232].mxu1 }
0x207e   : > { %v23462_v2 = vpop.f32.mrb[233].mxu1  ;;  %18958 = vrot.lane.b32.xlu0 %v18957_v20, %s24499_s23  ;;  %v12200_v3 = vsel %vm1186_vm2, %v12076_v4, 0 }
0x207f   : > { %v23466_v57 = vpop.f32.mrb[234].mxu1  ;;  %17860 = vmatpush3.bf16.xpose.msra.mxu0 %v12200_v3 }
0x2080   : > { %v23468_v8 = vpop.f32.mrb[235].mxu1  ;;  %v11826_v55 = vpop.f32.mrb[20].mxu0  ;;  %17865 = vmatprep.subr.bf16.mxu0 %v24496_v56  ;;  %v23473_v33 = vpack.i.bf16 %v23466_v57, %v23460_v30  ;;  %v12181_v18 = vpack.c.bf16 %v23466_v57, %v23460_v30 }
0x2081   : > { %v11828_v42 = vpop.f32.mrb[21].mxu0  ;;  %v23479_v26 = vpack.i.bf16 %v23468_v8, %v23462_v2  ;;  %v12180_v50 = vpack.c.bf16 %v23468_v8, %v23462_v2  ;;  %v24505_v8 = vld [vmem:[#allocation14_spill] sm:$0xff] }
0x2082   : > { %18978 = vrot.lane.b32.xlu0 %v18957_v20, %s24490_s21  ;;  %v11830_v19 = vpop.f32.mrb[22].mxu0 }
0x2083   : > { %v11973_v46 = vpack.c.bf16 %v11830_v19, %v11826_v55  ;;  %v11832_v62 = vpop.f32.mrb[23].mxu0  ;;  %v18972_v15 = vpack.i.bf16 %v11830_v19, %v11826_v55 }
0x2084   : > { %v18962_v12 = vpack.i.bf16 %v11832_v62, %v11828_v42  ;;  %v12077_v25 = vpack.c.bf16 %v11832_v62, %v11828_v42 }
0x2086   : > { %18988 = vrot.lane.b32.xlu0 %v18987_v49, %s24490_s21  ;;  %17862 = vmatmul.mubr.msk.bf16.vlgmr.msra.gmra.mrb[24].mxu0 %vm1186_vm2, %v11972_v47  ;;  %v12247_v48 = vsel %vm1186_vm2, %v12077_v25, 0 }
0x2087   : > { %18963 = vrot.lane.b32.xlu1 %v18962_v12, %s24499_s23  ;;  %17866 = vmatpush3.bf16.xpose.msra.mxu0 %v12247_v48 }
0x2088   : > { %17867 = vmatprep.mubr.msk.bf16.mxu0 %vm20189_vm1, %v24496_v56  ;;  %17877 = vmatprep.subr.bf16.mxu0 %v24496_v56 }
0x208a   : > { %18998 = vrot.lane.b32.xlu0 %v18957_v20, %s24491_s29 }
0x208b   : > { %18968 = vrot.lane.b32.xlu1 %v18987_v49, %s24499_s23 }
0x208e   : > { %19008 = vrot.lane.b32.xlu0 %v18987_v49, %s24491_s29  ;;  %17868 = vmatmul.mubr.msk.bf16.vlgmr.msra.gmra.mrb[28].mxu0 %vm1186_vm2, %v11973_v46 }
0x208f   : > { %18973 = vrot.lane.b32.xlu1 %v18972_v15, %s24499_s23  ;;  %17879 = vmatprep.mubr.msk.bf16.mxu0 %vm20189_vm1, %v24496_v56 }
0x2092   : > { %19018 = vrot.lane.b32.xlu0 %v18957_v20, %s24492_s19 }
0x2093   : > { %18983 = vrot.lane.b32.xlu1 %v18962_v12, %s24490_s21 }
0x2096   : > { %19028 = vrot.lane.b32.xlu0 %v18987_v49, %s24492_s19 }
0x2097   : > { %18993 = vrot.lane.b32.xlu1 %v18972_v15, %s24490_s21 }
0x209a   : > { %19038 = vrot.lane.b32.xlu0 %v18957_v20, %s24493_s26 }
0x209b   : > { %19003 = vrot.lane.b32.xlu1 %v18962_v12, %s24491_s29 }
0x209e   : > { %19048 = vrot.lane.b32.xlu0 %v18987_v49, %s24493_s26 }
0x209f   : > { %19013 = vrot.lane.b32.xlu1 %v18972_v15, %s24491_s29 }
0x20a2   : > { %19058 = vrot.lane.b32.xlu0 %v18957_v20, %s24494_s28 }
0x20a3   : > { %19023 = vrot.lane.b32.xlu1 %v18962_v12, %s24492_s19 }
0x20a6   : > { %19068 = vrot.lane.b32.xlu0 %v18987_v49, %s24494_s28 }
0x20a7   : > { %19033 = vrot.lane.b32.xlu1 %v18972_v15, %s24492_s19 }
0x20aa   : > { %19078 = vrot.lane.b32.xlu0 %v18957_v20, %s24495_s17 }
0x20ab   : > { %19043 = vrot.lane.b32.xlu1 %v18962_v12, %s24493_s26 }
0x20ae   : > { %19088 = vrot.lane.b32.xlu0 %v18987_v49, %s24495_s17 }
0x20af   : > { %19053 = vrot.lane.b32.xlu1 %v18972_v15, %s24493_s26 }
0x20b2   : > { %19098 = vrot.lane.b32.xlu0 %v23479_v26, %s24499_s23 }
0x20b3   : > { %19063 = vrot.lane.b32.xlu1 %v18962_v12, %s24494_s28 }
0x20b6   : > { %19108 = vrot.lane.b32.xlu0 %v23479_v26, %s24490_s21 }
0x20b7   : > { %19073 = vrot.lane.b32.xlu1 %v18972_v15, %s24494_s28 }
0x20ba   : > { %19118 = vrot.lane.b32.xlu0 %v23479_v26, %s24491_s29 }
0x20bb   : > { %19083 = vrot.lane.b32.xlu1 %v18962_v12, %s24495_s17 }
0x20be   : > { %19123 = vrot.lane.b32.xlu0 %v23473_v33, %s24491_s29  ;;  %s515_s29 = scalar_lea.vmem [#allocation2], %s15495_s25 }
0x20bf   : > { %19093 = vrot.lane.b32.xlu1 %v18972_v15, %s24495_s17 }
0x20c3   : > { %19103 = vrot.lane.b32.xlu1 %v23473_v33, %s24499_s23 }
0x20c7   : > { %19113 = vrot.lane.b32.xlu1 %v23473_v33, %s24490_s21  ;;  %s24512_s21 = sld [smem:[#allocation20_spill]] }
0x20cb   : > { %19128 = vrot.lane.b32.xlu1 %v23479_v26, %s24492_s19 }
0x20f0   : > { %v18959_v29 = vpop.permute.xlu0 %18958 }
0x20f1   : > { %v18961_v53 = vunpack.i.h.bf16 %v18959_v29  ;;  %v18960_v34 = vunpack.i.l.bf16 %v18959_v29 }
0x20f3   : > { %v12078_v39 = vpack.c.bf16 %v18961_v53, %v18960_v34 }
0x20f4   : > { %v18979_v44 = vpop.permute.xlu0 %18978 }
0x20f5   : > { %v12294_v41 = vsel %vm1186_vm2, %v12078_v39, 0  ;;  %v18981_v31 = vunpack.i.h.bf16 %v18979_v44  ;;  %v18980_v28 = vunpack.i.l.bf16 %v18979_v44 }
0x20f6   : > { %17872 = vmatpush3.bf16.xpose.msra.mxu1 %v12294_v41 }
0x20f7   : > { %17883 = vmatprep.subr.bf16.mxu1 %v24496_v56  ;;  %v12080_v0 = vpack.c.bf16 %v18981_v31, %v18980_v28 }
0x20f8   : > { %v18989_v6 = vpop.permute.xlu0 %18988 }
0x20f9   : > { %v18964_v38 = vpop.permute.xlu1 %18963  ;;  %v12388_v24 = vsel %vm1186_vm2, %v12080_v0, 0  ;;  %v18991_v10 = vunpack.i.h.bf16 %v18989_v6  ;;  %v18990_v22 = vunpack.i.l.bf16 %v18989_v6 }
0x20fa   : > { %v18966_v21 = vunpack.i.h.bf16 %v18964_v38  ;;  %v18965_v35 = vunpack.i.l.bf16 %v18964_v38 }
0x20fb   : > { %v11976_v4 = vpack.c.bf16 %v18991_v10, %v18990_v22 }
0x20fc   : > { %v18999_v13 = vpop.permute.xlu0 %18998  ;;  %v12079_v37 = vpack.c.bf16 %v18966_v21, %v18965_v35 }
0x20fd   : > { %v18969_v58 = vpop.permute.xlu1 %18968  ;;  %v19001_v27 = vunpack.i.h.bf16 %v18999_v13  ;;  %v19000_v14 = vunpack.i.l.bf16 %v18999_v13 }
0x20fe   : > { %v18971_v5 = vunpack.i.h.bf16 %v18969_v58  ;;  %v18970_v52 = vunpack.i.l.bf16 %v18969_v58  ;;  %v12341_v17 = vsel %vm1186_vm2, %v12079_v37, 0 }
0x20ff   : > { %17878 = vmatpush3.bf16.xpose.msra.mxu0 %v12341_v17  ;;  %v12082_v20 = vpack.c.bf16 %v19001_v27, %v19000_v14 }
0x2100   : > { %v11974_v61 = vpack.c.bf16 %v18971_v5, %v18970_v52  ;;  %v19009_v51 = vpop.permute.xlu0 %19008  ;;  %17889 = vmatprep.subr.bf16.mxu0 %v24496_v56 }
0x2101   : > { %v18974_v59 = vpop.permute.xlu1 %18973  ;;  %v12482_v62 = vsel %vm1186_vm2, %v12082_v20, 0  ;;  %v19011_v12 = vunpack.i.h.bf16 %v19009_v51  ;;  %v19010_v25 = vunpack.i.l.bf16 %v19009_v51 }
0x2102   : > { %v18976_v63 = vunpack.i.h.bf16 %v18974_v59  ;;  %v18975_v32 = vunpack.i.l.bf16 %v18974_v59  ;;  %17874 = vmatmul.mubr.msk.bf16.vlgmr.msra.gmra.mrb[236].mxu1 %vm1186_vm2, %v11974_v61 }
0x2103   : > { %17884 = vmatpush3.bf16.xpose.msra.mxu1 %v12388_v24  ;;  %17885 = vmatprep.mubr.msk.bf16.mxu1 %vm20189_vm1, %v24496_v56  ;;  %v11978_v6 = vpack.c.bf16 %v19011_v12, %v19010_v25 }
0x2104   : > { %v11975_v1 = vpack.c.bf16 %v18976_v63, %v18975_v32  ;;  %v19019_v9 = vpop.permute.xlu0 %19018  ;;  %17895 = vmatprep.subr.bf16.mxu1 %v24496_v56 }
0x2105   : > { %v18984_v47 = vpop.permute.xlu1 %18983  ;;  %v19021_v19 = vunpack.i.h.bf16 %v19019_v9  ;;  %v19020_v46 = vunpack.i.l.bf16 %v19019_v9 }
0x2106   : > { %v18986_v7 = vunpack.i.h.bf16 %v18984_v47  ;;  %v18985_v49 = vunpack.i.l.bf16 %v18984_v47  ;;  %17880 = vmatmul.mubr.msk.bf16.vlgmr.msra.gmra.mrb[32].mxu0 %vm1186_vm2, %v11975_v1 }
0x2107   : > { %17891 = vmatprep.mubr.msk.bf16.mxu0 %vm20189_vm1, %v24496_v56  ;;  %v12084_v41 = vpack.c.bf16 %v19021_v19, %v19020_v46 }
0x2108   : > { %v19029_v3 = vpop.permute.xlu0 %19028  ;;  %v12081_v55 = vpack.c.bf16 %v18986_v7, %v18985_v49 }
0x2109   : > { %v18994_v42 = vpop.permute.xlu1 %18993  ;;  %v12576_v37 = vsel %vm1186_vm2, %v12084_v41, 0  ;;  %v19031_v0 = vunpack.i.h.bf16 %v19029_v3  ;;  %v19030_v5 = vunpack.i.l.bf16 %v19029_v3 }
0x210a   : > { %17886 = vmatmul.mubr.msk.bf16.vlgmr.msra.gmra.mrb[240].mxu1 %vm1186_vm2, %v11976_v4  ;;  %v12435_v15 = vsel %vm1186_vm2, %v12081_v55, 0  ;;  %v18996_v48 = vunpack.i.h.bf16 %v18994_v42  ;;  %v18995_v29 = vunpack.i.l.bf16 %v18994_v42 }
0x210b   : > { %17896 = vmatpush3.bf16.xpose.msra.mxu1 %v12482_v62  ;;  %17890 = vmatpush3.bf16.xpose.msra.mxu0 %v12435_v15  ;;  %v11980_v14 = vpack.c.bf16 %v19031_v0, %v19030_v5 }
0x210c   : > { %v19039_v53 = vpop.permute.xlu0 %19038  ;;  %17897 = vmatprep.mubr.msk.bf16.mxu1 %vm20189_vm1, %v24496_v56  ;;  %17907 = vmatprep.subr.bf16.mxu1 %v24496_v56  ;;  %v11977_v31 = vpack.c.bf16 %v18996_v48, %v18995_v29 }
0x210d   : > { %v19004_v34 = vpop.permute.xlu1 %19003  ;;  %17901 = vmatprep.subr.bf16.mxu0 %v24496_v56  ;;  %v19041_v35 = vunpack.i.h.bf16 %v19039_v53  ;;  %v19040_v13 = vunpack.i.l.bf16 %v19039_v53 }
0x210e   : > { %v19006_v39 = vunpack.i.h.bf16 %v19004_v34  ;;  %v19005_v44 = vunpack.i.l.bf16 %v19004_v34 }
0x210f   : > { %v12086_v27 = vpack.c.bf16 %v19041_v35, %v19040_v13 }
0x2110   : > { %v19049_v28 = vpop.permute.xlu0 %19048  ;;  %v12083_v38 = vpack.c.bf16 %v19006_v39, %v19005_v44 }
0x2111   : > { %v19014_v21 = vpop.permute.xlu1 %19013  ;;  %v12670_v47 = vsel %vm1186_vm2, %v12086_v27, 0  ;;  %v19051_v49 = vunpack.i.h.bf16 %v19049_v28  ;;  %v19050_v20 = vunpack.i.l.bf16 %v19049_v28 }
0x2112   : > { %17892 = vmatmul.mubr.msk.bf16.vlgmr.msra.gmra.mrb[36].mxu0 %vm1186_vm2, %v11977_v31  ;;  %17898 = vmatmul.mubr.msk.bf16.vlgmr.msra.gmra.mrb[244].mxu1 %vm1186_vm2, %v11978_v6  ;;  %v12529_v58 = vsel %vm1186_vm2, %v12083_v38, 0  ;;  %v19016_v52 = vunpack.i.h.bf16 %v19014_v21  ;;  %v19015_v17 = vunpack.i.l.bf16 %v19014_v21 }
0x2113   : > { %17908 = vmatpush3.bf16.xpose.msra.mxu1 %v12576_v37  ;;  %17902 = vmatpush3.bf16.xpose.msra.mxu0 %v12529_v58  ;;  %v11982_v15 = vpack.c.bf16 %v19051_v49, %v19050_v20 }
0x2114   : > { %v19059_v61 = vpop.permute.xlu0 %19058  ;;  %17903 = vmatprep.mubr.msk.bf16.mxu0 %vm20189_vm1, %v24496_v56  ;;  %17909 = vmatprep.mubr.msk.bf16.mxu1 %vm20189_vm1, %v24496_v56  ;;  %v11979_v63 = vpack.c.bf16 %v19016_v52, %v19015_v17 }
0x2115   : > { %v19024_v51 = vpop.permute.xlu1 %19023  ;;  %17919 = vmatprep.subr.bf16.mxu1 %v24496_v56  ;;  %17913 = vmatprep.subr.bf16.mxu0 %v24496_v56  ;;  %v19061_v1 = vunpack.i.h.bf16 %v19059_v61  ;;  %v19060_v9 = vunpack.i.l.bf16 %v19059_v61 }
0x2116   : > { %v19026_v59 = vunpack.i.h.bf16 %v19024_v51  ;;  %v19025_v24 = vunpack.i.l.bf16 %v19024_v51 }
0x2117   : > { %v12088_v46 = vpack.c.bf16 %v19061_v1, %v19060_v9 }
0x2118   : > { %v12085_v32 = vpack.c.bf16 %v19026_v59, %v19025_v24  ;;  %v19069_v22 = vpop.permute.xlu0 %19068 }
0x2119   : > { %v19034_v10 = vpop.permute.xlu1 %19033  ;;  %v12764_v34 = vsel %vm1186_vm2, %v12088_v46, 0  ;;  %v19071_v44 = vunpack.i.h.bf16 %v19069_v22  ;;  %v19070_v41 = vunpack.i.l.bf16 %v19069_v22 }
0x211a   : > { %17904 = vmatmul.mubr.msk.bf16.vlgmr.msra.gmra.mrb[40].mxu0 %vm1186_vm2, %v11979_v63  ;;  %17910 = vmatmul.mubr.msk.bf16.vlgmr.msra.gmra.mrb[248].mxu1 %vm1186_vm2, %v11980_v14  ;;  %v12623_v7 = vsel %vm1186_vm2, %v12085_v32, 0  ;;  %v19036_v4 = vunpack.i.h.bf16 %v19034_v10  ;;  %v19035_v3 = vunpack.i.l.bf16 %v19034_v10 }
0x211b   : > { %17920 = vmatpush3.bf16.xpose.msra.mxu1 %v12670_v47  ;;  %17914 = vmatpush3.bf16.xpose.msra.mxu0 %v12623_v7  ;;  %v11984_v13 = vpack.c.bf16 %v19071_v44, %v19070_v41 }
0x211c   : > { %17915 = vmatprep.mubr.msk.bf16.mxu0 %vm20189_vm1, %v24496_v56  ;;  %17921 = vmatprep.mubr.msk.bf16.mxu1 %vm20189_vm1, %v24496_v56  ;;  %v19079_v62 = vpop.permute.xlu0 %19078  ;;  %v11981_v12 = vpack.c.bf16 %v19036_v4, %v19035_v3  ;;  %v24506_v3 = vld [vmem:[#allocation15_spill] sm:$0xff] }
0x211d   : > { %v19044_v55 = vpop.permute.xlu1 %19043  ;;  %17931 = vmatprep.subr.bf16.mxu1 %v24496_v56  ;;  %17925 = vmatprep.subr.bf16.mxu0 %v24496_v56  ;;  %v19081_v29 = vunpack.i.h.bf16 %v19079_v62  ;;  %v19080_v53 = vunpack.i.l.bf16 %v19079_v62 }
0x211e   : > { %v19046_v42 = vunpack.i.h.bf16 %v19044_v55  ;;  %v19045_v19 = vunpack.i.l.bf16 %v19044_v55 }
0x211f   : > { %v12090_v35 = vpack.c.bf16 %v19081_v29, %v19080_v53 }
0x2120   : > { %v12087_v25 = vpack.c.bf16 %v19046_v42, %v19045_v19  ;;  %v19089_v0 = vpop.permute.xlu0 %19088 }
0x2121   : > { %v19054_v48 = vpop.permute.xlu1 %19053  ;;  %v12858_v52 = vsel %vm1186_vm2, %v12090_v35, 0  ;;  %v19091_v61 = vunpack.i.h.bf16 %v19089_v0  ;;  %v19090_v51 = vunpack.i.l.bf16 %v19089_v0 }
0x2122   : > { %17916 = vmatmul.mubr.msk.bf16.vlgmr.msra.gmra.mrb[44].mxu0 %vm1186_vm2, %v11981_v12  ;;  %17922 = vmatmul.mubr.msk.bf16.vlgmr.msra.gmra.mrb[252].mxu1 %vm1186_vm2, %v11982_v15  ;;  %v12717_v39 = vsel %vm1186_vm2, %v12087_v25, 0  ;;  %v19056_v6 = vunpack.i.h.bf16 %v19054_v48  ;;  %v19055_v31 = vunpack.i.l.bf16 %v19054_v48 }
0x2123   : > { %17932 = vmatpush3.bf16.xpose.msra.mxu1 %v12764_v34  ;;  %17926 = vmatpush3.bf16.xpose.msra.mxu0 %v12717_v39  ;;  %v11986_v32 = vpack.c.bf16 %v19091_v61, %v19090_v51 }
0x2124   : > { %17927 = vmatprep.mubr.msk.bf16.mxu0 %vm20189_vm1, %v24496_v56  ;;  %17933 = vmatprep.mubr.msk.bf16.mxu1 %vm20189_vm1, %v24496_v56  ;;  %v11983_v37 = vpack.c.bf16 %v19056_v6, %v19055_v31 }
0x2125   : > { %v19064_v28 = vpop.permute.xlu1 %19063  ;;  %17943 = vmatprep.subr.bf16.mxu1 %v24496_v56  ;;  %17937 = vmatprep.subr.bf16.mxu0 %v24496_v56 }
0x2126   : > { %v19066_v38 = vunpack.i.h.bf16 %v19064_v28  ;;  %v19065_v21 = vunpack.i.l.bf16 %v19064_v28 }
0x2128   : > { %v12089_v58 = vpack.c.bf16 %v19066_v38, %v19065_v21 }
0x2129   : > { %v19074_v5 = vpop.permute.xlu1 %19073 }
0x212a   : > { %17928 = vmatmul.mubr.msk.bf16.vlgmr.msra.gmra.mrb[48].mxu0 %vm1186_vm2, %v11983_v37  ;;  %17934 = vmatmul.mubr.msk.bf16.vlgmr.msra.gmra.mrb[0].mxu1 %vm1186_vm2, %v11984_v13  ;;  %v12811_v17 = vsel %vm1186_vm2, %v12089_v58, 0  ;;  %v19076_v59 = vunpack.i.h.bf16 %v19074_v5  ;;  %v19075_v24 = vunpack.i.l.bf16 %v19074_v5 }
0x212b   : > { %17944 = vmatpush3.bf16.xpose.msra.mxu1 %v12858_v52  ;;  %17938 = vmatpush3.bf16.xpose.msra.mxu0 %v12811_v17 }
0x212c   : > { %17939 = vmatprep.mubr.msk.bf16.mxu0 %vm20189_vm1, %v24496_v56  ;;  %17945 = vmatprep.mubr.msk.bf16.mxu1 %vm20189_vm1, %v24496_v56  ;;  %v11985_v10 = vpack.c.bf16 %v19076_v59, %v19075_v24 }
0x212d   : > { %v19084_v27 = vpop.permute.xlu1 %19083  ;;  %17955 = vmatprep.subr.bf16.mxu1 %v24496_v56  ;;  %17949 = vmatprep.subr.bf16.mxu0 %v24496_v56 }
0x212e   : > { %v19086_v14 = vunpack.i.h.bf16 %v19084_v27  ;;  %v19085_v63 = vunpack.i.l.bf16 %v19084_v27 }
0x2130   : > { %v12091_v22 = vpack.c.bf16 %v19086_v14, %v19085_v63 }
0x2131   : > { %v19094_v1 = vpop.permute.xlu1 %19093 }
0x2132   : > { %17940 = vmatmul.mubr.msk.bf16.vlgmr.msra.gmra.mrb[52].mxu0 %vm1186_vm2, %v11985_v10  ;;  %17946 = vmatmul.mubr.msk.bf16.vlgmr.msra.gmra.mrb[4].mxu1 %vm1186_vm2, %v11986_v32  ;;  %v12905_v9 = vsel %vm1186_vm2, %v12091_v22, 0  ;;  %v19096_v47 = vunpack.i.h.bf16 %v19094_v1  ;;  %v19095_v7 = vunpack.i.l.bf16 %v19094_v1 }
0x2133   : > { %17956 = vmatpush3.bf16.msra.mxu1 %v12180_v50  ;;  %17950 = vmatpush3.bf16.xpose.msra.mxu0 %v12905_v9 }
0x2134   : > { %17951 = vmatprep.mubr.msk.bf16.mxu0 %vm20189_vm1, %v24496_v56  ;;  %17961 = vmatprep.subr.bf16.mxu0 %v24496_v56  ;;  %v11987_v49 = vpack.c.bf16 %v19096_v47, %v19095_v7 }
0x2135   : > { %17957 = vmatprep.mubr.msk.bf16.mxu1 %vm20189_vm1, %v24496_v56  ;;  %17967 = vmatprep.subr.bf16.mxu1 %v24496_v56 }
0x213a   : > { %17952 = vmatmul.mubr.msk.bf16.vlgmr.msra.gmra.mrb[56].mxu0 %vm1186_vm2, %v11987_v49 }
0x213b   : > { %17962 = vmatpush3.bf16.msra.mxu0 %v12181_v18  ;;  %17963 = vmatprep.mubr.msk.bf16.mxu0 %vm20189_vm1, %v24496_v56 }
0x213c   : > { %17973 = vmatprep.subr.bf16.mxu0 %v24496_v56 }
0x2159   : > { %v12236_v2 = vpop.f32.mrb[24].mxu0 }
0x215a   : > { %v23611_v50 = vadd.f32 %v12236_v2, %v24505_v8  ;;  %v17863_v20 = vpop.f32.mrb[25].mxu0 }
0x215b   : > { %v12239_v4 = vpop.f32.mrb[26].mxu0 }
0x215c   : > { %v23614_v55 = vadd.f32 %v12239_v4, %v24506_v3  ;;  %v17864_v42 = vpop.f32.mrb[27].mxu0  ;;  %v12948_v19 = vsel %vm1186_vm2, %v23611_v50, -inf }
0x215d   : > { %12949 = vmax.xlane.f32.xlu0 %v12948_v19 }
0x215e   : > { %v12951_v30 = vsel %vm1186_vm2, %v23614_v55, -inf }
0x215f   : > { %12952 = vmax.xlane.f32.xlu1 %v12951_v30 }
0x2161   : > { %v12283_v57 = vpop.f32.mrb[28].mxu0 }
0x2162   : > { %v23621_v18 = vadd.f32 %v12283_v57, %v24505_v8  ;;  %v17869_v46 = vpop.f32.mrb[29].mxu0 }
0x2163   : > { %v12286_v62 = vpop.f32.mrb[30].mxu0 }
0x2164   : > { %v23624_v15 = vadd.f32 %v12286_v62, %v24506_v3  ;;  %v17870_v12 = vpop.f32.mrb[31].mxu0  ;;  %v12954_v25 = vsel %vm1186_vm2, %v23621_v18, -inf }
0x2165   : > { %12955 = vmax.xlane.f32.xlu0 %v12954_v25 }
0x2166   : > { %v12957_v48 = vsel %vm1186_vm2, %v23624_v15, -inf }
0x2169   : > { %12958 = vmax.xlane.f32.xlu0 %v12957_v48 }
0x21d5   : > { %v12330_v29 = vpop.f32.mrb[236].mxu1 }
0x21d6   : > { %v23631_v53 = vadd.f32 %v12330_v29, %v24505_v8  ;;  %v17875_v34 = vpop.f32.mrb[237].mxu1 }
0x21d7   : > { %v12333_v39 = vpop.f32.mrb[238].mxu1 }
0x21d8   : > { %v23634_v44 = vadd.f32 %v12333_v39, %v24506_v3  ;;  %v17876_v41 = vpop.f32.mrb[239].mxu1  ;;  %v12960_v6 = vsel %vm1186_vm2, %v23631_v53, -inf }
0x21d9   : > { %v12377_v31 = vpop.f32.mrb[32].mxu0  ;;  %12961 = vmax.xlane.f32.xlu0 %v12960_v6 }
0x21da   : > { %v23639_v28 = vadd.f32 %v12377_v31, %v24505_v8  ;;  %v17881_v38 = vpop.f32.mrb[33].mxu0  ;;  %v12963_v21 = vsel %vm1186_vm2, %v23634_v44, -inf }
0x21db   : > { %v12380_v35 = vpop.f32.mrb[34].mxu0  ;;  %12964 = vmax.xlane.f32.xlu1 %v12963_v21 }
0x21dc   : > { %v23644_v13 = vadd.f32 %v12380_v35, %v24506_v3  ;;  %v17882_v37 = vpop.f32.mrb[35].mxu0  ;;  %v12966_v58 = vsel %vm1186_vm2, %v23639_v28, -inf }
0x21dd   : > { %12967 = vmax.xlane.f32.xlu0 %v12966_v58  ;;  %v12424_v0 = vpop.f32.mrb[240].mxu1 }
0x21de   : > { %v23649_v5 = vadd.f32 %v12424_v0, %v24505_v8  ;;  %v17887_v52 = vpop.f32.mrb[241].mxu1  ;;  %v12969_v17 = vsel %vm1186_vm2, %v23644_v13, -inf }
0x21df   : > { %12970 = vmax.xlane.f32.xlu1 %v12969_v17  ;;  %v12427_v61 = vpop.f32.mrb[242].mxu1 }
0x21e0   : > { %v23654_v51 = vadd.f32 %v12427_v61, %v24506_v3  ;;  %v17888_v59 = vpop.f32.mrb[243].mxu1  ;;  %v12972_v24 = vsel %vm1186_vm2, %v23649_v5, -inf }
0x21e1   : > { %12973 = vmax.xlane.f32.xlu0 %v12972_v24 }
0x21e2   : > { %v12975_v27 = vsel %vm1186_vm2, %v23654_v51, -inf }
0x21e3   : > { %12976 = vmax.xlane.f32.xlu1 %v12975_v27 }
0x21e5   : > { %v12471_v14 = vpop.f32.mrb[36].mxu0  ;;  %v12518_v63 = vpop.f32.mrb[244].mxu1 }
0x21e6   : > { %v23661_v32 = vadd.f32 %v12471_v14, %v24505_v8  ;;  %v17893_v10 = vpop.f32.mrb[37].mxu0  ;;  %v17899_v22 = vpop.f32.mrb[245].mxu1  ;;  %v23664_v47 = vadd.f32 %v12518_v63, %v24505_v8 }
0x21e7   : > { %v12474_v1 = vpop.f32.mrb[38].mxu0  ;;  %v12521_v9 = vpop.f32.mrb[246].mxu1 }
0x21e8   : > { %v23667_v7 = vadd.f32 %v12474_v1, %v24506_v3  ;;  %v17894_v49 = vpop.f32.mrb[39].mxu0  ;;  %v17900_v2 = vpop.f32.mrb[247].mxu1  ;;  %v12978_v20 = vsel %vm1186_vm2, %v23661_v32, -inf  ;;  %v23672_v4 = vadd.f32 %v12521_v9, %v24506_v3  ;;  %v12984_v19 = vsel %vm1186_vm2, %v23664_v47, -inf }
0x21e9   : > { %12979 = vmax.xlane.f32.xlu0 %v12978_v20 }
0x21ea   : > { %v12981_v42 = vsel %vm1186_vm2, %v23667_v7, -inf  ;;  %v12987_v25 = vsel %vm1186_vm2, %v23672_v4, -inf }
0x21eb   : > { %12982 = vmax.xlane.f32.xlu1 %v12981_v42 }
0x21ed   : > { %v12565_v30 = vpop.f32.mrb[40].mxu0  ;;  %12985 = vmax.xlane.f32.xlu0 %v12984_v19  ;;  %v12612_v57 = vpop.f32.mrb[248].mxu1 }
0x21ee   : > { %v23679_v46 = vadd.f32 %v12565_v30, %v24505_v8  ;;  %v17905_v62 = vpop.f32.mrb[41].mxu0  ;;  %v17911_v12 = vpop.f32.mrb[249].mxu1 }
0x21ef   : > { %v12568_v48 = vpop.f32.mrb[42].mxu0  ;;  %12988 = vmax.xlane.f32.xlu1 %v12987_v25  ;;  %v12615_v29 = vpop.f32.mrb[250].mxu1 }
0x21f0   : > { %v17906_v34 = vpop.f32.mrb[43].mxu0  ;;  %v17912_v39 = vpop.f32.mrb[251].mxu1  ;;  %v12990_v41 = vsel %vm1186_vm2, %v23679_v46, -inf }
0x21f1   : > { %12991 = vmax.xlane.f32.xlu0 %v12990_v41  ;;  %v23697_v19 = vpop.permute.xlu0 %19098  ;;  %v23705_v39 = vpop.permute.xlu1 %19103 }
0x21f5   : > { %v12659_v6 = vpop.f32.mrb[44].mxu0  ;;  %v12706_v31 = vpop.f32.mrb[252].mxu1 }
0x21f6   : > { %v17917_v38 = vpop.f32.mrb[45].mxu0  ;;  %v17923_v21 = vpop.f32.mrb[253].mxu1 }
0x21f7   : > { %v12662_v35 = vpop.f32.mrb[46].mxu0  ;;  %v12709_v37 = vpop.f32.mrb[254].mxu1 }
0x21f8   : > { %v17918_v58 = vpop.f32.mrb[47].mxu0  ;;  %v17924_v0 = vpop.f32.mrb[255].mxu1 }
0x21f9   : > { %v23703_v34 = vpop.permute.xlu0 %19108  ;;  %v23709_v38 = vpop.permute.xlu1 %19113  ;;  %v23716_v0 = vadd.f32 %v12568_v48, %v24506_v3 }
0x21fd   : > { %v12753_v52 = vpop.f32.mrb[48].mxu0  ;;  %v12800_v17 = vpop.f32.mrb[0].mxu1 }
0x21fe   : > { %v17929_v61 = vpop.f32.mrb[49].mxu0  ;;  %v17935_v59 = vpop.f32.mrb[1].mxu1 }
0x21ff   : > { %v12756_v24 = vpop.f32.mrb[50].mxu0  ;;  %v12803_v27 = vpop.f32.mrb[2].mxu1  ;;  %v23719_v59 = vadd.f32 %v12612_v57, %v24505_v8  ;;  %v23734_v57 = vadd.f32 %v12662_v35, %v24506_v3 }
0x2200   : > { %v17930_v14 = vpop.f32.mrb[51].mxu0  ;;  %19138 = vrot.lane.b32.xlu1 %v23479_v26, %s24493_s26  ;;  %v17936_v63 = vpop.f32.mrb[3].mxu1 }
0x2201   : > { %v23707_v41 = vpop.permute.xlu0 %19118  ;;  %v23713_v58 = vpop.permute.xlu1 %19128  ;;  %v23722_v63 = vadd.f32 %v12615_v29, %v24506_v3  ;;  %v12996_v48 = vsel %vm1186_vm2, %v23719_v59, -inf  ;;  %v13005_v35 = vsel %vm1186_vm2, %v23734_v57, -inf }
0x2203   : > { %v12999_v29 = vsel %vm1186_vm2, %v23722_v63, -inf }
0x2205   : > { %v23687_v10 = vpop.f32.mrb[52].mxu0  ;;  %v23689_v22 = vpop.f32.mrb[4].mxu1 }
0x2206   : > { %v17941_v1 = vpop.f32.mrb[53].mxu0  ;;  %v17947_v9 = vpop.f32.mrb[5].mxu1 }
0x2207   : > { %v23691_v49 = vpop.f32.mrb[54].mxu0  ;;  %19133 = vrot.lane.b32.xlu0 %v23473_v33, %s24492_s19  ;;  %v23695_v2 = vpop.f32.mrb[6].mxu1  ;;  %v12993_v1 = vsel %vm1186_vm2, %v23716_v0, -inf  ;;  %s15429_s19 = sshll.u32 %s515_s29, 4  ;;  %s24364_s19 = int_to_ptr.vmem [resolvable:$true] %s15429_s19 }
0x2208   : > { %v17942_v20 = vpop.f32.mrb[55].mxu0  ;;  %v17948_v42 = vpop.f32.mrb[7].mxu1  ;;  %s20123_s27 = scalar_lea.vmem %s24364_s19, 512 }
0x2209   : > { %v23711_v21 = vpop.permute.xlu0 %19123  ;;  %v12953_v14 = vpop.xlane.xlu1 %12952  ;;  %v23728_v20 = vadd.f32 %v12659_v6, %v24505_v8  ;;  %p20124_p11 = scmp.ne.s32.totalorder %s24364_s19, %s20123_s27 }
0x220a   : > { %v13045_v42 = vsub.f32 %v23614_v55, %v12953_v14  ;;  %v23744_v55 = vadd.f32 %v12709_v37, %v24506_v3  ;;  %v23749_v14 = vadd.f32 %v12753_v52, %v24505_v8 }
0x220b   : > { %v13002_v6 = vsel %vm1186_vm2, %v23728_v20, -inf  ;;  %p20125_p12 = pnand %p20124_p11, %p20324_p5 }
0x220c   : > { %v13011_v37 = vsel %vm1186_vm2, %v23744_v55, -inf  ;;  %v13014_v52 = vsel %vm1186_vm2, %v23749_v14, -inf }
0x220d   : > { %v23699_v30 = vpop.f32.mrb[56].mxu0  ;;  %v12950_v61 = vpop.xlane.xlu0 %12949  ;;  %p20126_p13 = pneg %p20125_p12 }
0x220e   : > { %v17953_v62 = vpop.f32.mrb[57].mxu0  ;;  %v13044_v9 = vsub.f32 %v23611_v50, %v12950_v61  ;;  %v23739_v50 = vadd.f32 %v12706_v31, %v24505_v8  ;;  %v13078_v61 = vmul.f32 1.442695, %v13045_v42  ;;  %v23760_v42 = vadd.f32 %v12800_v17, %v24505_v8 }
0x220f   : > { %v23701_v12 = vpop.f32.mrb[58].mxu0 }
0x2210   : > { %v17954_v25 = vpop.f32.mrb[59].mxu0  ;;  %v13076_v62 = vmul.f32 1.442695, %v13044_v9  ;;  %v13008_v31 = vsel %vm1186_vm2, %v23739_v50, -inf  ;;  %v23754_v9 = vadd.f32 %v12756_v24, %v24506_v3 }
0x2211   : > { %v12956_v25 = vpop.xlane.xlu0 %12955 }
0x2212   : > { %19975 = vpow2.f32 %v13076_v62  ;;  %v23766_v62 = vadd.f32 %v12803_v27, %v24506_v3  ;;  %v13017_v24 = vsel %vm1186_vm2, %v23754_v9, -inf  ;;  %v23780_v27 = vadd.f32 %v23687_v10, %v24505_v8 }
0x2213   : > { %19977 = vpow2.f32 %v13078_v61 }
0x2214   : > { %v13023_v61 = vsel %vm1186_vm2, %v23766_v62, -inf  ;;  %v13026_v10 = vsel %vm1186_vm2, %v23780_v27, -inf }
0x2224   : > { %12994 = vmax.xlane.f32.xlu1 %v12993_v1  ;;  %v12959_v1 = vpop.xlane.xlu0 %12958 }
0x2226   : > { %12997 = vmax.xlane.f32.xlu0 %v12996_v48  ;;  %v13046_v48 = vsub.f32 %v23621_v18, %v12956_v25  ;;  %v13020_v18 = vsel %vm1186_vm2, %v23760_v42, -inf  ;;  %v23772_v25 = vpop.eup %19975 }
0x2228   : > { %13000 = vmax.xlane.f32.xlu1 %v12999_v29  ;;  %v13047_v29 = vsub.f32 %v23624_v15, %v12959_v1  ;;  %v23776_v15 = vpop.eup %19977 }
0x2229   : > { %v13143_v1 = vsel %vm1186_vm2, %v23776_v15, 0.0 }
0x222a   : > { %13003 = vmax.xlane.f32.xlu0 %v13002_v6  ;;  %v13080_v6 = vmul.f32 1.442695, %v13046_v48  ;;  %v13082_v17 = vmul.f32 1.442695, %v13047_v29  ;;  %v23798_v48 = vadd.f32 %v23695_v2, %v24506_v3  ;;  %v23812_v2 = vadd.f32 %v23699_v30, %v24505_v8 }
0x222c   : > { %13006 = vmax.xlane.f32.xlu1 %v13005_v35  ;;  %19979 = vpow2.f32 %v13080_v6  ;;  %v13140_v35 = vsel %vm1186_vm2, %v23772_v25, 0.0 }
0x222d   : > { %19981 = vpow2.f32 %v13082_v17 }
0x222e   : > { %13009 = vmax.xlane.f32.xlu0 %v13008_v31  ;;  %v23786_v31 = vadd.f32 %v23691_v49, %v24506_v3 }
0x2230   : > { %13012 = vmax.xlane.f32.xlu1 %v13011_v37  ;;  %v23792_v37 = vadd.f32 %v23689_v22, %v24505_v8  ;;  %v13029_v49 = vsel %vm1186_vm2, %v23786_v31, -inf  ;;  %v13035_v22 = vsel %vm1186_vm2, %v23798_v48, -inf }
0x2232   : > { %13015 = vmax.xlane.f32.xlu0 %v13014_v52  ;;  %v13032_v52 = vsel %vm1186_vm2, %v23792_v37, -inf }
0x2234   : > { %13018 = vmax.xlane.f32.xlu1 %v13017_v24 }
0x2236   : > { %13021 = vmax.xlane.f32.xlu0 %v13020_v18  ;;  %v23804_v29 = vpop.eup %19979  ;;  %v23818_v18 = vadd.f32 %v23701_v12, %v24506_v3 }
0x2237   : > { %v23808_v24 = vpop.eup %19981  ;;  %v13146_v6 = vsel %vm1186_vm2, %v23804_v29, 0.0 }
0x2238   : > { %13024 = vmax.xlane.f32.xlu1 %v13023_v61  ;;  %v13149_v17 = vsel %vm1186_vm2, %v23808_v24, 0.0  ;;  %v13038_v61 = vsel %vm1186_vm2, %v23812_v2, -inf  ;;  %v13041_v8 = vsel %vm1186_vm2, %v23818_v18, -inf }
0x223a   : > { %13141 = vadd.xlane.f32.xlu0 %v13140_v35 }
0x223c   : > { %13144 = vadd.xlane.f32.xlu1 %v13143_v1 }
0x223e   : > { %13027 = vmax.xlane.f32.xlu0 %v13026_v10 }
0x2240   : > { %13030 = vmax.xlane.f32.xlu1 %v13029_v49 }
0x2242   : > { %13033 = vmax.xlane.f32.xlu0 %v13032_v52 }
0x2244   : > { %13036 = vmax.xlane.f32.xlu1 %v13035_v22 }
0x2246   : > { %13147 = vadd.xlane.f32.xlu0 %v13146_v6 }
0x2248   : > { %13150 = vadd.xlane.f32.xlu1 %v13149_v17 }
0x224a   : > { %13039 = vmax.xlane.f32.xlu0 %v13038_v61 }
0x224c   : > { %13042 = vmax.xlane.f32.xlu1 %v13041_v8 }
0x2266   : > { %v12962_v30 = vpop.xlane.xlu0 %12961 }
0x2267   : > { %v13048_v35 = vsub.f32 %v23631_v53, %v12962_v30 }
0x2268   : > { %v12965_v1 = vpop.xlane.xlu1 %12964 }
0x2269   : > { %v13084_v10 = vmul.f32 1.442695, %v13048_v35  ;;  %v13049_v3 = vsub.f32 %v23634_v44, %v12965_v1 }
0x226a   : > { %v12968_v12 = vpop.xlane.xlu0 %12967 }
0x226b   : > { %19983 = vpow2.f32 %v13084_v10  ;;  %v13086_v49 = vmul.f32 1.442695, %v13049_v3  ;;  %v13050_v52 = vsub.f32 %v23639_v28, %v12968_v12 }
0x226c   : > { %v12971_v22 = vpop.xlane.xlu1 %12970 }
0x226d   : > { %19985 = vpow2.f32 %v13086_v49  ;;  %v13088_v6 = vmul.f32 1.442695, %v13050_v52  ;;  %v13051_v17 = vsub.f32 %v23644_v13, %v12971_v22 }
0x226e   : > { %v12974_v61 = vpop.xlane.xlu0 %12973 }
0x226f   : > { %19987 = vpow2.f32 %v13088_v6  ;;  %v13090_v8 = vmul.f32 1.442695, %v13051_v17  ;;  %v13052_v16 = vsub.f32 %v23649_v5, %v12974_v61 }
0x2270   : > { %v12977_v53 = vpop.xlane.xlu1 %12976 }
0x2271   : > { %19989 = vpow2.f32 %v13090_v8  ;;  %v13092_v30 = vmul.f32 1.442695, %v13052_v16  ;;  %v13053_v44 = vsub.f32 %v23654_v51, %v12977_v53 }
0x2273   : > { %19991 = vpow2.f32 %v13092_v30  ;;  %v13094_v35 = vmul.f32 1.442695, %v13053_v44 }
0x2275   : > { %v23832_v1 = vpop.eup %19983  ;;  %19993 = vpow2.f32 %v13094_v35 }
0x2276   : > { %v12980_v28 = vpop.xlane.xlu0 %12979  ;;  %v13152_v10 = vsel %vm1186_vm2, %v23832_v1, 0.0 }
0x2277   : > { %v23836_v13 = vpop.eup %19985  ;;  %v13054_v3 = vsub.f32 %v23661_v32, %v12980_v28  ;;  %13153 = vadd.xlane.f32.xlu0 %v13152_v10 }
0x2278   : > { %v12983_v5 = vpop.xlane.xlu1 %12982  ;;  %v13155_v16 = vsel %vm1186_vm2, %v23836_v13, 0.0 }
0x2279   : > { %v23841_v12 = vpop.eup %19987  ;;  %v13096_v51 = vmul.f32 1.442695, %v13054_v3  ;;  %v13055_v49 = vsub.f32 %v23667_v7, %v12983_v5  ;;  %13156 = vadd.xlane.f32.xlu1 %v13155_v16 }
0x227a   : > { %v12986_v52 = vpop.xlane.xlu0 %12985  ;;  %v13158_v22 = vsel %vm1186_vm2, %v23841_v12, 0.0 }
0x227b   : > { %v23846_v6 = vpop.eup %19989  ;;  %19995 = vpow2.f32 %v13096_v51  ;;  %v13056_v32 = vsub.f32 %v23664_v47, %v12986_v52  ;;  %13159 = vadd.xlane.f32.xlu0 %v13158_v22  ;;  %v13098_v53 = vmul.f32 1.442695, %v13055_v49 }
0x227c   : > { %v12989_v17 = vpop.xlane.xlu1 %12988  ;;  %v13161_v61 = vsel %vm1186_vm2, %v23846_v6, 0.0 }
0x227d   : > { %v23851_v8 = vpop.eup %19991  ;;  %v13100_v30 = vmul.f32 1.442695, %v13056_v32  ;;  %v13057_v7 = vsub.f32 %v23672_v4, %v12989_v17  ;;  %13162 = vadd.xlane.f32.xlu1 %v13161_v61 }
0x227e   : > { %v12992_v44 = vpop.xlane.xlu0 %12991  ;;  %v13164_v35 = vsel %vm1186_vm2, %v23851_v8, 0.0 }
0x227f   : > { %v23856_v28 = vpop.eup %19993  ;;  %19997 = vpow2.f32 %v13100_v30  ;;  %v13058_v47 = vsub.f32 %v23679_v46, %v12992_v44  ;;  %13165 = vadd.xlane.f32.xlu0 %v13164_v35  ;;  %v13102_v3 = vmul.f32 1.442695, %v13057_v7 }
0x2280   : > { %v13167_v10 = vsel %vm1186_vm2, %v23856_v28, 0.0  ;;  %19999 = vpow2.f32 %v13098_v53  ;;  %v23881_v53 = vpop.permute.xlu1 %19138 }
0x2281   : > { %v13104_v5 = vmul.f32 1.442695, %v13058_v47  ;;  %13168 = vadd.xlane.f32.xlu1 %v13167_v10 }
0x2282   : > { %v23883_v30 = vpop.permute.xlu0 %19133 }
0x2283   : > { %20001 = vpow2.f32 %v13104_v5 }
0x2284   : > { %20003 = vpow2.f32 %v13102_v3 }
0x2285   : > { %v23861_v4 = vpop.eup %19995 }
0x2286   : > { %v13170_v16 = vsel %vm1186_vm2, %v23861_v4, 0.0 }
0x2287   : > { %13171 = vadd.xlane.f32.xlu0 %v13170_v16 }
0x2289   : > { %v23865_v51 = vpop.eup %19997 }
0x228a   : > { %v13176_v46 = vsel %vm1186_vm2, %v23865_v51, 0.0  ;;  %v23869_v49 = vpop.eup %19999 }
0x228b   : > { %13177 = vadd.xlane.f32.xlu1 %v13176_v46  ;;  %v13173_v32 = vsel %vm1186_vm2, %v23869_v49, 0.0 }
0x228d   : > { %v23871_v52 = vpop.eup %20001 }
0x228e   : > { %v13182_v22 = vsel %vm1186_vm2, %v23871_v52, 0.0  ;;  %v23877_v17 = vpop.eup %20003 }
0x228f   : > { %13183 = vadd.xlane.f32.xlu0 %v13182_v22  ;;  %13174 = vadd.xlane.f32.xlu1 %v13173_v32  ;;  %v13179_v61 = vsel %vm1186_vm2, %v23877_v17, 0.0 }
0x2293   : > { %13180 = vadd.xlane.f32.xlu1 %v13179_v61 }
0x22b1   : > { %v12995_v7 = vpop.xlane.xlu1 %12994 }
0x22b2   : > { %v13059_v44 = vsub.f32 %v23716_v0, %v12995_v7 }
0x22b3   : > { %v12998_v35 = vpop.xlane.xlu0 %12997 }
0x22b4   : > { %v13060_v47 = vsub.f32 %v23719_v59, %v12998_v35  ;;  %v13106_v3 = vmul.f32 1.442695, %v13059_v44 }
0x22b5   : > { %v13001_v10 = vpop.xlane.xlu1 %13000 }
0x22b6   : > { %v13108_v5 = vmul.f32 1.442695, %v13060_v47  ;;  %v13061_v16 = vsub.f32 %v23722_v63, %v13001_v10 }
0x22b7   : > { %v13004_v46 = vpop.xlane.xlu0 %13003 }
0x22b8   : > { %20005 = vpow2.f32 %v13108_v5  ;;  %v13062_v22 = vsub.f32 %v23728_v20, %v13004_v46  ;;  %v13110_v61 = vmul.f32 1.442695, %v13061_v16 }
0x22b9   : > { %v13007_v32 = vpop.xlane.xlu1 %13006  ;;  %20007 = vpow2.f32 %v13106_v3 }
0x22ba   : > { %v13112_v54 = vmul.f32 1.442695, %v13062_v22  ;;  %v13063_v7 = vsub.f32 %v23734_v57, %v13007_v32 }
0x22bb   : > { %v13010_v43 = vpop.xlane.xlu0 %13009 }
0x22bc   : > { %20009 = vpow2.f32 %v13112_v54  ;;  %v13064_v0 = vsub.f32 %v23739_v50, %v13010_v43  ;;  %v13114_v47 = vmul.f32 1.442695, %v13063_v7 }
0x22bd   : > { %v13013_v59 = vpop.xlane.xlu1 %13012  ;;  %20011 = vpow2.f32 %v13110_v61 }
0x22be   : > { %v13116_v44 = vmul.f32 1.442695, %v13064_v0  ;;  %v13065_v63 = vsub.f32 %v23744_v55, %v13013_v59 }
0x22bf   : > { %v13016_v35 = vpop.xlane.xlu0 %13015 }
0x22c0   : > { %20013 = vpow2.f32 %v13116_v44  ;;  %v13118_v57 = vmul.f32 1.442695, %v13065_v63  ;;  %v13066_v55 = vsub.f32 %v23749_v14, %v13016_v35 }
0x22c1   : > { %v13019_v10 = vpop.xlane.xlu1 %13018  ;;  %20015 = vpow2.f32 %v13114_v47 }
0x22c2   : > { %v23892_v5 = vpop.eup %20005  ;;  %v13067_v20 = vsub.f32 %v23754_v9, %v13019_v10  ;;  %v13120_v44 = vmul.f32 1.442695, %v13066_v55 }
0x22c3   : > { %v13022_v3 = vpop.xlane.xlu0 %13021  ;;  %v13188_v54 = vsel %vm1186_vm2, %v23892_v5, 0.0  ;;  %v23897_v43 = vpop.eup %20007 }
0x22c4   : > { %v13122_v50 = vmul.f32 1.442695, %v13067_v20  ;;  %13189 = vadd.xlane.f32.xlu1 %v13188_v54  ;;  %v13185_v61 = vsel %vm1186_vm2, %v23897_v43, 0.0  ;;  %v13068_v59 = vsub.f32 %v23760_v42, %v13022_v3 }
0x22c5   : > { %v13025_v16 = vpop.xlane.xlu1 %13024 }
0x22c6   : > { %v23899_v46 = vpop.eup %20009  ;;  %20017 = vpow2.f32 %v13122_v50  ;;  %v13069_v22 = vsub.f32 %v23766_v62, %v13025_v16  ;;  %v13124_v47 = vmul.f32 1.442695, %v13068_v59 }
0x22c7   : > { %v13142_v32 = vpop.xlane.xlu0 %13141  ;;  %v13194_v9 = vsel %vm1186_vm2, %v23899_v46, 0.0  ;;  %v23907_v0 = vpop.eup %20011  ;;  %20019 = vpow2.f32 %v13118_v57 }
0x22c8   : > { %v13126_v7 = vmul.f32 1.442695, %v13069_v22  ;;  %13195 = vadd.xlane.f32.xlu0 %v13194_v9  ;;  %13186 = vadd.xlane.f32.xlu1 %v13185_v61  ;;  %20021 = vrcp.f32 %v13142_v32  ;;  %v13191_v35 = vsel %vm1186_vm2, %v23907_v0, 0.0 }
0x22c9   : > { %v13145_v14 = vpop.xlane.xlu1 %13144 }
0x22ca   : > { %20023 = vpow2.f32 %v13126_v7  ;;  %v23912_v63 = vpop.eup %20013 }
0x22cb   : > { %20025 = vrcp.f32 %v13145_v14  ;;  %v13028_v62 = vpop.xlane.xlu0 %13027  ;;  %v23916_v42 = vpop.eup %20015  ;;  %v13200_v57 = vsel %vm1186_vm2, %v23912_v63, 0.0 }
0x22cc   : > { %13192 = vadd.xlane.f32.xlu1 %v13191_v35  ;;  %20027 = vpow2.f32 %v13120_v44  ;;  %v13070_v20 = vsub.f32 %v23780_v27, %v13028_v62  ;;  %v13197_v7 = vsel %vm1186_vm2, %v23916_v42, 0.0  ;;  %v19101_v44 = vunpack.i.h.bf16 %v23697_v19 }
0x22cd   : > { %v13031_v10 = vpop.xlane.xlu1 %13030  ;;  %20029 = vpow2.f32 %v13124_v47  ;;  %v19100_v62 = vunpack.i.l.bf16 %v23697_v19 }
0x22ce   : > { %v13071_v54 = vsub.f32 %v23786_v31, %v13031_v10  ;;  %v13128_v27 = vmul.f32 1.442695, %v13070_v20 }
0x22cf   : > { %v13034_v3 = vpop.xlane.xlu0 %13033 }
0x22d0   : > { %v23920_v50 = vpop.eup %20017  ;;  %v13130_v16 = vmul.f32 1.442695, %v13071_v54  ;;  %13201 = vadd.xlane.f32.xlu1 %v13200_v57  ;;  %v13072_v31 = vsub.f32 %v23792_v37, %v13034_v3 }
0x22d1   : > { %v23922_v55 = vpop.xlane.xlu1 %13036  ;;  %v13209_v22 = vsel %vm1186_vm2, %v23920_v50, 0.0  ;;  %v23926_v32 = vpop.eup %20019 }
0x22d2   : > { %20031 = vpow2.f32 %v13130_v16  ;;  %13210 = vadd.xlane.f32.xlu0 %v13209_v22  ;;  %v20022_v9 = vpop.eup %20021  ;;  %v13132_v20 = vmul.f32 1.442695, %v13072_v31  ;;  %v13203_v3 = vsel %vm1186_vm2, %v23926_v32, 0.0  ;;  %v12182_v22 = vpack.c.bf16 %v19101_v44, %v19100_v62 }
0x22d3   : > { %v13148_v61 = vpop.xlane.xlu0 %13147  ;;  %v13268_v37 = vmul.f32 %v20022_v9, %v23772_v25  ;;  %v19106_v44 = vunpack.i.h.bf16 %v23705_v39  ;;  %v19105_v62 = vunpack.i.l.bf16 %v23705_v39 }
0x22d4   : > { %v23931_v59 = vpop.eup %20023  ;;  %13198 = vadd.xlane.f32.xlu1 %v13197_v7  ;;  %20033 = vrcp.f32 %v13148_v61 }
0x22d5   : > { %v20026_v14 = vpop.eup %20025  ;;  %v13151_v35 = vpop.xlane.xlu1 %13150  ;;  %v13215_v47 = vsel %vm1186_vm2, %v23931_v59, 0.0  ;;  %20035 = vpow2.f32 %v13128_v27 }
0x22d6   : > { %v13269_v10 = vmul.f32 %v20026_v14, %v23776_v15  ;;  %13216 = vadd.xlane.f32.xlu0 %v13215_v47  ;;  %20037 = vrcp.f32 %v13151_v35  ;;  %v23941_v57 = vpop.eup %20027 }
0x22d7   : > { %v13040_v54 = vpop.xlane.xlu0 %13039  ;;  %20039 = vpow2.f32 %v13132_v20  ;;  %v23945_v25 = vpop.eup %20029  ;;  %v13206_v15 = vsel %vm1186_vm2, %v23941_v57, 0.0 }
0x22d8   : > { %v13300_v19 = vpack.c.bf16 %v13269_v10, %v13268_v37  ;;  %v13074_v16 = vsub.f32 %v23812_v2, %v13040_v54  ;;  %13204 = vadd.xlane.f32.xlu1 %v13203_v3  ;;  %v13212_v9 = vsel %vm1186_vm2, %v23945_v25, 0.0  ;;  %v12183_v54 = vpack.c.bf16 %v19106_v44, %v19105_v62 }
0x22d9   : > { %v19110_v62 = vunpack.i.l.bf16 %v23703_v34 }
0x22da   : > { %v13136_v61 = vmul.f32 1.442695, %v13074_v16  ;;  %17958 = vmatmul.mubr.msk.bf16.vlgmr.msra.gmra.mrb[8].mxu1 %vm1186_vm2, %v13300_v19  ;;  %v13043_v19 = vpop.xlane.xlu1 %13042 }
0x22db   : > { %17968 = vmatpush3.bf16.msra.mxu1 %v12182_v22  ;;  %17969 = vmatprep.mubr.msk.bf16.mxu1 %vm20189_vm1, %v24496_v56  ;;  %v13075_v22 = vsub.f32 %v23818_v18, %v13043_v19  ;;  %v19115_v19 = vunpack.i.l.bf16 %v23709_v38 }
0x22dc   : > { %v23951_v27 = vpop.eup %20031  ;;  %13207 = vadd.xlane.f32.xlu1 %v13206_v15  ;;  %17979 = vmatprep.subr.bf16.mxu1 %v24496_v56  ;;  %20041 = vpow2.f32 %v13136_v61 }
0x22dd   : > { %v13221_v2 = vsel %vm1186_vm2, %v23951_v27, 0.0  ;;  %v13138_v61 = vmul.f32 1.442695, %v13075_v22 }
0x22de   : > { %13222 = vadd.xlane.f32.xlu0 %v13221_v2  ;;  %v20034_v31 = vpop.eup %20033 }
0x22df   : > { %v23958_v7 = vpop.eup %20035  ;;  %v13270_v35 = vmul.f32 %v20034_v31, %v23804_v29 }
0x22e0   : > { %13213 = vadd.xlane.f32.xlu1 %v13212_v9  ;;  %v20038_v14 = vpop.eup %20037  ;;  %v13218_v37 = vsel %vm1186_vm2, %v23958_v7, 0.0 }
0x22e1   : > { %v13271_v47 = vmul.f32 %v20038_v14, %v23808_v24  ;;  %v23966_v10 = vpop.eup %20039  ;;  %v13073_v24 = vsub.f32 %v23798_v48, %v23922_v55 }
0x22e2   : > { %v13224_v3 = vsel %vm1186_vm2, %v23966_v10, 0.0 }
0x22e3   : > { %v13301_v20 = vpack.c.bf16 %v13271_v47, %v13270_v35  ;;  %v13134_v16 = vmul.f32 1.442695, %v13073_v24  ;;  %v19116_v24 = vunpack.i.h.bf16 %v23709_v38 }
0x22e4   : > { %13219 = vadd.xlane.f32.xlu1 %v13218_v37 }
0x22e5   : > { %17964 = vmatmul.mubr.msk.bf16.vlgmr.msra.gmra.mrb[60].mxu0 %vm1186_vm2, %v13301_v20  ;;  %20043 = vpow2.f32 %v13134_v16 }
0x22e6   : > { %17974 = vmatpush3.bf16.msra.mxu0 %v12183_v54  ;;  %17975 = vmatprep.mubr.msk.bf16.mxu0 %vm20189_vm1, %v24496_v56  ;;  %v23973_v39 = vpop.eup %20041 }
0x22e7   : > { %17985 = vmatprep.subr.bf16.mxu0 %v24496_v56  ;;  %v13230_v29 = vsel %vm1186_vm2, %v23973_v39, 0.0 }
0x22e8   : > { %13225 = vadd.xlane.f32.xlu1 %v13224_v3 }
0x22ec   : > { %13231 = vadd.xlane.f32.xlu1 %v13230_v29 }
0x22ef   : > { %v23991_v31 = vpop.eup %20043 }
0x22f0   : > { %v13227_v37 = vsel %vm1186_vm2, %v23991_v31, 0.0 }
0x22f4   : > { %19143 = vrot.lane.b32.xlu0 %v23473_v33, %s24493_s26 }
0x22fd   : > { %19148 = vrot.lane.b32.xlu1 %v23479_v26, %s24494_s28 }
0x2301   : > { %19153 = vrot.lane.b32.xlu1 %v23473_v33, %s24494_s28  ;;  %s16404_s28 = sshll.u32 %s24511_s18, 9  ;;  %s20127_s18 = sshll.u32 %s20198_s30, 4  ;;  %s20128_s18 = int_to_ptr.vmem [resolvable:$false] %s20127_s18 }
0x2302   : > { %s24369_s20 = scalar_lea.hbm %s24514_s0, %s16404_s28  ;;  %s20129_s25 = scalar_lea.vmem %s20128_s18, 1024 }
0x2303   : > { %p20130_p0 = scmp.lt.s32.totalorder %s24364_s19, %s20128_s18  ;;  %p20131_p1 = scmp.lt.s32.totalorder %s20129_s25, %s20123_s27 }
0x2304   : > { %v13154_v15 = vpop.xlane.xlu0 %13153 }
0x2305   : > { %20045 = vrcp.f32 %v13154_v15  ;;  %19158 = vrot.lane.b32.xlu1 %v23479_v26, %s24495_s17  ;;  %v19111_v26 = vunpack.i.h.bf16 %v23703_v34  ;;  %v12185_v15 = vpack.c.bf16 %v19116_v24, %v19115_v19  ;;  %p20132_p2 = por %p20131_p1, %p20130_p0 }
0x2306   : > { %v13157_v2 = vpop.xlane.xlu1 %13156 }
0x2307   : > { %20047 = vrcp.f32 %v13157_v2  ;;  %v12184_v29 = vpack.c.bf16 %v19111_v26, %v19110_v62  ;;  %v19125_v26 = vunpack.i.l.bf16 %v23711_v21  ;;  %p20133_p3 = pnand %p20132_p2, %p20126_p13 }
0x2308   : > { %20049 = vpow2.f32 %v13138_v61  ;;  %v13160_v48 = vpop.xlane.xlu0 %13159 }
0x2309   : > { %20051 = vrcp.f32 %v13160_v48  ;;  %19163 = vrot.lane.b32.xlu1 %v23473_v33, %s24495_s17 }
0x230a   : > { %v13163_v55 = vpop.xlane.xlu1 %13162 }
0x230b   : > { %20053 = vrcp.f32 %v13163_v55 }
0x230c   : > { %v13166_v18 = vpop.xlane.xlu0 %13165 }
0x230d   : > { %20055 = vrcp.f32 %v13166_v18 }
0x230e   : > { %v13169_v9 = vpop.xlane.xlu1 %13168 }
0x230f   : > { %v20046_v14 = vpop.eup %20045  ;;  %20057 = vrcp.f32 %v13169_v9 }
0x2310   : > { %v13272_v47 = vmul.f32 %v20046_v14, %v23832_v1 }
0x2311   : > { %v20048_v44 = vpop.eup %20047 }
0x2312   : > { %v23995_v35 = vpop.eup %20049  ;;  %v13273_v33 = vmul.f32 %v20048_v44, %v23836_v13  ;;  %v19126_v44 = vunpack.i.h.bf16 %v23711_v21 }
0x2313   : > { %v20052_v20 = vpop.eup %20051  ;;  %13228 = vadd.xlane.f32.xlu0 %v13227_v37  ;;  %v13233_v1 = vsel %vm1186_vm2, %v23995_v35, 0.0 }
0x2314   : > { %v13302_v54 = vpack.c.bf16 %v13273_v33, %v13272_v47  ;;  %v13274_v34 = vmul.f32 %v20052_v20, %v23841_v12  ;;  %v19121_v12 = vunpack.i.h.bf16 %v23707_v41  ;;  %v13172_v2 = vpop.xlane.xlu0 %13171  ;;  %v19131_v20 = vunpack.i.h.bf16 %v23713_v58 }
0x2315   : > { %v20054_v3 = vpop.eup %20053  ;;  %20059 = vrcp.f32 %v13172_v2 }
0x2316   : > { %v13275_v16 = vmul.f32 %v20054_v3, %v23846_v6  ;;  %17970 = vmatmul.mubr.msk.bf16.vlgmr.msra.gmra.mrb[12].mxu1 %vm1186_vm2, %v13302_v54  ;;  %v19120_v6 = vunpack.i.l.bf16 %v23707_v41  ;;  %v19130_v54 = vunpack.i.l.bf16 %v23713_v58 }
0x2317   : > { %v20056_v13 = vpop.eup %20055  ;;  %17980 = vmatpush3.bf16.msra.mxu1 %v12184_v29  ;;  %13234 = vadd.xlane.f32.xlu0 %v13233_v1  ;;  %v12187_v29 = vpack.c.bf16 %v19126_v44, %v19125_v26 }
0x2318   : > { %v13303_v22 = vpack.c.bf16 %v13275_v16, %v13274_v34  ;;  %v13178_v61 = vpop.xlane.xlu1 %13177  ;;  %17981 = vmatprep.mubr.msk.bf16.mxu1 %vm20189_vm1, %v24496_v56  ;;  %17991 = vmatprep.subr.bf16.mxu1 %v24496_v56  ;;  %v13276_v48 = vmul.f32 %v20056_v13, %v23851_v8  ;;  %v12186_v14 = vpack.c.bf16 %v19121_v12, %v19120_v6 }
0x2319   : > { %v20058_v38 = vpop.eup %20057  ;;  %v12188_v21 = vpack.c.bf16 %v19131_v20, %v19130_v54 }
0x231a   : > { %v13277_v55 = vmul.f32 %v20058_v38, %v23856_v28  ;;  %17976 = vmatmul.mubr.msk.bf16.vlgmr.msra.gmra.mrb[64].mxu0 %vm1186_vm2, %v13303_v22  ;;  %v19136_v22 = vunpack.i.h.bf16 %v23883_v30 }
0x231b   : > { %17986 = vmatpush3.bf16.msra.mxu0 %v12185_v15  ;;  %17987 = vmatprep.mubr.msk.bf16.mxu0 %vm20189_vm1, %v24496_v56 }
0x231c   : > { %v13304_v18 = vpack.c.bf16 %v13277_v55, %v13276_v48  ;;  %v13175_v9 = vpop.xlane.xlu1 %13174  ;;  %17997 = vmatprep.subr.bf16.mxu0 %v24496_v56  ;;  %v19141_v55 = vunpack.i.h.bf16 %v23881_v53 }
0x231d   : > { %20061 = vrcp.f32 %v13175_v9 }
0x231e   : > { %17982 = vmatmul.mubr.msk.bf16.vlgmr.msra.gmra.mrb[16].mxu1 %vm1186_vm2, %v13304_v18  ;;  %20063 = vrcp.f32 %v13178_v61  ;;  %v19135_v61 = vunpack.i.l.bf16 %v23883_v30  ;;  %v19140_v18 = vunpack.i.l.bf16 %v23881_v53 }
0x231f   : > { %17992 = vmatpush3.bf16.msra.mxu1 %v12186_v14  ;;  %17993 = vmatprep.mubr.msk.bf16.mxu1 %vm20189_vm1, %v24496_v56  ;;  %v20060_v8 = vpop.eup %20059 }
0x2320   : > { %v13181_v41 = vpop.xlane.xlu1 %13180  ;;  %18003 = vmatprep.subr.bf16.mxu1 %v24496_v56  ;;  %v13278_v47 = vmul.f32 %v20060_v8, %v23861_v4  ;;  %v13184_v4 = vpop.xlane.xlu0 %13183  ;;  %v12189_v14 = vpack.c.bf16 %v19136_v22, %v19135_v61 }
0x2321   : > { %20065 = vrcp.f32 %v13181_v41 }
0x2322   : > { %20067 = vrcp.f32 %v13184_v4 }
0x2327   : > { %v20062_v28 = vpop.eup %20061 }
0x2328   : > { %v20064_v62 = vpop.eup %20063  ;;  %v13279_v33 = vmul.f32 %v20062_v28, %v23869_v49 }
0x2329   : > { %v13280_v24 = vmul.f32 %v20064_v62, %v23865_v51 }
0x232a   : > { %v13305_v3 = vpack.c.bf16 %v13279_v33, %v13278_v47 }
0x232b   : > { %v20066_v37 = vpop.eup %20065 }
0x232c   : > { %v13281_v19 = vmul.f32 %v20066_v37, %v23877_v17  ;;  %17988 = vmatmul.mubr.msk.bf16.vlgmr.msra.gmra.mrb[68].mxu0 %vm1186_vm2, %v13305_v3  ;;  %v20068_v1 = vpop.eup %20067 }
0x232d   : > { %17998 = vmatpush3.bf16.msra.mxu0 %v12187_v29  ;;  %17999 = vmatprep.mubr.msk.bf16.mxu0 %vm20189_vm1, %v24496_v56  ;;  %v13282_v15 = vmul.f32 %v20068_v1, %v23871_v52 }
0x232e   : > { %v13306_v34 = vpack.c.bf16 %v13281_v19, %v13280_v24  ;;  %18009 = vmatprep.subr.bf16.mxu0 %v24496_v56 }
0x2330   : > { %17994 = vmatmul.mubr.msk.bf16.vlgmr.msra.gmra.mrb[20].mxu1 %vm1186_vm2, %v13306_v34 }
0x2331   : > { %18004 = vmatpush3.bf16.msra.mxu1 %v12188_v21  ;;  %18005 = vmatprep.mubr.msk.bf16.mxu1 %vm20189_vm1, %v24496_v56 }
0x2332   : > { %18015 = vmatprep.subr.bf16.mxu1 %v24496_v56 }
0x2351   : > { %v13190_v58 = vpop.xlane.xlu1 %13189 }
0x2355   : > { %v13187_v51 = vpop.xlane.xlu1 %13186  ;;  %v13196_v17 = vpop.xlane.xlu0 %13195 }
0x2356   : > { %20069 = vrcp.f32 %v13187_v51 }
0x2357   : > { %20071 = vrcp.f32 %v13190_v58 }
0x2359   : > { %v13193_v49 = vpop.xlane.xlu1 %13192 }
0x235a   : > { %20073 = vrcp.f32 %v13193_v49 }
0x235b   : > { %20075 = vrcp.f32 %v13196_v17 }
0x235d   : > { %v13202_v16 = vpop.xlane.xlu1 %13201 }
0x235f   : > { %v13211_v38 = vpop.xlane.xlu0 %13210 }
0x2360   : > { %v20070_v13 = vpop.eup %20069 }
0x2361   : > { %v13199_v12 = vpop.xlane.xlu1 %13198  ;;  %v20072_v6 = vpop.eup %20071  ;;  %v13283_v2 = vmul.f32 %v20070_v13, %v23897_v43  ;;  %v12190_v43 = vpack.c.bf16 %v19141_v55, %v19140_v18 }
0x2362   : > { %20077 = vrcp.f32 %v13199_v12  ;;  %v13284_v41 = vmul.f32 %v20072_v6, %v23892_v5 }
0x2363   : > { %v13307_v9 = vpack.c.bf16 %v13283_v2, %v13282_v15  ;;  %20079 = vrcp.f32 %v13202_v16  ;;  %v13217_v28 = vpop.xlane.xlu0 %13216 }
0x2364   : > { %v20074_v48 = vpop.eup %20073 }
0x2365   : > { %v13285_v30 = vmul.f32 %v20074_v48, %v23907_v0  ;;  %v13205_v8 = vpop.xlane.xlu1 %13204  ;;  %18000 = vmatmul.mubr.msk.bf16.vlgmr.msra.gmra.mrb[72].mxu0 %vm1186_vm2, %v13307_v9  ;;  %v20076_v5 = vpop.eup %20075 }
0x2366   : > { %20081 = vrcp.f32 %v13205_v8  ;;  %18010 = vmatpush3.bf16.msra.mxu0 %v12189_v14  ;;  %18011 = vmatprep.mubr.msk.bf16.mxu0 %vm20189_vm1, %v24496_v56  ;;  %v13286_v26 = vmul.f32 %v20076_v5, %v23899_v46 }
0x2367   : > { %v13308_v52 = vpack.c.bf16 %v13285_v30, %v13284_v41  ;;  %20083 = vrcp.f32 %v13211_v38  ;;  %18021 = vmatprep.subr.bf16.mxu0 %v24496_v56 }
0x2369   : > { %18006 = vmatmul.mubr.msk.bf16.vlgmr.msra.gmra.mrb[24].mxu1 %vm1186_vm2, %v13308_v52  ;;  %v13208_v53 = vpop.xlane.xlu1 %13207 }
0x236a   : > { %18016 = vmatpush3.bf16.msra.mxu1 %v12190_v43  ;;  %20085 = vrcp.f32 %v13208_v53  ;;  %18017 = vmatprep.mubr.msk.bf16.mxu1 %vm20189_vm1, %v24496_v56 }
0x236b   : > { %v13223_v0 = vpop.xlane.xlu0 %13222  ;;  %18027 = vmatprep.subr.bf16.mxu1 %v24496_v56 }
0x236c   : > { %v20078_v44 = vpop.eup %20077 }
0x236d   : > { %v13287_v62 = vmul.f32 %v20078_v44, %v23916_v42  ;;  %v13214_v47 = vpop.xlane.xlu1 %13213  ;;  %v20080_v33 = vpop.eup %20079 }
0x236e   : > { %v13288_v24 = vmul.f32 %v20080_v33, %v23912_v63  ;;  %20087 = vrcp.f32 %v13214_v47 }
0x236f   : > { %v13309_v37 = vpack.c.bf16 %v13287_v62, %v13286_v26  ;;  %v19144_v20 = vpop.permute.xlu0 %19143  ;;  %20089 = vrcp.f32 %v13217_v28 }
0x2370   : > { %v20082_v54 = vpop.eup %20081  ;;  %v19146_v3 = vunpack.i.h.bf16 %v19144_v20  ;;  %v19145_v29 = vunpack.i.l.bf16 %v19144_v20 }
0x2371   : > { %v13289_v19 = vmul.f32 %v20082_v54, %v23926_v32  ;;  %18012 = vmatmul.mubr.msk.bf16.vlgmr.msra.gmra.mrb[76].mxu0 %vm1186_vm2, %v13309_v37  ;;  %v13220_v34 = vpop.xlane.xlu1 %13219  ;;  %v20084_v21 = vpop.eup %20083 }
0x2372   : > { %v12191_v58 = vpack.c.bf16 %v19146_v3, %v19145_v29  ;;  %18023 = vmatprep.mubr.msk.bf16.mxu0 %vm20189_vm1, %v24496_v56  ;;  %v13291_v4 = vmul.f32 %v20084_v21, %v23920_v50  ;;  %20091 = vrcp.f32 %v13220_v34 }
0x2373   : > { %v13310_v46 = vpack.c.bf16 %v13289_v19, %v13288_v24  ;;  %20093 = vrcp.f32 %v13223_v0 }
0x2374   : > { %v20086_v42 = vpop.eup %20085  ;;  %18022 = vmatpush3.bf16.msra.mxu0 %v12191_v58 }
0x2375   : > { %v13290_v51 = vmul.f32 %v20086_v42, %v23941_v57  ;;  %18018 = vmatmul.mubr.msk.bf16.vlgmr.msra.gmra.mrb[28].mxu1 %vm1186_vm2, %v13310_v46  ;;  %v13226_v63 = vpop.xlane.xlu1 %13225  ;;  %18033 = vmatprep.subr.bf16.mxu0 %v24496_v56 }
0x2376   : > { %18029 = vmatprep.mubr.msk.bf16.mxu1 %vm20189_vm1, %v24496_v56  ;;  %20095 = vrcp.f32 %v13226_v63 }
0x2377   : > { %v13311_v32 = vpack.c.bf16 %v13291_v4, %v13290_v51 }
0x2378   : > { %v20088_v50 = vpop.eup %20087 }
0x2379   : > { %18024 = vmatmul.mubr.msk.bf16.vlgmr.msra.gmra.mrb[80].mxu0 %vm1186_vm2, %v13311_v32  ;;  %v13232_v49 = vpop.xlane.xlu1 %13231  ;;  %v20090_v57 = vpop.eup %20089  ;;  %v13292_v13 = vmul.f32 %v20088_v50, %v23945_v25 }
0x237a   : > { %18035 = vmatprep.mubr.msk.bf16.mxu0 %vm20189_vm1, %v24496_v56  ;;  %v13293_v38 = vmul.f32 %v20090_v57, %v23931_v59 }
0x237c   : > { %v20092_v22 = vpop.eup %20091  ;;  %v13312_v48 = vpack.c.bf16 %v13293_v38, %v13292_v13 }
0x237d   : > { %v19149_v17 = vpop.permute.xlu1 %19148  ;;  %v20094_v6 = vpop.eup %20093  ;;  %v13294_v55 = vmul.f32 %v20092_v22, %v23958_v7  ;;  %v19469_v7 = vld [vmem:[%s24416_s4 + $0xc0] sm:$0xff]  }
0x237e   : > { %v19151_v16 = vunpack.i.h.bf16 %v19149_v17  ;;  %v19150_v1 = vunpack.i.l.bf16 %v19149_v17  ;;  %v13295_v9 = vmul.f32 %v20094_v6, %v23951_v27 }
0x2380   : > { %v12192_v61 = vpack.c.bf16 %v19151_v16, %v19150_v1  ;;  %v13313_v59 = vpack.c.bf16 %v13295_v9, %v13294_v55  ;;  %v20096_v5 = vpop.eup %20095  ;;  %v19472_v16 = vld [vmem:[%s24416_s4 + $0xd8] sm:$0xff]  }
0x2381   : > { %v19154_v12 = vpop.permute.xlu1 %19153  ;;  %v13296_v44 = vmul.f32 %v20096_v5, %v23966_v10 }
0x2382   : > { %v19156_v15 = vunpack.i.h.bf16 %v19154_v12  ;;  %v19155_v2 = vunpack.i.l.bf16 %v19154_v12  ;;  %18028 = vmatpush3.bf16.msra.mxu1 %v12192_v61 }
0x2383   : > { %18039 = vmatprep.subr.bf16.mxu1 %v24496_v56 }
0x2384   : > { %v12193_v18 = vpack.c.bf16 %v19156_v15, %v19155_v2 }
0x2385   : > { %v19159_v14 = vpop.permute.xlu1 %19158  ;;  %18030 = vmatmul.mubr.msk.bf16.vlgmr.msra.gmra.mrb[32].mxu1 %vm1186_vm2, %v13312_v48 }
0x2386   : > { %v19161_v25 = vunpack.i.h.bf16 %v19159_v14  ;;  %v19160_v41 = vunpack.i.l.bf16 %v19159_v14  ;;  %18034 = vmatpush3.bf16.msra.mxu0 %v12193_v18  ;;  %18041 = vmatprep.mubr.msk.bf16.mxu1 %vm20189_vm1, %v24496_v56  ;;  %v19473_v18 = vld [vmem:[%s24416_s4 + $0xe0] sm:$0xff]  }
0x2387   : > { %18045 = vmatprep.subr.bf16.mxu0 %v24496_v56 }
0x2388   : > { %v12194_v30 = vpack.c.bf16 %v19161_v25, %v19160_v41 }
0x2389   : > { %v19164_v8 = vpop.permute.xlu1 %19163  ;;  %18036 = vmatmul.mubr.msk.bf16.vlgmr.msra.gmra.mrb[84].mxu0 %vm1186_vm2, %v13313_v59 }
0x238a   : > { %v19166_v27 = vunpack.i.h.bf16 %v19164_v8  ;;  %v19165_v52 = vunpack.i.l.bf16 %v19164_v8  ;;  %18040 = vmatpush3.bf16.msra.mxu1 %v12194_v30  ;;  %18047 = vmatprep.mubr.msk.bf16.mxu0 %vm20189_vm1, %v24496_v56  ;;  %v19470_v56 = vld [vmem:[%s24416_s4 + $0xc8] sm:$0xff]  }
0x238b   : > { %18051 = vmatprep.subr.bf16.mxu1 %v19469_v7 }
0x238c   : > { %v12195_v28 = vpack.c.bf16 %v19166_v27, %v19165_v52 }
0x238e   : > { %18046 = vmatpush3.bf16.msra.mxu0 %v12195_v28  ;;  %v19474_v28 = vld [vmem:[%s24416_s4 + $0xe8] sm:$0xff]  }
0x23a0   : > { %v13229_v43 = vpop.xlane.xlu0 %13228 }
0x23a1   : > { %20097 = vrcp.f32 %v13229_v43 }
0x23a2   : > { %20099 = vrcp.f32 %v13232_v49 }
0x23a4   : > { %v13235_v53 = vpop.xlane.xlu0 %13234 }
0x23a5   : > { %20101 = vrcp.f32 %v13235_v53 }
0x23ab   : > { %v20098_v0 = vpop.eup %20097 }
0x23ac   : > { %v13297_v26 = vmul.f32 %v20098_v0, %v23991_v31  ;;  %v20100_v62 = vpop.eup %20099 }
0x23ad   : > { %v13353_v47 = vpop.f32.mrb[8].mxu1  ;;  %v13298_v3 = vmul.f32 %v20100_v62, %v23973_v39 }
0x23ae   : > { %v13314_v33 = vpack.c.bf16 %v13297_v26, %v13296_v44  ;;  %v17959_v37 = vpop.f32.mrb[9].mxu1 }
0x23af   : > { %v20102_v20 = vpop.eup %20101  ;;  %v13356_v54 = vpop.f32.mrb[10].mxu1 }
0x23b0   : > { %v13299_v29 = vmul.f32 %v20102_v20, %v23995_v35  ;;  %v14020_v24 = vpack.c.bf16 %v13356_v54, %v13353_v47  ;;  %v17960_v19 = vpop.f32.mrb[11].mxu1  ;;  %18042 = vmatmul.mubr.msk.bf16.vlgmr.msra.gmra.mrb[36].mxu1 %vm1186_vm2, %v13314_v33  ;;  %v19471_v35 = vld [vmem:[%s24416_s4 + $0xd0] sm:$0xff]  }
0x23b1   : > { %18052 = vmatpush3.bf16.msra.mxu1 %v19469_v7 }
0x23b2   : > { %v13315_v10 = vpack.c.bf16 %v13299_v29, %v13298_v3  ;;  %18053 = vmatprep.mubr.msk.bf16.mxu1 %vm1186_vm2, %v14020_v24  ;;  %18057 = vmatprep.subr.bf16.mxu1 %v19470_v56 }
0x23b4   : > { %18048 = vmatmul.mubr.msk.bf16.vlgmr.msra.gmra.mrb[88].mxu0 %vm1186_vm2, %v13315_v10 }
0x23b5   : > { %14870 = vmatprep.mubr.bf16.mxu0 %v24497_v36 }
0x23b8   : > { %v13397_v31 = vpop.f32.mrb[60].mxu0 }
0x23b9   : > { %v17965_v34 = vpop.f32.mrb[61].mxu0 }
0x23ba   : > { %v13400_v21 = vpop.f32.mrb[62].mxu0 }
0x23bb   : > { %v14021_v58 = vpack.c.bf16 %v13400_v21, %v13397_v31  ;;  %v17966_v39 = vpop.f32.mrb[63].mxu0  ;;  %v19476_v21 = vld [vmem:[%s24416_s4 + $0xf8] sm:$0xff]  }
0x23bd   : > { %18054 = vmatmul.mubr.msk.bf16.vlgmr.msra.gmra.mrb[40].mxu1 %vm1186_vm2, %v14021_v58 }
0x23be   : > { %18058 = vmatpush3.bf16.msra.mxu1 %v19470_v56  ;;  %v19475_v56 = vld [vmem:[%s24416_s4 + $0xf0] sm:$0xff]  }
0x23bf   : > { %18063 = vmatprep.subr.bf16.mxu1 %v19471_v35 }
0x23e9   : > { %v13441_v46 = vpop.f32.mrb[12].mxu1 }
0x23ea   : > { %v17971_v42 = vpop.f32.mrb[13].mxu1 }
0x23eb   : > { %v13444_v4 = vpop.f32.mrb[14].mxu1 }
0x23ec   : > { %v14022_v51 = vpack.c.bf16 %v13444_v4, %v13441_v46  ;;  %v17972_v63 = vpop.f32.mrb[15].mxu1 }
0x23ed   : > { %v13485_v32 = vpop.f32.mrb[64].mxu0 }
0x23ee   : > { %v17977_v49 = vpop.f32.mrb[65].mxu0  ;;  %18059 = vmatprep.mubr.msk.bf16.mxu1 %vm1186_vm2, %v14022_v51 }
0x23ef   : > { %v13488_v50 = vpop.f32.mrb[66].mxu0 }
0x23f0   : > { %v14023_v17 = vpack.c.bf16 %v13488_v50, %v13485_v32  ;;  %v17978_v57 = vpop.f32.mrb[67].mxu0 }
0x23f1   : > { %v13529_v1 = vpop.f32.mrb[16].mxu1 }
0x23f2   : > { %v17983_v13 = vpop.f32.mrb[17].mxu1  ;;  %18060 = vmatmul.mubr.msk.bf16.vlgmr.msra.gmra.mrb[40].mxu1 %vm1186_vm2, %v14023_v17 }
0x23f3   : > { %v13532_v22 = vpop.f32.mrb[18].mxu1  ;;  %18064 = vmatpush3.bf16.msra.mxu1 %v19471_v35 }
0x23f4   : > { %v14024_v61 = vpack.c.bf16 %v13532_v22, %v13529_v1  ;;  %v17984_v38 = vpop.f32.mrb[19].mxu1  ;;  %18069 = vmatprep.subr.bf16.mxu1 %v19472_v16 }
0x23f6   : > { %18065 = vmatprep.mubr.msk.bf16.mxu1 %vm1186_vm2, %v14024_v61 }
0x23ff   : > { %v13573_v12 = vpop.f32.mrb[68].mxu0 }
0x2400   : > { %v17989_v6 = vpop.f32.mrb[69].mxu0 }
0x2401   : > { %v13576_v15 = vpop.f32.mrb[70].mxu0  ;;  %v16247_v6 = vld [vmem:[%s24417_s5 + $0x3] ss:$0 sm:$0xff] }
0x2402   : > { %v14025_v2 = vpack.c.bf16 %v13576_v15, %v13573_v12  ;;  %v17990_v48 = vpop.f32.mrb[71].mxu0 }
0x2403   : > { %v13617_v55 = vpop.f32.mrb[20].mxu1 }
0x2404   : > { %v17995_v9 = vpop.f32.mrb[21].mxu1  ;;  %18066 = vmatmul.mubr.msk.bf16.vlgmr.msra.gmra.mrb[40].mxu1 %vm1186_vm2, %v14025_v2 }
0x2405   : > { %v13620_v14 = vpop.f32.mrb[22].mxu1  ;;  %18070 = vmatpush3.bf16.msra.mxu1 %v19472_v16 }
0x2406   : > { %v14026_v25 = vpack.c.bf16 %v13620_v14, %v13617_v55  ;;  %v17996_v41 = vpop.f32.mrb[23].mxu1  ;;  %18075 = vmatprep.subr.bf16.mxu1 %v19473_v18 }
0x2408   : > { %18071 = vmatprep.mubr.msk.bf16.mxu1 %vm1186_vm2, %v14026_v25 }
0x2438   : > { %v13661_v59 = vpop.f32.mrb[72].mxu0 }
0x2439   : > { %v18001_v7 = vpop.f32.mrb[73].mxu0 }
0x243a   : > { %v13664_v30 = vpop.f32.mrb[74].mxu0 }
0x243b   : > { %v14027_v8 = vpack.c.bf16 %v13664_v30, %v13661_v59  ;;  %v18002_v27 = vpop.f32.mrb[75].mxu0 }
0x243c   : > { %v13705_v52 = vpop.f32.mrb[24].mxu1 }
0x243d   : > { %v18007_v43 = vpop.f32.mrb[25].mxu1  ;;  %18072 = vmatmul.mubr.msk.bf16.vlgmr.msra.gmra.mrb[40].mxu1 %vm1186_vm2, %v14027_v8 }
0x243e   : > { %v13708_v53 = vpop.f32.mrb[26].mxu1  ;;  %18076 = vmatpush3.bf16.msra.mxu1 %v19473_v18 }
0x243f   : > { %v14028_v5 = vpack.c.bf16 %v13708_v53, %v13705_v52  ;;  %v18008_v0 = vpop.f32.mrb[27].mxu1  ;;  %18081 = vmatprep.subr.bf16.mxu1 %v19474_v28 }
0x2441   : > { %18077 = vmatprep.mubr.msk.bf16.mxu1 %vm1186_vm2, %v14028_v5 }
0x2444   : > { %v13749_v44 = vpop.f32.mrb[76].mxu0 }
0x2445   : > { %v18013_v26 = vpop.f32.mrb[77].mxu0 }
0x2446   : > { %v13752_v62 = vpop.f32.mrb[78].mxu0 }
0x2447   : > { %v14029_v47 = vpack.c.bf16 %v13752_v62, %v13749_v44  ;;  %v18014_v33 = vpop.f32.mrb[79].mxu0 }
0x2448   : > { %v13793_v37 = vpop.f32.mrb[28].mxu1 }
0x2449   : > { %v18019_v20 = vpop.f32.mrb[29].mxu1  ;;  %18078 = vmatmul.mubr.msk.bf16.vlgmr.msra.gmra.mrb[40].mxu1 %vm1186_vm2, %v14029_v47 }
0x244a   : > { %v13796_v54 = vpop.f32.mrb[30].mxu1  ;;  %18082 = vmatpush3.bf16.msra.mxu1 %v19474_v28 }
0x244b   : > { %v14030_v3 = vpack.c.bf16 %v13796_v54, %v13793_v37  ;;  %v18020_v29 = vpop.f32.mrb[31].mxu1  ;;  %18087 = vmatprep.subr.bf16.mxu1 %v19475_v56 }
0x244c   : > { %v13837_v24 = vpop.f32.mrb[80].mxu0 }
0x244d   : > { %v18025_v19 = vpop.f32.mrb[81].mxu0  ;;  %18083 = vmatprep.mubr.msk.bf16.mxu1 %vm1186_vm2, %v14030_v3 }
0x244e   : > { %v13840_v10 = vpop.f32.mrb[82].mxu0  ;;  %v19485_v19 = vld [vmem:[%s24420_s8 + $0x274] ss:$12 sps:$4 sm:$0xff]  }
0x244f   : > { %v14031_v31 = vpack.c.bf16 %v13840_v10, %v13837_v24  ;;  %v18026_v34 = vpop.f32.mrb[83].mxu0  ;;  %v19483_v10 = vld [vmem:[%s24420_s8 + $0x270] ss:$12 sps:$4 sm:$0xff]  }
0x2450   : > { %v19486_v34 = vld [vmem:[%s24420_s8 + $0x288] ss:$12 sps:$4 sm:$0xff]  }
0x2455   : > { %18084 = vmatmul.mubr.msk.bf16.vlgmr.msra.gmra.mrb[40].mxu1 %vm1186_vm2, %v14031_v31  ;;  %v19488_v31 = vld [vmem:[%s24420_s8 + $0x28c] ss:$12 sps:$4 sm:$0xff]  }
0x2456   : > { %18088 = vmatpush3.bf16.msra.mxu1 %v19475_v56 }
0x2457   : > { %18093 = vmatprep.subr.bf16.mxu1 %v19476_v21 }
0x2458   : > { %v13881_v58 = vpop.f32.mrb[32].mxu1 }
0x2459   : > { %v18031_v39 = vpop.f32.mrb[33].mxu1 }
0x245a   : > { %v13884_v35 = vpop.f32.mrb[34].mxu1  ;;  %v19494_v39 = vld [vmem:[%s24420_s8 + $0x2bc] ss:$12 sps:$4 sm:$0xff]  }
0x245b   : > { %v14032_v46 = vpack.c.bf16 %v13884_v35, %v13881_v58  ;;  %v18032_v42 = vpop.f32.mrb[35].mxu1  ;;  %v19489_v58 = vld [vmem:[%s24420_s8 + $0x2a0] ss:$12 sps:$4 sm:$0xff]   ;;  %v19492_v35 = vld [vmem:[%s24420_s8 + $0x2b8] ss:$12 sps:$4 sm:$0xff]  }
0x245c   : > { %v13925_v4 = vpop.f32.mrb[84].mxu0  ;;  %v19495_v42 = vld [vmem:[%s24420_s8 + $0x2d0] ss:$12 sps:$4 sm:$0xff]  }
0x245d   : > { %v18037_v51 = vpop.f32.mrb[85].mxu0  ;;  %18089 = vmatprep.mubr.msk.bf16.mxu1 %vm1186_vm2, %v14032_v46  ;;  %v19497_v46 = vld [vmem:[%s24420_s8 + $0x2d4] ss:$12 sps:$4 sm:$0xff]  }
0x245e   : > { %v13928_v63 = vpop.f32.mrb[86].mxu0  ;;  %v19498_v51 = vld [vmem:[%s24420_s8 + $0x2e8] ss:$12 sps:$4 sm:$0xff]  }
0x245f   : > { %v14033_v32 = vpack.c.bf16 %v13928_v63, %v13925_v4  ;;  %v18038_v49 = vpop.f32.mrb[87].mxu0  ;;  %v19500_v4 = vld [vmem:[%s24420_s8 + $0x2ec] ss:$12 sps:$4 sm:$0xff]   ;;  %v19501_v63 = vld [vmem:[%s24420_s8 + $0x248] ss:$12 sps:$4 sm:$0xff]  }
0x2460   : > { %v19510_v49 = vld [vmem:[%s24422_s10 + $0x1b0] sm:$0xff]  }
0x2461   : > { %18090 = vmatmul.mubr.msk.bf16.vlgmr.msra.gmra.mrb[40].mxu1 %vm1186_vm2, %v14033_v32  ;;  %v19509_v32 = vld [vmem:[%s24422_s10 + $0x1f0] sm:$0xff]  }
0x2462   : > { %18094 = vmatpush3.bf16.msra.mxu1 %v19476_v21  ;;  %v19491_v21 = vld [vmem:[%s24420_s8 + $0x2a4] ss:$12 sps:$4 sm:$0xff]  }
0x2463   : > { %16933 = vmatprep.subr.bf16.mxu1 %v19509_v32 }
0x2483   : > { %v13969_v50 = vpop.f32.mrb[36].mxu1 }
0x2484   : > { %v18043_v17 = vpop.f32.mrb[37].mxu1 }
0x2485   : > { %v13972_v57 = vpop.f32.mrb[38].mxu1  ;;  %v19512_v17 = vld [vmem:[%s24422_s10 + $0x1b8] sm:$0xff]  }
0x2486   : > { %v14034_v16 = vpack.c.bf16 %v13972_v57, %v13969_v50  ;;  %v18044_v1 = vpop.f32.mrb[39].mxu1  ;;  %v19511_v50 = vld [vmem:[%s24422_s10 + $0x1f8] sm:$0xff]   ;;  %v19513_v57 = vld [vmem:[%s24422_s10 + $0x200] sm:$0xff]  }
0x2487   : > { %v14013_v13 = vpop.f32.mrb[88].mxu0  ;;  %v19515_v1 = vld [vmem:[%s24422_s10 + $0x208] sm:$0xff]  }
0x2488   : > { %v18049_v22 = vpop.f32.mrb[89].mxu0  ;;  %18095 = vmatprep.mubr.msk.bf16.mxu1 %vm1186_vm2, %v14034_v16  ;;  %v19514_v16 = vld [vmem:[%s24422_s10 + $0x1c0] sm:$0xff]  }
0x2489   : > { %v14016_v61 = vpop.f32.mrb[90].mxu0  ;;  %v19517_v22 = vld [vmem:[%s24422_s10 + $0x210] sm:$0xff]  }
0x248a   : > { %v14035_v38 = vpack.c.bf16 %v14016_v61, %v14013_v13  ;;  %v18050_v12 = vpop.f32.mrb[91].mxu0  ;;  %v19516_v13 = vld [vmem:[%s24422_s10 + $0x1c8] sm:$0xff]   ;;  %v19518_v61 = vld [vmem:[%s24422_s10 + $0x1d0] sm:$0xff]  }
0x248c   : > { %18096 = vmatmul.mubr.msk.bf16.vlgmr.msra.gmra.mrb[40].mxu1 %vm1186_vm2, %v14035_v38  ;;  %v19519_v38 = vld [vmem:[%s24422_s10 + $0x218] sm:$0xff]  }
0x248d   : > { %16934 = vmatpush3.bf16.msra.mxu1 %v19510_v49  ;;  %v24508_v49 = vld [vmem:[#allocation17_spill] sm:$0xff] }
0x248e   : > { %16935 = vmatprep.subr.bf16.mxu1 %v19511_v50 }
0x2491   : > { %16936 = vmatpush3.bf16.msra.mxu1 %v19512_v17 }
0x2492   : > { %16937 = vmatprep.subr.bf16.mxu1 %v19513_v57 }
0x2495   : > { %16938 = vmatpush3.bf16.msra.mxu1 %v19514_v16 }
0x2496   : > { %16939 = vmatprep.subr.bf16.mxu1 %v19515_v1 }
0x2499   : > { %16940 = vmatpush3.bf16.msra.mxu1 %v19516_v13 }
0x249a   : > { %16941 = vmatprep.subr.bf16.mxu1 %v19517_v22 }
0x249d   : > { %16942 = vmatpush3.bf16.msra.mxu1 %v19518_v61 }
0x249e   : > { %16943 = vmatprep.subr.bf16.mxu1 %v19519_v38 }
0x255f   : > { %v18097_v15 = vpop.f32.mrb[40].mxu1 }
0x2560   : > { %v14562_v2 = vpop.f32.mrb[41].mxu1  ;;  %v18159_v9 = vadd.f32 %v18097_v15, %v16247_v6 }
0x2561   : > { %v18160_v48 = vadd.f32 %v16247_v6, %v14562_v2  ;;  %v18098_v55 = vpop.f32.mrb[42].mxu1 }
0x2562   : > { %v14565_v18 = vpop.f32.mrb[43].mxu1  ;;  %v24141_v59 = vadd.f32 %v18159_v9, %v23344_v23  ;;  %v18161_v7 = vadd.f32 %v18098_v55, %v16247_v6  ;;  %v19482_v23 = vld [vmem:[%s24420_s8 + $0x25c] ss:$12 sps:$4 sm:$0xff]  }
0x2563   : > { %v24134_v14 = vadd.f32 %v18160_v48, %v23332_v45  ;;  %v18162_v25 = vadd.f32 %v16247_v6, %v14565_v18  ;;  %v19477_v45 = vld [vmem:[%s24420_s8 + $0x240] ss:$12 sps:$4 sm:$0xff]  }
0x2564   : > { %v24146_v30 = vadd.f32 %v18161_v7, %v23335_v60  ;;  %v19480_v60 = vld [vmem:[%s24420_s8 + $0x258] ss:$12 sps:$4 sm:$0xff]  }
0x2565   : > { %v24137_v41 = vadd.f32 %v18162_v25, %v23340_v40  ;;  %14589 = vadd.xlane.f32.xlu0 %v24134_v14  ;;  %v19479_v40 = vld [vmem:[%s24420_s8 + $0x244] ss:$12 sps:$4 sm:$0xff]  }
0x2566   : > { %14838 = vmatprep.subr.bf16.mxu0 %v19479_v40 }
0x2567   : > { %14591 = vadd.xlane.f32.xlu1 %v24137_v41  ;;  %14839 = vmatpush1.bf16.msra.mxu0 %v19477_v45 }
0x2568   : > { %14840 = vmatprep.subr.bf16.mxu0 %v19482_v23 }
0x2569   : > { %14593 = vadd.xlane.f32.xlu0 %v24141_v59 }
0x256b   : > { %14841 = vmatpush1.bf16.msra.mxu0 %v19480_v60 }
0x256c   : > { %14842 = vmatprep.subr.bf16.mxu0 %v19485_v19 }
0x256d   : > { %14595 = vadd.xlane.f32.xlu0 %v24146_v30 }
0x256f   : > { %14843 = vmatpush1.bf16.msra.mxu0 %v19483_v10  ;;  %v19504_v10 = vld [vmem:[%s24420_s8 + $0x290] ss:$12 sps:$4 sm:$0xff]  }
0x2570   : > { %14844 = vmatprep.subr.bf16.mxu0 %v19488_v31  ;;  %v19507_v31 = vld [vmem:[%s24420_s8 + $0x2d8] ss:$12 sps:$4 sm:$0xff]  }
0x2573   : > { %14845 = vmatpush1.bf16.msra.mxu0 %v19486_v34  ;;  %v19508_v34 = vld [vmem:[%s24420_s8 + $0x2f0] ss:$12 sps:$4 sm:$0xff]  }
0x2574   : > { %14846 = vmatprep.subr.bf16.mxu0 %v19491_v21  ;;  %v19520_v21 = vld [vmem:[%s24422_s10 + $0x1d8] sm:$0xff]  }
0x2575   : > { %16944 = vmatpush3.bf16.msra.mxu1 %v19520_v21 }
0x2577   : > { %14847 = vmatpush1.bf16.msra.mxu0 %v19489_v58  ;;  %v19521_v58 = vld [vmem:[%s24422_s10 + $0x220] sm:$0xff]  }
0x2578   : > { %14848 = vmatprep.subr.bf16.mxu0 %v19494_v39  ;;  %v19522_v39 = vld [vmem:[%s24422_s10 + $0x1e0] sm:$0xff]   ;;  %16945 = vmatprep.subr.bf16.mxu1 %v19521_v58 }
0x2579   : > { %16946 = vmatpush3.bf16.msra.mxu1 %v19522_v39 }
0x257b   : > { %14849 = vmatpush1.bf16.msra.mxu0 %v19492_v35  ;;  %v19523_v35 = vld [vmem:[%s24422_s10 + $0x228] sm:$0xff]  }
0x257c   : > { %14850 = vmatprep.subr.bf16.mxu0 %v19497_v46  ;;  %v19524_v46 = vld [vmem:[%s24422_s10 + $0x1e8] sm:$0xff]   ;;  %16947 = vmatprep.subr.bf16.mxu1 %v19523_v35 }
0x257d   : > { %16948 = vmatpush3.bf16.msra.mxu1 %v19524_v46 }
0x257f   : > { %14851 = vmatpush1.bf16.msra.mxu0 %v19495_v42  ;;  %v19525_v42 = vld [vmem:[%s24422_s10 + $0x230] sm:$0xff]  }
0x2580   : > { %14852 = vmatprep.subr.bf16.mxu0 %v19500_v4  ;;  %v19526_v4 = vld [vmem:[%s24422_s10 + $0x238] sm:$0xff]  }
0x2583   : > { %14853 = vmatpush1.bf16.msra.mxu0 %v19498_v51  ;;  %v16305_v51 = vld [vmem:[%s24421_s9 + $0x9] sm:$0x7] }
0x2584   : > { %18099 = vmatprep.subr.bf16.mxu0 %v19501_v63  ;;  %v14702_v50 = vrot.slane %v16305_v51, %v24508_v49 }
0x25f2   : > { %v14590_v8 = vpop.xlane.xlu0 %14589 }
0x25f3   : > { %v14597_v27 = vmul.f32 0.013888889, %v14590_v8  ;;  %v16271_v8 = vld [vmem:[%s24418_s6 + $0x3] ss:$0 sm:$0xff] }
0x25f4   : > { %v14592_v52 = vpop.xlane.xlu1 %14591 }
0x25f5   : > { %v14601_v28 = vsub.f32 %v24134_v14, %v14597_v27  ;;  %v14598_v43 = vmul.f32 0.013888889, %v14592_v52 }
0x25f6   : > { %v14594_v53 = vpop.xlane.xlu0 %14593 }
0x25f7   : > { %v24163_v5 = vmul.f32 %v20361_v11, %v14601_v28  ;;  %v14602_v0 = vsub.f32 %v24137_v41, %v14598_v43  ;;  %v14599_v44 = vmul.f32 0.013888889, %v14594_v53  ;;  %v16272_v43 = vld [vmem:[%s24419_s7 + $0x3] ss:$0 sm:$0xff] }
0x25f9   : > { %v24167_v26 = vmul.f32 %v20361_v11, %v14602_v0  ;;  %v14603_v62 = vsub.f32 %v24141_v59, %v14599_v44  ;;  %v14609_v47 = vmul.f32 %v24163_v5, %v24163_v5 }
0x25fa   : > { %v14596_v33 = vpop.xlane.xlu0 %14595 }
0x25fb   : > { %v14600_v37 = vmul.f32 0.013888889, %v14596_v33  ;;  %14613 = vadd.xlane.f32.xlu0 %v14609_v47  ;;  %v24173_v56 = vmul.f32 %v20361_v11, %v14603_v62  ;;  %v14610_v54 = vmul.f32 %v24167_v26, %v24167_v26  ;;  %v19502_v33 = vld [vmem:[%s24420_s8 + $0x260] ss:$12 sps:$4 sm:$0xff]  }
0x25fd   : > { %v14604_v20 = vsub.f32 %v24146_v30, %v14600_v37  ;;  %v14611_v29 = vmul.f32 %v24173_v56, %v24173_v56 }
0x25ff   : > { %14615 = vadd.xlane.f32.xlu0 %v14610_v54  ;;  %v24179_v3 = vmul.f32 %v20361_v11, %v14604_v20 }
0x2601   : > { %v14612_v24 = vmul.f32 %v24179_v3, %v24179_v3 }
0x2603   : > { %14617 = vadd.xlane.f32.xlu0 %v14611_v29  ;;  %v19503_v29 = vld [vmem:[%s24420_s8 + $0x278] ss:$12 sps:$4 sm:$0xff]  }
0x2607   : > { %14619 = vadd.xlane.f32.xlu0 %v14612_v24 }
0x2688   : > { %v14614_v12 = vpop.xlane.xlu0 %14613 }
0x2689   : > { %v14621_v6 = vmul.f32 0.013888889, %v14614_v12 }
0x268b   : > { %v14625_v15 = vadd.f32 1e-05, %v14621_v6 }
0x268c   : > { %v14616_v2 = vpop.xlane.xlu0 %14615 }
0x268d   : > { %20103 = vrsqrt.f32 %v14625_v15  ;;  %v14622_v48 = vmul.f32 0.013888889, %v14616_v2 }
0x268f   : > { %v14626_v55 = vadd.f32 1e-05, %v14622_v48 }
0x2690   : > { %v14618_v18 = vpop.xlane.xlu0 %14617 }
0x2691   : > { %20105 = vrsqrt.f32 %v14626_v55  ;;  %v14623_v9 = vmul.f32 0.013888889, %v14618_v18 }
0x2693   : > { %v14627_v25 = vadd.f32 1e-05, %v14623_v9 }
0x2694   : > { %v14620_v7 = vpop.xlane.xlu0 %14619 }
0x2695   : > { %20107 = vrsqrt.f32 %v14627_v25  ;;  %v14624_v45 = vmul.f32 0.013888889, %v14620_v7 }
0x2697   : > { %v20104_v40 = vpop.eup %20103  ;;  %v14628_v23 = vadd.f32 1e-05, %v14624_v45 }
0x2698   : > { %v14633_v60 = vmul.f32 %v20104_v40, %v24163_v5 }
0x2699   : > { %20109 = vrsqrt.f32 %v14628_v23 }
0x269a   : > { %v14643_v52 = vmul.f32 %v16271_v8, %v14633_v60 }
0x269b   : > { %v20106_v27 = vpop.eup %20105 }
0x269c   : > { %v14634_v28 = vmul.f32 %v20106_v27, %v24167_v26  ;;  %v14653_v44 = vadd.f32 %v16272_v43, %v14643_v52 }
0x269e   : > { %v14644_v53 = vmul.f32 %v16271_v8, %v14634_v28 }
0x269f   : > { %v20108_v0 = vpop.eup %20107 }
0x26a0   : > { %v14654_v62 = vadd.f32 %v16272_v43, %v14644_v53  ;;  %v14635_v47 = vmul.f32 %v20108_v0, %v24173_v56  ;;  %v24509_v0 = vld [vmem:[#allocation18_spill] sm:$0xff] }
0x26a2   : > { %v14657_v5 = vpack.c.bf16 %v14654_v62, %v14653_v44  ;;  %v14645_v20 = vmul.f32 %v16271_v8, %v14635_v47  ;;  %v14706_v44 = vrot.slane %v16305_v51, %v24509_v0 }
0x26a3   : > { %v20110_v37 = vpop.eup %20109 }
0x26a4   : > { %v14636_v54 = vmul.f32 %v20110_v37, %v24179_v3  ;;  %14871 = vmatmul.mubr.bf16.vlgmr.msra.gmra.mrb[92].mxu0 %v14657_v5  ;;  %v14655_v56 = vadd.f32 %v16272_v43, %v14645_v20  ;;  %v19506_v3 = vld [vmem:[%s24420_s8 + $0x2c0] ss:$12 sps:$4 sm:$0xff]  }
0x26a5   : > { %18100 = vmatpush3.bf16.msra.mxu0 %v19501_v63  ;;  %14880 = vmatprep.mubr.bf16.mxu0 %v24497_v36  ;;  %v19505_v36 = vld [vmem:[%s24420_s8 + $0x2a8] ss:$12 sps:$4 sm:$0xff]  }
0x26a6   : > { %v14646_v26 = vmul.f32 %v16271_v8, %v14636_v54  ;;  %18101 = vmatprep.subr.bf16.mxu0 %v19502_v33  ;;  %v24507_v63 = vld [vmem:[#allocation16_spill] sm:$0xff] }
0x26a7   : > { %v14698_v32 = vrot.slane %v16305_v51, %v24507_v63 }
0x26a8   : > { %v14656_v24 = vadd.f32 %v16272_v43, %v14646_v26 }
0x26a9   : > { %18102 = vmatpush3.bf16.msra.mxu0 %v19502_v33 }
0x26aa   : > { %v14658_v19 = vpack.c.bf16 %v14656_v24, %v14655_v56  ;;  %18103 = vmatprep.subr.bf16.mxu0 %v19503_v29 }
0x26ac   : > { %14881 = vmatmul.mubr.bf16.gmra.mrb[96].mxu0 %v14658_v19 }
0x26ad   : > { %18104 = vmatpush3.bf16.msra.mxu0 %v19503_v29  ;;  %18115 = vmatprep.mubr.bf16.mxu0 %v14657_v5 }
0x26ae   : > { %18105 = vmatprep.subr.bf16.mxu0 %v19504_v10 }
0x26b1   : > { %18106 = vmatpush3.bf16.msra.mxu0 %v19504_v10 }
0x26b2   : > { %18107 = vmatprep.subr.bf16.mxu0 %v19505_v36 }
0x26b5   : > { %18108 = vmatpush3.bf16.msra.mxu0 %v19505_v36 }
0x26b6   : > { %18109 = vmatprep.subr.bf16.mxu0 %v19506_v3 }
0x26b9   : > { %18110 = vmatpush3.bf16.msra.mxu0 %v19506_v3 }
0x26ba   : > { %18111 = vmatprep.subr.bf16.mxu0 %v19507_v31 }
0x26bd   : > { %18112 = vmatpush3.bf16.msra.mxu0 %v19507_v31 }
0x26be   : > { %18113 = vmatprep.subr.bf16.mxu0 %v19508_v34 }
0x26c1   : > { %18114 = vmatpush3.bf16.msra.mxu0 %v19508_v34 }
0x26c2   : > { %18119 = vmatprep.subr.bf16.mxu0 %v19525_v42 }
0x26c4   : > { %18116 = vmatmul.mubr.bf16.vlgmr.msra.gmra.mrb[100].mxu0 %v14658_v19 }
0x26c5   : > { %18120 = vmatpush3.bf16.msra.mxu0 %v19525_v42 }
0x26c6   : > { %18121 = vmatprep.subr.bf16.mxu0 %v19526_v4 }
0x26c9   : > { %18122 = vmatpush3.bf16.msra.mxu0 %v19526_v4 }
0x2777   : > { %v14872_v17 = vpop.f32.mrb[92].mxu0 }
0x2778   : > { %v14873_v57 = vadd.f32 %v14872_v17, %v14698_v32  ;;  %v14874_v16 = vpop.f32.mrb[93].mxu0 }
0x2779   : > { %v14875_v1 = vadd.f32 %v14874_v16, %v14702_v50  ;;  %v14876_v13 = vpop.f32.mrb[94].mxu0 }
0x277a   : > { %v14877_v22 = vadd.f32 %v14876_v13, %v14698_v32  ;;  %v14878_v61 = vpop.f32.mrb[95].mxu0  ;;  %v14940_v12 = vmax.f32 %v14873_v57, 0.0 }
0x277b   : > { %v14879_v38 = vadd.f32 %v14878_v61, %v14702_v50  ;;  %v14941_v15 = vmax.f32 %v14875_v1, 0.0 }
0x277c   : > { %v14943_v6 = vmax.f32 %v14877_v22, 0.0 }
0x277d   : > { %v14944_v2 = vmax.f32 %v14879_v38, 0.0 }
0x277e   : > { %v14952_v48 = vpack.c.bf16 %v14943_v6, %v14940_v12 }
0x277f   : > { %v14953_v55 = vpack.c.bf16 %v14944_v2, %v14941_v15  ;;  %v14882_v18 = vpop.f32.mrb[96].mxu0 }
0x2780   : > { %v14883_v9 = vadd.f32 %v14882_v18, %v14698_v32  ;;  %v14884_v25 = vpop.f32.mrb[97].mxu0  ;;  %v19527_v18 = vld [vmem:[%s24426_s14] sm:$0xff]  }
0x2781   : > { %v14885_v7 = vadd.f32 %v14884_v25, %v14702_v50  ;;  %v14886_v45 = vpop.f32.mrb[98].mxu0  ;;  %15149 = vmatprep.mubr.bf16.mxu1 %v14953_v55  ;;  %18127 = vmatprep.subr.bf16.mxu0 %v19527_v18 }
0x2782   : > { %v14887_v40 = vadd.f32 %v14886_v45, %v14698_v32  ;;  %v14888_v23 = vpop.f32.mrb[99].mxu0  ;;  %15150 = vmatmul.mubr.bf16.vlgmr.msra.gmra.mrb[44].mxu1 %v14952_v48  ;;  %v14946_v8 = vmax.f32 %v14883_v9, 0.0  ;;  %v16367_v32 = vld [vmem:[%s24423_s11 + $0x3] ss:$0 sm:$0xff] }
0x2783   : > { %v14889_v60 = vadd.f32 %v14888_v23, %v14702_v50  ;;  %v14947_v52 = vmax.f32 %v14885_v7, 0.0 }
0x2784   : > { %v14949_v27 = vmax.f32 %v14887_v40, 0.0 }
0x2785   : > { %v14950_v28 = vmax.f32 %v14889_v60, 0.0 }
0x2786   : > { %v14955_v43 = vpack.c.bf16 %v14949_v27, %v14946_v8 }
0x2787   : > { %v14956_v53 = vpack.c.bf16 %v14950_v28, %v14947_v52 }
0x2789   : > { %15157 = vmatprep.mubr.bf16.mxu1 %v14956_v53 }
0x278a   : > { %15158 = vmatmul.mubr.bf16.gmra.mrb[48].mxu1 %v14955_v43 }
0x2797   : > { %v18117_v62 = vpop.f32.mrb[100].mxu0 }
0x2798   : > { %v14934_v47 = vadd.f32 %v18117_v62, %v14706_v44  ;;  %v14925_v5 = vpop.f32.mrb[101].mxu0 }
0x2799   : > { %v14926_v33 = vadd.f32 %v14925_v5, %v14706_v44  ;;  %v18118_v37 = vpop.f32.mrb[102].mxu0  ;;  %v19529_v5 = vld [vmem:[%s24426_s14 + $0x10] sm:$0xff]  }
0x279a   : > { %v14937_v20 = vadd.f32 %v18118_v37, %v14706_v44  ;;  %v14928_v54 = vpop.f32.mrb[103].mxu0  ;;  %v14948_v29 = vmax.f32 %v14934_v47, 0.0  ;;  %v19528_v47 = vld [vmem:[%s24426_s14 + $0x8] sm:$0xff]  }
0x279b   : > { %v14929_v26 = vadd.f32 %v14928_v54, %v14706_v44  ;;  %v14942_v24 = vmax.f32 %v14926_v33, 0.0  ;;  %v19531_v33 = vld [vmem:[%s24426_s14 + $0x20] sm:$0xff]   ;;  %v19532_v37 = vld [vmem:[%s24426_s14 + $0x28] sm:$0xff]   ;;  %v19534_v54 = vld [vmem:[%s24426_s14 + $0x38] sm:$0xff]  }
0x279c   : > { %v14951_v56 = vmax.f32 %v14937_v20, 0.0  ;;  %v19533_v20 = vld [vmem:[%s24426_s14 + $0x30] sm:$0xff]  }
0x279d   : > { %v14945_v19 = vmax.f32 %v14929_v26, 0.0 }
0x279e   : > { %v14957_v10 = vpack.c.bf16 %v14951_v56, %v14948_v29 }
0x279f   : > { %v14954_v36 = vpack.c.bf16 %v14945_v19, %v14942_v24 }
0x27a1   : > { %18123 = vmatprep.mubr.msk.bf16.mxu0 %vm4094_vm5, %v14954_v36 }
0x27a2   : > { %18124 = vmatmul.mubr.msk.bf16.vlgmr.msra.gmra.mrb[104].mxu0 %vm4094_vm5, %v14957_v10 }
0x27a3   : > { %18128 = vmatpush3.bf16.msra.mxu0 %v19527_v18 }
0x27a4   : > { %18129 = vmatprep.subr.bf16.mxu0 %v19528_v47 }
0x27a7   : > { %18130 = vmatpush3.bf16.msra.mxu0 %v19528_v47 }
0x27a8   : > { %18131 = vmatprep.subr.bf16.mxu0 %v19529_v5 }
0x27ab   : > { %18132 = vmatpush3.bf16.msra.mxu0 %v19529_v5 }
0x2855   : > { %v16949_v3 = vpop.f32.mrb[44].mxu1 }
0x2856   : > { %v16950_v31 = vpop.f32.mrb[45].mxu1 }
0x2857   : > { %v16951_v34 = vadd.f32 %v16950_v31, %v16949_v3  ;;  %v16952_v21 = vpop.f32.mrb[46].mxu1 }
0x2858   : > { %v16953_v58 = vpop.f32.mrb[47].mxu1 }
0x2859   : > { %v16954_v39 = vadd.f32 %v16953_v58, %v16952_v21  ;;  %v15152_v17 = vadd.f32 %v16951_v34, %v16367_v32 }
0x285b   : > { %v15155_v61 = vadd.f32 %v16954_v39, %v16367_v32 }
0x285d   : > { %v16955_v35 = vpop.f32.mrb[48].mxu1 }
0x285e   : > { %v16956_v46 = vpop.f32.mrb[49].mxu1 }
0x285f   : > { %v16957_v42 = vadd.f32 %v16956_v46, %v16955_v35  ;;  %v16958_v4 = vpop.f32.mrb[50].mxu1  ;;  %v16388_v46 = vld [vmem:[%s24424_s12] ss:$0 sm:$0xff] }
0x2860   : > { %v16959_v51 = vpop.f32.mrb[51].mxu1 }
0x2861   : > { %v16960_v63 = vadd.f32 %v16959_v51, %v16958_v4  ;;  %v15160_v49 = vadd.f32 %v16957_v42, %v16367_v32 }
0x2863   : > { %v15163_v1 = vadd.f32 %v16960_v63, %v16367_v32  ;;  %v16389_v63 = vld [vmem:[%s24425_s13] ss:$0 sm:$0xff] }
0x2875   : > { %v18125_v50 = vpop.f32.mrb[104].mxu0 }
0x2876   : > { %v15209_v57 = vadd.f32 %v18125_v50, %v15160_v49  ;;  %v15200_v16 = vpop.f32.mrb[105].mxu0 }
0x2877   : > { %v15201_v13 = vadd.f32 %v15200_v16, %v15152_v17  ;;  %v18126_v22 = vpop.f32.mrb[106].mxu0 }
0x2878   : > { %v15212_v38 = vadd.f32 %v18126_v22, %v15163_v1  ;;  %v15203_v12 = vpop.f32.mrb[107].mxu0  ;;  %v15217_v55 = vadd.f32 %v15209_v57, %v24141_v59 }
0x2879   : > { %v15215_v6 = vadd.f32 %v15201_v13, %v24134_v14  ;;  %v15204_v15 = vadd.f32 %v15203_v12, %v15155_v61 }
0x287a   : > { %v15218_v2 = vadd.f32 %v15212_v38, %v24146_v30 }
0x287b   : > { %15221 = vadd.xlane.f32.xlu0 %v15215_v6  ;;  %v15216_v48 = vadd.f32 %v15204_v15, %v24137_v41  ;;  %v16390_v15 = vld [vmem:[%s24512_s21] ss:$0 sm:$0xff] }
0x287c   : > { %15227 = vadd.xlane.f32.xlu1 %v15218_v2 }
0x287f   : > { %15223 = vadd.xlane.f32.xlu0 %v15216_v48 }
0x2883   : > { %15225 = vadd.xlane.f32.xlu0 %v15217_v55 }
0x2908   : > { %v15222_v9 = vpop.xlane.xlu0 %15221 }
0x2909   : > { %v15229_v25 = vmul.f32 0.013888889, %v15222_v9  ;;  %v15228_v14 = vpop.xlane.xlu1 %15227 }
0x290a   : > { %v15232_v45 = vmul.f32 0.013888889, %v15228_v14 }
0x290b   : > { %v15233_v7 = vsub.f32 %v15215_v6, %v15229_v25 }
0x290c   : > { %v15224_v30 = vpop.xlane.xlu0 %15223  ;;  %v15236_v41 = vsub.f32 %v15218_v2, %v15232_v45 }
0x290d   : > { %v15237_v40 = vmul.f32 %v20361_v11, %v15233_v7  ;;  %v15230_v23 = vmul.f32 0.013888889, %v15224_v30 }
0x290e   : > { %v15240_v28 = vmul.f32 %v20361_v11, %v15236_v41 }
0x290f   : > { %v15234_v60 = vsub.f32 %v15216_v48, %v15230_v23  ;;  %v15241_v8 = vmul.f32 %v15237_v40, %v15237_v40 }
0x2910   : > { %v15226_v59 = vpop.xlane.xlu0 %15225  ;;  %v15244_v44 = vmul.f32 %v15240_v28, %v15240_v28 }
0x2911   : > { %v15238_v27 = vmul.f32 %v20361_v11, %v15234_v60  ;;  %v15231_v52 = vmul.f32 0.013888889, %v15226_v59  ;;  %15245 = vadd.xlane.f32.xlu0 %v15241_v8 }
0x2913   : > { %v15235_v43 = vsub.f32 %v15217_v55, %v15231_v52  ;;  %v15242_v53 = vmul.f32 %v15238_v27, %v15238_v27 }
0x2915   : > { %v15239_v0 = vmul.f32 %v20361_v11, %v15235_v43  ;;  %15247 = vadd.xlane.f32.xlu1 %v15242_v53  ;;  %v19530_v11 = vld [vmem:[%s24426_s14 + $0x18] sm:$0xff]  }
0x2916   : > { %18133 = vmatprep.subr.bf16.mxu0 %v19530_v11 }
0x2917   : > { %v15243_v62 = vmul.f32 %v15239_v0, %v15239_v0  ;;  %18134 = vmatpush3.bf16.msra.mxu0 %v19530_v11 }
0x2918   : > { %18135 = vmatprep.subr.bf16.mxu0 %v19531_v33 }
0x2919   : > { %15251 = vadd.xlane.f32.xlu1 %v15244_v44  ;;  %15249 = vadd.xlane.f32.xlu0 %v15243_v62 }
0x291b   : > { %18136 = vmatpush3.bf16.msra.mxu0 %v19531_v33 }
0x291c   : > { %18137 = vmatprep.subr.bf16.mxu0 %v19532_v37 }
0x291f   : > { %18138 = vmatpush3.bf16.msra.mxu0 %v19532_v37 }
0x2920   : > { %18139 = vmatprep.subr.bf16.mxu0 %v19533_v20 }
0x2923   : > { %18140 = vmatpush3.bf16.msra.mxu0 %v19533_v20 }
0x2924   : > { %18141 = vmatprep.subr.bf16.mxu0 %v19534_v54 }
0x2927   : > { %18142 = vmatpush3.bf16.msra.mxu0 %v19534_v54 }
0x299e   : > { %v15246_v26 = vpop.xlane.xlu0 %15245 }
0x299f   : > { %v15253_v29 = vmul.f32 0.013888889, %v15246_v26 }
0x29a1   : > { %v15257_v56 = vadd.f32 1e-05, %v15253_v29 }
0x29a2   : > { %v15248_v24 = vpop.xlane.xlu1 %15247 }
0x29a3   : > { %20111 = vrsqrt.f32 %v15257_v56  ;;  %v15254_v19 = vmul.f32 0.013888889, %v15248_v24 }
0x29a5   : > { %v15258_v10 = vadd.f32 1e-05, %v15254_v19 }
0x29a6   : > { %v15252_v36 = vpop.xlane.xlu1 %15251  ;;  %v15250_v3 = vpop.xlane.xlu0 %15249 }
0x29a7   : > { %20113 = vrsqrt.f32 %v15258_v10  ;;  %v15256_v31 = vmul.f32 0.013888889, %v15252_v36  ;;  %v15255_v34 = vmul.f32 0.013888889, %v15250_v3 }
0x29a9   : > { %v15260_v21 = vadd.f32 1e-05, %v15256_v31  ;;  %v15259_v58 = vadd.f32 1e-05, %v15255_v34 }
0x29ab   : > { %20115 = vrsqrt.f32 %v15260_v21 }
0x29ac   : > { %20117 = vrsqrt.f32 %v15259_v58 }
0x29ad   : > { %v20112_v39 = vpop.eup %20111 }
0x29ae   : > { %v15265_v35 = vmul.f32 %v20112_v39, %v15237_v40 }
0x29b0   : > { %v15275_v51 = vmul.f32 %v16388_v46, %v15265_v35 }
0x29b1   : > { %v20114_v42 = vpop.eup %20113 }
0x29b2   : > { %v15266_v4 = vmul.f32 %v20114_v42, %v15238_v27  ;;  %v15285_v57 = vadd.f32 %v16389_v63, %v15275_v51 }
0x29b4   : > { %v15276_v32 = vmul.f32 %v16388_v46, %v15266_v4 }
0x29b5   : > { %v20116_v49 = vpop.eup %20115 }
0x29b6   : > { %v20118_v50 = vpop.eup %20117  ;;  %v15268_v17 = vmul.f32 %v20116_v49, %v15240_v28  ;;  %v15286_v16 = vadd.f32 %v16389_v63, %v15276_v32 }
0x29b7   : > { %v15267_v1 = vmul.f32 %v20118_v50, %v15239_v0 }
0x29b8   : > { %v15278_v13 = vmul.f32 %v16388_v46, %v15268_v17  ;;  %v15289_v22 = vpack.c.bf16 %v15286_v16, %v15285_v57 }
0x29b9   : > { %v15277_v61 = vmul.f32 %v16388_v46, %v15267_v1 }
0x29ba   : > { %v15288_v38 = vadd.f32 %v16389_v63, %v15278_v13  ;;  %18143 = vmatprep.mubr.bf16.mxu0 %v15289_v22 }
0x29bb   : > { %v15287_v12 = vadd.f32 %v16389_v63, %v15277_v61 }
0x29bd   : > { %v15290_v6 = vpack.c.bf16 %v15288_v38, %v15287_v12 }
0x29bf   : > { %18144 = vmatmul.mubr.bf16.vlgmr.msra.gmra.mrb[108].mxu0 %v15290_v6 }
0x2a92   : > { %v18145_v2 = vpop.f32.mrb[108].mxu0 }
0x2a93   : > { %v15405_v48 = vadd.f32 %v18145_v2, %v16390_v15  ;;  %v15396_v55 = vpop.f32.mrb[109].mxu0 }
0x2a94   : > { %v15397_v18 = vadd.f32 %v16390_v15, %v15396_v55  ;;  %v18146_v9 = vpop.f32.mrb[110].mxu0 }
0x2a95   : > { %15413 = vst [vmem:[%s515_s29 + $0x10] sm:$0xff] %v15405_v48  ;;  %v15408_v25 = vadd.f32 %v18146_v9, %v16390_v15  ;;  %v15399_v14 = vpop.f32.mrb[111].mxu0 }
0x2a96   : > { %15411 = vst [vmem:[%s515_s29] sm:$0xff] %v15397_v18  ;;  %v15400_v7 = vadd.f32 %v16390_v15, %v15399_v14 }
0x2a97   : > { %15414 = vst [vmem:[%s515_s29 + $0x18] sm:$0xff] %v15408_v25 }
0x2a98   : > { %15412 = vst [vmem:[%s515_s29 + $0x8] sm:$0xff] %v15400_v7 }
0x2a99   : > { %20136 = shalt.err (!%p20133_p3)
}
0x2a9a   : > { %s20137_s15 = scalar_lea.hbm %s24369_s20, 512  ;;  %s20141_s21 = scalar_lea.hbm %s24514_s0, 1024 }
0x2a9b   : > { %p20138_p4 = scmp.ne.s32.totalorder %s24369_s20, %s20137_s15  ;;  %p20142_p9 = scmp.lt.u32.totalorder %s24369_s20, %s24514_s0 }
0x2a9c   : > { %p20143_p10 = scmp.lt.u32.totalorder %s20141_s21, %s20137_s15  ;;  %p20145_p12 = scmp.lt.u32.totalorder %s20137_s15, %s24369_s20 }
0x2a9d   : > { %p20139_p7 = pnand %p20138_p4, %p20324_p5 }
0x2a9e   : > { %p20144_p11 = por %p20143_p10, %p20142_p9 }
0x2a9f   : > { %p20140_p8 = pneg %p20139_p7 }
0x2aa0   : > { %p20146_p13 = por %p20145_p12, %p20144_p11 }
0x2aa2   : > { %p20147_p0 = pnand %p20146_p13, %p20140_p8 }
0x2aa4   : > { %20150 = shalt.err (!%p20147_p0)
}
0x2aa5   : > { %s20199_s17 = smov 128   ;;  %s20200_s23 = smov 8  }
0x2aa6   : > { %18275 = dma.vmem_to_hbm [thread:$0]  (%p20324_p5), %s24364_s19, 512, %s24369_s20, %s24371_s22, %s20199_s17, %s20199_s17, %s20200_s23  }
0x2aa7 PF: > { %s24515_s27 = sld [smem:[#allocation8_spill]]  ;;  %s24516_s30 = sld [smem:[#allocation5_spill]] }
0x2aad   : > { %p18281_p1 = scmp.ge.s32.totalorder %s24515_s27, 2  ;;  %s15444_s25 = sand.u32 1, %s24516_s30  }
0x2aae   : > { %s15445_s15 = scalar_lea.sflag [#allocation3], %s15444_s25 }
0x2aaf   : > { %p18278_p2 = pnand %p18281_p1, %p20328_p6 }
0x2ab1   : > { %20168 = dma.done.wait (!%p18278_p2), %s15445_s15, 512  }
0x2ab2   : > { %20170 = vsyncadd (!%p18278_p2), %s15445_s15, 4294966784  ;;  %s24518_s24 = sld [smem:[#allocation10_spill]]  ;;  %s24519_s21 = sld [smem:[#allocation6_spill]] }
0x2ab3   : > { %s24520_s22 = sld [smem:[#allocation7_spill]]  ;;  %s24521_s23 = sld [smem:[#allocation11_spill]] }
0x2ab8   : > { %p26_p3 = scmp.ge.s32.totalorder %s24518_s24, 4  }
0x2aba   :  { %28 = sbr.rel (!%p26_p3) target bundleno = 7 (0x7), region = 152 }
0x2ac1   :  { %15450 = vsyncpa [#allocation3], 1 }
0x2ac2   :  { %15452 = vsyncpa [#allocation3 + $0x1], 1 }

</bundles_post_ra>
